<compile_context>
chip_gen: v6e
topology: v6e:2x2x1
jax: 0.10.0
libtpu: 0.0.40
codegen_flags: <defaults>
</compile_context>

<pallas_src>
import jax
import jax.numpy as jnp
from jax.experimental import pallas as pl
from jax.experimental.pallas import tpu as pltpu

H = 50   # hidden width of every MLP
E = 20   # trunk/branch embedding width ('e')


def _round_up(a, m):
    return (a + m - 1) // m * m


def _pad_lanes(a, dtype, width=128):
    a = jnp.asarray(a, dtype)
    return jnp.pad(a, ((0, 0), (0, width - a.shape[1])))


def _pack_matrix_slab(mats, dtype=jnp.bfloat16, row_align=16, width=128):
    """Stack 2-D matrices into one (R, width) slab; each matrix starts on a
    row_align boundary (bf16 packs 2 rows/sublane -> align to 16)."""
    pieces, offs, r = [], [], 0
    for m in mats:
        pad = (-r) % row_align
        if pad:
            pieces.append(jnp.zeros((pad, width), dtype))
            r += pad
        offs.append(r)
        pieces.append(_pad_lanes(m, dtype, width))
        r += m.shape[0]
    pad = (-r) % row_align
    if pad:
        pieces.append(jnp.zeros((pad, width), dtype))
    return jnp.concatenate(pieces, axis=0), offs


def _make_kernel(w_offs):
    o_w2, o_w3, o_r1a, o_r1f, o_r2 = w_offs   # static row offsets in weight slab

    def kernel(xs_ref, v_ref, w_ref, o_ref):
        f32, bf16 = jnp.float32, jnp.bfloat16

        def mm(a, w):  # bf16 MXU operands, f32 accumulate (single MXU pass)
            return jnp.dot(a.astype(bf16), w, preferred_element_type=f32)

        xs = xs_ref[...]                       # (TB, 2) f32, packed [x | s]
        x = xs[:, 0:1]                         # trunk input
        s = xs[:, 1:2]                         # branch input

        # f32 row-vector slab layout (see wrapper):
        w1x = v_ref[0:1, 0:2 * H]              # trunk W1 row in lanes 0:50, zeros 50:100
        w1s = v_ref[1:2, 0:2 * H]              # branch W1 row in lanes 50:100
        b1 = v_ref[2:3, 0:2 * H]
        b2 = v_ref[3:4, 0:2 * H]
        b3 = v_ref[4:5, 0:2 * E]
        rb1 = v_ref[5:6, 0:H]
        rb2 = v_ref[6:7, 0:H]
        w3row = v_ref[7:8, 0:H]                # root W3 (50,1) stored as a row
        rb3 = v_ref[8:9, 0:1]

        # --- trunk + branch fused: 1 -> 100 (tanh) -> 100 (tanh) -> 40 -------
        h = jnp.tanh(x * w1x + s * w1s + b1)                                # (TB, 100)
        h = jnp.tanh(mm(h, w_ref[o_w2:o_w2 + 2 * H, 0:2 * H]) + b2)         # (TB, 100)
        tb = mm(h, w_ref[o_w3:o_w3 + 2 * H, 0:2 * E]) + b3                  # (TB, 40) = [t | b]

        # --- root MLP on cat([t*b, t+b, t-b], -1), concat folded -------------
        t = tb[:, 0:E]
        b = tb[:, E:2 * E]
        r = jnp.tanh(mm(t * b, w_ref[o_r1a:o_r1a + E, 0:H])
                     + mm(tb, w_ref[o_r1f:o_r1f + 2 * E, 0:H]) + rb1)       # (TB, 50)
        r = jnp.tanh(mm(r, w_ref[o_r2:o_r2 + H, 0:H]) + rb2)                # (TB, 50)

        # final 50 -> 1 layer as a VPU multiply + lane reduction
        o_ref[...] = jnp.sum(r * w3row, axis=1, keepdims=True) + rb3        # (TB, 1)

    return kernel


def enriched_deeponet_pallas(x, s, params, *, tb=1024):
    """x, s: (B, 1) f32; params: {'trunk'|'branch'|'root': [W1,b1,W2,b2,W3,b3]}
    with weights in (in, out) layout and biases as (1, out) rows.
    Returns {'f': (B, 1)} matching EnrichedDeepONet.forward."""
    assert x.shape == s.shape and x.ndim == 2 and x.shape[1] == 1
    B = x.shape[0]
    f32 = jnp.float32

    # Batch tiling: large tiles (per-step overhead ~0.35us), >= 2 grid steps so
    # the "parallel" grid axis can shard across v7x's two TensorCores, and a
    # 2048-row cap to stay well inside v7x's 32 MiB scoped VMEM.
    Bp8 = _round_up(B, 8)
    TB = min(_round_up(tb, 8), Bp8, 2048)
    if Bp8 > 8 and (Bp8 + TB - 1) // TB < 2:
        TB = _round_up((Bp8 + 1) // 2, 8)
    Bp = _round_up(B, TB)

    xs = jnp.concatenate([x.astype(f32), s.astype(f32)], axis=1)            # (B, 2)
    if Bp != B:
        xs = jnp.pad(xs, ((0, Bp - B), (0, 0)))

    tw1, t_b1, tw2, t_b2, tw3, t_b3 = params["trunk"]
    bw1, b_b1, bw2, b_b2, bw3, b_b3 = params["branch"]
    rw1, r_b1, rw2, r_b2, rw3, r_b3 = params["root"]

    # trunk/branch lane-fused (block-diagonal) weights
    zrow = jnp.zeros((1, H), f32)
    w1x = jnp.concatenate([tw1.reshape(1, H), zrow], axis=1)                # (1, 100)
    w1s = jnp.concatenate([zrow, bw1.reshape(1, H)], axis=1)                # (1, 100)
    b1c = jnp.concatenate([t_b1, b_b1], axis=1)                             # (1, 100)
    b2c = jnp.concatenate([t_b2, b_b2], axis=1)                             # (1, 100)
    b3c = jnp.concatenate([t_b3, b_b3], axis=1)                             # (1, 40)
    w2bd = jnp.zeros((2 * H, 2 * H), f32).at[:H, :H].set(tw2).at[H:, H:].set(bw2)
    w3bd = jnp.zeros((2 * H, 2 * E), f32).at[:H, :E].set(tw3).at[H:, E:].set(bw3)

    # root layer-1 fold: cat([t*b,t+b,t-b])@W1 = (t*b)@W1a + [t|b]@[[W1b+W1c],[W1b-W1c]]
    w1a, w1b, w1c = rw1[0:E], rw1[E:2 * E], rw1[2 * E:3 * E]
    w1fold = jnp.concatenate([w1b + w1c, w1b - w1c], axis=0)                # (40, 50)

    # slab 1: f32 row vectors (first-layer rows, biases, final-layer row)
    vrows = [w1x, w1s, b1c, b2c, b3c, r_b1, r_b2, rw3.reshape(1, H), r_b3]
    vslab = jnp.concatenate([_pad_lanes(v, f32) for v in vrows], axis=0)    # (9, 128)
    vslab = jnp.pad(vslab, ((0, 16 - vslab.shape[0]), (0, 0)))              # (16, 128)

    # slab 2: bf16 matmul weights (single-pass MXU operands)
    wslab, w_offs = _pack_matrix_slab([w2bd, w3bd, w1a, w1fold, rw2])

    flops_row = 2 * ((2 * H) * (2 * H) + (2 * H) * (2 * E) + E * H
                     + (2 * E) * H + H * H) + 20 * H
    cost = pl.CostEstimate(
        flops=flops_row * Bp,
        transcendentals=6 * H * Bp,
        bytes_accessed=3 * Bp * 4 + int(vslab.size) * 4 + int(wslab.size) * 2,
    )

    out = pl.pallas_call(
        _make_kernel(w_offs),
        out_shape=jax.ShapeDtypeStruct((Bp, 1), f32),
        grid=(Bp // TB,),
        in_specs=[
            pl.BlockSpec((TB, 2), lambda i: (i, 0)),       # packed [x|s] batch tile
            pl.BlockSpec(vslab.shape, lambda i: (0, 0)),   # VMEM-resident f32 rows
            pl.BlockSpec(wslab.shape, lambda i: (0, 0)),   # VMEM-resident bf16 weights
        ],
        out_specs=pl.BlockSpec((TB, 1), lambda i: (i, 0)),
        compiler_params=pltpu.CompilerParams(dimension_semantics=("parallel",)),
        cost_estimate=cost,
    )(xs, vslab, wslab)
    return {"f": out[:B]}


# ---------------------------- pure-JAX reference ----------------------------
def _mlp_ref(x, w1, b1, w2, b2, w3, b3):
    h = jnp.tanh(x @ w1 + b1)
    h = jnp.tanh(h @ w2 + b2)
    return h @ w3 + b3


def enriched_deeponet_ref(x, s, params):
    t = _mlp_ref(x, *params["trunk"])
    b = _mlp_ref(s, *params["branch"])
    e = jnp.concatenate([t * b, t + b, t - b], axis=-1)
    return {"f": _mlp_ref(e, *params["root"])}


if __name__ == "__main__":
    B = 2048                      # 2 grid steps of TB=1024 -> exercises the parallel grid

    key = jax.random.PRNGKey(0)
    keys = iter(jax.random.split(key, 32))

    def xavier(shape):
        fan_in, fan_out = shape
        lim = (6.0 / (fan_in + fan_out)) ** 0.5
        return jax.random.uniform(next(keys), shape, jnp.float32, -lim, lim)

    def bias_row(dim):
        # torch.nn.init.uniform_ default U[0,1); stored as a (1, dim) row.
        return jax.random.uniform(next(keys), (1, dim), jnp.float32)

    def mlp_params(din, hid, dout):
        return [xavier((din, hid)), bias_row(hid),
                xavier((hid, hid)), bias_row(hid),
                xavier((hid, dout)), bias_row(dout)]

    params = {
        "trunk": mlp_params(1, H, E),      # inputs['x'] : 1 -> 50 -> 50 -> 20
        "branch": mlp_params(1, H, E),     # inputs['s'] : 1 -> 50 -> 50 -> 20
        "root": mlp_params(3 * E, H, 1),   # 'e' (60)    : 60 -> 50 -> 50 -> 1
    }

    x = jax.random.normal(next(keys), (B, 1), dtype=jnp.float32)
    s = jax.random.normal(next(keys), (B, 1), dtype=jnp.float32)

    out = enriched_deeponet_pallas(x, s, params)
    jax.block_until_ready(out["f"])
    assert out["f"].shape == (B, 1), out["f"].shape

    ref = enriched_deeponet_ref(x, s, params)
    max_err = float(jnp.max(jnp.abs(out["f"] - ref["f"])))
    # Kernel uses bf16 MXU operands (single pass, f32 accumulate); the f32 JAX
    # reference also runs the MXU at default (single bf16 pass) precision, so
    # agreement is at the ~1e-3 level; tolerance leaves headroom.
    assert jnp.allclose(out["f"], ref["f"], atol=2e-2, rtol=2e-2), max_err

    print("KERNEL_OK")
</pallas_src>

<mosaic_0001>
module attributes {stable_mosaic.version = 11 : i64} {
  func.func @kernel(%arg0: i32, %arg1: memref<1024x2xf32, #tpu.memory_space<vmem>>, %arg2: memref<16x128xf32, #tpu.memory_space<vmem>>, %arg3: memref<368x128xbf16, #tpu.memory_space<vmem>>, %arg4: memref<1024x1xf32, #tpu.memory_space<vmem>>) attributes {dimension_semantics = [#tpu.dimension_semantics<parallel>], iteration_bounds = array<i64: 2>, scalar_prefetch = 0 : i64, scratch_operands = 0 : i64, tpu.core_type = #tpu.core_type<tc>, window_params = [{transform_indices = @transform_0, window_bounds = array<i64: 1024, 2>}, {pipeline_mode = #tpu.pipeline_mode<synchronous>, transform_indices = @transform_1, window_bounds = array<i64: 16, 128>}, {pipeline_mode = #tpu.pipeline_mode<synchronous>, transform_indices = @transform_2, window_bounds = array<i64: 368, 128>}, {transform_indices = @transform_3, window_bounds = array<i64: 1024, 1>}]} {
    %c0 = arith.constant 0 : index
    %c0_0 = arith.constant 0 : index
    %0 = vector.load %arg1[%c0, %c0_0] : memref<1024x2xf32, #tpu.memory_space<vmem>>, vector<1024x2xf32>
    %1 = vector.extract_strided_slice %0 {offsets = [0, 0], sizes = [1024, 1], strides = [1, 1]} : vector<1024x2xf32> to vector<1024x1xf32>
    %2 = vector.extract_strided_slice %0 {offsets = [0, 1], sizes = [1024, 1], strides = [1, 1]} : vector<1024x2xf32> to vector<1024x1xf32>
    %c0_1 = arith.constant 0 : index
    %c0_2 = arith.constant 0 : index
    %3 = vector.load %arg2[%c0_1, %c0_2] : memref<16x128xf32, #tpu.memory_space<vmem>>, vector<1x100xf32>
    %c1 = arith.constant 1 : index
    %c0_3 = arith.constant 0 : index
    %4 = vector.load %arg2[%c1, %c0_3] : memref<16x128xf32, #tpu.memory_space<vmem>>, vector<1x100xf32>
    %c2 = arith.constant 2 : index
    %c0_4 = arith.constant 0 : index
    %5 = vector.load %arg2[%c2, %c0_4] : memref<16x128xf32, #tpu.memory_space<vmem>>, vector<1x100xf32>
    %c3 = arith.constant 3 : index
    %c0_5 = arith.constant 0 : index
    %6 = vector.load %arg2[%c3, %c0_5] : memref<16x128xf32, #tpu.memory_space<vmem>>, vector<1x100xf32>
    %c4 = arith.constant 4 : index
    %c0_6 = arith.constant 0 : index
    %7 = vector.load %arg2[%c4, %c0_6] : memref<16x128xf32, #tpu.memory_space<vmem>>, vector<1x40xf32>
    %c5 = arith.constant 5 : index
    %c0_7 = arith.constant 0 : index
    %8 = vector.load %arg2[%c5, %c0_7] : memref<16x128xf32, #tpu.memory_space<vmem>>, vector<1x50xf32>
    %c6 = arith.constant 6 : index
    %c0_8 = arith.constant 0 : index
    %9 = vector.load %arg2[%c6, %c0_8] : memref<16x128xf32, #tpu.memory_space<vmem>>, vector<1x50xf32>
    %c7 = arith.constant 7 : index
    %c0_9 = arith.constant 0 : index
    %10 = vector.load %arg2[%c7, %c0_9] : memref<16x128xf32, #tpu.memory_space<vmem>>, vector<1x50xf32>
    %c8 = arith.constant 8 : index
    %c0_10 = arith.constant 0 : index
    %11 = vector.load %arg2[%c8, %c0_10] : memref<16x128xf32, #tpu.memory_space<vmem>>, vector<1x1xf32>
    %12 = vector.broadcast %1 : vector<1024x1xf32> to vector<1024x100xf32>
    %13 = vector.broadcast %3 : vector<1x100xf32> to vector<1024x100xf32>
    %14 = arith.mulf %12, %13 : vector<1024x100xf32>
    %15 = vector.broadcast %2 : vector<1024x1xf32> to vector<1024x100xf32>
    %16 = vector.broadcast %4 : vector<1x100xf32> to vector<1024x100xf32>
    %17 = arith.mulf %15, %16 : vector<1024x100xf32>
    %18 = arith.addf %14, %17 : vector<1024x100xf32>
    %19 = vector.broadcast %5 : vector<1x100xf32> to vector<1024x100xf32>
    %20 = arith.addf %18, %19 : vector<1024x100xf32>
    %21 = math.tanh %20 : vector<1024x100xf32>
    %c0_11 = arith.constant 0 : index
    %c0_12 = arith.constant 0 : index
    %22 = vector.load %arg3[%c0_11, %c0_12] : memref<368x128xbf16, #tpu.memory_space<vmem>>, vector<100x100xbf16>
    %23 = arith.truncf %21 : vector<1024x100xf32> to vector<1024x100xbf16>
    %cst = arith.constant dense<0.000000e+00> : vector<1024x100xf32>
    %24 = tpu.matmul %23, %22, %cst {dimension_numbers = #tpu.dot_dimension_numbers<[1], [0], [0], [1], [0, 0, 1, 1], [], []>} : vector<1024x100xbf16>, vector<100x100xbf16>, vector<1024x100xf32> -> vector<1024x100xf32>
    %25 = vector.broadcast %6 : vector<1x100xf32> to vector<1024x100xf32>
    %26 = arith.addf %24, %25 : vector<1024x100xf32>
    %27 = math.tanh %26 : vector<1024x100xf32>
    %c112 = arith.constant 112 : index
    %c0_13 = arith.constant 0 : index
    %28 = vector.load %arg3[%c112, %c0_13] : memref<368x128xbf16, #tpu.memory_space<vmem>>, vector<100x40xbf16>
    %29 = arith.truncf %27 : vector<1024x100xf32> to vector<1024x100xbf16>
    %cst_14 = arith.constant dense<0.000000e+00> : vector<1024x40xf32>
    %30 = tpu.matmul %29, %28, %cst_14 {dimension_numbers = #tpu.dot_dimension_numbers<[1], [0], [0], [1], [0, 0, 1, 1], [], []>} : vector<1024x100xbf16>, vector<100x40xbf16>, vector<1024x40xf32> -> vector<1024x40xf32>
    %31 = vector.broadcast %7 : vector<1x40xf32> to vector<1024x40xf32>
    %32 = arith.addf %30, %31 : vector<1024x40xf32>
    %33 = vector.extract_strided_slice %32 {offsets = [0, 0], sizes = [1024, 20], strides = [1, 1]} : vector<1024x40xf32> to vector<1024x20xf32>
    %34 = vector.extract_strided_slice %32 {offsets = [0, 20], sizes = [1024, 20], strides = [1, 1]} : vector<1024x40xf32> to vector<1024x20xf32>
    %35 = arith.mulf %33, %34 : vector<1024x20xf32>
    %c224 = arith.constant 224 : index
    %c0_15 = arith.constant 0 : index
    %36 = vector.load %arg3[%c224, %c0_15] : memref<368x128xbf16, #tpu.memory_space<vmem>>, vector<20x50xbf16>
    %37 = arith.truncf %35 : vector<1024x20xf32> to vector<1024x20xbf16>
    %cst_16 = arith.constant dense<0.000000e+00> : vector<1024x50xf32>
    %38 = tpu.matmul %37, %36, %cst_16 {dimension_numbers = #tpu.dot_dimension_numbers<[1], [0], [0], [1], [0, 0, 1, 1], [], []>} : vector<1024x20xbf16>, vector<20x50xbf16>, vector<1024x50xf32> -> vector<1024x50xf32>
    %c256 = arith.constant 256 : index
    %c0_17 = arith.constant 0 : index
    %39 = vector.load %arg3[%c256, %c0_17] : memref<368x128xbf16, #tpu.memory_space<vmem>>, vector<40x50xbf16>
    %40 = arith.truncf %32 : vector<1024x40xf32> to vector<1024x40xbf16>
    %cst_18 = arith.constant dense<0.000000e+00> : vector<1024x50xf32>
    %41 = tpu.matmul %40, %39, %cst_18 {dimension_numbers = #tpu.dot_dimension_numbers<[1], [0], [0], [1], [0, 0, 1, 1], [], []>} : vector<1024x40xbf16>, vector<40x50xbf16>, vector<1024x50xf32> -> vector<1024x50xf32>
    %42 = arith.addf %38, %41 : vector<1024x50xf32>
    %43 = vector.broadcast %8 : vector<1x50xf32> to vector<1024x50xf32>
    %44 = arith.addf %42, %43 : vector<1024x50xf32>
    %45 = math.tanh %44 : vector<1024x50xf32>
    %c304 = arith.constant 304 : index
    %c0_19 = arith.constant 0 : index
    %46 = vector.load %arg3[%c304, %c0_19] : memref<368x128xbf16, #tpu.memory_space<vmem>>, vector<50x50xbf16>
    %47 = arith.truncf %45 : vector<1024x50xf32> to vector<1024x50xbf16>
    %cst_20 = arith.constant dense<0.000000e+00> : vector<1024x50xf32>
    %48 = tpu.matmul %47, %46, %cst_20 {dimension_numbers = #tpu.dot_dimension_numbers<[1], [0], [0], [1], [0, 0, 1, 1], [], []>} : vector<1024x50xbf16>, vector<50x50xbf16>, vector<1024x50xf32> -> vector<1024x50xf32>
    %49 = vector.broadcast %9 : vector<1x50xf32> to vector<1024x50xf32>
    %50 = arith.addf %48, %49 : vector<1024x50xf32>
    %51 = math.tanh %50 : vector<1024x50xf32>
    %52 = vector.broadcast %10 : vector<1x50xf32> to vector<1024x50xf32>
    %53 = arith.mulf %51, %52 : vector<1024x50xf32>
    %cst_21 = arith.constant dense<0.000000e+00> : vector<1024xf32>
    %54 = vector.multi_reduction <add>, %53, %cst_21 [1] : vector<1024x50xf32> to vector<1024xf32>
    %55 = vector.shape_cast %54 : vector<1024xf32> to vector<1024x1xf32>
    %56 = vector.broadcast %11 : vector<1x1xf32> to vector<1024x1xf32>
    %57 = arith.addf %55, %56 : vector<1024x1xf32>
    %c0_22 = arith.constant 0 : index
    %c0_23 = arith.constant 0 : index
    %58 = vector.load %arg4[%c0_22, %c0_23] : memref<1024x1xf32, #tpu.memory_space<vmem>>, vector<1024x1xf32>
    tpu.vector_store %arg4[%c0_22, %c0_23], %57 {strides = array<i32>} : memref<1024x1xf32, #tpu.memory_space<vmem>>, vector<1024x1xf32>,
    return
  }
  func.func @transform_0(%arg0: i32) -> (i32, i32) {
    %c0_i32 = arith.constant 0 : i32
    %c0_i32_0 = arith.constant 0 : i32
    return %arg0, %c0_i32 : i32, i32
  }
  func.func @transform_1(%arg0: i32) -> (i32, i32) {
    %c0_i32 = arith.constant 0 : i32
    %c0_i32_0 = arith.constant 0 : i32
    %c0_i32_1 = arith.constant 0 : i32
    return %c0_i32, %c0_i32_0 : i32, i32
  }
  func.func @transform_2(%arg0: i32) -> (i32, i32) {
    %c0_i32 = arith.constant 0 : i32
    %c0_i32_0 = arith.constant 0 : i32
    %c0_i32_1 = arith.constant 0 : i32
    return %c0_i32, %c0_i32_0 : i32, i32
  }
  func.func @transform_3(%arg0: i32) -> (i32, i32) {
    %c0_i32 = arith.constant 0 : i32
    %c0_i32_0 = arith.constant 0 : i32
    return %arg0, %c0_i32 : i32, i32
  }
}

</mosaic_0001>

<bundles_post_ra>
// kernel: tpu_custom_call.1
= control target key start
LH: loop header
LB: loop body
LE: loop exit
PB: predicated region body
PF: predicated region fallthrough
CT: control target
= control target key end

     0   :  { %s10908_s12 = smov 0   ;;  %s15264_s0 = inlined_call_operand.vmem [shape: f32[2048,2], index: 0, kind: input, shape index: {}]   ;;  %s15265_s1 = inlined_call_operand.vmem [shape: f32[16,128], index: 1, kind: input, shape index: {}]   ;;  %s15266_s2 = inlined_call_operand.vmem [shape: bf16[368,128], index: 2, kind: input, shape index: {}]   ;;  %s15267_s3 = inlined_call_operand.vmem [shape: f32[2048,1], index: 3, kind: output, shape index: {}]  }
   0x1 LB: > { %s8308_s13 = sadd.s32 4294967295, %s10883_s12   ;;  %p8312_p0 = scmp.ge.s32.totalorder %s10883_s12, 1  ;;  %s10883_s12 = sphi %s10908_s12, %s13_s12  }
   0x2   : > { %p138_p1 = scmp.lt.s32.totalorder %s10883_s12, 3 }
   0x4   : > { %p139_p2 = pnand %p8312_p0, %p138_p1 }
   0x6   : > { %142 = sbr.rel (%p139_p2) target bundleno = 1983 (0x7bf), region = 32 }
   0xb   : > { %s8313_s14 = sshll.u32 %s8308_s13, 7  ;;  %v15268_v0 = vmov 1   ;;  %v15270_v1 = vmov 0   ;;  %vm2429_vm0 = vcmask 1041408   ;;  %vm2236_vm1 = vcmask 818176   ;;  %s10887_s9 = smov 108  }
   0xc   : > { %9732 = vset.pattern.permute.xlu0 %v15268_v0  ;;  %9731 = vset.pattern.permute.xlu1 %v15270_v1  ;;  %p163_p3 = scmp.lt.s32.totalorder %s8313_s14, 255  ;;  %vm4950_vm2 = vcmask 1043456   ;;  %vm6798_vm3 = vcmask 1040384   ;;  %vm4757_vm4 = vcmask 326656   ;;  %vm5508_vm5 = vcmask 162816  }
   0xd   : > { %vm6605_vm6 = vcmask 408576   ;;  %vm8123_vm7 = vcmask 7168  }
   0xe   : > { %s15545_s14 = smov (!%p163_p3, %s8313_s14), 255 }
   0xf   : > { %s8314_s15 = sshll.u32 %s15545_s14, 3 }
  0x10   : > { %s10926_s18 = scalar_lea.vmem %s15264_s0, %s8314_s15  ;;  %s14692_s10 = scalar_lea.vmem %s15267_s3, %s8314_s15 }
  0x11   : > { %v10929_v2 = vld [vmem:[%s10926_s18 + $0x10] sm:$0xff]  ;;  %v10932_v3 = vld [vmem:[%s10926_s18] sm:$0xff]  ;;  %v178_v4 = vld [vmem:[%s10926_s18 + $0x18] sm:$0xff] }
  0x12   : > { %324 = vperm.xlu1 %9731, %v10929_v2   ;;  %1085 = vperm.xlu0 %9732, %v10932_v3   ;;  %v180_v5 = vld [vmem:[%s10926_s18 + $0x28] sm:$0xff]  ;;  %v182_v6 = vld [vmem:[%s10926_s18 + $0x38] sm:$0xff]  ;;  %v10961_v28 = vld [vmem:[%s10926_s18 + $0x210] sm:$0xff] }
  0x13   : > { %v184_v7 = vld [vmem:[%s10926_s18 + $0x48] sm:$0xff]  ;;  %v186_v8 = vld [vmem:[%s10926_s18 + $0x58] sm:$0xff]  ;;  %v10968_v32 = vld [vmem:[%s10926_s18 + $0x230] sm:$0xff] }
  0x14   : > { %v188_v9 = vld [vmem:[%s10926_s18 + $0x68] sm:$0xff]  ;;  %v190_v10 = vld [vmem:[%s10926_s18 + $0x78] sm:$0xff]  ;;  %v10978_v34 = vld [vmem:[%s10926_s18 + $0x250] sm:$0xff] }
  0x15   : > { %v192_v11 = vld [vmem:[%s10926_s18 + $0x88] sm:$0xff]  ;;  %v194_v12 = vld [vmem:[%s10926_s18 + $0x98] sm:$0xff]  ;;  %v10981_v35 = vld [vmem:[%s10926_s18 + $0x20] sm:$0xff] }
  0x16   : > { %329 = vperm.xlu1 %9731, %v178_v4   ;;  %1097 = vperm.xlu0 %9732, %v178_v4   ;;  %v196_v13 = vld [vmem:[%s10926_s18 + $0xa8] sm:$0xff]  ;;  %v198_v14 = vld [vmem:[%s10926_s18 + $0xb8] sm:$0xff]  ;;  %v10986_v36 = vld [vmem:[%s10926_s18 + $0x1d0] sm:$0xff] }
  0x17   : > { %v200_v15 = vld [vmem:[%s10926_s18 + $0xc8] sm:$0xff]  ;;  %v202_v16 = vld [vmem:[%s10926_s18 + $0xd8] sm:$0xff]  ;;  %v10989_v37 = vld [vmem:[%s10926_s18 + $0x30] sm:$0xff] }
  0x18   : > { %v204_v17 = vld [vmem:[%s10926_s18 + $0xe8] sm:$0xff]  ;;  %v206_v18 = vld [vmem:[%s10926_s18 + $0xf8] sm:$0xff]  ;;  %v10998_v40 = vld [vmem:[%s10926_s18 + $0x270] sm:$0xff] }
  0x19   : > { %v208_v19 = vld [vmem:[%s10926_s18 + $0x108] sm:$0xff]  ;;  %v210_v20 = vld [vmem:[%s10926_s18 + $0x118] sm:$0xff]  ;;  %v11001_v41 = vld [vmem:[%s10926_s18 + $0x40] sm:$0xff] }
  0x1a   : > { %339 = vperm.xlu1 %9731, %v180_v5   ;;  %1105 = vperm.xlu0 %9732, %v180_v5   ;;  %v212_v21 = vld [vmem:[%s10926_s18 + $0x128] sm:$0xff]  ;;  %v214_v22 = vld [vmem:[%s10926_s18 + $0x138] sm:$0xff]  ;;  %v11010_v44 = vld [vmem:[%s10926_s18 + $0x1f0] sm:$0xff] }
  0x1b   : > { %v216_v23 = vld [vmem:[%s10926_s18 + $0x148] sm:$0xff]  ;;  %v218_v24 = vld [vmem:[%s10926_s18 + $0x158] sm:$0xff]  ;;  %v11013_v45 = vld [vmem:[%s10926_s18 + $0x50] sm:$0xff] }
  0x1c   : > { %v220_v25 = vld [vmem:[%s10926_s18 + $0x168] sm:$0xff]  ;;  %v222_v26 = vld [vmem:[%s10926_s18 + $0x178] sm:$0xff]  ;;  %v11022_v48 = vld [vmem:[%s10926_s18 + $0x290] sm:$0xff] }
  0x1d   : > { %v224_v27 = vld [vmem:[%s10926_s18 + $0x188] sm:$0xff]  ;;  %v226_v29 = vld [vmem:[%s10926_s18 + $0x198] sm:$0xff]  ;;  %v11025_v49 = vld [vmem:[%s10926_s18 + $0x60] sm:$0xff] }
  0x1e   : > { %349 = vperm.xlu1 %9731, %v182_v6   ;;  %1113 = vperm.xlu0 %9732, %v182_v6   ;;  %v228_v30 = vld [vmem:[%s10926_s18 + $0x1a8] sm:$0xff]  ;;  %v230_v31 = vld [vmem:[%s10926_s18 + $0x1b8] sm:$0xff]  ;;  %v11034_v52 = vld [vmem:[%s10926_s18 + $0x2b0] sm:$0xff] }
  0x1f   : > { %v10972_v33 = vld [vmem:[%s10926_s18 + $0x8] sm:$0xff]  ;;  %v11037_v53 = vld [vmem:[%s10926_s18 + $0x70] sm:$0xff]  ;;  %v11049_v57 = vld [vmem:[%s10926_s18 + $0x80] sm:$0xff] }
  0x20   : > { %v11046_v56 = vld [vmem:[%s10926_s18 + $0x2d0] sm:$0xff]  ;;  %v11068_v4 = vld [vmem:[%s10926_s18 + $0xa0] sm:$0xff] }
  0x21   : > { %15298 = vst [vmem:[#allocation2_spill] sm:$0xff] %v11046_v56  ;;  %v269_v60 = vld [vmem:[%s10926_s18 + $0x2f0] sm:$0xff] }
  0x22   : > { %359 = vperm.xlu1 %9731, %v184_v7   ;;  %1121 = vperm.xlu0 %9732, %v184_v7   ;;  %v11059_v61 = vld [vmem:[%s10926_s18 + $0x90] sm:$0xff] }
  0x23   : > { %v277_v7 = vld [vmem:[%s10926_s18 + $0x330] sm:$0xff] }
  0x26   : > { %369 = vperm.xlu1 %9731, %v186_v8   ;;  %1129 = vperm.xlu0 %9732, %v186_v8   ;;  %v11077_v8 = vld [vmem:[%s10926_s18 + $0xb0] sm:$0xff] }
  0x2a   : > { %379 = vperm.xlu1 %9731, %v188_v9   ;;  %1137 = vperm.xlu0 %9732, %v188_v9  }
  0x2e   : > { %389 = vperm.xlu1 %9731, %v190_v10   ;;  %1145 = vperm.xlu0 %9732, %v190_v10  }
  0x32   : > { %399 = vperm.xlu1 %9731, %v192_v11   ;;  %1153 = vperm.xlu0 %9732, %v192_v11   ;;  %v281_v11 = vld [vmem:[%s10926_s18 + $0x350] sm:$0xff] }
  0x36   : > { %409 = vperm.xlu1 %9731, %v194_v12   ;;  %1161 = vperm.xlu0 %9732, %v194_v12   ;;  %v11086_v12 = vld [vmem:[%s10926_s18 + $0xc0] sm:$0xff] }
  0x3a   : > { %419 = vperm.xlu1 %9731, %v196_v13   ;;  %1169 = vperm.xlu0 %9732, %v196_v13  }
  0x3e   : > { %429 = vperm.xlu1 %9731, %v198_v14   ;;  %1177 = vperm.xlu0 %9732, %v198_v14  }
  0x42   : > { %439 = vperm.xlu1 %9731, %v200_v15   ;;  %1185 = vperm.xlu0 %9732, %v200_v15   ;;  %v285_v15 = vld [vmem:[%s10926_s18 + $0x370] sm:$0xff] }
  0x46   : > { %449 = vperm.xlu1 %9731, %v202_v16   ;;  %1193 = vperm.xlu0 %9732, %v202_v16   ;;  %v11095_v16 = vld [vmem:[%s10926_s18 + $0xd0] sm:$0xff] }
  0x4a   : > { %459 = vperm.xlu1 %9731, %v204_v17   ;;  %1201 = vperm.xlu0 %9732, %v204_v17  }
  0x4e   : > { %469 = vperm.xlu1 %9731, %v206_v18   ;;  %1209 = vperm.xlu0 %9732, %v206_v18  }
  0x52   : > { %479 = vperm.xlu1 %9731, %v208_v19   ;;  %1217 = vperm.xlu0 %9732, %v208_v19   ;;  %v289_v19 = vld [vmem:[%s10926_s18 + $0x390] sm:$0xff] }
  0x56   : > { %489 = vperm.xlu1 %9731, %v210_v20   ;;  %1225 = vperm.xlu0 %9732, %v210_v20   ;;  %v11104_v20 = vld [vmem:[%s10926_s18 + $0xe0] sm:$0xff] }
  0x5a   : > { %499 = vperm.xlu1 %9731, %v212_v21   ;;  %1233 = vperm.xlu0 %9732, %v212_v21  }
  0x5e   : > { %509 = vperm.xlu1 %9731, %v214_v22   ;;  %1241 = vperm.xlu0 %9732, %v214_v22  }
  0x62   : > { %519 = vperm.xlu1 %9731, %v216_v23   ;;  %1249 = vperm.xlu0 %9732, %v216_v23   ;;  %v293_v23 = vld [vmem:[%s10926_s18 + $0x3b0] sm:$0xff] }
  0x66   : > { %529 = vperm.xlu1 %9731, %v218_v24   ;;  %1257 = vperm.xlu0 %9732, %v218_v24   ;;  %v11113_v24 = vld [vmem:[%s10926_s18 + $0xf0] sm:$0xff] }
  0x6a   : > { %539 = vperm.xlu1 %9731, %v220_v25   ;;  %1265 = vperm.xlu0 %9732, %v220_v25  }
  0x6e   : > { %549 = vperm.xlu1 %9731, %v222_v26   ;;  %1273 = vperm.xlu0 %9732, %v222_v26  }
  0x72   : > { %559 = vperm.xlu1 %9731, %v224_v27   ;;  %1349 = vperm.xlu0 %9732, %v10961_v28  }
  0x76   : > { %569 = vperm.xlu1 %9731, %v226_v29   ;;  %1281 = vperm.xlu0 %9732, %v224_v27   ;;  %v297_v27 = vld [vmem:[%s10926_s18 + $0x3d0] sm:$0xff] }
  0x7a   : > { %579 = vperm.xlu1 %9731, %v228_v30   ;;  %1289 = vperm.xlu0 %9732, %v226_v29   ;;  %v11122_v29 = vld [vmem:[%s10926_s18 + $0x100] sm:$0xff] }
  0x7e   : > { %589 = vperm.xlu1 %9731, %v230_v31   ;;  %1365 = vperm.xlu0 %9732, %v10968_v32  }
  0x82   : > { %9733 = vset.pattern.permute.xlu1 %v15268_v0  ;;  %1297 = vperm.xlu0 %9732, %v228_v30   ;;  %v9808_v30 = vld [vmem:[%s15266_s2 + $0x30] ss:$0 sps:$4 sm:$0x33]  }
  0x83   : > { %1089 = vperm.xlu1 %9733, %v10972_v33   ;;  %9714 = vmatprep.subr.msk.bf16.mxu0 %vm2429_vm0, %v9808_v30 }
  0x84   : > { %9715 = vmatprep.subr.msk.bf16.mxu1 %vm2429_vm0, %v9808_v30 }
  0x86   : > { %1305 = vperm.xlu0 %9732, %v230_v31  }
  0x87   : > { %1093 = vperm.xlu1 %9733, %v10929_v2   ;;  %v273_v2 = vld [vmem:[%s10926_s18 + $0x310] sm:$0xff] }
  0x8a   : > { %1381 = vperm.xlu0 %9732, %v10978_v34  }
  0x8b   : > { %1101 = vperm.xlu1 %9733, %v10981_v35  }
  0x8d   : > { %v10991_v38 = vpop.permute.xlu1 %324  ;;  %v10993_v39 = vpop.permute.xlu0 %1085 }
  0x8e   : > { %1317 = vperm.xlu0 %9732, %v10986_v36  }
  0x8f   : > { %1109 = vperm.xlu1 %9733, %v10989_v37  }
  0x91   : > { %v11003_v42 = vpop.permute.xlu1 %329  ;;  %v11005_v43 = vpop.permute.xlu0 %1097 }
  0x92   : > { %1397 = vperm.xlu0 %9732, %v10998_v40  }
  0x93   : > { %1117 = vperm.xlu1 %9733, %v11001_v41  }
  0x95   : > { %v11015_v46 = vpop.permute.xlu1 %339  ;;  %v11017_v47 = vpop.permute.xlu0 %1105 }
  0x96   : > { %1333 = vperm.xlu0 %9732, %v11010_v44  }
  0x97   : > { %1125 = vperm.xlu1 %9733, %v11013_v45  }
  0x99   : > { %v11027_v50 = vpop.permute.xlu1 %349  ;;  %v11029_v51 = vpop.permute.xlu0 %1113 }
  0x9a   : > { %1413 = vperm.xlu0 %9732, %v11022_v48  }
  0x9b   : > { %1133 = vperm.xlu1 %9733, %v11025_v49  }
  0x9d   : > { %v11039_v54 = vpop.permute.xlu1 %359  ;;  %v11041_v55 = vpop.permute.xlu0 %1121 }
  0x9e   : > { %1429 = vperm.xlu0 %9732, %v11034_v52  }
  0x9f   : > { %1141 = vperm.xlu1 %9733, %v11037_v53  }
  0xa1   : > { %v11051_v58 = vpop.permute.xlu1 %369  ;;  %v11053_v59 = vpop.permute.xlu0 %1129 }
  0xa2   : > { %1445 = vperm.xlu0 %9732, %v11046_v56  }
  0xa3   : > { %1149 = vperm.xlu1 %9733, %v11049_v57  }
  0xa5   : > { %v11061_v62 = vpop.permute.xlu1 %379  ;;  %v11063_v63 = vpop.permute.xlu0 %1137 }
  0xa6   : > { %1461 = vperm.xlu0 %9732, %v269_v60  }
  0xa7   : > { %1157 = vperm.xlu1 %9733, %v11059_v61  }
  0xa9   : > { %v11070_v5 = vpop.permute.xlu1 %389  ;;  %v11072_v6 = vpop.permute.xlu0 %1145 }
  0xaa   : > { %1477 = vperm.xlu0 %9732, %v273_v2   ;;  %v2431_v2 = vsel %vm2429_vm0, %v9808_v30, 0 }
  0xab   : > { %1165 = vperm.xlu1 %9733, %v11068_v4   ;;  %9015 = vmatpush3.bf16.msra.mxu0 %v2431_v2 }
  0xac   : > { %9707 = vmatpush3.bf16.msra.mxu1 %v2431_v2  ;;  %v9811_v2 = vld [vmem:[%s15266_s2 + $0x18] sm:$0xff]  }
  0xad   : > { %v11079_v9 = vpop.permute.xlu1 %399  ;;  %v11081_v10 = vpop.permute.xlu0 %1153 }
  0xae   : > { %1493 = vperm.xlu0 %9732, %v277_v7   ;;  %v11135_v7 = vld [vmem:[%s10926_s18 + $0x110] sm:$0xff] }
  0xaf   : > { %1173 = vperm.xlu1 %9733, %v11077_v8  }
  0xb1   : > { %v11088_v13 = vpop.permute.xlu1 %409  ;;  %v11090_v14 = vpop.permute.xlu0 %1161 }
  0xb2   : > { %1509 = vperm.xlu0 %9732, %v281_v11   ;;  %v9809_v11 = vld [vmem:[%s15266_s2 + $0x28] sm:$0xff]  }
  0xb3   : > { %1181 = vperm.xlu1 %9733, %v11086_v12   ;;  %9016 = vmatprep.subr.bf16.mxu0 %v9809_v11 }
  0xb4   : > { %9017 = vmatpush3.bf16.msra.mxu0 %v9809_v11  ;;  %9701 = vmatprep.subr.bf16.mxu1 %v9809_v11 }
  0xb5   : > { %v11097_v17 = vpop.permute.xlu1 %419  ;;  %v11099_v18 = vpop.permute.xlu0 %1169  ;;  %9708 = vmatpush3.bf16.msra.mxu1 %v9809_v11  ;;  %v9812_v11 = vld [vmem:[%s15266_s2 + $0x10] sm:$0xff]  }
  0xb6   : > { %1525 = vperm.xlu0 %9732, %v285_v15  }
  0xb7   : > { %1189 = vperm.xlu1 %9733, %v11095_v16  }
  0xb9   : > { %v11106_v21 = vpop.permute.xlu1 %429  ;;  %v11108_v22 = vpop.permute.xlu0 %1177 }
  0xba   : > { %1541 = vperm.xlu0 %9732, %v289_v19  }
  0xbb   : > { %1197 = vperm.xlu1 %9733, %v11104_v20  }
  0xbd   : > { %v11115_v25 = vpop.permute.xlu1 %439  ;;  %v11117_v26 = vpop.permute.xlu0 %1185 }
  0xbe   : > { %1557 = vperm.xlu0 %9732, %v293_v23   ;;  %v11149_v23 = vld [vmem:[%s10926_s18 + $0x120] sm:$0xff] }
  0xbf   : > { %1205 = vperm.xlu1 %9733, %v11113_v24  }
  0xc1   : > { %v11127_v31 = vpop.permute.xlu1 %449  ;;  %v11129_v60 = vpop.permute.xlu0 %1193 }
  0xc2   : > { %1573 = vperm.xlu0 %9732, %v297_v27   ;;  %v9810_v27 = vld [vmem:[%s15266_s2 + $0x20] sm:$0xff]  }
  0xc3   : > { %1213 = vperm.xlu1 %9733, %v11122_v29   ;;  %9018 = vmatprep.subr.bf16.mxu0 %v9810_v27 }
  0xc4   : > { %9702 = vmatprep.subr.bf16.mxu1 %v9810_v27  ;;  %9019 = vmatpush3.bf16.msra.mxu0 %v9810_v27 }
  0xc5   : > { %v11141_v15 = vpop.permute.xlu1 %459  ;;  %v11143_v19 = vpop.permute.xlu0 %1201  ;;  %9709 = vmatpush3.bf16.msra.mxu1 %v9810_v27  ;;  %9020 = vmatprep.subr.bf16.mxu0 %v9811_v2  ;;  %v9813_v27 = vld [vmem:[%s15266_s2 + $0x8] sm:$0xff]  }
  0xc6   : > { %15299 = vst [vmem:[#allocation3_spill] sm:$0xff] %v11141_v15  ;;  %15300 = vst [vmem:[#allocation4_spill] sm:$0xff] %v11143_v19  ;;  %9801 = vset.pattern.permute.xlu0 %v15270_v1  ;;  %9703 = vmatprep.subr.bf16.mxu1 %v9811_v2 }
  0xc7   : > { %1221 = vperm.xlu1 %9733, %v11135_v7   ;;  %314 = vperm.xlu0 %9801, %v10932_v3   ;;  %v11161_v3 = vld [vmem:[%s10926_s18 + $0x130] sm:$0xff] }
  0xc8   : > { %9021 = vmatpush3.bf16.msra.mxu0 %v9811_v2 }
  0xc9   : > { %v11154_v30 = vpop.permute.xlu1 %469  ;;  %v11156_v0 = vpop.permute.xlu0 %1209  ;;  %9710 = vmatpush3.bf16.msra.mxu1 %v9811_v2  ;;  %9022 = vmatprep.subr.bf16.mxu0 %v9812_v11  ;;  %v9814_v2 = vld [vmem:[%s15266_s2] sm:$0xff]  }
  0xca   : > { %15301 = vst [vmem:[#allocation5_spill] sm:$0xff] %v11154_v30  ;;  %15302 = vst [vmem:[#allocation6_spill] sm:$0xff] %v11156_v0  ;;  %9704 = vmatprep.subr.bf16.mxu1 %v9812_v11  ;;  %v15315_v30 = vmov 0  }
  0xcb   : > { %1229 = vperm.xlu1 %9733, %v11149_v23   ;;  %319 = vperm.xlu0 %9801, %v10972_v33   ;;  %v11173_v33 = vld [vmem:[%s10926_s18 + $0x140] sm:$0xff] }
  0xcc   : > { %9023 = vmatpush3.bf16.msra.mxu0 %v9812_v11 }
  0xcd   : > { %v11166_v1 = vpop.permute.xlu1 %479  ;;  %v11168_v56 = vpop.permute.xlu0 %1217  ;;  %9711 = vmatpush3.bf16.msra.mxu1 %v9812_v11  ;;  %9024 = vmatprep.subr.bf16.mxu0 %v9813_v27 }
  0xce   : > { %15303 = vst [vmem:[#allocation7_spill] sm:$0xff] %v11166_v1  ;;  %15304 = vst [vmem:[#allocation8_spill] sm:$0xff] %v11168_v56  ;;  %9705 = vmatprep.subr.bf16.mxu1 %v9813_v27 }
  0xcf   : > { %1237 = vperm.xlu1 %9733, %v11161_v3   ;;  %334 = vperm.xlu0 %9801, %v10981_v35   ;;  %v11185_v35 = vld [vmem:[%s10926_s18 + $0x150] sm:$0xff] }
  0xd0   : > { %9025 = vmatpush3.bf16.msra.mxu0 %v9813_v27 }
  0xd1   : > { %v11178_v0 = vpop.permute.xlu1 %489  ;;  %v11180_v1 = vpop.permute.xlu0 %1225  ;;  %9712 = vmatpush3.bf16.msra.mxu1 %v9813_v27  ;;  %9026 = vmatprep.subr.bf16.mxu0 %v9814_v2 }
  0xd2   : > { %15305 = vst [vmem:[#allocation9_spill] sm:$0xff] %v11178_v0  ;;  %15306 = vst [vmem:[#allocation10_spill] sm:$0xff] %v11180_v1  ;;  %9706 = vmatprep.subr.bf16.mxu1 %v9814_v2 }
  0xd3   : > { %1245 = vperm.xlu1 %9733, %v11173_v33   ;;  %344 = vperm.xlu0 %9801, %v10989_v37   ;;  %v11197_v37 = vld [vmem:[%s10926_s18 + $0x160] sm:$0xff] }
  0xd4   : > { %9027 = vmatpush3.bf16.msra.mxu0 %v9814_v2 }
  0xd5   : > { %v11190_v56 = vpop.permute.xlu1 %499  ;;  %v11192_v0 = vpop.permute.xlu0 %1233  ;;  %9713 = vmatpush3.bf16.msra.mxu1 %v9814_v2  ;;  %v15318_v2 = vmov 1  }
  0xd6   : > { %15307 = vst [vmem:[#allocation11_spill] sm:$0xff] %v11190_v56  ;;  %15308 = vst [vmem:[#allocation12_spill] sm:$0xff] %v11192_v0 }
  0xd7   : > { %1253 = vperm.xlu1 %9733, %v11185_v35   ;;  %354 = vperm.xlu0 %9801, %v11001_v41   ;;  %v11209_v41 = vld [vmem:[%s10926_s18 + $0x170] sm:$0xff] }
  0xd9   : > { %v11202_v1 = vpop.permute.xlu1 %509  ;;  %v11204_v56 = vpop.permute.xlu0 %1241 }
  0xda   : > { %15309 = vst [vmem:[#allocation13_spill] sm:$0xff] %v11202_v1  ;;  %15310 = vst [vmem:[#allocation14_spill] sm:$0xff] %v11204_v56  ;;  %v239_v1 = vld [vmem:[%s10926_s18 + $0x200] sm:$0xff] }
  0xdb   : > { %1261 = vperm.xlu1 %9733, %v11197_v37   ;;  %364 = vperm.xlu0 %9801, %v11013_v45  }
  0xdd   : > { %v11211_v11 = vpop.permute.xlu1 %519  ;;  %v11213_v0 = vpop.permute.xlu0 %1249 }
  0xde   : > { %15311 = vst [vmem:[#allocation15_spill] sm:$0xff] %v11211_v11  ;;  %15312 = vst [vmem:[#allocation16_spill] sm:$0xff] %v11213_v0 }
  0xdf   : > { %1269 = vperm.xlu1 %9733, %v11209_v41   ;;  %374 = vperm.xlu0 %9801, %v11025_v49  }
  0xe1   : > { %v11217_v27 = vpop.permute.xlu1 %529  ;;  %v11219_v56 = vpop.permute.xlu0 %1257 }
  0xe2   : > { %15313 = vst [vmem:[#allocation17_spill] sm:$0xff] %v11217_v27  ;;  %15314 = vst [vmem:[#allocation18_spill] sm:$0xff] %v11219_v56  ;;  %v11235_v56 = vld [vmem:[%s10926_s18 + $0x208] sm:$0xff] }
  0xe3   : > { %9734 = vset.pattern.permute.xlu1 %v15315_v30  ;;  %384 = vperm.xlu0 %9801, %v11037_v53  }
  0xe4   : > { %634 = vperm.xlu1 %9734, %v239_v1  }
  0xe5   : > { %v11224_v45 = vpop.permute.xlu1 %539  ;;  %v11226_v0 = vpop.permute.xlu0 %1265 }
  0xe6   : > { %15316 = vst [vmem:[#allocation19_spill] sm:$0xff] %v11224_v45  ;;  %15317 = vst [vmem:[#allocation20_spill] sm:$0xff] %v11226_v0 }
  0xe7   : > { %394 = vperm.xlu0 %9801, %v11049_v57   ;;  %v242_v57 = vld [vmem:[%s10926_s18 + $0x218] sm:$0xff] }
  0xe8   : > { %9735 = vset.pattern.permute.xlu1 %v15318_v2 }
  0xe9   : > { %v11230_v49 = vpop.permute.xlu1 %549  ;;  %1341 = vperm.xlu1 %9735, %v239_v1   ;;  %v11232_v27 = vpop.permute.xlu0 %1273 }
  0xea   : > { %15319 = vst [vmem:[#allocation21_spill] sm:$0xff] %v11230_v49  ;;  %15320 = vst [vmem:[#allocation22_spill] sm:$0xff] %v11232_v27 }
  0xeb   : > { %404 = vperm.xlu0 %9801, %v11059_v61  }
  0xed   : > { %v11238_v53 = vpop.permute.xlu1 %559  ;;  %1345 = vperm.xlu1 %9735, %v11235_v56   ;;  %v11241_v45 = vpop.permute.xlu0 %1349 }
  0xee   : > { %15321 = vst [vmem:[#allocation23_spill] sm:$0xff] %v11238_v53  ;;  %15322 = vst [vmem:[#allocation24_spill] sm:$0xff] %v11241_v45 }
  0xef   : > { %414 = vperm.xlu0 %9801, %v11068_v4   ;;  %v223_v4 = vld [vmem:[%s10926_s18 + $0x180] sm:$0xff] }
  0xf1   : > { %v11245_v0 = vpop.permute.xlu1 %569  ;;  %9736 = vset.pattern.permute.xlu1 %v15315_v30  ;;  %v11248_v1 = vpop.permute.xlu0 %1281 }
  0xf2   : > { %15323 = vst [vmem:[#allocation25_spill] sm:$0xff] %v11245_v0  ;;  %15324 = vst [vmem:[#allocation26_spill] sm:$0xff] %v11248_v1  ;;  %649 = vperm.xlu1 %9736, %v242_v57   ;;  %v225_v1 = vld [vmem:[%s10926_s18 + $0x190] sm:$0xff] }
  0xf3   : > { %424 = vperm.xlu0 %9801, %v11077_v8  }
  0xf5   : > { %v11251_v61 = vpop.permute.xlu1 %579  ;;  %v11253_v53 = vpop.permute.xlu0 %1289 }
  0xf6   : > { %15325 = vst [vmem:[#allocation27_spill] sm:$0xff] %v11251_v61  ;;  %15326 = vst [vmem:[#allocation28_spill] sm:$0xff] %v11253_v53  ;;  %9737 = vset.pattern.permute.xlu1 %v15318_v2 }
  0xf7   : > { %1353 = vperm.xlu1 %9737, %v242_v57   ;;  %434 = vperm.xlu0 %9801, %v11086_v12   ;;  %v243_v12 = vld [vmem:[%s10926_s18 + $0x220] sm:$0xff] }
  0xf9   : > { %v11258_v45 = vpop.permute.xlu1 %589  ;;  %v11260_v0 = vpop.permute.xlu0 %1365 }
  0xfa   : > { %15327 = vst [vmem:[#allocation29_spill] sm:$0xff] %v11258_v45  ;;  %15328 = vst [vmem:[#allocation30_spill] sm:$0xff] %v11260_v0 }
  0xfb   : > { %1277 = vperm.xlu1 %9737, %v223_v4   ;;  %444 = vperm.xlu0 %9801, %v11095_v16  }
  0xfd   : > { %v11264_v8 = vpop.permute.xlu0 %1297 }
  0xfe   : > { %15329 = vst [vmem:[#allocation31_spill] sm:$0xff] %v11264_v8  ;;  %v11266_v61 = vpop.permute.xlu1 %1089 }
  0xff   : > { %1285 = vperm.xlu1 %9737, %v225_v1   ;;  %454 = vperm.xlu0 %9801, %v11104_v20  }
 0x101   : > { %v11269_v57 = vpop.permute.xlu0 %1305 }
 0x102   : > { %15330 = vst [vmem:[#allocation32_spill] sm:$0xff] %v11269_v57  ;;  %v11272_v53 = vpop.permute.xlu1 %1093  ;;  %v11287_v57 = vld [vmem:[%s10926_s18 + $0x228] sm:$0xff] }
 0x103   : > { %9738 = vset.pattern.permute.xlu1 %v15315_v30  ;;  %464 = vperm.xlu0 %9801, %v11113_v24  }
 0x104   : > { %654 = vperm.xlu1 %9738, %v243_v12  }
 0x105   : > { %v11276_v16 = vpop.permute.xlu0 %1381 }
 0x106   : > { %15331 = vst [vmem:[#allocation33_spill] sm:$0xff] %v11276_v16  ;;  %v11278_v0 = vpop.permute.xlu1 %1101 }
 0x107   : > { %474 = vperm.xlu0 %9801, %v11122_v29   ;;  %v246_v29 = vld [vmem:[%s10926_s18 + $0x238] sm:$0xff] }
 0x108   : > { %9739 = vset.pattern.permute.xlu1 %v15318_v2 }
 0x109   : > { %1357 = vperm.xlu1 %9739, %v243_v12   ;;  %v11282_v20 = vpop.permute.xlu0 %1317 }
 0x10a   : > { %15332 = vst [vmem:[#allocation34_spill] sm:$0xff] %v11282_v20  ;;  %v11284_v45 = vpop.permute.xlu1 %1109 }
 0x10b   : > { %484 = vperm.xlu0 %9801, %v11135_v7  }
 0x10d   : > { %1361 = vperm.xlu1 %9739, %v11287_v57   ;;  %v11291_v24 = vpop.permute.xlu0 %1397 }
 0x10e   : > { %15333 = vst [vmem:[#allocation35_spill] sm:$0xff] %v11291_v24  ;;  %v11293_v16 = vpop.permute.xlu1 %1117 }
 0x10f   : > { %494 = vperm.xlu0 %9801, %v11149_v23   ;;  %v227_v23 = vld [vmem:[%s10926_s18 + $0x1a0] sm:$0xff] }
 0x111   : > { %9740 = vset.pattern.permute.xlu1 %v15315_v30  ;;  %v11298_v12 = vpop.permute.xlu0 %1333 }
 0x112   : > { %15334 = vst [vmem:[#allocation36_spill] sm:$0xff] %v11298_v12  ;;  %669 = vperm.xlu1 %9740, %v246_v29   ;;  %v11300_v20 = vpop.permute.xlu1 %1125  ;;  %v229_v12 = vld [vmem:[%s10926_s18 + $0x1b0] sm:$0xff] }
 0x113   : > { %504 = vperm.xlu0 %9801, %v11161_v3  }
 0x115   : > { %v11303_v7 = vpop.permute.xlu0 %1413 }
 0x116   : > { %15335 = vst [vmem:[#allocation37_spill] sm:$0xff] %v11303_v7  ;;  %9741 = vset.pattern.permute.xlu1 %v15318_v2  ;;  %v11306_v24 = vpop.permute.xlu1 %1133 }
 0x117   : > { %1369 = vperm.xlu1 %9741, %v246_v29   ;;  %514 = vperm.xlu0 %9801, %v11173_v33   ;;  %v247_v33 = vld [vmem:[%s10926_s18 + $0x240] sm:$0xff] }
 0x119   : > { %v11310_v8 = vpop.permute.xlu0 %1429 }
 0x11a   : > { %15336 = vst [vmem:[#allocation38_spill] sm:$0xff] %v11310_v8  ;;  %v11312_v27 = vpop.permute.xlu1 %1141  ;;  %v248_v8 = vld [vmem:[%s10926_s18 + $0x248] sm:$0xff] }
 0x11b   : > { %1293 = vperm.xlu1 %9741, %v227_v23   ;;  %524 = vperm.xlu0 %9801, %v11185_v35  }
 0x11d   : > { %v11316_v3 = vpop.permute.xlu0 %1445 }
 0x11e   : > { %15337 = vst [vmem:[#allocation39_spill] sm:$0xff] %v11316_v3  ;;  %v11318_v7 = vpop.permute.xlu1 %1149 }
 0x11f   : > { %1301 = vperm.xlu1 %9741, %v229_v12   ;;  %534 = vperm.xlu0 %9801, %v11197_v37  }
 0x121   : > { %v11321_v29 = vpop.permute.xlu0 %1461 }
 0x122   : > { %15338 = vst [vmem:[#allocation40_spill] sm:$0xff] %v11321_v29  ;;  %v11324_v49 = vpop.permute.xlu1 %1157 }
 0x123   : > { %9742 = vset.pattern.permute.xlu1 %v15315_v30  ;;  %544 = vperm.xlu0 %9801, %v11209_v41  }
 0x124   : > { %674 = vperm.xlu1 %9742, %v247_v33  }
 0x125   : > { %v11328_v35 = vpop.permute.xlu0 %1477 }
 0x126   : > { %15339 = vst [vmem:[#allocation41_spill] sm:$0xff] %v11328_v35  ;;  %v11330_v3 = vpop.permute.xlu1 %1165  ;;  %v250_v35 = vld [vmem:[%s10926_s18 + $0x258] sm:$0xff] }
 0x127   : > { %554 = vperm.xlu0 %9801, %v223_v4  }
 0x128   : > { %9743 = vset.pattern.permute.xlu1 %v15318_v2 }
 0x129   : > { %1373 = vperm.xlu1 %9743, %v247_v33   ;;  %v11333_v37 = vpop.permute.xlu0 %1493 }
 0x12a   : > { %15340 = vst [vmem:[#allocation42_spill] sm:$0xff] %v11333_v37  ;;  %v11335_v29 = vpop.permute.xlu1 %1173 }
 0x12b   : > { %564 = vperm.xlu0 %9801, %v225_v1  }
 0x12d   : > { %1377 = vperm.xlu1 %9743, %v248_v8   ;;  %v11338_v11 = vpop.permute.xlu0 %1509 }
 0x12e   : > { %15341 = vst [vmem:[#allocation43_spill] sm:$0xff] %v11338_v11  ;;  %v11340_v41 = vpop.permute.xlu1 %1181 }
 0x12f   : > { %574 = vperm.xlu0 %9801, %v227_v23   ;;  %v231_v23 = vld [vmem:[%s10926_s18 + $0x1c0] sm:$0xff] }
 0x131   : > { %9744 = vset.pattern.permute.xlu1 %v15315_v30  ;;  %v11344_v4 = vpop.permute.xlu0 %1525 }
 0x132   : > { %15342 = vst [vmem:[#allocation44_spill] sm:$0xff] %v11344_v4  ;;  %689 = vperm.xlu1 %9744, %v250_v35   ;;  %v11346_v33 = vpop.permute.xlu1 %1189 }
 0x133   : > { %15343 = vst [vmem:[#allocation45_spill] sm:$0xff] %v11346_v33  ;;  %584 = vperm.xlu0 %9801, %v229_v12  }
 0x135   : > { %v11348_v37 = vpop.permute.xlu0 %1541 }
 0x136   : > { %15344 = vst [vmem:[#allocation46_spill] sm:$0xff] %v11348_v37  ;;  %9745 = vset.pattern.permute.xlu1 %v15318_v2  ;;  %v11351_v1 = vpop.permute.xlu1 %1197 }
 0x137   : > { %15345 = vst [vmem:[#allocation47_spill] sm:$0xff] %v11351_v1  ;;  %1385 = vperm.xlu1 %9745, %v250_v35   ;;  %639 = vperm.xlu0 %9801, %v11235_v56   ;;  %v11368_v35 = vld [vmem:[%s15265_s1] ss:$0 sm:$0xff]  ;;  %v11373_v56 = vld [vmem:[%s15265_s1 + $0x1] ss:$0 sm:$0xff]  ;;  %v232_v1 = vld [vmem:[%s10926_s18 + $0x1c8] sm:$0xff] }
 0x138   : > { %v959_v4 = vmul.f32 %v11368_v35, %v11003_v42 }
 0x139   : > { %v11354_v11 = vpop.permute.xlu0 %1557 }
 0x13a   : > { %15346 = vst [vmem:[#allocation48_spill] sm:$0xff] %v11354_v11  ;;  %v11357_v19 = vpop.permute.xlu1 %1205  ;;  %v958_v11 = vmul.f32 %v11368_v35, %v10991_v38  ;;  %v1605_v38 = vmul.f32 %v11373_v56, %v11017_v47  ;;  %v234_v47 = vld [vmem:[%s10926_s18 + $0x1d8] sm:$0xff] }
 0x13b   : > { %15347 = vst [vmem:[#allocation49_spill] sm:$0xff] %v11357_v19  ;;  %9746 = vset.pattern.permute.xlu1 %v15315_v30  ;;  %644 = vperm.xlu0 %9801, %v10961_v28   ;;  %v1602_v28 = vmul.f32 %v11373_v56, %v11272_v53 }
 0x13c   : > { %594 = vperm.xlu1 %9746, %v231_v23  }
 0x13d   : > { %v11361_v12 = vpop.permute.xlu0 %1573 }
 0x13e   : > { %15348 = vst [vmem:[#allocation50_spill] sm:$0xff] %v11361_v12  ;;  %v11363_v37 = vpop.permute.xlu1 %1213  ;;  %v1600_v12 = vmul.f32 %v11373_v56, %v10993_v39  ;;  %v961_v39 = vmul.f32 %v11368_v35, %v11015_v46 }
 0x13f   : > { %15349 = vst [vmem:[#allocation51_spill] sm:$0xff] %v11363_v37  ;;  %659 = vperm.xlu0 %9801, %v11287_v57   ;;  %v1603_v37 = vmul.f32 %v11373_v56, %v11005_v43  ;;  %v11399_v43 = vld [vmem:[%s15265_s1 + $0x2] ss:$0 sm:$0xff] }
 0x140   : > { %9747 = vset.pattern.permute.xlu1 %v15318_v2 }
 0x141   : > { %1309 = vperm.xlu1 %9747, %v231_v23   ;;  %v1730_v23 = vadd.f32 %v1602_v28, %v958_v11  ;;  %v1733_v11 = vadd.f32 %v1605_v38, %v961_v39  ;;  %v1607_v28 = vmul.f32 %v11373_v56, %v11029_v51  ;;  %v965_v38 = vmul.f32 %v11368_v35, %v11039_v54 }
 0x142   : > { %v11387_v19 = vpop.permute.xlu1 %1221  ;;  %v315_v57 = vpop.permute.xlu0 %314 }
 0x143   : > { %15350 = vst [vmem:[#allocation52_spill] sm:$0xff] %v11387_v19  ;;  %v956_v53 = vmul.f32 %v11368_v35, %v315_v57  ;;  %664 = vperm.xlu0 %9801, %v10968_v32   ;;  %v1731_v19 = vadd.f32 %v1603_v37, %v959_v4  ;;  %v1601_v32 = vmul.f32 %v11373_v56, %v11266_v61 }
 0x144   : > { %v1862_v37 = vadd.f32 %v11399_v43, %v1730_v23  ;;  %v1865_v51 = vadd.f32 %v11399_v43, %v1733_v11  ;;  %v1611_v11 = vmul.f32 %v11373_v56, %v11053_v59  ;;  %v969_v59 = vmul.f32 %v11368_v35, %v11061_v62 }
 0x145   : > { %v1728_v42 = vadd.f32 %v1600_v12, %v956_v53  ;;  %1313 = vperm.xlu1 %9747, %v232_v1   ;;  %v963_v12 = vmul.f32 %v11368_v35, %v11027_v50  ;;  %v1863_v61 = vadd.f32 %v11399_v43, %v1731_v19 }
 0x146   : > { %v11401_v33 = vpop.permute.xlu1 %1229  ;;  %v320_v57 = vpop.permute.xlu0 %319 }
 0x147   : > { %v1860_v46 = vadd.f32 %v11399_v43, %v1728_v42  ;;  %v957_v15 = vmul.f32 %v11368_v35, %v320_v57  ;;  %679 = vperm.xlu0 %9801, %v248_v8   ;;  %v1604_v8 = vmul.f32 %v11373_v56, %v11278_v0  ;;  %v1609_v0 = vmul.f32 %v11373_v56, %v11041_v55 }
 0x148   : > { %v967_v55 = vmul.f32 %v11368_v35, %v11051_v58 }
 0x149   : > { %v1729_v4 = vadd.f32 %v1601_v32, %v957_v15  ;;  %9748 = vset.pattern.permute.xlu1 %v15315_v30  ;;  %9831 = vtanh.f32 %v1860_v46  ;;  %v1735_v15 = vadd.f32 %v1607_v28, %v963_v12  ;;  %v251_v28 = vld [vmem:[%s10926_s18 + $0x260] sm:$0xff] }
 0x14a   : > { %609 = vperm.xlu1 %9748, %v234_v47   ;;  %v11415_v53 = vpop.permute.xlu1 %1237  ;;  %v335_v42 = vpop.permute.xlu0 %334  ;;  %9833 = vtanh.f32 %v1862_v37  ;;  %v1739_v58 = vadd.f32 %v1611_v11, %v967_v55 }
 0x14b   : > { %v1861_v50 = vadd.f32 %v11399_v43, %v1729_v4  ;;  %v960_v39 = vmul.f32 %v11368_v35, %v335_v42  ;;  %684 = vperm.xlu0 %9801, %v10978_v34   ;;  %v1606_v34 = vmul.f32 %v11373_v56, %v11284_v45  ;;  %v1867_v54 = vadd.f32 %v11399_v43, %v1735_v15 }
 0x14c   : > { %v1737_v45 = vadd.f32 %v1609_v0, %v965_v38  ;;  %v1613_v42 = vmul.f32 %v11373_v56, %v11063_v63  ;;  %v1871_v63 = vadd.f32 %v11399_v43, %v1739_v58  ;;  %v971_v0 = vmul.f32 %v11368_v35, %v11070_v5 }
 0x14d   : > { %9835 = vtanh.f32 %v1861_v50  ;;  %v1732_v19 = vadd.f32 %v1604_v8, %v960_v39  ;;  %v252_v8 = vld [vmem:[%s10926_s18 + $0x268] sm:$0xff]  ;;  %v1612_v5 = vmul.f32 %v11373_v56, %v11306_v24  ;;  %v973_v58 = vmul.f32 %v11368_v35, %v11079_v9 }
 0x14e   : > { %9837 = vtanh.f32 %v1863_v61  ;;  %9749 = vset.pattern.permute.xlu1 %v15318_v2  ;;  %v11428_v23 = vpop.permute.xlu1 %1245  ;;  %v345_v57 = vpop.permute.xlu0 %344  ;;  %v1869_v50 = vadd.f32 %v11399_v43, %v1737_v45  ;;  %v1741_v38 = vadd.f32 %v1613_v42, %v969_v59  ;;  %v975_v59 = vmul.f32 %v11368_v35, %v11088_v13 }
 0x14f   : > { %v1864_v32 = vadd.f32 %v11399_v43, %v1732_v19  ;;  %v962_v46 = vmul.f32 %v11368_v35, %v345_v57  ;;  %1321 = vperm.xlu1 %9749, %v234_v47   ;;  %599 = vperm.xlu0 %9801, %v232_v1   ;;  %9839 = vtanh.f32 %v1865_v51  ;;  %v1608_v1 = vmul.f32 %v11373_v56, %v11293_v16 }
 0x150   : > { %v1615_v57 = vmul.f32 %v11373_v56, %v11072_v6  ;;  %v1619_v42 = vmul.f32 %v11373_v56, %v11090_v14 }
 0x151   : > { %9841 = vtanh.f32 %v1864_v32  ;;  %v1734_v12 = vadd.f32 %v1606_v34, %v962_v46 }
 0x152   : > { %v11440_v37 = vpop.permute.xlu1 %1253  ;;  %v355_v4 = vpop.permute.xlu0 %354  ;;  %9843 = vtanh.f32 %v1867_v54  ;;  %v1743_v45 = vadd.f32 %v1615_v57, %v971_v0 }
 0x153   : > { %v1866_v47 = vadd.f32 %v11399_v43, %v1734_v12  ;;  %v964_v61 = vmul.f32 %v11368_v35, %v355_v4  ;;  %9750 = vset.pattern.permute.xlu1 %v15315_v30  ;;  %604 = vperm.xlu0 %9801, %v10986_v36   ;;  %v1610_v36 = vmul.f32 %v11373_v56, %v11300_v20 }
 0x154   : > { %694 = vperm.xlu1 %9750, %v251_v28   ;;  %v1875_v13 = vadd.f32 %v11399_v43, %v1743_v45 }
 0x155   : > { %9845 = vtanh.f32 %v1866_v47  ;;  %v1736_v16 = vadd.f32 %v1608_v1, %v964_v61  ;;  %v11475_v1 = vld [vmem:[%s10926_s18 + $0x1e8] sm:$0xff] }
 0x156   : > { %v11454_v39 = vpop.permute.xlu1 %1261  ;;  %v365_v51 = vpop.permute.xlu0 %364 }
 0x157   : > { %v1868_v15 = vadd.f32 %v11399_v43, %v1736_v16  ;;  %v966_v19 = vmul.f32 %v11368_v35, %v365_v51  ;;  %699 = vperm.xlu0 %9801, %v252_v8   ;;  %v9832_v62 = vpop.eup %9831 }
 0x158   : > { %9751 = vset.pattern.permute.xlu1 %v15318_v2  ;;  %v9834_v34 = vpop.eup %9833 }
 0x159   : > { %9847 = vtanh.f32 %v1868_v15  ;;  %v1738_v20 = vadd.f32 %v1610_v36, %v966_v19  ;;  %1389 = vperm.xlu1 %9751, %v251_v28   ;;  %v1873_v28 = vadd.f32 %v11399_v43, %v1741_v38  ;;  %v254_v36 = vld [vmem:[%s10926_s18 + $0x278] sm:$0xff]  ;;  %v1616_v38 = vmul.f32 %v11373_v56, %v11318_v7 }
 0x15a   : > { %v9836_v32 = vpop.eup %9835  ;;  %9849 = vtanh.f32 %v1869_v50  ;;  %v11466_v46 = vpop.permute.xlu1 %1269 }
 0x15b   : > { %v375_v54 = vpop.permute.xlu0 %374  ;;  %v9838_v55 = vpop.eup %9837  ;;  %v1870_v11 = vadd.f32 %v11399_v43, %v1738_v20  ;;  %704 = vperm.xlu0 %9801, %v10998_v40   ;;  %v2129_v12 = vpack.c.bf16 %v9836_v32, %v9832_v62  ;;  %9851 = vtanh.f32 %v1871_v63  ;;  %v1617_v40 = vmul.f32 %v11373_v56, %v11081_v10 }
 0x15c   : > { %v968_v6 = vmul.f32 %v11368_v35, %v375_v54  ;;  %v2130_v4 = vpack.c.bf16 %v9838_v55, %v9834_v34  ;;  %v9840_v47 = vpop.eup %9839  ;;  %v1747_v62 = vadd.f32 %v1619_v42, %v975_v59  ;;  %v977_v20 = vmul.f32 %v11368_v35, %v11097_v17  ;;  %v11510_v55 = vld [vmem:[%s10926_s18 + $0x288] sm:$0xff] }
 0x15d   : > { %9853 = vtanh.f32 %v1870_v11  ;;  %1393 = vperm.xlu1 %9751, %v252_v8   ;;  %9028 = vmatprep.mubr.msk.bf16.mxu0 %vm2236_vm1, %v2129_v12  ;;  %v1614_v8 = vmul.f32 %v11373_v56, %v11312_v27  ;;  %v1745_v19 = vadd.f32 %v1617_v40, %v973_v58  ;;  %v1621_v32 = vmul.f32 %v11373_v56, %v11099_v18  ;;  %v235_v40 = vld [vmem:[%s10926_s18 + $0x1e0] sm:$0xff] }
 0x15e   : > { %v1740_v61 = vadd.f32 %v1612_v5, %v968_v6  ;;  %v9842_v24 = vpop.eup %9841  ;;  %9029 = vmatmul.mubr.msk.bf16.vlgmr.msra.gmra.mxu0 %vm2236_vm1, %v2130_v4  ;;  %9855 = vtanh.f32 %v1873_v28  ;;  %v1879_v6 = vadd.f32 %v11399_v43, %v1747_v62  ;;  %v1618_v18 = vmul.f32 %v11373_v56, %v11324_v49 }
 0x15f   : > { %v385_v16 = vpop.permute.xlu0 %384  ;;  %v11491_v9 = vpop.permute.xlu1 %634  ;;  %619 = vperm.xlu0 %9801, %v11475_v1   ;;  %v2131_v10 = vpack.c.bf16 %v9840_v47, %v9842_v24  ;;  %v1877_v11 = vadd.f32 %v11399_v43, %v1745_v19  ;;  %v1749_v45 = vadd.f32 %v1621_v32, %v977_v20  ;;  %v979_v4 = vmul.f32 %v11368_v35, %v11106_v21 }
 0x160   : > { %v1872_v50 = vadd.f32 %v11399_v43, %v1740_v61  ;;  %v970_v51 = vmul.f32 %v11368_v35, %v385_v16  ;;  %v9844_v14 = vpop.eup %9843  ;;  %v1623_v47 = vmul.f32 %v11373_v56, %v11108_v22  ;;  %v1620_v42 = vmul.f32 %v11373_v56, %v11330_v3 }
 0x161   : > { %9752 = vset.pattern.permute.xlu1 %v15315_v30  ;;  %9032 = vmatprep.mubr.msk.bf16.mxu0 %vm2236_vm1, %v2131_v10  ;;  %v11537_v10 = vld [vmem:[%s10926_s18 + $0x2a8] sm:$0xff]  ;;  %v1627_v19 = vmul.f32 %v11373_v56, %v11129_v60 }
 0x162   : > { %9857 = vtanh.f32 %v1872_v50  ;;  %v1742_v15 = vadd.f32 %v1614_v8, %v970_v51  ;;  %v9846_v27 = vpop.eup %9845  ;;  %709 = vperm.xlu1 %9752, %v254_v36   ;;  %v1881_v50 = vadd.f32 %v11399_v43, %v1749_v45  ;;  %v1751_v51 = vadd.f32 %v1623_v47, %v979_v4 }
 0x163   : > { %v395_v63 = vpop.permute.xlu0 %394  ;;  %624 = vperm.xlu0 %9801, %v11010_v44   ;;  %v2132_v34 = vpack.c.bf16 %v9844_v14, %v9846_v27  ;;  %9859 = vtanh.f32 %v1875_v13  ;;  %v1625_v13 = vmul.f32 %v11373_v56, %v11117_v26  ;;  %v983_v27 = vmul.f32 %v11368_v35, %v11127_v31 }
 0x164   : > { %v1874_v0 = vadd.f32 %v11399_v43, %v1742_v15  ;;  %v972_v57 = vmul.f32 %v11368_v35, %v395_v63  ;;  %v11507_v54 = vpop.permute.xlu1 %1341 }
 0x166   : > { %9861 = vtanh.f32 %v1874_v0  ;;  %v1744_v7 = vadd.f32 %v1616_v38, %v972_v57  ;;  %v9848_v5 = vpop.eup %9847  ;;  %9753 = vset.pattern.permute.xlu1 %v15318_v2  ;;  %9033 = vmatmul.mubr.msk.bf16.gmra.mxu0 %vm2236_vm1, %v2132_v34  ;;  %v1883_v0 = vadd.f32 %v11399_v43, %v1751_v51  ;;  %v1755_v34 = vadd.f32 %v1627_v19, %v983_v27  ;;  %v15356_v27 = vld [vmem:[#allocation47_spill] sm:$0xff] }
 0x167   : > { %v405_v44 = vpop.permute.xlu0 %404  ;;  %v9850_v17 = vpop.eup %9849  ;;  %1401 = vperm.xlu1 %9753, %v254_v36   ;;  %719 = vperm.xlu0 %9801, %v11510_v55   ;;  %v981_v36 = vmul.f32 %v11368_v35, %v11115_v25  ;;  %v1622_v25 = vmul.f32 %v11373_v56, %v11335_v29  ;;  %v1628_v19 = vmul.f32 %v11373_v56, %v15356_v27  ;;  %v15365_v27 = vld [vmem:[#allocation12_spill] sm:$0xff] }
 0x168   : > { %v1876_v12 = vadd.f32 %v11399_v43, %v1744_v7  ;;  %v974_v28 = vmul.f32 %v11368_v35, %v405_v44  ;;  %v11525_v61 = vpop.permute.xlu1 %1345  ;;  %v2133_v24 = vpack.c.bf16 %v9850_v17, %v9848_v5  ;;  %v9852_v58 = vpop.eup %9851  ;;  %v1624_v7 = vmul.f32 %v11373_v56, %v11340_v41  ;;  %v15351_v44 = vld [vmem:[#allocation3_spill] sm:$0xff] }
 0x169   : > { %v1753_v60 = vadd.f32 %v1625_v13, %v981_v36  ;;  %v985_v17 = vmul.f32 %v11368_v35, %v15351_v44  ;;  %v15361_v44 = vld [vmem:[#allocation10_spill] sm:$0xff] }
 0x16a   : > { %9863 = vtanh.f32 %v1876_v12  ;;  %v1746_v49 = vadd.f32 %v1618_v18, %v974_v28  ;;  %v9854_v59 = vpop.eup %9853  ;;  %9036 = vmatprep.mubr.msk.bf16.mxu0 %vm2236_vm1, %v2133_v24  ;;  %v15352_v18 = vld [vmem:[#allocation4_spill] sm:$0xff]  ;;  %v11570_v28 = vld [vmem:[%s10926_s18 + $0x2c8] sm:$0xff] }
 0x16b   : > { %9865 = vtanh.f32 %v1877_v11  ;;  %v415_v16 = vpop.permute.xlu0 %414  ;;  %9754 = vset.pattern.permute.xlu1 %v15315_v30  ;;  %724 = vperm.xlu0 %9801, %v11022_v48   ;;  %v2134_v8 = vpack.c.bf16 %v9852_v58, %v9854_v59  ;;  %v9856_v3 = vpop.eup %9855  ;;  %v1629_v12 = vmul.f32 %v11373_v56, %v15352_v18  ;;  %v1885_v45 = vadd.f32 %v11399_v43, %v1753_v60  ;;  %v15362_v18 = vld [vmem:[#allocation49_spill] sm:$0xff] }
 0x16c   : > { %v1878_v21 = vadd.f32 %v11399_v43, %v1746_v49  ;;  %v976_v22 = vmul.f32 %v11368_v35, %v415_v16  ;;  %9867 = vtanh.f32 %v1879_v6  ;;  %614 = vperm.xlu1 %9754, %v235_v40   ;;  %v1887_v58 = vadd.f32 %v11399_v43, %v1755_v34  ;;  %v15353_v49 = vld [vmem:[#allocation45_spill] sm:$0xff]  ;;  %v15359_v34 = vld [vmem:[#allocation8_spill] sm:$0xff] }
 0x16d   : > { %v11543_v15 = vpop.permute.xlu1 %649  ;;  %v238_v16 = vld [vmem:[%s10926_s18 + $0x1f8] sm:$0xff] }
 0x16e   : > { %9869 = vtanh.f32 %v1878_v21  ;;  %v1748_v14 = vadd.f32 %v1620_v42, %v976_v22  ;;  %9037 = vmatmul.mubr.msk.bf16.gmra.mxu0 %vm2236_vm1, %v2134_v8  ;;  %v15354_v21 = vld [vmem:[#allocation5_spill] sm:$0xff]  ;;  %v15355_v8 = vld [vmem:[#allocation6_spill] sm:$0xff] }
 0x16f   : > { %v9858_v48 = vpop.eup %9857  ;;  %v425_v62 = vpop.permute.xlu0 %424  ;;  %739 = vperm.xlu0 %9801, %v11537_v10   ;;  %9871 = vtanh.f32 %v1881_v50  ;;  %v987_v22 = vmul.f32 %v11368_v35, %v15354_v21  ;;  %v1631_v50 = vmul.f32 %v11373_v56, %v15355_v8 }
 0x170   : > { %v1880_v63 = vadd.f32 %v11399_v43, %v1748_v14  ;;  %v978_v26 = vmul.f32 %v11368_v35, %v425_v62  ;;  %v2135_v38 = vpack.c.bf16 %v9856_v3, %v9858_v48  ;;  %9755 = vset.pattern.permute.xlu1 %v15318_v2  ;;  %v9860_v31 = vpop.eup %9859 }
 0x171   : > { %1325 = vperm.xlu1 %9755, %v235_v40   ;;  %v1626_v40 = vmul.f32 %v11373_v56, %v15353_v49 }
 0x172   : > { %9873 = vtanh.f32 %v1880_v63  ;;  %v1750_v57 = vadd.f32 %v1622_v25, %v978_v26  ;;  %9040 = vmatprep.mubr.msk.bf16.mxu0 %vm2236_vm1, %v2135_v38  ;;  %v11558_v20 = vpop.permute.xlu1 %1353  ;;  %v15357_v63 = vld [vmem:[#allocation2_spill] sm:$0xff] }
 0x173   : > { %v9862_v29 = vpop.eup %9861  ;;  %v435_v32 = vpop.permute.xlu0 %434  ;;  %744 = vperm.xlu0 %9801, %v11034_v52   ;;  %9875 = vtanh.f32 %v1883_v0  ;;  %v1759_v0 = vadd.f32 %v1631_v50, %v987_v22 }
 0x174   : > { %v1882_v5 = vadd.f32 %v11399_v43, %v1750_v57  ;;  %v980_v11 = vmul.f32 %v11368_v35, %v435_v32  ;;  %v2136_v6 = vpack.c.bf16 %v9860_v31, %v9862_v29  ;;  %v11599_v31 = vld [vmem:[%s10926_s18 + $0x2e8] sm:$0xff]  ;;  %v1633_v32 = vmul.f32 %v11373_v56, %v15359_v34 }
 0x175   : > { %1329 = vperm.xlu1 %9755, %v11475_v1   ;;  %v1757_v1 = vadd.f32 %v1629_v12, %v985_v17  ;;  %v15358_v57 = vld [vmem:[#allocation7_spill] sm:$0xff]  ;;  %v1635_v17 = vmul.f32 %v11373_v56, %v15361_v44  ;;  %v1630_v12 = vmul.f32 %v11373_v56, %v15362_v18  ;;  %v15368_v44 = vld [vmem:[#allocation14_spill] sm:$0xff] }
 0x176   : > { %9877 = vtanh.f32 %v1882_v5  ;;  %v1752_v41 = vadd.f32 %v1624_v7, %v980_v11  ;;  %v11574_v47 = vpop.permute.xlu1 %1277  ;;  %9041 = vmatmul.mubr.msk.bf16.gmra.mxu0 %vm2236_vm1, %v2136_v6  ;;  %v989_v29 = vmul.f32 %v11368_v35, %v15358_v57  ;;  %v15360_v11 = vld [vmem:[#allocation9_spill] sm:$0xff] }
 0x177   : > { %v9864_v4 = vpop.eup %9863  ;;  %v445_v52 = vpop.permute.xlu0 %444  ;;  %759 = vperm.xlu0 %9801, %v11570_v28   ;;  %9879 = vtanh.f32 %v1885_v45  ;;  %v1889_v38 = vadd.f32 %v11399_v43, %v1757_v1  ;;  %v991_v6 = vmul.f32 %v11368_v35, %v15360_v11  ;;  %v15367_v11 = vld [vmem:[#allocation13_spill] sm:$0xff] }
 0x178   : > { %v9866_v24 = vpop.eup %9865  ;;  %v1884_v59 = vadd.f32 %v11399_v43, %v1752_v41  ;;  %v982_v42 = vmul.f32 %v11368_v35, %v445_v52  ;;  %v1761_v1 = vadd.f32 %v1633_v32, %v989_v29  ;;  %v15366_v29 = vld [vmem:[#allocation52_spill] sm:$0xff] }
 0x179   : > { %v2137_v51 = vpack.c.bf16 %v9866_v24, %v9864_v4  ;;  %v9868_v3 = vpop.eup %9867  ;;  %9756 = vset.pattern.permute.xlu1 %v15315_v30  ;;  %v1763_v21 = vadd.f32 %v1635_v17, %v991_v6  ;;  %v1634_v34 = vmul.f32 %v11373_v56, %v15366_v29  ;;  %v995_v6 = vmul.f32 %v11368_v35, %v15367_v11 }
 0x17a   : > { %v1754_v36 = vadd.f32 %v1626_v40, %v982_v42  ;;  %9881 = vtanh.f32 %v1884_v59  ;;  %629 = vperm.xlu1 %9756, %v238_v16   ;;  %v11590_v14 = vpop.permute.xlu1 %1285  ;;  %v255_v59 = vld [vmem:[%s10926_s18 + $0x280] sm:$0xff]  ;;  %v1639_v17 = vmul.f32 %v11373_v56, %v15368_v44  ;;  %v1640_v44 = vmul.f32 %v11373_v56, %v11428_v23 }
 0x17b   : > { %v9870_v13 = vpop.eup %9869  ;;  %9044 = vmatprep.mubr.msk.bf16.mxu0 %vm2236_vm1, %v2137_v51  ;;  %v455_v48 = vpop.permute.xlu0 %454  ;;  %764 = vperm.xlu0 %9801, %v15357_v63   ;;  %9883 = vtanh.f32 %v1887_v58  ;;  %v1891_v58 = vadd.f32 %v11399_v43, %v1759_v0  ;;  %v1895_v57 = vadd.f32 %v11399_v43, %v1763_v21 }
 0x17c   : > { %v1886_v62 = vadd.f32 %v11399_v43, %v1754_v36  ;;  %v984_v25 = vmul.f32 %v11368_v35, %v455_v48  ;;  %v2138_v26 = vpack.c.bf16 %v9868_v3, %v9870_v13  ;;  %v9872_v60 = vpop.eup %9871  ;;  %v10855_v3 = vld [vmem:[%s10926_s18 + $0x2f0] sm:$0xff]  ;;  %v15364_v13 = vld [vmem:[#allocation11_spill] sm:$0xff] }
 0x17d   : > { %v993_v48 = vmul.f32 %v11368_v35, %v15364_v13 }
 0x17e   : > { %9885 = vtanh.f32 %v1886_v62  ;;  %v1756_v7 = vadd.f32 %v1628_v19, %v984_v25  ;;  %9757 = vset.pattern.permute.xlu1 %v15318_v2  ;;  %9045 = vmatmul.mubr.msk.bf16.gmra.mxu0 %vm2236_vm1, %v2138_v26  ;;  %v1637_v19 = vmul.f32 %v11373_v56, %v15365_v27  ;;  %v11634_v25 = vld [vmem:[%s10926_s18 + $0x308] sm:$0xff] }
 0x17f   : > { %v9874_v5 = vpop.eup %9873  ;;  %v465_v45 = vpop.permute.xlu0 %464  ;;  %1337 = vperm.xlu1 %9757, %v238_v16   ;;  %779 = vperm.xlu0 %9801, %v11599_v31   ;;  %9887 = vtanh.f32 %v1889_v38  ;;  %v15363_v16 = vld [vmem:[#allocation51_spill] sm:$0xff]  ;;  %v1893_v38 = vadd.f32 %v11399_v43, %v1761_v1 }
 0x180   : > { %v1888_v41 = vadd.f32 %v11399_v43, %v1756_v7  ;;  %v986_v4 = vmul.f32 %v11368_v35, %v465_v45  ;;  %v11615_v52 = vpop.permute.xlu1 %654  ;;  %v2139_v24 = vpack.c.bf16 %v9872_v60, %v9874_v5  ;;  %v9876_v49 = vpop.eup %9875  ;;  %v1632_v22 = vmul.f32 %v11373_v56, %v15363_v16 }
 0x181   : > { %v1765_v5 = vadd.f32 %v1637_v19, %v993_v48  ;;  %v1767_v16 = vadd.f32 %v1639_v17, %v995_v6  ;;  %v15371_v48 = vld [vmem:[#allocation17_spill] sm:$0xff]  ;;  %v15372_v19 = vld [vmem:[#allocation18_spill] sm:$0xff] }
 0x182   : > { %9889 = vtanh.f32 %v1888_v41  ;;  %v1758_v40 = vadd.f32 %v1630_v12, %v986_v4  ;;  %9048 = vmatprep.mubr.msk.bf16.mxu0 %vm2236_vm1, %v2139_v24  ;;  %v999_v27 = vmul.f32 %v11368_v35, %v15371_v48 }
 0x183   : > { %v9878_v42 = vpop.eup %9877  ;;  %v475_v8 = vpop.permute.xlu0 %474  ;;  %9758 = vset.pattern.permute.xlu1 %v15315_v30  ;;  %784 = vperm.xlu0 %9801, %v10855_v3   ;;  %9891 = vtanh.f32 %v1891_v58  ;;  %v1636_v58 = vmul.f32 %v11373_v56, %v11401_v33  ;;  %v1897_v21 = vadd.f32 %v11399_v43, %v1765_v5  ;;  %v1899_v29 = vadd.f32 %v11399_v43, %v1767_v16 }
 0x184   : > { %v1890_v50 = vadd.f32 %v11399_v43, %v1758_v40  ;;  %v988_v51 = vmul.f32 %v11368_v35, %v475_v8  ;;  %v2140_v36 = vpack.c.bf16 %v9876_v49, %v9878_v42  ;;  %714 = vperm.xlu1 %9758, %v255_v59   ;;  %v11631_v62 = vpop.permute.xlu1 %1357  ;;  %v9880_v26 = vpop.eup %9879  ;;  %v10856_v42 = vld [vmem:[%s10926_s18 + $0x310] sm:$0xff]  ;;  %v15369_v8 = vld [vmem:[#allocation15_spill] sm:$0xff] }
 0x186   : > { %9893 = vtanh.f32 %v1890_v50  ;;  %v1760_v63 = vadd.f32 %v1632_v22, %v988_v51  ;;  %9049 = vmatmul.mubr.msk.bf16.gmra.mxu0 %vm2236_vm1, %v2140_v36  ;;  %v997_v50 = vmul.f32 %v11368_v35, %v15369_v8  ;;  %v15370_v51 = vld [vmem:[#allocation16_spill] sm:$0xff] }
 0x187   : > { %v485_v0 = vpop.permute.xlu0 %484  ;;  %v9882_v60 = vpop.eup %9881  ;;  %799 = vperm.xlu0 %9801, %v11634_v25   ;;  %v1641_v33 = vmul.f32 %v11373_v56, %v15370_v51 }
 0x188   : > { %v1892_v32 = vadd.f32 %v11399_v43, %v1760_v63  ;;  %v990_v7 = vmul.f32 %v11368_v35, %v485_v0  ;;  %9759 = vset.pattern.permute.xlu1 %v15318_v2  ;;  %v11649_v18 = vpop.permute.xlu1 %1361  ;;  %v2141_v12 = vpack.c.bf16 %v9880_v26, %v9882_v60  ;;  %v9884_v45 = vpop.eup %9883  ;;  %v1643_v63 = vmul.f32 %v11373_v56, %v15372_v19 }
 0x189   : > { %1405 = vperm.xlu1 %9759, %v255_v59   ;;  %v11659_v59 = vld [vmem:[%s10926_s18 + $0x328] sm:$0xff] }
 0x18a   : > { %9895 = vtanh.f32 %v1892_v32  ;;  %v1762_v41 = vadd.f32 %v1634_v34, %v990_v7  ;;  %9052 = vmatprep.mubr.msk.bf16.mxu0 %vm2236_vm1, %v2141_v12  ;;  %v1769_v32 = vadd.f32 %v1641_v33, %v997_v50  ;;  %v1771_v5 = vadd.f32 %v1643_v63, %v999_v27  ;;  %v15376_v27 = vld [vmem:[#allocation22_spill] sm:$0xff] }
 0x18b   : > { %v9886_v4 = vpop.eup %9885  ;;  %9897 = vtanh.f32 %v1893_v38  ;;  %v495_v24 = vpop.permute.xlu0 %494  ;;  %804 = vperm.xlu0 %9801, %v10856_v42   ;;  %v1638_v38 = vmul.f32 %v11373_v56, %v11415_v53  ;;  %v1642_v50 = vmul.f32 %v11373_v56, %v11440_v37  ;;  %v1647_v19 = vmul.f32 %v11373_v56, %v15376_v27 }
 0x18c   : > { %v1894_v49 = vadd.f32 %v11399_v43, %v1762_v41  ;;  %v992_v40 = vmul.f32 %v11368_v35, %v495_v24  ;;  %v2142_v1 = vpack.c.bf16 %v9884_v45, %v9886_v4  ;;  %9899 = vtanh.f32 %v1895_v57  ;;  %v9888_v22 = vpop.eup %9887  ;;  %v258_v57 = vld [vmem:[%s10926_s18 + $0x298] sm:$0xff]  ;;  %v10857_v45 = vld [vmem:[%s10926_s18 + $0x330] sm:$0xff]  ;;  %v15373_v4 = vld [vmem:[#allocation19_spill] sm:$0xff] }
 0x18d   : > { %1409 = vperm.xlu1 %9759, %v11510_v55   ;;  %v11666_v36 = vpop.permute.xlu1 %669  ;;  %v1001_v24 = vmul.f32 %v11368_v35, %v15373_v4  ;;  %v1903_v8 = vadd.f32 %v11399_v43, %v1771_v5 }
 0x18e   : > { %9901 = vtanh.f32 %v1894_v49  ;;  %v1764_v3 = vadd.f32 %v1636_v58, %v992_v40  ;;  %9053 = vmatmul.mubr.msk.bf16.gmra.mxu0 %vm2236_vm1, %v2142_v1  ;;  %v15374_v58 = vld [vmem:[#allocation20_spill] sm:$0xff]  ;;  %v1901_v40 = vadd.f32 %v11399_v43, %v1769_v32  ;;  %v11695_v1 = vld [vmem:[%s10926_s18 + $0x348] sm:$0xff] }
 0x18f   : > { %v9890_v13 = vpop.eup %9889  ;;  %v505_v26 = vpop.permute.xlu0 %504  ;;  %819 = vperm.xlu0 %9801, %v11659_v59   ;;  %9903 = vtanh.f32 %v1897_v21  ;;  %v1645_v49 = vmul.f32 %v11373_v56, %v15374_v58 }
 0x190   : > { %v1896_v0 = vadd.f32 %v11399_v43, %v1764_v3  ;;  %v994_v60 = vmul.f32 %v11368_v35, %v505_v26  ;;  %v2143_v55 = vpack.c.bf16 %v9888_v22, %v9890_v13  ;;  %v9892_v34 = vpop.eup %9891  ;;  %v15375_v13 = vld [vmem:[#allocation21_spill] sm:$0xff] }
 0x191   : > { %9760 = vset.pattern.permute.xlu1 %v15315_v30  ;;  %v1773_v3 = vadd.f32 %v1645_v49, %v1001_v24  ;;  %v1003_v48 = vmul.f32 %v11368_v35, %v15375_v13  ;;  %v1646_v49 = vmul.f32 %v11373_v56, %v11466_v46 }
 0x192   : > { %9905 = vtanh.f32 %v1896_v0  ;;  %v1766_v7 = vadd.f32 %v1638_v38, %v994_v60  ;;  %9056 = vmatprep.mubr.msk.bf16.mxu0 %vm2236_vm1, %v2143_v55  ;;  %729 = vperm.xlu1 %9760, %v258_v57   ;;  %v11682_v11 = vpop.permute.xlu1 %1369  ;;  %v259_v0 = vld [vmem:[%s10926_s18 + $0x2a0] sm:$0xff] }
 0x193   : > { %v9894_v53 = vpop.eup %9893  ;;  %v515_v6 = vpop.permute.xlu0 %514  ;;  %824 = vperm.xlu0 %9801, %v10857_v45   ;;  %9907 = vtanh.f32 %v1899_v29  ;;  %v15377_v60 = vld [vmem:[#allocation26_spill] sm:$0xff]  ;;  %v1905_v5 = vadd.f32 %v11399_v43, %v1773_v3  ;;  %v15380_v3 = vld [vmem:[#allocation25_spill] sm:$0xff] }
 0x194   : > { %v1898_v17 = vadd.f32 %v11399_v43, %v1766_v7  ;;  %v996_v12 = vmul.f32 %v11368_v35, %v515_v6  ;;  %v2144_v41 = vpack.c.bf16 %v9892_v34, %v9894_v53  ;;  %v1649_v55 = vmul.f32 %v11373_v56, %v15377_v60 }
 0x195   : > { %v1644_v34 = vmul.f32 %v11373_v56, %v11454_v39  ;;  %v1775_v6 = vadd.f32 %v1647_v19, %v1003_v48  ;;  %v1007_v13 = vmul.f32 %v11368_v35, %v15380_v3  ;;  %v1648_v19 = vmul.f32 %v11373_v56, %v11574_v47  ;;  %v11756_v47 = vld [vmem:[%s10926_s18 + $0x388] sm:$0xff] }
 0x196   : > { %9909 = vtanh.f32 %v1898_v17  ;;  %v1768_v42 = vadd.f32 %v1640_v44, %v996_v12  ;;  %9761 = vset.pattern.permute.xlu1 %v15318_v2  ;;  %v11698_v21 = vpop.permute.xlu1 %1293  ;;  %9057 = vmatmul.mubr.msk.bf16.gmra.mxu0 %vm2236_vm1, %v2144_v41  ;;  %v15378_v44 = vld [vmem:[#allocation23_spill] sm:$0xff]  ;;  %v10858_v12 = vld [vmem:[%s10926_s18 + $0x350] sm:$0xff] }
 0x197   : > { %v9896_v23 = vpop.eup %9895  ;;  %v525_v16 = vpop.permute.xlu0 %524  ;;  %1417 = vperm.xlu1 %9761, %v258_v57   ;;  %839 = vperm.xlu0 %9801, %v11695_v1   ;;  %9911 = vtanh.f32 %v1901_v40  ;;  %v1005_v17 = vmul.f32 %v11368_v35, %v15378_v44  ;;  %v11727_v41 = vld [vmem:[%s10926_s18 + $0x368] sm:$0xff]  ;;  %v1650_v44 = vmul.f32 %v11373_v56, %v11590_v14 }
 0x198   : > { %v9898_v22 = vpop.eup %9897  ;;  %v1900_v51 = vadd.f32 %v11399_v43, %v1768_v42  ;;  %v998_v33 = vmul.f32 %v11368_v35, %v525_v16 }
 0x199   : > { %v2145_v63 = vpack.c.bf16 %v9898_v22, %v9896_v23  ;;  %v9900_v26 = vpop.eup %9899  ;;  %v1777_v24 = vadd.f32 %v1649_v55, %v1005_v17  ;;  %v1907_v22 = vadd.f32 %v11399_v43, %v1775_v6  ;;  %v10859_v55 = vld [vmem:[%s10926_s18 + $0x370] sm:$0xff] }
 0x19a   : > { %v1770_v38 = vadd.f32 %v1642_v50, %v998_v33  ;;  %9913 = vtanh.f32 %v1900_v51  ;;  %v11715_v57 = vpop.permute.xlu1 %1301 }
 0x19b   : > { %v9902_v37 = vpop.eup %9901  ;;  %9060 = vmatprep.mubr.msk.bf16.mxu0 %vm2236_vm1, %v2145_v63  ;;  %v535_v29 = vpop.permute.xlu0 %534  ;;  %9762 = vset.pattern.permute.xlu1 %v15315_v30  ;;  %9915 = vtanh.f32 %v1903_v8  ;;  %v15379_v8 = vld [vmem:[#allocation28_spill] sm:$0xff]  ;;  %v1909_v48 = vadd.f32 %v11399_v43, %v1777_v24 }
 0x19c   : > { %v1902_v32 = vadd.f32 %v11399_v43, %v1770_v38  ;;  %v1000_v7 = vmul.f32 %v11368_v35, %v535_v29  ;;  %v2146_v53 = vpack.c.bf16 %v9900_v26, %v9902_v37  ;;  %844 = vperm.xlu0 %9801, %v10858_v12   ;;  %734 = vperm.xlu1 %9762, %v259_v0   ;;  %v9904_v45 = vpop.eup %9903  ;;  %v15381_v37 = vld [vmem:[#allocation31_spill] sm:$0xff] }
 0x19d   : > { %v1651_v50 = vmul.f32 %v11373_v56, %v15379_v8  ;;  %v1653_v60 = vmul.f32 %v11373_v56, %v15381_v37 }
 0x19e   : > { %9917 = vtanh.f32 %v1902_v32  ;;  %v1772_v39 = vadd.f32 %v1644_v34, %v1000_v7  ;;  %9061 = vmatmul.mubr.msk.bf16.gmra.mxu0 %vm2236_vm1, %v2146_v53  ;;  %v15382_v7 = vld [vmem:[#allocation27_spill] sm:$0xff] }
 0x19f   : > { %v9906_v4 = vpop.eup %9905  ;;  %v545_v58 = vpop.permute.xlu0 %544  ;;  %9919 = vtanh.f32 %v1905_v5  ;;  %v1009_v53 = vmul.f32 %v11368_v35, %v15382_v7 }
 0x1a0   : > { %v1904_v40 = vadd.f32 %v11399_v43, %v1772_v39  ;;  %v1002_v42 = vmul.f32 %v11368_v35, %v545_v58  ;;  %v11734_v23 = vpop.permute.xlu1 %674  ;;  %v2147_v16 = vpack.c.bf16 %v9904_v45, %v9906_v4  ;;  %859 = vperm.xlu0 %9801, %v11727_v41   ;;  %9763 = vset.pattern.permute.xlu1 %v15318_v2  ;;  %v9908_v51 = vpop.eup %9907  ;;  %v262_v45 = vld [vmem:[%s10926_s18 + $0x2b8] sm:$0xff]  ;;  %v15383_v4 = vld [vmem:[#allocation32_spill] sm:$0xff] }
 0x1a1   : > { %1421 = vperm.xlu1 %9763, %v259_v0   ;;  %v1779_v0 = vadd.f32 %v1651_v50, %v1007_v13  ;;  %v1781_v39 = vadd.f32 %v1653_v60, %v1009_v53  ;;  %v1655_v24 = vmul.f32 %v11373_v56, %v15383_v4  ;;  %v1652_v50 = vmul.f32 %v11373_v56, %v11698_v21  ;;  %v11787_v21 = vld [vmem:[%s10926_s18 + $0x3a8] sm:$0xff] }
 0x1a2   : > { %9921 = vtanh.f32 %v1904_v40  ;;  %v1774_v46 = vadd.f32 %v1646_v49, %v1002_v42  ;;  %9064 = vmatprep.mubr.msk.bf16.mxu0 %vm2236_vm1, %v2147_v16  ;;  %v15384_v16 = vld [vmem:[#allocation29_spill] sm:$0xff]  ;;  %v1654_v60 = vmul.f32 %v11373_v56, %v11715_v57 }
 0x1a3   : > { %v9910_v33 = vpop.eup %9909  ;;  %v555_v27 = vpop.permute.xlu0 %554  ;;  %9923 = vtanh.f32 %v1907_v22  ;;  %v1011_v22 = vmul.f32 %v11368_v35, %v15384_v16  ;;  %v1913_v3 = vadd.f32 %v11399_v43, %v1781_v39 }
 0x1a4   : > { %v1906_v63 = vadd.f32 %v11399_v43, %v1774_v46  ;;  %v1004_v26 = vmul.f32 %v11368_v35, %v555_v27  ;;  %v2148_v38 = vpack.c.bf16 %v9908_v51, %v9910_v33  ;;  %864 = vperm.xlu0 %9801, %v10859_v55   ;;  %v11752_v29 = vpop.permute.xlu1 %1373  ;;  %v9912_v32 = vpop.eup %9911  ;;  %v11799_v55 = vld [vmem:[%s15265_s1] ss:$0 sm:$0xff] }
 0x1a5   : > { %1425 = vperm.xlu1 %9763, %v11537_v10   ;;  %v1911_v10 = vadd.f32 %v11399_v43, %v1779_v0  ;;  %v1783_v13 = vadd.f32 %v1655_v24, %v1011_v22  ;;  %v1020_v0 = vmul.f32 %v11368_v35, %v11491_v9  ;;  %v1024_v16 = vmul.f32 %v11799_v55, %v11615_v52  ;;  %v15385_v22 = vld [vmem:[#allocation24_spill] sm:$0xff] }
 0x1a6   : > { %9925 = vtanh.f32 %v1906_v63  ;;  %v1776_v34 = vadd.f32 %v1648_v19, %v1004_v26  ;;  %9065 = vmatmul.mubr.msk.bf16.gmra.mxu0 %vm2236_vm1, %v2148_v38  ;;  %v1664_v19 = vmul.f32 %v11373_v56, %v11507_v54 }
 0x1a7   : > { %v565_v5 = vpop.permute.xlu0 %564  ;;  %v9914_v6 = vpop.eup %9913  ;;  %9927 = vtanh.f32 %v1909_v48  ;;  %v10860_v48 = vld [vmem:[%s10926_s18 + $0x390] sm:$0xff]  ;;  %v1915_v9 = vadd.f32 %v11399_v43, %v1783_v13 }
 0x1a8   : > { %v1908_v17 = vadd.f32 %v11399_v43, %v1776_v34  ;;  %v1006_v12 = vmul.f32 %v11368_v35, %v565_v5  ;;  %879 = vperm.xlu0 %9801, %v11756_v47   ;;  %v11770_v58 = vpop.permute.xlu1 %1377  ;;  %v2149_v49 = vpack.c.bf16 %v9912_v32, %v9914_v6  ;;  %v9916_v40 = vpop.eup %9915  ;;  %v11806_v32 = vld [vmem:[%s15265_s1 + $0x1] ss:$0 sm:$0xff]  ;;  %v1792_v7 = vadd.f32 %v1664_v19, %v1020_v0 }
 0x1a9   : > { %9764 = vset.pattern.permute.xlu1 %v15315_v30  ;;  %v1667_v56 = vmul.f32 %v11806_v32, %v11558_v20  ;;  %v263_v5 = vld [vmem:[%s10926_s18 + $0x2c0] sm:$0xff]  ;;  %v1665_v20 = vmul.f32 %v11806_v32, %v11525_v61 }
 0x1aa   : > { %9929 = vtanh.f32 %v1908_v17  ;;  %v1778_v14 = vadd.f32 %v1650_v44, %v1006_v12  ;;  %9068 = vmatprep.mubr.msk.bf16.mxu0 %vm2236_vm1, %v2149_v49  ;;  %749 = vperm.xlu1 %9764, %v262_v45   ;;  %v1023_v44 = vmul.f32 %v11799_v55, %v11543_v15  ;;  %v1668_v15 = vmul.f32 %v11806_v32, %v11631_v62  ;;  %v10863_v49 = vld [vmem:[%s10926_s18 + $0x3b0] sm:$0xff]  ;;  %v11828_v61 = vld [vmem:[%s15265_s1 + $0x2] ss:$0 sm:$0xff] }
 0x1ab   : > { %v9918_v42 = vpop.eup %9917  ;;  %v575_v8 = vpop.permute.xlu0 %574  ;;  %9931 = vtanh.f32 %v1911_v10 }
 0x1ac   : > { %v1910_v51 = vadd.f32 %v11399_v43, %v1778_v14  ;;  %v1008_v46 = vmul.f32 %v11368_v35, %v575_v8  ;;  %v2150_v33 = vpack.c.bf16 %v9916_v40, %v9918_v42  ;;  %884 = vperm.xlu0 %9801, %v10860_v48   ;;  %v9920_v27 = vpop.eup %9919  ;;  %v1795_v24 = vadd.f32 %v1667_v56, %v1023_v44  ;;  %v11832_v14 = vld [vmem:[%s10926_s18 + $0x3c8] sm:$0xff] }
 0x1ad   : > { %v11784_v26 = vpop.permute.xlu1 %689  ;;  %v1666_v8 = vmul.f32 %v11806_v32, %v15385_v22  ;;  %v1796_v13 = vadd.f32 %v1668_v15, %v1024_v16  ;;  %v1671_v48 = vmul.f32 %v11806_v32, %v11682_v11  ;;  %v1669_v11 = vmul.f32 %v11806_v32, %v11649_v18  ;;  %v11861_v18 = vld [vmem:[%s10926_s18 + $0x3e8] sm:$0xff] }
 0x1ae   : > { %9933 = vtanh.f32 %v1910_v51  ;;  %v1780_v63 = vadd.f32 %v1652_v50, %v1008_v46  ;;  %9765 = vset.pattern.permute.xlu1 %v15318_v2  ;;  %9069 = vmatmul.mubr.msk.bf16.gmra.mxu0 %vm2236_vm1, %v2150_v33 }
 0x1af   : > { %v9922_v38 = vpop.eup %9921  ;;  %v585_v37 = vpop.permute.xlu0 %584  ;;  %1433 = vperm.xlu1 %9765, %v262_v45   ;;  %9935 = vtanh.f32 %v1913_v3  ;;  %v1927_v3 = vadd.f32 %v11828_v61, %v1795_v24  ;;  %v301_v24 = vld [vmem:[%s10926_s18 + $0x3f0] sm:$0xff] }
 0x1b0   : > { %v1912_v54 = vadd.f32 %v11399_v43, %v1780_v63  ;;  %v1010_v34 = vmul.f32 %v11799_v55, %v585_v37  ;;  %v2151_v35 = vpack.c.bf16 %v9920_v27, %v9922_v38  ;;  %899 = vperm.xlu0 %9801, %v11787_v21   ;;  %v9924_v57 = vpop.eup %9923  ;;  %v1027_v63 = vmul.f32 %v11799_v55, %v11666_v36 }
 0x1b2   : > { %9937 = vtanh.f32 %v1912_v54  ;;  %v1782_v53 = vadd.f32 %v1654_v60, %v1010_v34  ;;  %9072 = vmatprep.mubr.msk.bf16.mxu0 %vm2236_vm1, %v2151_v35  ;;  %v11815_v17 = vpop.permute.xlu1 %1385  ;;  %v1928_v54 = vadd.f32 %v11828_v61, %v1796_v13  ;;  %v1799_v34 = vadd.f32 %v1671_v48, %v1027_v63  ;;  %v15387_v48 = vld [vmem:[#allocation33_spill] sm:$0xff] }
 0x1b3   : > { %v9926_v6 = vpop.eup %9925  ;;  %v640_v12 = vpop.permute.xlu0 %639  ;;  %9766 = vset.pattern.permute.xlu1 %v15315_v30  ;;  %9939 = vtanh.f32 %v1915_v9  ;;  %v1672_v35 = vmul.f32 %v11806_v32, %v11752_v29  ;;  %v10865_v9 = vld [vmem:[%s10926_s18 + $0x3d0] sm:$0xff] }
 0x1b4   : > { %v1914_v45 = vadd.f32 %v11399_v43, %v1782_v53  ;;  %v1021_v10 = vmul.f32 %v11799_v55, %v640_v12  ;;  %v2152_v39 = vpack.c.bf16 %v9924_v57, %v9926_v6  ;;  %v9928_v4 = vpop.eup %9927  ;;  %904 = vperm.xlu0 %9801, %v10863_v49   ;;  %754 = vperm.xlu1 %9766, %v263_v5   ;;  %v15386_v6 = vld [vmem:[#allocation30_spill] sm:$0xff] }
 0x1b5   : > { %v1924_v43 = vadd.f32 %v11828_v61, %v1792_v7  ;;  %v1028_v53 = vmul.f32 %v11799_v55, %v11734_v23  ;;  %v1670_v29 = vmul.f32 %v11806_v32, %v15386_v6  ;;  %v1675_v49 = vmul.f32 %v11806_v32, %v11815_v17 }
 0x1b6   : > { %9941 = vtanh.f32 %v1914_v45  ;;  %v1793_v40 = vadd.f32 %v1665_v20, %v1021_v10  ;;  %9073 = vmatmul.mubr.msk.bf16.gmra.mxu0 %vm2236_vm1, %v2152_v39  ;;  %v266_v45 = vld [vmem:[%s10926_s18 + $0x2d8] sm:$0xff] }
 0x1b7   : > { %v9930_v42 = vpop.eup %9929  ;;  %v645_v62 = vpop.permute.xlu0 %644  ;;  %9943 = vtanh.f32 %v1924_v43  ;;  %v1800_v10 = vadd.f32 %v1672_v35, %v1028_v53 }
 0x1b8   : > { %v1925_v50 = vadd.f32 %v11828_v61, %v1793_v40  ;;  %v1022_v51 = vmul.f32 %v11799_v55, %v645_v62  ;;  %v11841_v46 = vpop.permute.xlu1 %594  ;;  %v2153_v33 = vpack.c.bf16 %v9928_v4, %v9930_v42  ;;  %919 = vperm.xlu0 %9801, %v11832_v14   ;;  %9767 = vset.pattern.permute.xlu1 %v15318_v2  ;;  %v9932_v52 = vpop.eup %9931 }
 0x1b9   : > { %1437 = vperm.xlu1 %9767, %v263_v5   ;;  %v1673_v40 = vmul.f32 %v11806_v32, %v11770_v58  ;;  %v1932_v22 = vadd.f32 %v11828_v61, %v1800_v10 }
 0x1ba   : > { %v1794_v27 = vadd.f32 %v1666_v8, %v1022_v51  ;;  %9076 = vmatprep.mubr.msk.bf16.mxu0 %vm2236_vm1, %v2153_v33  ;;  %9945 = vtanh.f32 %v1925_v50  ;;  %v1031_v8 = vmul.f32 %v11799_v55, %v11784_v26  ;;  %v1012_v26 = vmul.f32 %v11799_v55, %v11841_v46 }
 0x1bb   : > { %v9934_v19 = vpop.eup %9933  ;;  %v660_v38 = vpop.permute.xlu0 %659  ;;  %9947 = vtanh.f32 %v1927_v3 }
 0x1bc   : > { %v1926_v0 = vadd.f32 %v11828_v61, %v1794_v27  ;;  %v1025_v37 = vmul.f32 %v11799_v55, %v660_v38  ;;  %v2154_v60 = vpack.c.bf16 %v9932_v52, %v9934_v19  ;;  %924 = vperm.xlu0 %9801, %v10865_v9   ;;  %v1310_v36 = vpop.permute.xlu1 %1309  ;;  %v9936_v56 = vpop.eup %9935  ;;  %v1803_v3 = vadd.f32 %v1675_v49, %v1031_v8 }
 0x1bd   : > { %1441 = vperm.xlu1 %9767, %v11570_v28   ;;  %v1931_v28 = vadd.f32 %v11828_v61, %v1799_v34  ;;  %v1656_v50 = vmul.f32 %v11806_v32, %v1310_v36  ;;  %v1674_v52 = vmul.f32 %v11806_v32, %v15387_v48 }
 0x1be   : > { %9949 = vtanh.f32 %v1926_v0  ;;  %v1797_v57 = vadd.f32 %v1669_v11, %v1025_v37  ;;  %9077 = vmatmul.mubr.msk.bf16.gmra.mxu0 %vm2236_vm1, %v2154_v60  ;;  %v267_v37 = vld [vmem:[%s10926_s18 + $0x2e0] sm:$0xff] }
 0x1bf   : > { %v9938_v7 = vpop.eup %9937  ;;  %v665_v5 = vpop.permute.xlu0 %664  ;;  %9951 = vtanh.f32 %v1928_v54  ;;  %v1784_v11 = vadd.f32 %v1656_v50, %v1012_v26  ;;  %v1935_v54 = vadd.f32 %v11828_v61, %v1803_v3  ;;  %v270_v3 = vld [vmem:[%s10926_s18 + $0x2f8] sm:$0xff] }
 0x1c0   : > { %v1929_v44 = vadd.f32 %v11828_v61, %v1797_v57  ;;  %v1026_v12 = vmul.f32 %v11799_v55, %v665_v5  ;;  %v2155_v20 = vpack.c.bf16 %v9936_v56, %v9938_v7  ;;  %939 = vperm.xlu0 %9801, %v11861_v18   ;;  %v1314_v23 = vpop.permute.xlu1 %1313  ;;  %v9940_v39 = vpop.eup %9939 }
 0x1c1   : > { %9768 = vset.pattern.permute.xlu1 %v15315_v30  ;;  %v1657_v46 = vmul.f32 %v11806_v32, %v1314_v23  ;;  %v1916_v5 = vadd.f32 %v11828_v61, %v1784_v11 }
 0x1c2   : > { %9953 = vtanh.f32 %v1929_v44  ;;  %v1798_v4 = vadd.f32 %v1670_v29, %v1026_v12  ;;  %9080 = vmatprep.mubr.msk.bf16.mxu0 %vm2236_vm1, %v2155_v20  ;;  %769 = vperm.xlu1 %9768, %v266_v45   ;;  %v15388_v20 = vld [vmem:[#allocation34_spill] sm:$0xff] }
 0x1c3   : > { %v9942_v15 = vpop.eup %9941  ;;  %v680_v43 = vpop.permute.xlu0 %679  ;;  %9955 = vtanh.f32 %v1931_v28 }
 0x1c4   : > { %v1930_v42 = vadd.f32 %v11828_v61, %v1798_v4  ;;  %v1029_v16 = vmul.f32 %v11799_v55, %v680_v43  ;;  %v2156_v62 = vpack.c.bf16 %v9940_v39, %v9942_v15  ;;  %944 = vperm.xlu0 %9801, %v301_v24   ;;  %v9944_v33 = vpop.eup %9943 }
 0x1c5   : > { %v610_v51 = vpop.permute.xlu1 %609 }
 0x1c6   : > { %9957 = vtanh.f32 %v1930_v42  ;;  %v1801_v17 = vadd.f32 %v1673_v40, %v1029_v16  ;;  %9769 = vset.pattern.permute.xlu1 %v15318_v2  ;;  %9081 = vmatmul.mubr.msk.bf16.gmra.mxu0 %vm2236_vm1, %v2156_v62  ;;  %v1015_v34 = vmul.f32 %v11799_v55, %v610_v51 }
 0x1c7   : > { %v685_v58 = vpop.permute.xlu0 %684  ;;  %v9946_v13 = vpop.eup %9945  ;;  %1449 = vperm.xlu1 %9769, %v266_v45   ;;  %9959 = vtanh.f32 %v1932_v22  ;;  %v1658_v45 = vmul.f32 %v11806_v32, %v15388_v20 }
 0x1c8   : > { %v1933_v27 = vadd.f32 %v11828_v61, %v1801_v17  ;;  %v1030_v19 = vmul.f32 %v11799_v55, %v685_v58  ;;  %9806 = vset.pattern.permute.xlu0 %v15318_v2  ;;  %v2161_v63 = vpack.c.bf16 %v9946_v13, %v9944_v33  ;;  %v9948_v38 = vpop.eup %9947 }
 0x1c9   : > { %1589 = vperm.xlu0 %9806, %v301_v24  }
 0x1ca   : > { %9961 = vtanh.f32 %v1933_v27  ;;  %v1802_v0 = vadd.f32 %v1674_v52, %v1030_v19  ;;  %9092 = vmatprep.mubr.msk.bf16.mxu1 %vm2236_vm1, %v2161_v63  ;;  %v1322_v35 = vpop.permute.xlu1 %1321 }
 0x1cb   : > { %v9950_v60 = vpop.eup %9949  ;;  %v600_v9 = vpop.permute.xlu0 %599  ;;  %v1659_v56 = vmul.f32 %v11806_v32, %v1322_v35  ;;  %9770 = vset.pattern.permute.xlu1 %v15315_v30 }
 0x1cc   : > { %v1934_v36 = vadd.f32 %v11828_v61, %v1802_v0  ;;  %v1013_v57 = vmul.f32 %v11799_v55, %v600_v9  ;;  %v2162_v7 = vpack.c.bf16 %v9948_v38, %v9950_v60  ;;  %774 = vperm.xlu1 %9770, %v267_v37   ;;  %v9952_v53 = vpop.eup %9951  ;;  %v271_v9 = vld [vmem:[%s10926_s18 + $0x300] sm:$0xff] }
 0x1cd   : > { %v1787_v6 = vadd.f32 %v1659_v56, %v1015_v34 }
 0x1ce   : > { %9963 = vtanh.f32 %v1934_v36  ;;  %v1785_v29 = vadd.f32 %v1657_v46, %v1013_v57  ;;  %9093 = vmatmul.mubr.msk.bf16.vlgmr.msra.gmra.mxu1 %vm2236_vm1, %v2162_v7 }
 0x1cf   : > { %v9954_v44 = vpop.eup %9953  ;;  %9965 = vtanh.f32 %v1935_v54  ;;  %v605_v12 = vpop.permute.xlu0 %604  ;;  %v1919_v4 = vadd.f32 %v11828_v61, %v1787_v6 }
 0x1d0   : > { %v1917_v28 = vadd.f32 %v11828_v61, %v1785_v29  ;;  %v1014_v10 = vmul.f32 %v11799_v55, %v605_v12  ;;  %v695_v23 = vpop.permute.xlu1 %694  ;;  %v2163_v39 = vpack.c.bf16 %v9954_v44, %v9952_v53  ;;  %9771 = vset.pattern.permute.xlu1 %v15318_v2  ;;  %v9956_v24 = vpop.eup %9955  ;;  %9967 = vtanh.f32 %v1916_v5 }
 0x1d1   : > { %1453 = vperm.xlu1 %9771, %v267_v37   ;;  %v1032_v22 = vmul.f32 %v11799_v55, %v695_v23  ;;  %v15389_v37 = vld [vmem:[#allocation35_spill] sm:$0xff] }
 0x1d2   : > { %v1786_v15 = vadd.f32 %v1658_v45, %v1014_v10  ;;  %9096 = vmatprep.mubr.msk.bf16.mxu1 %vm2236_vm1, %v2163_v39  ;;  %9969 = vtanh.f32 %v1917_v28  ;;  %v1678_v60 = vmul.f32 %v11806_v32, %v15389_v37 }
 0x1d3   : > { %v9958_v49 = vpop.eup %9957  ;;  %v700_v40 = vpop.permute.xlu0 %699  ;;  %9971 = vtanh.f32 %v1919_v4 }
 0x1d4   : > { %v1918_v43 = vadd.f32 %v11828_v61, %v1786_v15  ;;  %v2164_v42 = vpack.c.bf16 %v9956_v24, %v9958_v49  ;;  %v1390_v16 = vpop.permute.xlu1 %1389  ;;  %v9960_v62 = vpop.eup %9959  ;;  %v1033_v17 = vmul.f32 %v11799_v55, %v700_v40  ;;  %v274_v15 = vld [vmem:[%s10926_s18 + $0x318] sm:$0xff] }
 0x1d5   : > { %v1676_v8 = vmul.f32 %v11806_v32, %v1390_v16  ;;  %1457 = vperm.xlu1 %9771, %v11599_v31  }
 0x1d6   : > { %9973 = vtanh.f32 %v1918_v43  ;;  %9097 = vmatmul.mubr.msk.bf16.gmra.mxu1 %vm2236_vm1, %v2164_v42 }
 0x1d7   : > { %v9962_v50 = vpop.eup %9961  ;;  %v1804_v51 = vadd.f32 %v1676_v8, %v1032_v22  ;;  %v705_v13 = vpop.permute.xlu0 %704 }
 0x1d8   : > { %v2165_v33 = vpack.c.bf16 %v9962_v50, %v9960_v62  ;;  %v1394_v58 = vpop.permute.xlu1 %1393  ;;  %v1034_v19 = vmul.f32 %v11799_v55, %v705_v13 }
 0x1d9   : > { %v1677_v48 = vmul.f32 %v11806_v32, %v1394_v58  ;;  %9772 = vset.pattern.permute.xlu1 %v15315_v30  ;;  %v1936_v26 = vadd.f32 %v11828_v61, %v1804_v51  ;;  %v275_v58 = vld [vmem:[%s10926_s18 + $0x320] sm:$0xff] }
 0x1da   : > { %9100 = vmatprep.mubr.msk.bf16.mxu1 %vm2236_vm1, %v2165_v33  ;;  %789 = vperm.xlu1 %9772, %v270_v3   ;;  %v1806_v46 = vadd.f32 %v1678_v60, %v1034_v19 }
 0x1db   : > { %v9964_v52 = vpop.eup %9963  ;;  %v1805_v27 = vadd.f32 %v1677_v48, %v1033_v17  ;;  %9975 = vtanh.f32 %v1936_v26  ;;  %v620_v20 = vpop.permute.xlu0 %619  ;;  %v15390_v17 = vld [vmem:[#allocation36_spill] sm:$0xff] }
 0x1dc   : > { %v9966_v31 = vpop.eup %9965  ;;  %v1938_v5 = vadd.f32 %v11828_v61, %v1806_v46  ;;  %v1017_v4 = vmul.f32 %v11799_v55, %v620_v20  ;;  %v1662_v51 = vmul.f32 %v11806_v32, %v15390_v17 }
 0x1dd   : > { %v2166_v63 = vpack.c.bf16 %v9966_v31, %v9964_v52  ;;  %v1937_v38 = vadd.f32 %v11828_v61, %v1805_v27  ;;  %v710_v11 = vpop.permute.xlu1 %709  ;;  %v9968_v0 = vpop.eup %9967 }
 0x1de   : > { %9773 = vset.pattern.permute.xlu1 %v15318_v2  ;;  %v1035_v57 = vmul.f32 %v11799_v55, %v710_v11 }
 0x1df   : > { %9101 = vmatmul.mubr.msk.bf16.gmra.mxu1 %vm2236_vm1, %v2166_v63  ;;  %v9970_v54 = vpop.eup %9969  ;;  %9977 = vtanh.f32 %v1937_v38  ;;  %1465 = vperm.xlu1 %9773, %v270_v3   ;;  %v625_v43 = vpop.permute.xlu0 %624 }
 0x1e0   : > { %v2157_v34 = vpack.c.bf16 %v9970_v54, %v9968_v0  ;;  %v9972_v35 = vpop.eup %9971  ;;  %9979 = vtanh.f32 %v1938_v5 }
 0x1e2   : > { %9084 = vmatprep.mubr.msk.bf16.mxu0 %vm2236_vm1, %v2157_v34  ;;  %v1402_v56 = vpop.permute.xlu1 %1401 }
 0x1e3   : > { %v9974_v36 = vpop.eup %9973  ;;  %v1679_v7 = vmul.f32 %v11806_v32, %v1402_v56  ;;  %9774 = vset.pattern.permute.xlu1 %v15315_v30  ;;  %v720_v38 = vpop.permute.xlu0 %719 }
 0x1e4   : > { %v2158_v53 = vpack.c.bf16 %v9972_v35, %v9974_v36  ;;  %794 = vperm.xlu1 %9774, %v271_v9   ;;  %v1037_v46 = vmul.f32 %v11799_v55, %v720_v38  ;;  %v278_v35 = vld [vmem:[%s10926_s18 + $0x338] sm:$0xff] }
 0x1e5   : > { %v1807_v6 = vadd.f32 %v1679_v7, %v1035_v57 }
 0x1e6   : > { %9085 = vmatmul.mubr.msk.bf16.gmra.mxu0 %vm2236_vm1, %v2158_v53 }
 0x1e7   : > { %v1939_v29 = vadd.f32 %v11828_v61, %v1807_v6  ;;  %v615_v44 = vpop.permute.xlu1 %614  ;;  %v725_v36 = vpop.permute.xlu0 %724 }
 0x1e8   : > { %9775 = vset.pattern.permute.xlu1 %v15318_v2  ;;  %v9976_v12 = vpop.eup %9975  ;;  %v1016_v10 = vmul.f32 %v11799_v55, %v615_v44  ;;  %v15391_v44 = vld [vmem:[#allocation37_spill] sm:$0xff] }
 0x1e9   : > { %9981 = vtanh.f32 %v1939_v29  ;;  %1469 = vperm.xlu1 %9775, %v271_v9  }
 0x1ec   : > { %v9978_v45 = vpop.eup %9977  ;;  %v1326_v28 = vpop.permute.xlu1 %1325 }
 0x1ed   : > { %v1660_v23 = vmul.f32 %v11806_v32, %v1326_v28  ;;  %1473 = vperm.xlu1 %9775, %v11634_v25   ;;  %v2167_v39 = vpack.c.bf16 %v9978_v45, %v9976_v12  ;;  %v1018_v25 = vmul.f32 %v11799_v55, %v625_v43  ;;  %v9980_v62 = vpop.eup %9979  ;;  %v1682_v12 = vmul.f32 %v11806_v32, %v15391_v44  ;;  %v279_v28 = vld [vmem:[%s10926_s18 + $0x340] sm:$0xff] }
 0x1ef   : > { %v1788_v24 = vadd.f32 %v1660_v23, %v1016_v10  ;;  %9104 = vmatprep.mubr.msk.bf16.mxu1 %vm2236_vm1, %v2167_v39  ;;  %v1790_v3 = vadd.f32 %v1662_v51, %v1018_v25 }
 0x1f0   : > { %v1330_v49 = vpop.permute.xlu1 %1329 }
 0x1f1   : > { %v1661_v40 = vmul.f32 %v11806_v32, %v1330_v49  ;;  %9776 = vset.pattern.permute.xlu1 %v15315_v30  ;;  %v1920_v42 = vadd.f32 %v11828_v61, %v1788_v24  ;;  %v1922_v26 = vadd.f32 %v11828_v61, %v1790_v3 }
 0x1f2   : > { %809 = vperm.xlu1 %9776, %v274_v15  }
 0x1f3   : > { %v1789_v16 = vadd.f32 %v1661_v40, %v1017_v4  ;;  %9983 = vtanh.f32 %v1920_v42  ;;  %v740_v40 = vpop.permute.xlu0 %739 }
 0x1f4   : > { %v1041_v51 = vmul.f32 %v11799_v55, %v740_v40 }
 0x1f5   : > { %v1921_v22 = vadd.f32 %v11828_v61, %v1789_v16  ;;  %v630_v8 = vpop.permute.xlu1 %629 }
 0x1f6   : > { %v9982_v50 = vpop.eup %9981  ;;  %9777 = vset.pattern.permute.xlu1 %v15318_v2  ;;  %v1019_v48 = vmul.f32 %v11799_v55, %v630_v8 }
 0x1f7   : > { %9985 = vtanh.f32 %v1921_v22  ;;  %1481 = vperm.xlu1 %9777, %v274_v15   ;;  %v2168_v33 = vpack.c.bf16 %v9982_v50, %v9980_v62  ;;  %v282_v50 = vld [vmem:[%s10926_s18 + $0x358] sm:$0xff] }
 0x1f8   : > { %9987 = vtanh.f32 %v1922_v26 }
 0x1f9   : > { %9105 = vmatmul.mubr.msk.bf16.gmra.mxu1 %vm2236_vm1, %v2168_v33  ;;  %v745_v33 = vpop.permute.xlu0 %744 }
 0x1fa   : > { %v1338_v13 = vpop.permute.xlu1 %1337 }
 0x1fb   : > { %v1663_v52 = vmul.f32 %v11806_v32, %v1338_v13  ;;  %9778 = vset.pattern.permute.xlu1 %v15315_v30 }
 0x1fc   : > { %814 = vperm.xlu1 %9778, %v275_v58  }
 0x1fd   : > { %v1791_v31 = vadd.f32 %v1663_v52, %v1019_v48 }
 0x1ff   : > { %v1923_v27 = vadd.f32 %v11828_v61, %v1791_v31  ;;  %v715_v19 = vpop.permute.xlu1 %714 }
 0x200   : > { %9779 = vset.pattern.permute.xlu1 %v15318_v2  ;;  %v9984_v63 = vpop.eup %9983  ;;  %v1036_v37 = vmul.f32 %v11799_v55, %v715_v19 }
 0x201   : > { %9989 = vtanh.f32 %v1923_v27  ;;  %1485 = vperm.xlu1 %9779, %v275_v58   ;;  %v15392_v27 = vld [vmem:[#allocation38_spill] sm:$0xff] }
 0x202   : > { %v1686_v19 = vmul.f32 %v11806_v32, %v15392_v27  ;;  %v9816_v27 = vld [vmem:[%s15266_s2 + $0x60] sm:$0xff]  }
 0x204   : > { %v9986_v11 = vpop.eup %9985  ;;  %v1406_v0 = vpop.permute.xlu1 %1405 }
 0x205   : > { %v1680_v60 = vmul.f32 %v11806_v32, %v1406_v0  ;;  %1489 = vperm.xlu1 %9779, %v11659_v59   ;;  %v2159_v54 = vpack.c.bf16 %v9986_v11, %v9984_v63  ;;  %v1038_v59 = vmul.f32 %v11799_v55, %v725_v36  ;;  %v9988_v53 = vpop.eup %9987  ;;  %v283_v11 = vld [vmem:[%s10926_s18 + $0x360] sm:$0xff]  ;;  %v760_v36 = vpop.permute.xlu0 %759 }
 0x207   : > { %v1808_v34 = vadd.f32 %v1680_v60, %v1036_v37  ;;  %9088 = vmatprep.mubr.msk.bf16.mxu0 %vm2236_vm1, %v2159_v54  ;;  %v1810_v45 = vadd.f32 %v1682_v12, %v1038_v59  ;;  %v1045_v12 = vmul.f32 %v11799_v55, %v760_v36 }
 0x208   : > { %v1410_v9 = vpop.permute.xlu1 %1409 }
 0x209   : > { %v1681_v56 = vmul.f32 %v11806_v32, %v1410_v9  ;;  %9780 = vset.pattern.permute.xlu1 %v15315_v30  ;;  %v1940_v57 = vadd.f32 %v11828_v61, %v1808_v34  ;;  %v1942_v4 = vadd.f32 %v11828_v61, %v1810_v45 }
 0x20a   : > { %829 = vperm.xlu1 %9780, %v278_v35  }
 0x20b   : > { %v1809_v7 = vadd.f32 %v1681_v56, %v1037_v46  ;;  %9991 = vtanh.f32 %v1940_v57 }
 0x20d   : > { %v1941_v5 = vadd.f32 %v11828_v61, %v1809_v7  ;;  %v730_v6 = vpop.permute.xlu1 %729 }
 0x20e   : > { %v9990_v29 = vpop.eup %9989  ;;  %9781 = vset.pattern.permute.xlu1 %v15318_v2  ;;  %v1039_v23 = vmul.f32 %v11799_v55, %v730_v6  ;;  %v286_v6 = vld [vmem:[%s10926_s18 + $0x378] sm:$0xff] }
 0x20f   : > { %9993 = vtanh.f32 %v1941_v5  ;;  %1497 = vperm.xlu1 %9781, %v278_v35   ;;  %v2160_v20 = vpack.c.bf16 %v9990_v29, %v9988_v53  ;;  %v9815_v29 = vld [vmem:[%s15266_s2 + $0x68] ss:$0 sps:$4 sm:$0x33]  }
 0x210   : > { %9995 = vtanh.f32 %v1942_v4  ;;  %9716 = vmatprep.subr.msk.bf16.mxu1 %vm2429_vm0, %v9815_v29 }
 0x211   : > { %9089 = vmatmul.mubr.msk.bf16.gmra.mxu0 %vm2236_vm1, %v2160_v20  ;;  %v765_v20 = vpop.permute.xlu0 %764 }
 0x212   : > { %v1418_v10 = vpop.permute.xlu1 %1417 }
 0x213   : > { %v1683_v39 = vmul.f32 %v11806_v32, %v1418_v10  ;;  %9782 = vset.pattern.permute.xlu1 %v15315_v30  ;;  %v1046_v10 = vmul.f32 %v11799_v55, %v765_v20 }
 0x214   : > { %834 = vperm.xlu1 %9782, %v279_v28  }
 0x215   : > { %v1811_v24 = vadd.f32 %v1683_v39, %v1039_v23  ;;  %v3419_v23 = vsel %vm2429_vm0, %v9815_v29, 0 }
 0x216   : > { %9157 = vmatpush3.bf16.msra.mxu1 %v3419_v23 }
 0x217   : > { %v1943_v15 = vadd.f32 %v11828_v61, %v1811_v24  ;;  %v735_v49 = vpop.permute.xlu1 %734  ;;  %9158 = vmatprep.subr.bf16.mxu1 %v9816_v27 }
 0x218   : > { %9783 = vset.pattern.permute.xlu1 %v15318_v2  ;;  %v9992_v43 = vpop.eup %9991  ;;  %v1040_v25 = vmul.f32 %v11799_v55, %v735_v49  ;;  %v15393_v49 = vld [vmem:[#allocation39_spill] sm:$0xff] }
 0x219   : > { %9997 = vtanh.f32 %v1943_v15  ;;  %1501 = vperm.xlu1 %9783, %v279_v28  }
 0x21a   : > { %9159 = vmatpush3.bf16.msra.mxu1 %v9816_v27 }
 0x21c   : > { %v9994_v42 = vpop.eup %9993  ;;  %v1422_v16 = vpop.permute.xlu1 %1421 }
 0x21d   : > { %v1684_v62 = vmul.f32 %v11806_v32, %v1422_v16  ;;  %1505 = vperm.xlu1 %9783, %v11695_v1   ;;  %v2169_v22 = vpack.c.bf16 %v9994_v42, %v9992_v43  ;;  %v1042_v1 = vmul.f32 %v11799_v55, %v745_v33  ;;  %v9996_v48 = vpop.eup %9995  ;;  %v1690_v43 = vmul.f32 %v11806_v32, %v15393_v49  ;;  %v287_v16 = vld [vmem:[%s10926_s18 + $0x380] sm:$0xff] }
 0x21f   : > { %v1812_v8 = vadd.f32 %v1684_v62, %v1040_v25  ;;  %9108 = vmatprep.mubr.msk.bf16.mxu1 %vm2236_vm1, %v2169_v22  ;;  %v1814_v38 = vadd.f32 %v1686_v19, %v1042_v1  ;;  %v1818_v42 = vadd.f32 %v1690_v43, %v1046_v10 }
 0x220   : > { %v1426_v17 = vpop.permute.xlu1 %1425 }
 0x221   : > { %v1685_v3 = vmul.f32 %v11806_v32, %v1426_v17  ;;  %9784 = vset.pattern.permute.xlu1 %v15315_v30  ;;  %v1944_v58 = vadd.f32 %v11828_v61, %v1812_v8  ;;  %v1946_v54 = vadd.f32 %v11828_v61, %v1814_v38  ;;  %v1950_v8 = vadd.f32 %v11828_v61, %v1818_v42 }
 0x222   : > { %849 = vperm.xlu1 %9784, %v282_v50  }
 0x223   : > { %v1813_v13 = vadd.f32 %v1685_v3, %v1041_v51  ;;  %9999 = vtanh.f32 %v1944_v58  ;;  %v780_v3 = vpop.permute.xlu0 %779 }
 0x225   : > { %v1945_v52 = vadd.f32 %v11828_v61, %v1813_v13  ;;  %v750_v26 = vpop.permute.xlu1 %749 }
 0x226   : > { %v9998_v31 = vpop.eup %9997  ;;  %9785 = vset.pattern.permute.xlu1 %v15318_v2  ;;  %v1043_v37 = vmul.f32 %v11799_v55, %v750_v26 }
 0x227   : > { %10001 = vtanh.f32 %v1945_v52  ;;  %1513 = vperm.xlu1 %9785, %v282_v50   ;;  %v2170_v63 = vpack.c.bf16 %v9998_v31, %v9996_v48  ;;  %v290_v31 = vld [vmem:[%s10926_s18 + $0x398] sm:$0xff]  ;;  %v785_v38 = vpop.permute.xlu0 %784 }
 0x228   : > { %10003 = vtanh.f32 %v1946_v54 }
 0x229   : > { %9109 = vmatmul.mubr.msk.bf16.gmra.mxu1 %vm2236_vm1, %v2170_v63  ;;  %v1049_v63 = vmul.f32 %v11799_v55, %v780_v3  ;;  %v295_v3 = vld [vmem:[%s10926_s18 + $0x3c0] sm:$0xff] }
 0x22a   : > { %v1434_v0 = vpop.permute.xlu1 %1433 }
 0x22b   : > { %v1687_v60 = vmul.f32 %v11806_v32, %v1434_v0  ;;  %9786 = vset.pattern.permute.xlu1 %v15315_v30  ;;  %v800_v20 = vpop.permute.xlu0 %799 }
 0x22c   : > { %854 = vperm.xlu1 %9786, %v283_v11   ;;  %v1053_v49 = vmul.f32 %v11799_v55, %v800_v20  ;;  %v9819_v20 = vld [vmem:[%s15266_s2 + $0x48] sm:$0xff]  }
 0x22d   : > { %v1815_v46 = vadd.f32 %v1687_v60, %v1043_v37  ;;  %v1050_v37 = vmul.f32 %v11799_v55, %v785_v38 }
 0x22f   : > { %v1947_v34 = vadd.f32 %v11828_v61, %v1815_v46  ;;  %v755_v35 = vpop.permute.xlu1 %754  ;;  %v805_v43 = vpop.permute.xlu0 %804 }
 0x230   : > { %9787 = vset.pattern.permute.xlu1 %v15318_v2  ;;  %v10000_v9 = vpop.eup %9999  ;;  %v1044_v7 = vmul.f32 %v11799_v55, %v755_v35  ;;  %v15394_v35 = vld [vmem:[#allocation40_spill] sm:$0xff] }
 0x231   : > { %10005 = vtanh.f32 %v1947_v34  ;;  %1517 = vperm.xlu1 %9787, %v283_v11  }
 0x234   : > { %v10002_v56 = vpop.eup %10001  ;;  %v1438_v57 = vpop.permute.xlu1 %1437 }
 0x235   : > { %v1688_v59 = vmul.f32 %v11806_v32, %v1438_v57  ;;  %1521 = vperm.xlu1 %9787, %v11727_v41   ;;  %v2171_v53 = vpack.c.bf16 %v10002_v56, %v10000_v9  ;;  %v10004_v39 = vpop.eup %10003  ;;  %v1694_v9 = vmul.f32 %v11806_v32, %v15394_v35  ;;  %v291_v57 = vld [vmem:[%s10926_s18 + $0x3a0] sm:$0xff] }
 0x237   : > { %v1816_v5 = vadd.f32 %v1688_v59, %v1044_v7  ;;  %9112 = vmatprep.mubr.msk.bf16.mxu1 %vm2236_vm1, %v2171_v53  ;;  %v1822_v56 = vadd.f32 %v1694_v9, %v1050_v37  ;;  %v12099_v9 = vld [vmem:[%s15265_s1 + $0x1] ss:$0 sm:$0xff] }
 0x238   : > { %v1442_v44 = vpop.permute.xlu1 %1441 }
 0x239   : > { %v1689_v45 = vmul.f32 %v11806_v32, %v1442_v44  ;;  %9788 = vset.pattern.permute.xlu1 %v15315_v30  ;;  %v1948_v41 = vadd.f32 %v11828_v61, %v1816_v5  ;;  %v1954_v5 = vadd.f32 %v11828_v61, %v1822_v56 }
 0x23a   : > { %869 = vperm.xlu1 %9788, %v286_v6  }
 0x23b   : > { %v1817_v28 = vadd.f32 %v1689_v45, %v1045_v12  ;;  %10007 = vtanh.f32 %v1948_v41  ;;  %v9817_v45 = vld [vmem:[%s15266_s2 + $0x58] sm:$0xff]  }
 0x23c   : > { %9160 = vmatprep.subr.bf16.mxu1 %v9817_v45 }
 0x23d   : > { %v1949_v4 = vadd.f32 %v11828_v61, %v1817_v28  ;;  %v770_v24 = vpop.permute.xlu1 %769  ;;  %9161 = vmatpush3.bf16.msra.mxu1 %v9817_v45 }
 0x23e   : > { %v10006_v15 = vpop.eup %10005  ;;  %9789 = vset.pattern.permute.xlu1 %v15318_v2  ;;  %v1047_v62 = vmul.f32 %v11799_v55, %v770_v24  ;;  %v294_v24 = vld [vmem:[%s10926_s18 + $0x3b8] sm:$0xff] }
 0x23f   : > { %10009 = vtanh.f32 %v1949_v4  ;;  %1529 = vperm.xlu1 %9789, %v286_v6   ;;  %v2172_v40 = vpack.c.bf16 %v10006_v15, %v10004_v39 }
 0x240   : > { %10011 = vtanh.f32 %v1950_v8 }
 0x241   : > { %9113 = vmatmul.mubr.msk.bf16.gmra.mxu1 %vm2236_vm1, %v2172_v40 }
 0x242   : > { %v1450_v25 = vpop.permute.xlu1 %1449 }
 0x243   : > { %v1691_v22 = vmul.f32 %v11806_v32, %v1450_v25  ;;  %9790 = vset.pattern.permute.xlu1 %v15315_v30 }
 0x244   : > { %874 = vperm.xlu1 %9790, %v287_v16  }
 0x245   : > { %v1819_v50 = vadd.f32 %v1691_v22, %v1047_v62 }
 0x247   : > { %v1951_v17 = vadd.f32 %v11828_v61, %v1819_v50  ;;  %v775_v51 = vpop.permute.xlu1 %774  ;;  %v15395_v50 = vld [vmem:[#allocation41_spill] sm:$0xff] }
 0x248   : > { %9791 = vset.pattern.permute.xlu1 %v15318_v2  ;;  %v10008_v33 = vpop.eup %10007  ;;  %v1048_v1 = vmul.f32 %v11799_v55, %v775_v51 }
 0x249   : > { %10013 = vtanh.f32 %v1951_v17  ;;  %1533 = vperm.xlu1 %9791, %v287_v16   ;;  %v1054_v16 = vmul.f32 %v11799_v55, %v805_v43  ;;  %v1698_v17 = vmul.f32 %v11806_v32, %v15395_v50 }
 0x24c   : > { %v10010_v58 = vpop.eup %10009  ;;  %v1454_v13 = vpop.permute.xlu1 %1453 }
 0x24d   : > { %v1692_v48 = vmul.f32 %v11806_v32, %v1454_v13  ;;  %1537 = vperm.xlu1 %9791, %v11756_v47   ;;  %v2173_v52 = vpack.c.bf16 %v10010_v58, %v10008_v33  ;;  %v10012_v60 = vpop.eup %10011  ;;  %v1826_v33 = vadd.f32 %v1698_v17, %v1054_v16  ;;  %v9818_v13 = vld [vmem:[%s15266_s2 + $0x50] sm:$0xff]   ;;  %v12134_v17 = vpop.f32.mrf.mxu0 }
 0x24e   : > { %9162 = vmatprep.subr.bf16.mxu1 %v9818_v13 }
 0x24f   : > { %v1820_v26 = vadd.f32 %v1692_v48, %v1048_v1  ;;  %9116 = vmatprep.mubr.msk.bf16.mxu1 %vm2236_vm1, %v2173_v52  ;;  %v1958_v52 = vadd.f32 %v11828_v61, %v1826_v33  ;;  %9163 = vmatpush3.bf16.msra.mxu1 %v9818_v13  ;;  %v12140_v13 = vpop.f32.mrf.mxu0 }
 0x250   : > { %v1458_v19 = vpop.permute.xlu1 %1457  ;;  %9164 = vmatprep.subr.bf16.mxu1 %v9819_v20 }
 0x251   : > { %v1693_v11 = vmul.f32 %v11806_v32, %v1458_v19  ;;  %9792 = vset.pattern.permute.xlu1 %v15315_v30  ;;  %v1952_v47 = vadd.f32 %v11828_v61, %v1820_v26  ;;  %v820_v19 = vpop.permute.xlu0 %819 }
 0x252   : > { %889 = vperm.xlu1 %9792, %v290_v31  }
 0x253   : > { %v1821_v0 = vadd.f32 %v1693_v11, %v1049_v63  ;;  %10015 = vtanh.f32 %v1952_v47  ;;  %v12088_v11 = vld [vmem:[%s15265_s1] ss:$0 sm:$0xff]  ;;  %9165 = vmatpush3.bf16.msra.mxu1 %v9819_v20 }
 0x255   : > { %v1953_v54 = vadd.f32 %v11828_v61, %v1821_v0  ;;  %v790_v46 = vpop.permute.xlu1 %789  ;;  %v825_v35 = vpop.permute.xlu0 %824 }
 0x256   : > { %v10014_v34 = vpop.eup %10013  ;;  %9793 = vset.pattern.permute.xlu1 %v15318_v2  ;;  %v1051_v59 = vmul.f32 %v11799_v55, %v790_v46  ;;  %v1058_v56 = vmul.f32 %v12088_v11, %v825_v35 }
 0x257   : > { %10017 = vtanh.f32 %v1953_v54  ;;  %1545 = vperm.xlu1 %9793, %v290_v31   ;;  %v2174_v36 = vpack.c.bf16 %v10014_v34, %v10012_v60  ;;  %v298_v54 = vld [vmem:[%s10926_s18 + $0x3d8] sm:$0xff]  ;;  %v1057_v34 = vmul.f32 %v12088_v11, %v820_v19 }
 0x258   : > { %10019 = vtanh.f32 %v1954_v5  ;;  %v15396_v5 = vld [vmem:[#allocation42_spill] sm:$0xff] }
 0x259   : > { %9117 = vmatmul.mubr.msk.bf16.gmra.mxu1 %vm2236_vm1, %v2174_v36 }
 0x25a   : > { %v1466_v7 = vpop.permute.xlu1 %1465 }
 0x25b   : > { %v1695_v53 = vmul.f32 %v11806_v32, %v1466_v7  ;;  %9794 = vset.pattern.permute.xlu1 %v15315_v30 }
 0x25c   : > { %894 = vperm.xlu1 %9794, %v291_v57  }
 0x25d   : > { %v1823_v6 = vadd.f32 %v1695_v53, %v1051_v59 }
 0x25f   : > { %v1955_v29 = vadd.f32 %v11828_v61, %v1823_v6  ;;  %v795_v44 = vpop.permute.xlu1 %794  ;;  %v1702_v6 = vmul.f32 %v12099_v9, %v15396_v5 }
 0x260   : > { %9795 = vset.pattern.permute.xlu1 %v15318_v2  ;;  %v10016_v12 = vpop.eup %10015  ;;  %v1052_v10 = vmul.f32 %v11799_v55, %v795_v44 }
 0x261   : > { %10021 = vtanh.f32 %v1955_v29  ;;  %1549 = vperm.xlu1 %9795, %v291_v57   ;;  %v1830_v44 = vadd.f32 %v1702_v6, %v1058_v56 }
 0x264   : > { %v10018_v41 = vpop.eup %10017  ;;  %v1470_v28 = vpop.permute.xlu1 %1469 }
 0x265   : > { %v1696_v23 = vmul.f32 %v11806_v32, %v1470_v28  ;;  %1553 = vperm.xlu1 %9795, %v11787_v21   ;;  %v2175_v39 = vpack.c.bf16 %v10018_v41, %v10016_v12  ;;  %v10020_v25 = vpop.eup %10019  ;;  %v299_v12 = vld [vmem:[%s10926_s18 + $0x3e0] sm:$0xff] }
 0x266   : > { %v12120_v28 = vld [vmem:[%s15265_s1 + $0x2] ss:$0 sm:$0xff] }
 0x267   : > { %v1824_v4 = vadd.f32 %v1696_v23, %v1052_v10  ;;  %9120 = vmatprep.mubr.msk.bf16.mxu1 %vm2236_vm1, %v2175_v39  ;;  %v1962_v10 = vadd.f32 %v12120_v28, %v1830_v44 }
 0x268   : > { %v1474_v15 = vpop.permute.xlu1 %1473 }
 0x269   : > { %v1697_v40 = vmul.f32 %v11806_v32, %v1474_v15  ;;  %9796 = vset.pattern.permute.xlu1 %v15315_v30  ;;  %v1956_v42 = vadd.f32 %v11828_v61, %v1824_v4  ;;  %v840_v15 = vpop.permute.xlu0 %839 }
 0x26a   : > { %909 = vperm.xlu1 %9796, %v294_v24  }
 0x26b   : > { %v1825_v21 = vadd.f32 %v1697_v40, %v1053_v49  ;;  %10023 = vtanh.f32 %v1956_v42 }
 0x26d   : > { %v1957_v62 = vadd.f32 %v11828_v61, %v1825_v21  ;;  %v810_v22 = vpop.permute.xlu1 %809  ;;  %v845_v50 = vpop.permute.xlu0 %844 }
 0x26e   : > { %v10022_v8 = vpop.eup %10021  ;;  %9797 = vset.pattern.permute.xlu1 %v15318_v2  ;;  %v1055_v1 = vmul.f32 %v11799_v55, %v810_v22 }
 0x26f   : > { %10025 = vtanh.f32 %v1957_v62  ;;  %1561 = vperm.xlu1 %9797, %v294_v24   ;;  %v2176_v51 = vpack.c.bf16 %v10022_v8, %v10020_v25  ;;  %v302_v25 = vld [vmem:[%s10926_s18 + $0x3f8] sm:$0xff]  ;;  %v9820_v62 = vld [vmem:[%s15266_s2 + $0x40] sm:$0xff]   ;;  %v1061_v8 = vmul.f32 %v12088_v11, %v840_v15 }
 0x270   : > { %10027 = vtanh.f32 %v1958_v52  ;;  %9166 = vmatprep.subr.bf16.mxu1 %v9820_v62 }
 0x271   : > { %9121 = vmatmul.mubr.msk.bf16.gmra.mxu1 %vm2236_vm1, %v2176_v51  ;;  %v860_v35 = vpop.permute.xlu0 %859 }
 0x272   : > { %v1482_v58 = vpop.permute.xlu1 %1481  ;;  %9167 = vmatpush3.bf16.msra.mxu1 %v9820_v62  ;;  %v1065_v5 = vmul.f32 %v12088_v11, %v860_v35 }
 0x273   : > { %v1699_v48 = vmul.f32 %v11806_v32, %v1482_v58  ;;  %9798 = vset.pattern.permute.xlu1 %v15315_v30 }
 0x274   : > { %914 = vperm.xlu1 %9798, %v295_v3  }
 0x275   : > { %v1827_v26 = vadd.f32 %v1699_v48, %v1055_v1  ;;  %v865_v6 = vpop.permute.xlu0 %864 }
 0x277   : > { %v1959_v31 = vadd.f32 %v11828_v61, %v1827_v26  ;;  %v815_v27 = vpop.permute.xlu1 %814  ;;  %v15397_v26 = vld [vmem:[#allocation43_spill] sm:$0xff] }
 0x278   : > { %9799 = vset.pattern.permute.xlu1 %v15318_v2  ;;  %v10024_v55 = vpop.eup %10023  ;;  %v1056_v47 = vmul.f32 %v12088_v11, %v815_v27 }
 0x279   : > { %10029 = vtanh.f32 %v1959_v31  ;;  %1565 = vperm.xlu1 %9799, %v295_v3   ;;  %v1062_v3 = vmul.f32 %v12088_v11, %v845_v50  ;;  %v1706_v31 = vmul.f32 %v12099_v9, %v15397_v26 }
 0x27b   : > { %v1834_v27 = vadd.f32 %v1706_v31, %v1062_v3 }
 0x27c   : > { %v10026_v63 = vpop.eup %10025  ;;  %v1486_v38 = vpop.permute.xlu1 %1485 }
 0x27d   : > { %v1700_v0 = vmul.f32 %v11806_v32, %v1486_v38  ;;  %1569 = vperm.xlu1 %9799, %v11832_v14   ;;  %v2177_v37 = vpack.c.bf16 %v10026_v63, %v10024_v55  ;;  %v10028_v57 = vpop.eup %10027  ;;  %v12146_v55 = vpop.f32.mrf.mxu0  ;;  %v9821_v63 = vld [vmem:[%s15266_s2 + $0x38] sm:$0xff]  }
 0x27e   : > { %9168 = vmatprep.subr.bf16.mxu1 %v9821_v63 }
 0x27f   : > { %v1828_v60 = vadd.f32 %v1700_v0, %v1056_v47  ;;  %9124 = vmatprep.mubr.msk.bf16.mxu1 %vm2236_vm1, %v2177_v37  ;;  %v1966_v0 = vadd.f32 %v12120_v28, %v1834_v27  ;;  %9169 = vmatpush3.bf16.msra.mxu1 %v9821_v63 }
 0x280   : > { %v1490_v46 = vpop.permute.xlu1 %1489 }
 0x281   : > { %v1701_v36 = vmul.f32 %v12099_v9, %v1490_v46  ;;  %9800 = vset.pattern.permute.xlu1 %v15315_v30  ;;  %v1960_v32 = vadd.f32 %v11828_v61, %v1828_v60 }
 0x282   : > { %929 = vperm.xlu1 %9800, %v298_v54  }
 0x283   : > { %v1829_v14 = vadd.f32 %v1701_v36, %v1057_v34  ;;  %10031 = vtanh.f32 %v1960_v32 }
 0x285   : > { %v1961_v7 = vadd.f32 %v11828_v61, %v1829_v14  ;;  %v830_v59 = vpop.permute.xlu1 %829 }
 0x286   : > { %v10030_v53 = vpop.eup %10029  ;;  %9802 = vset.pattern.permute.xlu1 %v15318_v2  ;;  %v1059_v45 = vmul.f32 %v12088_v11, %v830_v59 }
 0x287   : > { %10033 = vtanh.f32 %v1961_v7  ;;  %1577 = vperm.xlu1 %9802, %v298_v54   ;;  %v2178_v29 = vpack.c.bf16 %v10030_v53, %v10028_v57 }
 0x288   : > { %10035 = vtanh.f32 %v1962_v10 }
 0x289   : > { %9125 = vmatmul.mubr.msk.bf16.gmra.mxu1 %vm2236_vm1, %v2178_v29 }
 0x28a   : > { %v1498_v61 = vpop.permute.xlu1 %1497 }
 0x28b   : > { %v1703_v41 = vmul.f32 %v12099_v9, %v1498_v61  ;;  %9803 = vset.pattern.permute.xlu1 %v15315_v30  ;;  %v1066_v61 = vmul.f32 %v12088_v11, %v865_v6 }
 0x28c   : > { %934 = vperm.xlu1 %9803, %v299_v12  }
 0x28d   : > { %v1831_v23 = vadd.f32 %v1703_v41, %v1059_v45 }
 0x28f   : > { %v1963_v39 = vadd.f32 %v12120_v28, %v1831_v23  ;;  %v835_v4 = vpop.permute.xlu1 %834 }
 0x290   : > { %9804 = vset.pattern.permute.xlu1 %v15318_v2  ;;  %v10032_v24 = vpop.eup %10031  ;;  %v1060_v40 = vmul.f32 %v12088_v11, %v835_v4  ;;  %v15398_v4 = vld [vmem:[#allocation44_spill] sm:$0xff] }
 0x291   : > { %10037 = vtanh.f32 %v1963_v39  ;;  %1581 = vperm.xlu1 %9804, %v299_v12  }
 0x294   : > { %v10034_v49 = vpop.eup %10033  ;;  %v1502_v43 = vpop.permute.xlu1 %1501 }
 0x295   : > { %v1704_v42 = vmul.f32 %v12099_v9, %v1502_v43  ;;  %1585 = vperm.xlu1 %9804, %v11861_v18   ;;  %v2179_v21 = vpack.c.bf16 %v10034_v49, %v10032_v24  ;;  %v10036_v58 = vpop.eup %10035  ;;  %v1710_v24 = vmul.f32 %v12099_v9, %v15398_v4 }
 0x297   : > { %v1832_v16 = vadd.f32 %v1704_v42, %v1060_v40  ;;  %9128 = vmatprep.mubr.msk.bf16.mxu1 %vm2236_vm1, %v2179_v21  ;;  %v1838_v49 = vadd.f32 %v1710_v24, %v1066_v61 }
 0x298   : > { %v1506_v22 = vpop.permute.xlu1 %1505 }
 0x299   : > { %v1705_v51 = vmul.f32 %v12099_v9, %v1506_v22  ;;  %9805 = vset.pattern.permute.xlu1 %v15315_v30  ;;  %v1964_v18 = vadd.f32 %v12120_v28, %v1832_v16  ;;  %v1970_v16 = vadd.f32 %v12120_v28, %v1838_v49 }
 0x29a   : > { %949 = vperm.xlu1 %9805, %v302_v25  }
 0x29b   : > { %v1833_v33 = vadd.f32 %v1705_v51, %v1061_v8  ;;  %10039 = vtanh.f32 %v1964_v18  ;;  %v880_v18 = vpop.permute.xlu0 %879 }
 0x29d   : > { %v1965_v1 = vadd.f32 %v12120_v28, %v1833_v33  ;;  %v850_v48 = vpop.permute.xlu1 %849 }
 0x29e   : > { %v10038_v52 = vpop.eup %10037  ;;  %9807 = vset.pattern.permute.xlu1 %v15318_v2  ;;  %v1063_v38 = vmul.f32 %v12088_v11, %v850_v48  ;;  %v12155_v2 = vpop.f32.mrf.mxu0 }
 0x29f   : > { %10041 = vtanh.f32 %v1965_v1  ;;  %1593 = vperm.xlu1 %9807, %v302_v25   ;;  %v2180_v30 = vpack.c.bf16 %v10038_v52, %v10036_v58  ;;  %v885_v27 = vpop.permute.xlu0 %884 }
 0x2a0   : > { %10043 = vtanh.f32 %v1966_v0  ;;  %v12158_v46 = vpop.f32.mrf.mxu0  ;;  %v1070_v0 = vmul.f32 %v12088_v11, %v885_v27 }
 0x2a1   : > { %9129 = vmatmul.mubr.msk.bf16.gmra.mxu1 %vm2236_vm1, %v2180_v30  ;;  %v1069_v30 = vmul.f32 %v12088_v11, %v880_v18 }
 0x2a2   : > { %v1514_v19 = vpop.permute.xlu1 %1513  ;;  %v12160_v14 = vpop.f32.mrf.mxu0 }
 0x2a3   : > { %v1707_v47 = vmul.f32 %v12099_v9, %v1514_v19 }
 0x2a4   : > { %v12166_v29 = vpop.f32.mrf.mxu0 }
 0x2a5   : > { %v1835_v37 = vadd.f32 %v1707_v47, %v1063_v38 }
 0x2a6   : > { %v12171_v41 = vpop.f32.mrf.mxu0 }
 0x2a7   : > { %v1967_v60 = vadd.f32 %v12120_v28, %v1835_v37  ;;  %v855_v54 = vpop.permute.xlu1 %854 }
 0x2a8   : > { %v10040_v34 = vpop.eup %10039  ;;  %v1064_v56 = vmul.f32 %v12088_v11, %v855_v54  ;;  %v12176_v43 = vpop.f32.mrf.mxu0 }
 0x2a9   : > { %10045 = vtanh.f32 %v1967_v60 }
 0x2aa   : > { %v12182_v25 = vpop.f32.mrf.mxu0 }
 0x2ac   : > { %v10042_v36 = vpop.eup %10041  ;;  %v1518_v32 = vpop.permute.xlu1 %1517 }
 0x2ad   : > { %v1708_v57 = vmul.f32 %v12099_v9, %v1518_v32  ;;  %v2181_v7 = vpack.c.bf16 %v10042_v36, %v10040_v34  ;;  %v10044_v45 = vpop.eup %10043  ;;  %v12185_v50 = vpop.f32.mrf.mxu0  ;;  %v15399_v36 = vld [vmem:[#allocation46_spill] sm:$0xff] }
 0x2ae   : > { %v1714_v32 = vmul.f32 %v12099_v9, %v15399_v36 }
 0x2af   : > { %v1836_v59 = vadd.f32 %v1708_v57, %v1064_v56  ;;  %9132 = vmatprep.mubr.msk.bf16.mxu1 %vm2236_vm1, %v2181_v7  ;;  %v12187_v58 = vpop.f32.mrf.mxu0 }
 0x2b0   : > { %v1522_v53 = vpop.permute.xlu1 %1521  ;;  %v1842_v57 = vadd.f32 %v1714_v32, %v1070_v0 }
 0x2b1   : > { %v1709_v44 = vmul.f32 %v12099_v9, %v1522_v53  ;;  %v1968_v12 = vadd.f32 %v12120_v28, %v1836_v59  ;;  %v12193_v19 = vpop.f32.mrf.mxu0 }
 0x2b2   : > { %v1974_v6 = vadd.f32 %v12120_v28, %v1842_v57 }
 0x2b3   : > { %v1837_v20 = vadd.f32 %v1709_v44, %v1065_v5  ;;  %10047 = vtanh.f32 %v1968_v12  ;;  %v12198_v60 = vpop.f32.mrf.mxu0 }
 0x2b5   : > { %v1969_v10 = vadd.f32 %v12120_v28, %v1837_v20  ;;  %v870_v23 = vpop.permute.xlu1 %869  ;;  %v12203_v7 = vpop.f32.mrf.mxu0 }
 0x2b6   : > { %v10046_v39 = vpop.eup %10045  ;;  %v1067_v42 = vmul.f32 %v12088_v11, %v870_v23  ;;  %v900_v23 = vpop.permute.xlu0 %899 }
 0x2b7   : > { %10049 = vtanh.f32 %v1969_v10  ;;  %v2182_v15 = vpack.c.bf16 %v10046_v39, %v10044_v45  ;;  %v12209_v44 = vpop.f32.mrf.mxu0 }
 0x2b8   : > { %10051 = vtanh.f32 %v1970_v16  ;;  %v1073_v16 = vmul.f32 %v12088_v11, %v900_v23 }
 0x2b9   : > { %9133 = vmatmul.mubr.msk.bf16.gmra.mxu1 %vm2236_vm1, %v2182_v15  ;;  %v12212_v45 = vpop.f32.mrf.mxu0 }
 0x2ba   : > { %v1530_v40 = vpop.permute.xlu1 %1529 }
 0x2bb   : > { %v1711_v21 = vmul.f32 %v12099_v9, %v1530_v40  ;;  %v12214_v24 = vpop.f32.mrf.mxu0 }
 0x2bd   : > { %v1839_v62 = vadd.f32 %v1711_v21, %v1067_v42 }
 0x2bf   : > { %v1971_v22 = vadd.f32 %v12120_v28, %v1839_v62  ;;  %v875_v8 = vpop.permute.xlu1 %874  ;;  %v905_v62 = vpop.permute.xlu0 %904 }
 0x2c0   : > { %v10048_v51 = vpop.eup %10047  ;;  %v1068_v1 = vmul.f32 %v12088_v11, %v875_v8 }
 0x2c1   : > { %10053 = vtanh.f32 %v1971_v22  ;;  %v12220_v22 = vpop.f32.mrf.mxu0 }
 0x2c4   : > { %v10050_v33 = vpop.eup %10049  ;;  %v1534_v3 = vpop.permute.xlu1 %1533 }
 0x2c5   : > { %v1712_v48 = vmul.f32 %v12099_v9, %v1534_v3  ;;  %v2183_v52 = vpack.c.bf16 %v10050_v33, %v10048_v51  ;;  %v10052_v37 = vpop.eup %10051  ;;  %v1074_v33 = vmul.f32 %v12088_v11, %v905_v62 }
 0x2c7   : > { %v1840_v26 = vadd.f32 %v1712_v48, %v1068_v1  ;;  %9136 = vmatprep.mubr.msk.bf16.mxu1 %vm2236_vm1, %v2183_v52  ;;  %v12225_v1 = vpop.f32.mrf.mxu0 }
 0x2c8   : > { %v1538_v31 = vpop.permute.xlu1 %1537 }
 0x2c9   : > { %v1713_v63 = vmul.f32 %v12099_v9, %v1538_v31  ;;  %v1972_v38 = vadd.f32 %v12120_v28, %v1840_v26  ;;  %v15400_v31 = vld [vmem:[#allocation48_spill] sm:$0xff] }
 0x2cb   : > { %v1841_v47 = vadd.f32 %v1713_v63, %v1069_v30  ;;  %10055 = vtanh.f32 %v1972_v38  ;;  %v1718_v30 = vmul.f32 %v12099_v9, %v15400_v31  ;;  %v12230_v38 = vpop.f32.mrf.mxu0 }
 0x2cd   : > { %v1973_v54 = vadd.f32 %v12120_v28, %v1841_v47  ;;  %v890_v34 = vpop.permute.xlu1 %889  ;;  %v1846_v63 = vadd.f32 %v1718_v30, %v1074_v33  ;;  %v15401_v33 = vld [vmem:[#allocation50_spill] sm:$0xff] }
 0x2ce   : > { %v10054_v35 = vpop.eup %10053  ;;  %v1071_v53 = vmul.f32 %v12088_v11, %v890_v34  ;;  %v12236_v34 = vpop.f32.mrf.mxu0 }
 0x2cf   : > { %10057 = vtanh.f32 %v1973_v54  ;;  %v2184_v56 = vpack.c.bf16 %v10054_v35, %v10052_v37  ;;  %v1978_v54 = vadd.f32 %v12120_v28, %v1846_v63 }
 0x2d0   : > { %10059 = vtanh.f32 %v1974_v6 }
 0x2d1   : > { %9137 = vmatmul.mubr.msk.bf16.gmra.mxu1 %vm2236_vm1, %v2184_v56  ;;  %v12239_v56 = vpop.f32.mrf.mxu0 }
 0x2d2   : > { %v1546_v59 = vpop.permute.xlu1 %1545 }
 0x2d3   : > { %v1715_v5 = vmul.f32 %v12099_v9, %v1546_v59  ;;  %v920_v59 = vpop.permute.xlu0 %919  ;;  %v12241_v6 = vpop.f32.mrf.mxu0 }
 0x2d5   : > { %v1843_v12 = vadd.f32 %v1715_v5, %v1071_v53 }
 0x2d7   : > { %v1975_v20 = vadd.f32 %v12120_v28, %v1843_v12  ;;  %v895_v61 = vpop.permute.xlu1 %894 }
 0x2d8   : > { %v10056_v10 = vpop.eup %10055  ;;  %v1072_v15 = vmul.f32 %v12088_v11, %v895_v61 }
 0x2d9   : > { %10061 = vtanh.f32 %v1975_v20 }
 0x2dc   : > { %v10058_v39 = vpop.eup %10057  ;;  %v1550_v4 = vpop.permute.xlu1 %1549 }
 0x2dd   : > { %v1716_v49 = vmul.f32 %v12099_v9, %v1550_v4  ;;  %v2185_v40 = vpack.c.bf16 %v10058_v39, %v10056_v10  ;;  %v10060_v3 = vpop.eup %10059  ;;  %v1077_v39 = vmul.f32 %v12088_v11, %v920_v59  ;;  %v925_v4 = vpop.permute.xlu0 %924 }
 0x2df   : > { %v1844_v42 = vadd.f32 %v1716_v49, %v1072_v15  ;;  %9140 = vmatprep.mubr.msk.bf16.mxu1 %vm2236_vm1, %v2185_v40  ;;  %v12247_v15 = vpop.f32.mrf.mxu0 }
 0x2e0   : > { %v1554_v21 = vpop.permute.xlu1 %1553 }
 0x2e1   : > { %v1717_v8 = vmul.f32 %v12099_v9, %v1554_v21  ;;  %v1976_v51 = vadd.f32 %v12120_v28, %v1844_v42  ;;  %v1078_v21 = vmul.f32 %v12088_v11, %v925_v4  ;;  %v12252_v62 = vpop.f32.mrf.mxu0 }
 0x2e3   : > { %v1845_v18 = vadd.f32 %v1717_v8, %v1073_v16  ;;  %10063 = vtanh.f32 %v1976_v51  ;;  %v12264_v31 = vpop.f32.mrf.mxu0 }
 0x2e5   : > { %v1977_v48 = vadd.f32 %v12120_v28, %v1845_v18  ;;  %v910_v52 = vpop.permute.xlu1 %909 }
 0x2e6   : > { %v10062_v26 = vpop.eup %10061  ;;  %v1075_v0 = vmul.f32 %v12088_v11, %v910_v52 }
 0x2e7   : > { %10065 = vtanh.f32 %v1977_v48  ;;  %v2186_v27 = vpack.c.bf16 %v10062_v26, %v10060_v3  ;;  %v1722_v3 = vmul.f32 %v12099_v9, %v15401_v33  ;;  %v12260_v48 = vld [vmem:[%s15266_s2 + $0x78] ss:$0 sps:$4 sm:$0x33]  }
 0x2e8   : > { %10067 = vtanh.f32 %v1978_v54  ;;  %9718 = vmatprep.subr.msk.bf16.mxu1 %vm2429_vm0, %v12260_v48 }
 0x2e9   : > { %9141 = vmatmul.mubr.msk.bf16.gmra.mxu1 %vm2236_vm1, %v2186_v27  ;;  %v1850_v26 = vadd.f32 %v1722_v3, %v1078_v21 }
 0x2ea   : > { %v1562_v47 = vpop.permute.xlu1 %1561 }
 0x2eb   : > { %v1719_v37 = vmul.f32 %v12099_v9, %v1562_v47  ;;  %v1982_v47 = vadd.f32 %v12120_v28, %v1850_v26 }
 0x2ed   : > { %v1847_v35 = vadd.f32 %v1719_v37, %v1075_v0  ;;  %v940_v0 = vpop.permute.xlu0 %939  ;;  %v12270_v37 = vpop.f32.mrf.mxu0 }
 0x2ee   : > { %v1081_v4 = vmul.f32 %v12088_v11, %v940_v0 }
 0x2ef   : > { %v1979_v36 = vadd.f32 %v12120_v28, %v1847_v35  ;;  %v915_v32 = vpop.permute.xlu1 %914 }
 0x2f0   : > { %v10064_v57 = vpop.eup %10063  ;;  %v1076_v12 = vmul.f32 %v12088_v11, %v915_v32  ;;  %v12273_v32 = vpop.f32.mrf.mxu0 }
 0x2f1   : > { %10069 = vtanh.f32 %v1979_v36  ;;  %v945_v59 = vpop.permute.xlu0 %944 }
 0x2f2   : > { %v1082_v26 = vmul.f32 %v12088_v11, %v945_v59 }
 0x2f4   : > { %v10066_v53 = vpop.eup %10065  ;;  %v1566_v5 = vpop.permute.xlu1 %1565 }
 0x2f5   : > { %v1720_v20 = vmul.f32 %v12099_v9, %v1566_v5  ;;  %v2187_v61 = vpack.c.bf16 %v10066_v53, %v10064_v57  ;;  %v10068_v16 = vpop.eup %10067 }
 0x2f7   : > { %v1848_v10 = vadd.f32 %v1720_v20, %v1076_v12  ;;  %9144 = vmatprep.mubr.msk.bf16.mxu1 %vm2236_vm1, %v2187_v61  ;;  %v12275_v12 = vpop.f32.mrf.mxu0 }
 0x2f8   : > { %v1570_v23 = vpop.permute.xlu1 %1569 }
 0x2f9   : > { %v1721_v49 = vmul.f32 %v12099_v9, %v1570_v23  ;;  %v1980_v40 = vadd.f32 %v12120_v28, %v1848_v10 }
 0x2fb   : > { %v1849_v42 = vadd.f32 %v1721_v49, %v1077_v39  ;;  %10071 = vtanh.f32 %v1980_v40  ;;  %v1590_v49 = vpop.permute.xlu0 %1589  ;;  %v12281_v40 = vpop.f32.mrf.mxu0 }
 0x2fd   : > { %v1981_v8 = vadd.f32 %v12120_v28, %v1849_v42  ;;  %v930_v51 = vpop.permute.xlu1 %929 }
 0x2fe   : > { %v10070_v18 = vpop.eup %10069  ;;  %v1079_v27 = vmul.f32 %v12088_v11, %v930_v51 }
 0x2ff   : > { %10073 = vtanh.f32 %v1981_v8  ;;  %v2188_v52 = vpack.c.bf16 %v10070_v18, %v10068_v16  ;;  %v1726_v8 = vmul.f32 %v12099_v9, %v1590_v49  ;;  %v12286_v18 = vpop.f32.mrf.mxu0 }
 0x300   : > { %10075 = vtanh.f32 %v1982_v47  ;;  %v12296_v47 = vld [vmem:[%s15265_s1 + $0x3] ss:$0 sm:$0xff] }
 0x301   : > { %9145 = vmatmul.mubr.msk.bf16.gmra.mxu1 %vm2236_vm1, %v2188_v52 }
 0x302   : > { %v1578_v30 = vpop.permute.xlu1 %1577 }
 0x303   : > { %v1723_v63 = vmul.f32 %v12099_v9, %v1578_v30 }
 0x305   : > { %v1851_v54 = vadd.f32 %v1723_v63, %v1079_v27  ;;  %v1854_v27 = vadd.f32 %v1726_v8, %v1082_v26  ;;  %v12290_v63 = vpop.f32.mrf.mxu0  ;;  %v2503_v8 = vadd.f32 %v12296_v47, %v12187_v58 }
 0x307   : > { %v1983_v35 = vadd.f32 %v12120_v28, %v1851_v54  ;;  %v935_v36 = vpop.permute.xlu1 %934  ;;  %v2471_v54 = vadd.f32 %v12296_v47, %v12155_v2  ;;  %v1986_v59 = vadd.f32 %v12120_v28, %v1854_v27 }
 0x308   : > { %v10072_v57 = vpop.eup %10071  ;;  %v1080_v20 = vmul.f32 %v12088_v11, %v935_v36 }
 0x309   : > { %10077 = vtanh.f32 %v1983_v35  ;;  %v12300_v35 = vpop.f32.mrf.mxu1 }
 0x30c   : > { %v10074_v53 = vpop.eup %10073  ;;  %v1582_v5 = vpop.permute.xlu1 %1581 }
 0x30d   : > { %v1724_v61 = vmul.f32 %v12099_v9, %v1582_v5  ;;  %v2189_v10 = vpack.c.bf16 %v10074_v53, %v10072_v57  ;;  %v10076_v51 = vpop.eup %10075  ;;  %v12305_v53 = vpop.f32.mrf.mxu0 }
 0x30f   : > { %v1852_v23 = vadd.f32 %v1724_v61, %v1080_v20  ;;  %9148 = vmatprep.mubr.msk.bf16.mxu1 %vm2236_vm1, %v2189_v10  ;;  %v2468_v20 = vadd.f32 %v12296_v47, %v12140_v13  ;;  %v12309_v61 = vpop.f32.mrf.mxu1  ;;  %v12312_v2 = vpop.f32.mrf.mxu0  ;;  %v2487_v13 = vadd.f32 %v12296_v47, %v12171_v41  ;;  %v2495_v41 = vadd.f32 %v12166_v29, %v12296_v47 }
 0x310   : > { %v1586_v39 = vpop.permute.xlu1 %1585 }
 0x311   : > { %v1725_v42 = vmul.f32 %v12099_v9, %v1586_v39  ;;  %v1984_v21 = vadd.f32 %v12120_v28, %v1852_v23  ;;  %v12316_v23 = vpop.f32.mrf.mxu1  ;;  %v12322_v49 = vpop.f32.mrf.mxu0 }
 0x313   : > { %v1853_v16 = vadd.f32 %v1725_v42, %v1081_v4  ;;  %10079 = vtanh.f32 %v1984_v21  ;;  %v2476_v4 = vadd.f32 %v12134_v17, %v12296_v47  ;;  %v2484_v42 = vadd.f32 %v12296_v47, %v12160_v14  ;;  %v12326_v21 = vpop.f32.mrf.mxu1 }
 0x315   : > { %v1985_v33 = vadd.f32 %v12120_v28, %v1853_v16  ;;  %v950_v3 = vpop.permute.xlu1 %949  ;;  %v12333_v17 = vpop.f32.mrf.mxu1 }
 0x316   : > { %v10078_v52 = vpop.eup %10077  ;;  %v1083_v36 = vmul.f32 %v12088_v11, %v950_v3 }
 0x317   : > { %10081 = vtanh.f32 %v1985_v33  ;;  %v2190_v30 = vpack.c.bf16 %v10078_v52, %v10076_v51  ;;  %v2492_v51 = vadd.f32 %v12158_v46, %v12296_v47  ;;  %v2500_v52 = vadd.f32 %v12296_v47, %v12182_v25 }
 0x318   : > { %10083 = vtanh.f32 %v2471_v54  ;;  %v2511_v46 = vadd.f32 %v12185_v50, %v12296_v47  ;;  %v2519_v54 = vadd.f32 %v12296_v47, %v12209_v44 }
 0x319   : > { %9149 = vmatmul.mubr.msk.bf16.gmra.mxu1 %vm2236_vm1, %v2190_v30  ;;  %10085 = vtanh.f32 %v1986_v59  ;;  %v12343_v30 = vpop.f32.mrf.mxu1 }
 0x31a   : > { %v1594_v0 = vpop.permute.xlu1 %1593 }
 0x31b   : > { %v1727_v57 = vmul.f32 %v12099_v9, %v1594_v0  ;;  %v2479_v9 = vadd.f32 %v12146_v55, %v12296_v47  ;;  %v12329_v55 = vpop.f32.mrf.mxu0  ;;  %v12351_v58 = vpop.f32.mrf.mxu1 }
 0x31d   : > { %v1855_v5 = vadd.f32 %v1727_v57, %v1083_v36  ;;  %v12339_v33 = vpop.f32.mrf.mxu0  ;;  %v2508_v57 = vadd.f32 %v12176_v43, %v12296_v47  ;;  %v12361_v50 = vpop.f32.mrf.mxu1  ;;  %v2527_v43 = vadd.f32 %v12203_v7, %v12296_v47 }
 0x31f   : > { %v1987_v10 = vadd.f32 %v12120_v28, %v1855_v5  ;;  %v12345_v0 = vpop.f32.mrf.mxu0 }
 0x320   : > { %v10080_v11 = vpop.eup %10079 }
 0x321   : > { %10087 = vtanh.f32 %v1987_v10  ;;  %v12357_v59 = vpop.f32.mrf.mxu0 }
 0x322   : > { %10089 = vtanh.f32 %v2468_v20  ;;  %v2516_v20 = vadd.f32 %v12296_v47, %v12198_v60  ;;  %v12371_v60 = vpop.f32.mrf.mxu1 }
 0x323   : > { %10091 = vtanh.f32 %v2479_v9  ;;  %v5702_v9 = vsel %vm2429_vm0, %v12260_v48, 0  ;;  %v2535_v48 = vadd.f32 %v12296_v47, %v12225_v1 }
 0x324   : > { %v10082_v39 = vpop.eup %10081  ;;  %10093 = vtanh.f32 %v2487_v13 }
 0x325   : > { %v2191_v28 = vpack.c.bf16 %v10082_v39, %v10080_v11  ;;  %10095 = vtanh.f32 %v2476_v4  ;;  %v10084_v16 = vpop.eup %10083  ;;  %v12365_v39 = vpop.f32.mrf.mxu0 }
 0x326   : > { %10097 = vtanh.f32 %v2484_v42  ;;  %v10086_v14 = vpop.eup %10085 }
 0x327   : > { %9152 = vmatprep.mubr.msk.bf16.mxu1 %vm2236_vm1, %v2191_v28  ;;  %10099 = vtanh.f32 %v2495_v41  ;;  %v2524_v28 = vadd.f32 %v12193_v19, %v12296_v47  ;;  %v12377_v42 = vpop.f32.mrf.mxu0  ;;  %v2543_v19 = vadd.f32 %v12220_v22, %v12296_v47 }
 0x328   : > { %10101 = vtanh.f32 %v2503_v8 }
 0x329   : > { %10103 = vtanh.f32 %v2492_v51 }
 0x32a   : > { %10105 = vtanh.f32 %v2500_v52  ;;  %v2551_v52 = vadd.f32 %v12296_v47, %v12241_v6 }
 0x32b   : > { %10107 = vtanh.f32 %v2511_v46 }
 0x32c   : > { %10109 = vtanh.f32 %v2519_v54 }
 0x32d   : > { %10111 = vtanh.f32 %v2508_v57 }
 0x32e   : > { %v10088_v3 = vpop.eup %10087  ;;  %10113 = vtanh.f32 %v2516_v20  ;;  %v2567_v20 = vadd.f32 %v12296_v47, %v12270_v37 }
 0x32f   : > { %v10090_v26 = vpop.eup %10089  ;;  %v2192_v29 = vpack.c.bf16 %v10088_v3, %v10086_v14  ;;  %10115 = vtanh.f32 %v2527_v43  ;;  %v12381_v14 = vpop.f32.mrf.mxu1 }
 0x330   : > { %v3119_v27 = vpack.c.bf16 %v10084_v16, %v10090_v26  ;;  %v10092_v25 = vpop.eup %10091  ;;  %v2532_v16 = vadd.f32 %v12296_v47, %v12214_v24  ;;  %10117 = vtanh.f32 %v2535_v48  ;;  %v12383_v3 = vpop.f32.mrf.mxu0 }
 0x331   : > { %9153 = vmatmul.mubr.msk.bf16.gmra.mxu1 %vm2236_vm1, %v2192_v29  ;;  %v10094_v36 = vpop.eup %10093  ;;  %10119 = vtanh.f32 %v2524_v28  ;;  %v12389_v1 = vpop.f32.mrf.mxu1  ;;  %v2540_v29 = vadd.f32 %v12212_v45, %v12296_v47  ;;  %v2559_v45 = vadd.f32 %v12239_v56, %v12296_v47 }
 0x332   : > { %9170 = vmatprep.mubr.msk.bf16.mxu1 %vm2236_vm1, %v3119_v27  ;;  %v10096_v5 = vpop.eup %10095  ;;  %10121 = vtanh.f32 %v2532_v16  ;;  %v12395_v27 = vpop.f32.mrf.mxu0  ;;  %v2583_v16 = vadd.f32 %v12296_v47, %v12286_v18 }
 0x333   : > { %v10098_v10 = vpop.eup %10097  ;;  %v3120_v11 = vpack.c.bf16 %v10092_v25, %v10096_v5  ;;  %v2548_v25 = vadd.f32 %v12296_v47, %v12236_v34  ;;  %10123 = vtanh.f32 %v2543_v19 }
 0x334   : > { %v3121_v44 = vpack.c.bf16 %v10094_v36, %v10098_v10  ;;  %v10100_v13 = vpop.eup %10099  ;;  %v12399_v36 = vpop.f32.mrf.mxu1  ;;  %10125 = vtanh.f32 %v2551_v52  ;;  %v2580_v52 = vadd.f32 %v12296_v47, %v12275_v12 }
 0x335   : > { %v10102_v4 = vpop.eup %10101  ;;  %10127 = vtanh.f32 %v2540_v29  ;;  %v12401_v5 = vpop.f32.mrf.mxu0 }
 0x336   : > { %v10104_v41 = vpop.eup %10103  ;;  %v12403_v6 = vpop.f32.mrf.mxu1  ;;  %10129 = vtanh.f32 %v2548_v25 }
 0x337   : > { %v10106_v8 = vpop.eup %10105  ;;  %v3122_v7 = vpack.c.bf16 %v10100_v13, %v10104_v41  ;;  %v2564_v13 = vadd.f32 %v12296_v47, %v12252_v62  ;;  %10131 = vtanh.f32 %v2559_v45  ;;  %v2575_v62 = vadd.f32 %v12264_v31, %v12296_v47 }
 0x338   : > { %v3123_v51 = vpack.c.bf16 %v10102_v4, %v10106_v8  ;;  %v10108_v24 = vpop.eup %10107  ;;  %10133 = vtanh.f32 %v2567_v20  ;;  %v2588_v45 = vadd.f32 %v12273_v32, %v12296_v47  ;;  %v2607_v32 = vadd.f32 %v12312_v2, %v12296_v47 }
 0x339   : > { %9171 = vmatmul.mubr.msk.bf16.vlgmr.msra.gmra.mxu1 %vm2236_vm1, %v3120_v11  ;;  %v10110_v26 = vpop.eup %10109  ;;  %v2556_v11 = vadd.f32 %v12230_v38, %v12296_v47  ;;  %v9823_v38 = vld [vmem:[%s15266_s2 + $0x90] ss:$0 sps:$4 sm:$0xff]  }
 0x33a   : > { %9174 = vmatprep.mubr.msk.bf16.mxu1 %vm2236_vm1, %v3121_v44  ;;  %9433 = vmatpush3.bf16.msra.mxu1 %v5702_v9  ;;  %v10112_v46 = vpop.eup %10111  ;;  %v12413_v9 = vpop.f32.mrf.mxu0 }
 0x33b   : > { %v10114_v54 = vpop.eup %10113  ;;  %v3124_v22 = vpack.c.bf16 %v10108_v24, %v10112_v46  ;;  %v12415_v44 = vpop.f32.mrf.mxu1  ;;  %10135 = vtanh.f32 %v2556_v11  ;;  %9717 = vmatprep.subr.msk.bf16.mxu0 %vm4950_vm2, %v9823_v38 }
 0x33c   : > { %v3125_v57 = vpack.c.bf16 %v10110_v26, %v10114_v54  ;;  %v10116_v34 = vpop.eup %10115  ;;  %v12419_v28 = vpop.f32.mrf.mxu0  ;;  %10137 = vtanh.f32 %v2564_v13  ;;  %v2599_v54 = vadd.f32 %v12296_v47, %v12322_v49 }
 0x33d   : > { %v10118_v10 = vpop.eup %10117  ;;  %v12421_v37 = vpop.f32.mrf.mxu1  ;;  %10139 = vtanh.f32 %v2575_v62 }
 0x33e   : > { %v10120_v43 = vpop.eup %10119  ;;  %10141 = vtanh.f32 %v2583_v16 }
 0x33f   : > { %v10122_v48 = vpop.eup %10121  ;;  %v3126_v4 = vpack.c.bf16 %v10116_v34, %v10120_v43  ;;  %v12437_v19 = vpop.f32.mrf.mxu1 }
 0x340   : > { %v3127_v56 = vpack.c.bf16 %v10118_v10, %v10122_v48  ;;  %v10124_v41 = vpop.eup %10123  ;;  %v2596_v10 = vadd.f32 %v12296_v47, %v12305_v53 }
 0x341   : > { %9175 = vmatmul.mubr.msk.bf16.gmra.mxu1 %vm2236_vm1, %v3122_v7  ;;  %v10126_v8 = vpop.eup %10125  ;;  %v2572_v7 = vadd.f32 %v12247_v15, %v12296_v47  ;;  %v12441_v31 = vpop.f32.mrf.mxu1  ;;  %v2591_v15 = vadd.f32 %v12281_v40, %v12296_v47 }
 0x342   : > { %9178 = vmatprep.mubr.msk.bf16.mxu1 %vm2236_vm1, %v3123_v51  ;;  %v12435_v51 = vpop.f32.mrf.mxu0  ;;  %v10128_v24 = vpop.eup %10127 }
 0x343   : > { %v10130_v26 = vpop.eup %10129  ;;  %v3128_v29 = vpack.c.bf16 %v10124_v41, %v10128_v24  ;;  %10143 = vtanh.f32 %v2572_v7  ;;  %v12449_v25 = vpop.f32.mrf.mxu1 }
 0x344   : > { %v3129_v18 = vpack.c.bf16 %v10126_v8, %v10130_v26  ;;  %v12443_v46 = vpop.f32.mrf.mxu0  ;;  %10145 = vtanh.f32 %v2580_v52  ;;  %v10132_v12 = vpop.eup %10131  ;;  %v2612_v8 = vadd.f32 %v12296_v47, %v12339_v33  ;;  %v2631_v33 = vadd.f32 %v12296_v47, %v12395_v27 }
 0x345   : > { %10147 = vtanh.f32 %v2591_v15  ;;  %v12460_v11 = vpop.f32.mrf.mxu1 }
 0x346   : > { %v12456_v34 = vpop.f32.mrf.mxu0  ;;  %10149 = vtanh.f32 %v2599_v54 }
 0x347   : > { %10151 = vtanh.f32 %v2588_v45  ;;  %v12468_v48 = vpop.f32.mrf.mxu1 }
 0x348   : > { %v12462_v13 = vpop.f32.mrf.mxu0  ;;  %10153 = vtanh.f32 %v2596_v10 }
 0x349   : > { %9179 = vmatmul.mubr.msk.bf16.gmra.mxu1 %vm2236_vm1, %v3124_v22  ;;  %v4952_v22 = vsel %vm4950_vm2, %v9823_v38, 0  ;;  %v2604_v38 = vadd.f32 %v12290_v63, %v12296_v47  ;;  %v12474_v41 = vpop.f32.mrf.mxu1  ;;  %10155 = vtanh.f32 %v2607_v32  ;;  %v2623_v63 = vadd.f32 %v12345_v0, %v12296_v47 }
 0x34a   : > { %9182 = vmatprep.mubr.msk.bf16.mxu1 %vm2236_vm1, %v3125_v57  ;;  %v10134_v57 = vpop.eup %10133  ;;  %9299 = vmatpush3.bf16.msra.mxu0 %v4952_v22  ;;  %v2662_v62 = vpop.f32.mrf.mxu0  ;;  %v2628_v22 = vadd.f32 %v12296_v47, %v12377_v42 }
 0x34b   : > { %v10136_v20 = vpop.eup %10135 }
 0x34c   : > { %v10138_v40 = vpop.eup %10137  ;;  %v3130_v43 = vpack.c.bf16 %v10132_v12, %v10136_v20  ;;  %v12478_v52 = vpop.f32.mrf.mxu0 }
 0x34d   : > { %v3131_v49 = vpack.c.bf16 %v10134_v57, %v10138_v40  ;;  %v10140_v53 = vpop.eup %10139  ;;  %v2647_v40 = vadd.f32 %v12296_v47, %v12435_v51 }
 0x34e   : > { %v12490_v15 = vpop.f32.mrf.mxu0 }
 0x350   : > { %v12496_v20 = vpop.f32.mrf.mxu0 }
 0x351   : > { %9183 = vmatmul.mubr.msk.bf16.gmra.mxu1 %vm2236_vm1, %v3126_v4  ;;  %v2615_v4 = vadd.f32 %v12296_v47, %v12357_v59  ;;  %v12480_v59 = vpop.f32.mrf.mxu1 }
 0x352   : > { %9186 = vmatprep.mubr.msk.bf16.mxu1 %vm2236_vm1, %v3127_v56  ;;  %v10142_v56 = vpop.eup %10141  ;;  %v2678_v32 = vpop.f32.mrf.mxu0 }
 0x353   : > { %v10144_v16 = vpop.eup %10143  ;;  %10157 = vtanh.f32 %v2615_v4  ;;  %v12492_v12 = vpop.f32.mrf.mxu1  ;;  %v2644_v4 = vadd.f32 %v12296_v47, %v12413_v9 }
 0x354   : > { %v10146_v7 = vpop.eup %10145  ;;  %v3132_v2 = vpack.c.bf16 %v10140_v53, %v10144_v16  ;;  %10159 = vtanh.f32 %v2604_v38  ;;  %v12512_v38 = vpop.f32.mrf.mxu0 }
 0x355   : > { %v3133_v24 = vpack.c.bf16 %v10142_v56, %v10146_v7  ;;  %10161 = vtanh.f32 %v2612_v8  ;;  %v10148_v26 = vpop.eup %10147  ;;  %v12498_v27 = vpop.f32.mrf.mxu1 }
 0x356   : > { %10163 = vtanh.f32 %v2623_v63  ;;  %v2691_v51 = vpop.f32.mrf.mxu0  ;;  %v9825_v63 = vld [vmem:[%s15266_s2 + $0x88] sm:$0xff]  }
 0x357   : > { %10165 = vtanh.f32 %v2631_v33  ;;  %v12504_v10 = vpop.f32.mrf.mxu1  ;;  %v2652_v33 = vadd.f32 %v12401_v5, %v12296_v47  ;;  %9300 = vmatprep.subr.bf16.mxu0 %v9825_v63  ;;  %v9826_v5 = vld [vmem:[%s15266_s2 + $0x80] sm:$0xff]  }
 0x358   : > { %9301 = vmatpush3.bf16.msra.mxu0 %v9825_v63 }
 0x359   : > { %9187 = vmatmul.mubr.msk.bf16.gmra.mxu1 %vm2236_vm1, %v3128_v29  ;;  %v10150_v29 = vpop.eup %10149  ;;  %9302 = vmatprep.subr.bf16.mxu0 %v9826_v5 }
 0x35a   : > { %9190 = vmatprep.mubr.msk.bf16.mxu1 %vm2236_vm1, %v3129_v18  ;;  %v2620_v18 = vadd.f32 %v12329_v55, %v12296_v47  ;;  %v10152_v54 = vpop.eup %10151  ;;  %v2639_v55 = vadd.f32 %v12383_v3, %v12296_v47  ;;  %v12514_v3 = vpop.f32.mrf.mxu1 }
 0x35b   : > { %v10154_v57 = vpop.eup %10153  ;;  %v3134_v45 = vpack.c.bf16 %v10148_v26, %v10152_v54 }
 0x35c   : > { %v3135_v0 = vpack.c.bf16 %v10150_v29, %v10154_v57  ;;  %10167 = vtanh.f32 %v2620_v18  ;;  %v10156_v42 = vpop.eup %10155  ;;  %v12520_v9 = vpop.f32.mrf.mxu1  ;;  %9303 = vmatpush3.bf16.msra.mxu0 %v9826_v5 }
 0x35d   : > { %10169 = vtanh.f32 %v2628_v22 }
 0x35e   : > { %10171 = vtanh.f32 %v2639_v55  ;;  %v12533_v54 = vpop.f32.mrf.mxu1 }
 0x35f   : > { %10173 = vtanh.f32 %v2647_v40 }
 0x361   : > { %9191 = vmatmul.mubr.msk.bf16.gmra.mxu1 %vm2236_vm1, %v3130_v43  ;;  %v10158_v43 = vpop.eup %10157 }
 0x362   : > { %9194 = vmatprep.mubr.msk.bf16.mxu1 %vm2236_vm1, %v3131_v49  ;;  %v2636_v49 = vadd.f32 %v12365_v39, %v12296_v47  ;;  %v10160_v53 = vpop.eup %10159  ;;  %v2655_v39 = vadd.f32 %v12419_v28, %v12296_v47  ;;  %v2660_v28 = vadd.f32 %v12296_v47, %v12456_v34  ;;  %v2671_v34 = vadd.f32 %v12462_v13, %v12296_v47 }
 0x363   : > { %v10162_v56 = vpop.eup %10161  ;;  %v3136_v16 = vpack.c.bf16 %v10156_v42, %v10160_v53  ;;  %v2679_v42 = vadd.f32 %v12296_v47, %v2678_v32 }
 0x364   : > { %v3137_v8 = vpack.c.bf16 %v10158_v43, %v10162_v56  ;;  %10175 = vtanh.f32 %v2636_v49  ;;  %v10164_v7 = vpop.eup %10163  ;;  %v2668_v43 = vadd.f32 %v12443_v46, %v12296_v47  ;;  %v2676_v56 = vadd.f32 %v12296_v47, %v12490_v15 }
 0x365   : > { %10177 = vtanh.f32 %v2644_v4  ;;  %v10166_v26 = vpop.eup %10165  ;;  %v2687_v46 = vadd.f32 %v12496_v20, %v12296_v47 }
 0x366   : > { %10179 = vtanh.f32 %v2655_v39 }
 0x369   : > { %9195 = vmatmul.mubr.msk.bf16.gmra.mxu1 %vm2236_vm1, %v3132_v2  ;;  %v2663_v2 = vadd.f32 %v12296_v47, %v2662_v62  ;;  %v10168_v29 = vpop.eup %10167  ;;  %v9087_v62 = vpop.f32.mrf.mxu0 }
 0x36a   : > { %9198 = vmatprep.mubr.msk.bf16.mxu1 %vm2236_vm1, %v3133_v24  ;;  %v9824_v24 = vld [vmem:[%s15266_s2 + $0x70] sm:$0xff]   ;;  %v10170_v18 = vpop.eup %10169  ;;  %v3138_v22 = vpack.c.bf16 %v10164_v7, %v10168_v29  ;;  %v2692_v29 = vadd.f32 %v12296_v47, %v2691_v51 }
 0x36b   : > { %9434 = vmatprep.subr.bf16.mxu1 %v9824_v24  ;;  %10181 = vtanh.f32 %v2663_v2  ;;  %v3139_v57 = vpack.c.bf16 %v10166_v26, %v10170_v18  ;;  %v10172_v55 = vpop.eup %10171 }
 0x36c   : > { %9435 = vmatpush3.bf16.msra.mxu1 %v9824_v24  ;;  %10183 = vtanh.f32 %v2652_v33  ;;  %v10174_v40 = vpop.eup %10173  ;;  %v2684_v24 = vadd.f32 %v12478_v52, %v12296_v47  ;;  %v2703_v52 = vadd.f32 %v9087_v62, %v12296_v47 }
 0x36d   : > { %10185 = vtanh.f32 %v2660_v28 }
 0x36e   : > { %10187 = vtanh.f32 %v2671_v34 }
 0x36f   : > { %10189 = vtanh.f32 %v2679_v42 }
 0x370   : > { %10191 = vtanh.f32 %v2668_v43 }
 0x371   : > { %9199 = vmatmul.mubr.msk.bf16.gmra.mxu1 %vm2236_vm1, %v3134_v45  ;;  %v12538_v45 = vpop.f32.mrf.mxu1  ;;  %v10176_v4 = vpop.eup %10175  ;;  %10193 = vtanh.f32 %v2676_v56 }
 0x372   : > { %9202 = vmatprep.mubr.msk.bf16.mxu1 %vm2236_vm1, %v3135_v0  ;;  %v2694_v0 = vpop.f32.mrf.mxu0  ;;  %10195 = vtanh.f32 %v2687_v46 }
 0x373   : > { %v12547_v53 = vpop.f32.mrf.mxu1  ;;  %v2695_v15 = vadd.f32 %v12296_v47, %v2694_v0 }
 0x374   : > { %v9090_v49 = vpop.f32.mrf.mxu0 }
 0x375   : > { %v12551_v7 = vpop.f32.mrf.mxu1  ;;  %10197 = vtanh.f32 %v2695_v15  ;;  %v2716_v46 = vadd.f32 %v9090_v49, %v12296_v47 }
 0x376   : > { %v2707_v39 = vpop.f32.mrf.mxu0  ;;  %10199 = vtanh.f32 %v2684_v24 }
 0x377   : > { %v12560_v26 = vpop.f32.mrf.mxu1  ;;  %10201 = vtanh.f32 %v2692_v29 }
 0x378   : > { %v9091_v63 = vpop.f32.mrf.mxu0  ;;  %10203 = vtanh.f32 %v2703_v52  ;;  %v2740_v52 = vadd.f32 %v12296_v47, %v12343_v30  ;;  %v2759_v30 = vadd.f32 %v12296_v47, %v12399_v36 }
 0x379   : > { %9203 = vmatmul.mubr.msk.bf16.gmra.mxu1 %vm2236_vm1, %v3136_v16  ;;  %v10178_v16 = vpop.eup %10177  ;;  %v12563_v18 = vpop.f32.mrf.mxu1  ;;  %v2719_v62 = vadd.f32 %v9091_v63, %v12296_v47 }
 0x37a   : > { %9206 = vmatprep.mubr.msk.bf16.mxu1 %vm2236_vm1, %v3137_v8  ;;  %v3140_v8 = vpack.c.bf16 %v10172_v55, %v10176_v4  ;;  %v3141_v13 = vpack.c.bf16 %v10174_v40, %v10178_v16  ;;  %v10180_v32 = vpop.eup %10179  ;;  %v2700_v55 = vadd.f32 %v12512_v38, %v12296_v47  ;;  %v2708_v40 = vadd.f32 %v12296_v47, %v2707_v39 }
 0x37b   : > { %v10182_v2 = vpop.eup %10181  ;;  %v12568_v5 = vpop.f32.mrf.mxu1 }
 0x37c   : > { %v10184_v33 = vpop.eup %10183 }
 0x37d   : > { %v10186_v28 = vpop.eup %10185  ;;  %v12574_v4 = vpop.f32.mrf.mxu1 }
 0x37e   : > { %v3143_v20 = vpack.c.bf16 %v10182_v2, %v10186_v28  ;;  %v10188_v34 = vpop.eup %10187  ;;  %v2724_v2 = vadd.f32 %v12296_v47, %v12309_v61  ;;  %v2743_v61 = vadd.f32 %v12296_v47, %v12361_v50 }
 0x37f   : > { %v10190_v0 = vpop.eup %10189 }
 0x380   : > { %v10192_v42 = vpop.eup %10191 }
 0x381   : > { %9207 = vmatmul.mubr.msk.bf16.gmra.mxu1 %vm2236_vm1, %v3138_v22  ;;  %v3142_v22 = vpack.c.bf16 %v10180_v32, %v10184_v33  ;;  %v10194_v43 = vpop.eup %10193  ;;  %v3144_v56 = vpack.c.bf16 %v10188_v34, %v10192_v42 }
 0x382   : > { %9210 = vmatprep.mubr.msk.bf16.mxu1 %vm2236_vm1, %v3139_v57  ;;  %v2710_v57 = vpop.f32.mrf.mxu0  ;;  %v3145_v16 = vpack.c.bf16 %v10190_v0, %v10194_v43  ;;  %v10196_v38 = vpop.eup %10195 }
 0x383   : > { %v2711_v51 = vadd.f32 %v12296_v47, %v2710_v57  ;;  %v10198_v39 = vpop.eup %10197 }
 0x384   : > { %v10200_v15 = vpop.eup %10199 }
 0x385   : > { %10205 = vtanh.f32 %v2711_v51  ;;  %v10202_v24 = vpop.eup %10201  ;;  %v3146_v33 = vpack.c.bf16 %v10196_v38, %v10200_v15 }
 0x386   : > { %10207 = vtanh.f32 %v2700_v55  ;;  %v3147_v63 = vpack.c.bf16 %v10198_v39, %v10202_v24  ;;  %v10204_v49 = vpop.eup %10203 }
 0x387   : > { %10209 = vtanh.f32 %v2708_v40  ;;  %v2748_v40 = vadd.f32 %v12333_v17, %v12296_v47  ;;  %v2767_v17 = vadd.f32 %v12389_v1, %v12296_v47 }
 0x388   : > { %10211 = vtanh.f32 %v2719_v62 }
 0x389   : > { %9211 = vmatmul.mubr.msk.bf16.gmra.mxu1 %vm2236_vm1, %v3140_v8  ;;  %v12579_v8 = vpop.f32.mrf.mxu1 }
 0x38a   : > { %9214 = vmatprep.mubr.msk.bf16.mxu1 %vm2236_vm1, %v3141_v13  ;;  %v2727_v13 = vadd.f32 %v12296_v47, %v12326_v21  ;;  %v2735_v21 = vadd.f32 %v12316_v23, %v12296_v47 }
 0x38b   : > { %v12584_v32 = vpop.f32.mrf.mxu1 }
 0x38c   : > { %10213 = vtanh.f32 %v2727_v13 }
 0x38d   : > { %10215 = vtanh.f32 %v2716_v46  ;;  %v12588_v29 = vpop.f32.mrf.mxu1  ;;  %v2764_v46 = vadd.f32 %v12371_v60, %v12296_v47  ;;  %v2783_v60 = vadd.f32 %v12421_v37, %v12296_v47 }
 0x38e   : > { %10217 = vtanh.f32 %v2724_v2  ;;  %v2772_v2 = vadd.f32 %v12296_v47, %v12415_v44  ;;  %v2791_v44 = vadd.f32 %v12296_v47, %v12468_v48 }
 0x38f   : > { %10219 = vtanh.f32 %v2735_v21 }
 0x390   : > { %10221 = vtanh.f32 %v2743_v61  ;;  %v2780_v61 = vadd.f32 %v12403_v6, %v12296_v47  ;;  %v2799_v6 = vadd.f32 %v12460_v11, %v12296_v47 }
 0x391   : > { %9215 = vmatmul.mubr.msk.bf16.gmra.mxu1 %vm2236_vm1, %v3142_v22  ;;  %v2732_v22 = vadd.f32 %v12300_v35, %v12296_v47  ;;  %v2751_v35 = vadd.f32 %v12351_v58, %v12296_v47 }
 0x392   : > { %9218 = vmatprep.mubr.msk.bf16.mxu1 %vm2236_vm1, %v3143_v20  ;;  %v10206_v28 = vpop.eup %10205  ;;  %v12598_v20 = vpop.f32.mrf.mxu1 }
 0x393   : > { %v10208_v57 = vpop.eup %10207  ;;  %10223 = vtanh.f32 %v2732_v22 }
 0x394   : > { %v10210_v34 = vpop.eup %10209  ;;  %v3148_v51 = vpack.c.bf16 %v10204_v49, %v10208_v57  ;;  %v12602_v23 = vpop.f32.mrf.mxu1  ;;  %10225 = vtanh.f32 %v2740_v52  ;;  %v2788_v57 = vadd.f32 %v12296_v47, %v12449_v25  ;;  %v2807_v25 = vadd.f32 %v12296_v47, %v12498_v27 }
 0x395   : > { %v3149_v0 = vpack.c.bf16 %v10206_v28, %v10210_v34  ;;  %v10212_v55 = vpop.eup %10211  ;;  %10227 = vtanh.f32 %v2751_v35  ;;  %v2796_v35 = vadd.f32 %v12441_v31, %v12296_v47  ;;  %v2815_v31 = vadd.f32 %v12492_v12, %v12296_v47 }
 0x396   : > { %v12608_v50 = vpop.f32.mrf.mxu1  ;;  %10229 = vtanh.f32 %v2759_v30 }
 0x397   : > { %10231 = vtanh.f32 %v2748_v40 }
 0x398   : > { %v12616_v62 = vpop.f32.mrf.mxu1 }
 0x399   : > { %9219 = vmatmul.mubr.msk.bf16.gmra.mxu1 %vm2236_vm1, %v3144_v56  ;;  %v10214_v42 = vpop.eup %10213  ;;  %v2756_v56 = vadd.f32 %v12296_v47, %v12381_v14  ;;  %v2775_v14 = vadd.f32 %v12296_v47, %v12437_v19 }
 0x39a   : > { %9222 = vmatprep.mubr.msk.bf16.mxu1 %vm2236_vm1, %v3145_v16  ;;  %v10216_v43 = vpop.eup %10215  ;;  %v12622_v36 = vpop.f32.mrf.mxu1 }
 0x39b   : > { %v10218_v16 = vpop.eup %10217  ;;  %v3150_v38 = vpack.c.bf16 %v10212_v55, %v10216_v43  ;;  %10233 = vtanh.f32 %v2756_v56 }
 0x39c   : > { %v3151_v58 = vpack.c.bf16 %v10214_v42, %v10218_v16  ;;  %v10220_v13 = vpop.eup %10219  ;;  %10235 = vtanh.f32 %v2767_v17  ;;  %v2804_v42 = vadd.f32 %v12296_v47, %v12480_v59  ;;  %v2823_v59 = vadd.f32 %v12296_v47, %v12533_v54 }
 0x39d   : > { %v10222_v39 = vpop.eup %10221  ;;  %10237 = vtanh.f32 %v2775_v14 }
 0x39e   : > { %10239 = vtanh.f32 %v2764_v46 }
 0x39f   : > { %10241 = vtanh.f32 %v2772_v2 }
 0x3a0   : > { %v10224_v15 = vpop.eup %10223  ;;  %10243 = vtanh.f32 %v2783_v60  ;;  %v2836_v60 = vadd.f32 %v12296_v47, %v12547_v53  ;;  %v2847_v53 = vadd.f32 %v12551_v7, %v12296_v47 }
 0x3a1   : > { %9223 = vmatmul.mubr.msk.bf16.gmra.mxu1 %vm2236_vm1, %v3146_v33  ;;  %v10226_v24 = vpop.eup %10225  ;;  %v12630_v33 = vpop.f32.mrf.mxu1  ;;  %10245 = vtanh.f32 %v2791_v44 }
 0x3a2   : > { %9226 = vmatprep.mubr.msk.bf16.mxu1 %vm2236_vm1, %v3147_v63  ;;  %v3152_v63 = vpack.c.bf16 %v10220_v13, %v10224_v15  ;;  %v3153_v1 = vpack.c.bf16 %v10222_v39, %v10226_v24  ;;  %v10228_v19 = vpop.eup %10227  ;;  %10247 = vtanh.f32 %v2780_v61  ;;  %v2820_v13 = vadd.f32 %v12296_v47, %v12514_v3 }
 0x3a3   : > { %v12632_v21 = vpop.f32.mrf.mxu1  ;;  %v10230_v49 = vpop.eup %10229  ;;  %10249 = vtanh.f32 %v2788_v57  ;;  %v2839_v3 = vadd.f32 %v12296_v47, %v12560_v26  ;;  %v2828_v24 = vadd.f32 %v12504_v10, %v12296_v47  ;;  %v12697_v10 = vld [vmem:[%s15266_s2 + $0xb0] ss:$0 sps:$4 sm:$0x11]   ;;  %v2855_v61 = vadd.f32 %v12296_v47, %v12579_v8 }
 0x3a4   : > { %v10232_v22 = vpop.eup %10231  ;;  %10251 = vtanh.f32 %v2799_v6  ;;  %9719 = vmatprep.subr.msk.bf16.mxu0 %vm6798_vm3, %v12697_v10  ;;  %v2844_v57 = vadd.f32 %v12538_v45, %v12296_v47  ;;  %v2863_v45 = vadd.f32 %v12574_v4, %v12296_v47 }
 0x3a5   : > { %v12642_v28 = vpop.f32.mrf.mxu1  ;;  %v3154_v34 = vpack.c.bf16 %v10228_v19, %v10232_v22  ;;  %10253 = vtanh.f32 %v2807_v25 }
 0x3a6   : > { %10255 = vtanh.f32 %v2796_v35 }
 0x3a7   : > { %v12646_v37 = vpop.f32.mrf.mxu1  ;;  %10257 = vtanh.f32 %v2804_v42 }
 0x3a8   : > { %v10234_v52 = vpop.eup %10233  ;;  %10259 = vtanh.f32 %v2815_v31 }
 0x3a9   : > { %9227 = vmatmul.mubr.msk.bf16.gmra.mxu1 %vm2236_vm1, %v3148_v51  ;;  %v3155_v51 = vpack.c.bf16 %v10230_v49, %v10234_v52  ;;  %v10236_v48 = vpop.eup %10235  ;;  %v12656_v55 = vpop.f32.mrf.mxu1  ;;  %10261 = vtanh.f32 %v2823_v59 }
 0x3aa   : > { %9230 = vmatprep.mubr.msk.bf16.mxu1 %vm2236_vm1, %v3149_v0  ;;  %v10238_v0 = vpop.eup %10237 }
 0x3ab   : > { %v10240_v30 = vpop.eup %10239  ;;  %v12660_v43 = vpop.f32.mrf.mxu1 }
 0x3ac   : > { %v10242_v40 = vpop.eup %10241  ;;  %v3156_v56 = vpack.c.bf16 %v10236_v48, %v10240_v30  ;;  %v2860_v30 = vadd.f32 %v12563_v18, %v12296_v47  ;;  %v12732_v18 = vld [vmem:[%s15265_s1 + $0x3] ss:$0 sm:$0xff] }
 0x3ad   : > { %v3157_v11 = vpack.c.bf16 %v10238_v0, %v10242_v40  ;;  %v12666_v27 = vpop.f32.mrf.mxu1  ;;  %v10244_v16 = vpop.eup %10243  ;;  %v2868_v40 = vadd.f32 %v12296_v47, %v12588_v29 }
 0x3af   : > { %v12674_v39 = vpop.f32.mrf.mxu1 }
 0x3b1   : > { %9231 = vmatmul.mubr.msk.bf16.gmra.mxu1 %vm2236_vm1, %v3150_v38  ;;  %v10246_v38 = vpop.eup %10245  ;;  %v12680_v54 = vpop.f32.mrf.mxu1 }
 0x3b2   : > { %9234 = vmatprep.mubr.msk.bf16.mxu1 %vm2236_vm1, %v3151_v58  ;;  %v2812_v58 = vadd.f32 %v12474_v41, %v12296_v47  ;;  %v10248_v17 = vpop.eup %10247  ;;  %v2831_v41 = vadd.f32 %v12520_v9, %v12296_v47 }
 0x3b3   : > { %v10250_v14 = vpop.eup %10249  ;;  %v3158_v46 = vpack.c.bf16 %v10244_v16, %v10248_v17  ;;  %v2887_v16 = vadd.f32 %v12732_v18, %v12630_v33  ;;  %v2884_v17 = vadd.f32 %v12732_v18, %v12616_v62 }
 0x3b4   : > { %v3159_v12 = vpack.c.bf16 %v10246_v38, %v10250_v14  ;;  %10263 = vtanh.f32 %v2812_v58  ;;  %v10252_v15 = vpop.eup %10251  ;;  %v2876_v38 = vadd.f32 %v12732_v18, %v12584_v32  ;;  %v2895_v32 = vadd.f32 %v12732_v18, %v12622_v36 }
 0x3b5   : > { %10265 = vtanh.f32 %v2820_v13  ;;  %v10254_v2 = vpop.eup %10253 }
 0x3b6   : > { %10267 = vtanh.f32 %v2831_v41  ;;  %v2903_v41 = vadd.f32 %v12732_v18, %v12656_v55 }
 0x3b7   : > { %10269 = vtanh.f32 %v2839_v3  ;;  %v2892_v3 = vadd.f32 %v12732_v18, %v12608_v50  ;;  %v2911_v50 = vadd.f32 %v12732_v18, %v12646_v37  ;;  %v2916_v37 = vadd.f32 %v12732_v18, %v12666_v27 }
 0x3b8   : > { %10271 = vtanh.f32 %v2828_v24 }
 0x3b9   : > { %9235 = vmatmul.mubr.msk.bf16.gmra.mxu1 %vm2236_vm1, %v3152_v63  ;;  %10273 = vtanh.f32 %v2836_v60 }
 0x3ba   : > { %9238 = vmatprep.mubr.msk.bf16.mxu1 %vm2236_vm1, %v3153_v1  ;;  %v10256_v1 = vpop.eup %10255  ;;  %10275 = vtanh.f32 %v2847_v53 }
 0x3bb   : > { %v10258_v19 = vpop.eup %10257  ;;  %v3160_v44 = vpack.c.bf16 %v10252_v15, %v10256_v1  ;;  %10277 = vtanh.f32 %v2855_v61  ;;  %v2900_v1 = vadd.f32 %v12732_v18, %v12642_v28  ;;  %v12771_v28 = vld [vmem:[%s15265_s1 + $0x4] ss:$0 sm:$0xff] }
 0x3bc   : > { %v3161_v9 = vpack.c.bf16 %v10254_v2, %v10258_v19  ;;  %v10260_v26 = vpop.eup %10259  ;;  %10279 = vtanh.f32 %v2844_v57  ;;  %v2908_v57 = vadd.f32 %v12732_v18, %v12632_v21 }
 0x3bd   : > { %v10262_v22 = vpop.eup %10261 }
 0x3c1   : > { %9239 = vmatmul.mubr.msk.bf16.gmra.mxu1 %vm2236_vm1, %v3154_v34  ;;  %v12686_v63 = vpop.f32.mrf.mxu1  ;;  %v10264_v34 = vpop.eup %10263 }
 0x3c2   : > { %9242 = vmatprep.mubr.msk.bf16.mxu1 %vm2236_vm1, %v3155_v51  ;;  %v2852_v51 = vadd.f32 %v12296_v47, %v12568_v5  ;;  %v10266_v6 = vpop.eup %10265  ;;  %v3162_v7 = vpack.c.bf16 %v10260_v26, %v10264_v34  ;;  %v2871_v5 = vadd.f32 %v12296_v47, %v12602_v23  ;;  %v2879_v47 = vadd.f32 %v12732_v18, %v12598_v20 }
 0x3c3   : > { %v12690_v49 = vpop.f32.mrf.mxu1  ;;  %v3163_v48 = vpack.c.bf16 %v10262_v22, %v10266_v6  ;;  %v10268_v0 = vpop.eup %10267  ;;  %v2919_v26 = vadd.f32 %v12732_v18, %v12680_v54 }
 0x3c4   : > { %10281 = vtanh.f32 %v2852_v51  ;;  %v10270_v35 = vpop.eup %10269 }
 0x3c5   : > { %v12707_v52 = vpop.f32.mrf.mxu1  ;;  %v10272_v42 = vpop.eup %10271  ;;  %10283 = vtanh.f32 %v2863_v45 }
 0x3c6   : > { %v3164_v31 = vpack.c.bf16 %v10268_v0, %v10272_v42  ;;  %10285 = vtanh.f32 %v2871_v5 }
 0x3c7   : > { %v12711_v8 = vpop.f32.mrf.mxu1  ;;  %10287 = vtanh.f32 %v2860_v30 }
 0x3c8   : > { %10289 = vtanh.f32 %v2868_v40  ;;  %v6800_v40 = vsel %vm6798_vm3, %v12697_v10, 0  ;;  %v2932_v10 = vadd.f32 %v12732_v18, %v12690_v49 }
 0x3c9   : > { %9243 = vmatmul.mubr.msk.bf16.gmra.mxu1 %vm2236_vm1, %v3156_v56  ;;  %v10274_v56 = vpop.eup %10273  ;;  %10291 = vtanh.f32 %v2879_v47  ;;  %v2924_v47 = vadd.f32 %v12732_v18, %v12660_v43 }
 0x3ca   : > { %9246 = vmatprep.mubr.msk.bf16.mxu1 %vm2236_vm1, %v3157_v11  ;;  %v3165_v4 = vpack.c.bf16 %v10270_v35, %v10274_v56  ;;  %v10276_v23 = vpop.eup %10275  ;;  %10293 = vtanh.f32 %v2887_v16  ;;  %v2927_v35 = vadd.f32 %v12732_v18, %v12674_v39 }
 0x3cb   : > { %v10278_v59 = vpop.eup %10277  ;;  %10295 = vtanh.f32 %v2876_v38 }
 0x3cc   : > { %v10280_v58 = vpop.eup %10279  ;;  %10297 = vtanh.f32 %v2884_v17 }
 0x3cd   : > { %10299 = vtanh.f32 %v2895_v32 }
 0x3ce   : > { %10301 = vtanh.f32 %v2903_v41 }
 0x3cf   : > { %10303 = vtanh.f32 %v2892_v3 }
 0x3d0   : > { %10305 = vtanh.f32 %v2900_v1 }
 0x3d1   : > { %9247 = vmatmul.mubr.msk.bf16.gmra.mxu1 %vm2236_vm1, %v3158_v46  ;;  %v10282_v13 = vpop.eup %10281  ;;  %v3166_v46 = vpack.c.bf16 %v10276_v23, %v10280_v58  ;;  %10307 = vtanh.f32 %v2911_v50 }
 0x3d2   : > { %9250 = vmatprep.mubr.msk.bf16.mxu1 %vm2236_vm1, %v3159_v12  ;;  %v3167_v20 = vpack.c.bf16 %v10278_v59, %v10282_v13  ;;  %v10284_v62 = vpop.eup %10283  ;;  %10309 = vtanh.f32 %v2919_v26 }
 0x3d3   : > { %v10286_v15 = vpop.eup %10285  ;;  %10311 = vtanh.f32 %v2908_v57 }
 0x3d4   : > { %v10288_v24 = vpop.eup %10287  ;;  %10313 = vtanh.f32 %v2916_v37 }
 0x3d5   : > { %v10290_v60 = vpop.eup %10289  ;;  %v3168_v36 = vpack.c.bf16 %v10284_v62, %v10288_v24  ;;  %10315 = vtanh.f32 %v2927_v35 }
 0x3d6   : > { %v10292_v53 = vpop.eup %10291 }
 0x3d7   : > { %v10294_v22 = vpop.eup %10293 }
 0x3d8   : > { %v10296_v51 = vpop.eup %10295 }
 0x3d9   : > { %9251 = vmatmul.mubr.msk.bf16.gmra.mxu1 %vm2236_vm1, %v3160_v44  ;;  %v12717_v25 = vpop.f32.mrf.mxu1  ;;  %v3169_v44 = vpack.c.bf16 %v10286_v15, %v10290_v60  ;;  %v10298_v6 = vpop.eup %10297 }
 0x3da   : > { %9254 = vmatprep.mubr.msk.bf16.mxu1 %vm2236_vm1, %v3161_v9  ;;  %v3171_v21 = vpack.c.bf16 %v10294_v22, %v10298_v6  ;;  %v10300_v56 = vpop.eup %10299 }
 0x3db   : > { %v12725_v11 = vpop.f32.mrf.mxu1  ;;  %v10302_v39 = vpop.eup %10301 }
 0x3dc   : > { %v10304_v16 = vpop.eup %10303 }
 0x3dd   : > { %v12736_v29 = vpop.f32.mrf.mxu1  ;;  %v3172_v38 = vpack.c.bf16 %v10300_v56, %v10304_v16 }
 0x3de   : > { %v2959_v22 = vadd.f32 %v12732_v18, %v12736_v29  ;;  %v2956_v29 = vadd.f32 %v12732_v18, %v12717_v25 }
 0x3df   : > { %v12744_v14 = vpop.f32.mrf.mxu1 }
 0x3e0   : > { %v2951_v15 = vadd.f32 %v12732_v18, %v12744_v14 }
 0x3e1   : > { %9255 = vmatmul.mubr.msk.bf16.gmra.mxu1 %vm2236_vm1, %v3162_v7 }
 0x3e2   : > { %9258 = vmatprep.mubr.msk.bf16.mxu1 %vm2236_vm1, %v3163_v48  ;;  %v3170_v48 = vpack.c.bf16 %v10292_v53, %v10296_v51 }
 0x3e9   : > { %9259 = vmatmul.mubr.msk.bf16.gmra.mxu1 %vm2236_vm1, %v3164_v31  ;;  %v2935_v31 = vadd.f32 %v12732_v18, %v12711_v8  ;;  %v10306_v8 = vpop.eup %10305 }
 0x3ea   : > { %9262 = vmatprep.mubr.msk.bf16.mxu1 %vm2236_vm1, %v3165_v4  ;;  %v3173_v17 = vpack.c.bf16 %v10302_v39, %v10306_v8  ;;  %v10308_v41 = vpop.eup %10307 }
 0x3eb   : > { %10317 = vtanh.f32 %v2935_v31  ;;  %v10310_v24 = vpop.eup %10309 }
 0x3ec   : > { %10319 = vtanh.f32 %v2924_v47  ;;  %v10312_v60 = vpop.eup %10311 }
 0x3ed   : > { %10321 = vtanh.f32 %v2932_v10  ;;  %v10314_v14 = vpop.eup %10313 }
 0x3ee   : > { %v10316_v51 = vpop.eup %10315 }
 0x3f1   : > { %v12746_v12 = vpop.f32.mrf.mxu1  ;;  %9263 = vmatmul.mubr.msk.bf16.gmra.mxu1 %vm2236_vm1, %v3166_v46 }
 0x3f2   : > { %9266 = vmatprep.mubr.msk.bf16.mxu1 %vm2236_vm1, %v3167_v20  ;;  %v2943_v20 = vadd.f32 %v12732_v18, %v12707_v52  ;;  %v2940_v52 = vadd.f32 %v12732_v18, %v12686_v63  ;;  %v3174_v63 = vpack.c.bf16 %v10308_v41, %v10312_v60 }
 0x3f3   : > { %v12752_v33 = vpop.f32.mrf.mxu1 }
 0x3f4   : > { %10323 = vtanh.f32 %v2943_v20 }
 0x3f5   : > { %v12758_v2 = vpop.f32.mrf.mxu1  ;;  %10325 = vtanh.f32 %v2951_v15 }
 0x3f6   : > { %10327 = vtanh.f32 %v2940_v52  ;;  %v2975_v31 = vadd.f32 %v12732_v18, %v12758_v2  ;;  %v2972_v2 = vadd.f32 %v12732_v18, %v12746_v12 }
 0x3f7   : > { %v12762_v19 = vpop.f32.mrf.mxu1 }
 0x3f8   : > { %v2967_v37 = vadd.f32 %v12732_v18, %v12762_v19 }
 0x3f9   : > { %v9172_v9 = vpop.f32.mrf.mxu1  ;;  %9267 = vmatmul.mubr.msk.bf16.gmra.mxu1 %vm2236_vm1, %v3168_v36  ;;  %v2948_v36 = vadd.f32 %v12732_v18, %v12725_v11 }
 0x3fa   : > { %9270 = vmatprep.mubr.msk.bf16.mxu1 %vm2236_vm1, %v3169_v44  ;;  %v12791_v0 = vadd.f32 %v9172_v9, %v12771_v28 }
 0x3fb   : > { %v3455_v55 = vpop.f32.mrf.mxu1  ;;  %10329 = vtanh.f32 %v2948_v36 }
 0x3fc   : > { %v12776_v61 = vadd.f32 %v12771_v28, %v3455_v55  ;;  %v3175_v55 = vpack.c.bf16 %v10310_v24, %v10314_v14  ;;  %10331 = vtanh.f32 %v2959_v22 }
 0x3fd   : > { %v9173_v34 = vpop.f32.mrf.mxu1  ;;  %10333 = vtanh.f32 %v2967_v37 }
 0x3fe   : > { %4094 = vrot.lane.b32.xlu1 %v12776_v61, %s10887_s9  ;;  %v12785_v54 = vadd.f32 %v9173_v34, %v12771_v28  ;;  %10335 = vtanh.f32 %v2956_v29 }
 0x3ff   : > { %v3458_v7 = vpop.f32.mrf.mxu1 }
 0x400   : > { %v12788_v45 = vadd.f32 %v12771_v28, %v3458_v7  ;;  %v4679_v30 = vpack.c.bf16 %v12785_v54, %v12791_v0  ;;  %v10318_v7 = vpop.eup %10317 }
 0x401   : > { %v9176_v27 = vpop.f32.mrf.mxu1  ;;  %9271 = vmatmul.mubr.msk.bf16.gmra.mxu1 %vm2236_vm1, %v3170_v48 }
 0x402   : > { %v4678_v5 = vpack.c.bf16 %v12788_v45, %v12776_v61  ;;  %9274 = vmatprep.mubr.msk.bf16.mxu1 %vm2236_vm1, %v3171_v21  ;;  %4096 = vrot.lane.b32.xlu0 %v12788_v45, %s10887_s9  ;;  %v12829_v49 = vadd.f32 %v9176_v27, %v12771_v28  ;;  %v10320_v21 = vpop.eup %10319  ;;  %v2964_v27 = vadd.f32 %v12732_v18, %v12752_v33 }
 0x403   : > { %4098 = vrot.lane.b32.xlu1 %v12791_v0, %s10887_s9  ;;  %v3471_v42 = vpop.f32.mrf.mxu1  ;;  %v10322_v19 = vpop.eup %10321  ;;  %v3176_v25 = vpack.c.bf16 %v10316_v51, %v10320_v21 }
 0x404   : > { %v12810_v4 = vadd.f32 %v12771_v28, %v3471_v42  ;;  %9304 = vmatprep.mubr.msk.bf16.mxu0 %vm4757_vm4, %v4678_v5  ;;  %v3177_v42 = vpack.c.bf16 %v10318_v7, %v10322_v19  ;;  %10337 = vtanh.f32 %v2964_v27  ;;  %v10324_v16 = vpop.eup %10323 }
 0x405   : > { %v9177_v23 = vpop.f32.mrf.mxu1  ;;  %9305 = vmatmul.mubr.msk.bf16.vlgmr.msra.gmra.mxu0 %vm4757_vm4, %v4679_v30  ;;  %v10326_v8 = vpop.eup %10325  ;;  %10339 = vtanh.f32 %v2975_v31 }
 0x406   : > { %4100 = vrot.lane.b32.xlu0 %v12785_v54, %s10887_s9  ;;  %9565 = vmatpush3.bf16.msra.mxu0 %v6800_v40  ;;  %v12821_v59 = vadd.f32 %v9177_v23, %v12771_v28  ;;  %v9828_v23 = vld [vmem:[%s15266_s2 + $0xa8] sm:$0xff]   ;;  %10341 = vtanh.f32 %v2972_v2 }
 0x407   : > { %4102 = vrot.lane.b32.xlu1 %v12810_v4, %s10887_s9  ;;  %v3474_v43 = vpop.f32.mrf.mxu1  ;;  %9566 = vmatprep.subr.bf16.mxu0 %v9828_v23 }
 0x408   : > { %v12826_v58 = vadd.f32 %v12771_v28, %v3474_v43  ;;  %v4681_v32 = vpack.c.bf16 %v12821_v59, %v12829_v49 }
 0x409   : > { %v9180_v13 = vpop.f32.mrf.mxu1  ;;  %9275 = vmatmul.mubr.msk.bf16.gmra.mxu1 %vm2236_vm1, %v3172_v38  ;;  %v10328_v38 = vpop.eup %10327 }
 0x40a   : > { %v4680_v46 = vpack.c.bf16 %v12826_v58, %v12810_v4  ;;  %9278 = vmatprep.mubr.msk.bf16.mxu1 %vm2236_vm1, %v3173_v17  ;;  %4104 = vrot.lane.b32.xlu0 %v12826_v58, %s10887_s9  ;;  %v12865_v11 = vadd.f32 %v9180_v13, %v12771_v28  ;;  %v10330_v17 = vpop.eup %10329  ;;  %v3178_v20 = vpack.c.bf16 %v10324_v16, %v10328_v38 }
 0x40b   : > { %4106 = vrot.lane.b32.xlu1 %v12829_v49, %s10887_s9  ;;  %v3487_v62 = vpop.f32.mrf.mxu1  ;;  %9567 = vmatpush3.bf16.msra.mxu0 %v9828_v23  ;;  %v3179_v12 = vpack.c.bf16 %v10326_v8, %v10330_v17  ;;  %v10332_v52 = vpop.eup %10331 }
 0x40c   : > { %v12846_v3 = vadd.f32 %v12771_v28, %v3487_v62  ;;  %9308 = vmatprep.mubr.msk.bf16.mxu0 %vm4757_vm4, %v4680_v46  ;;  %v10334_v60 = vpop.eup %10333 }
 0x40d   : > { %v9181_v1 = vpop.f32.mrf.mxu1  ;;  %9309 = vmatmul.mubr.msk.bf16.gmra.mxu0 %vm4757_vm4, %v4681_v32  ;;  %v10336_v14 = vpop.eup %10335 }
 0x40e   : > { %4108 = vrot.lane.b32.xlu0 %v12821_v59, %s10887_s9  ;;  %v12857_v44 = vadd.f32 %v9181_v1, %v12771_v28 }
 0x40f   : > { %4110 = vrot.lane.b32.xlu1 %v12846_v3, %s10887_s9  ;;  %v3490_v9 = vpop.f32.mrf.mxu1 }
 0x410   : > { %v12862_v50 = vadd.f32 %v12771_v28, %v3490_v9  ;;  %v4683_v57 = vpack.c.bf16 %v12857_v44, %v12865_v11 }
 0x411   : > { %v9184_v53 = vpop.f32.mrf.mxu1  ;;  %9279 = vmatmul.mubr.msk.bf16.gmra.mxu1 %vm2236_vm1, %v3174_v63  ;;  %v10338_v9 = vpop.eup %10337 }
 0x412   : > { %v4682_v26 = vpack.c.bf16 %v12862_v50, %v12846_v3  ;;  %9282 = vmatprep.mubr.msk.bf16.mxu1 %vm2236_vm1, %v3175_v55  ;;  %4112 = vrot.lane.b32.xlu0 %v12862_v50, %s10887_s9  ;;  %v12901_v33 = vadd.f32 %v9184_v53, %v12771_v28  ;;  %v3180_v53 = vpack.c.bf16 %v10332_v52, %v10336_v14  ;;  %v10340_v29 = vpop.eup %10339 }
 0x413   : > { %4114 = vrot.lane.b32.xlu1 %v12865_v11, %s10887_s9  ;;  %v3503_v34 = vpop.f32.mrf.mxu1  ;;  %v3181_v22 = vpack.c.bf16 %v10334_v60, %v10338_v9  ;;  %v10342_v27 = vpop.eup %10341 }
 0x414   : > { %v12882_v6 = vadd.f32 %v12771_v28, %v3503_v34  ;;  %9312 = vmatprep.mubr.msk.bf16.mxu0 %vm4757_vm4, %v4682_v26 }
 0x415   : > { %v9185_v48 = vpop.f32.mrf.mxu1  ;;  %9313 = vmatmul.mubr.msk.bf16.gmra.mxu0 %vm4757_vm4, %v4683_v57 }
 0x416   : > { %4116 = vrot.lane.b32.xlu0 %v12857_v44, %s10887_s9  ;;  %v12893_v5 = vadd.f32 %v9185_v48, %v12771_v28 }
 0x417   : > { %4118 = vrot.lane.b32.xlu1 %v12882_v6, %s10887_s9  ;;  %v3506_v35 = vpop.f32.mrf.mxu1 }
 0x418   : > { %v12898_v30 = vadd.f32 %v12771_v28, %v3506_v35  ;;  %v4685_v39 = vpack.c.bf16 %v12893_v5, %v12901_v33 }
 0x419   : > { %v9188_v40 = vpop.f32.mrf.mxu1  ;;  %9283 = vmatmul.mubr.msk.bf16.gmra.mxu1 %vm2236_vm1, %v3176_v25  ;;  %v3182_v25 = vpack.c.bf16 %v10340_v29, %v10342_v27 }
 0x41a   : > { %v4684_v56 = vpack.c.bf16 %v12898_v30, %v12882_v6  ;;  %9286 = vmatprep.mubr.msk.bf16.mxu1 %vm2236_vm1, %v3177_v42  ;;  %4120 = vrot.lane.b32.xlu0 %v12898_v30, %s10887_s9  ;;  %v12936_v32 = vadd.f32 %v9188_v40, %v12771_v28 }
 0x41b   : > { %4122 = vrot.lane.b32.xlu1 %v12901_v33, %s10887_s9  ;;  %v3519_v47 = vpop.f32.mrf.mxu1 }
 0x41c   : > { %v12919_v10 = vadd.f32 %v12771_v28, %v3519_v47  ;;  %9316 = vmatprep.mubr.msk.bf16.mxu0 %vm4757_vm4, %v4684_v56 }
 0x41d   : > { %v9189_v43 = vpop.f32.mrf.mxu1  ;;  %9317 = vmatmul.mubr.msk.bf16.gmra.mxu0 %vm4757_vm4, %v4685_v39 }
 0x41e   : > { %4124 = vrot.lane.b32.xlu0 %v12893_v5, %s10887_s9  ;;  %v12928_v13 = vadd.f32 %v9189_v43, %v12771_v28 }
 0x41f   : > { %4126 = vrot.lane.b32.xlu1 %v12919_v10, %s10887_s9  ;;  %v3522_v46 = vpop.f32.mrf.mxu1 }
 0x420   : > { %v12933_v18 = vadd.f32 %v12771_v28, %v3522_v46  ;;  %v4687_v15 = vpack.c.bf16 %v12928_v13, %v12936_v32 }
 0x421   : > { %v9192_v62 = vpop.f32.mrf.mxu1  ;;  %9287 = vmatmul.mubr.msk.bf16.gmra.mxu1 %vm2236_vm1, %v3178_v20 }
 0x422   : > { %v4686_v41 = vpack.c.bf16 %v12933_v18, %v12919_v10  ;;  %9290 = vmatprep.mubr.msk.bf16.mxu1 %vm2236_vm1, %v3179_v12  ;;  %4128 = vrot.lane.b32.xlu0 %v12933_v18, %s10887_s9  ;;  %v12964_v57 = vadd.f32 %v9192_v62, %v12771_v28 }
 0x423   : > { %4130 = vrot.lane.b32.xlu1 %v12936_v32, %s10887_s9  ;;  %v3535_v24 = vpop.f32.mrf.mxu1 }
 0x424   : > { %v12949_v1 = vadd.f32 %v12771_v28, %v3535_v24  ;;  %9320 = vmatprep.mubr.msk.bf16.mxu0 %vm4757_vm4, %v4686_v41 }
 0x425   : > { %v9193_v36 = vpop.f32.mrf.mxu1  ;;  %9321 = vmatmul.mubr.msk.bf16.gmra.mxu0 %vm4757_vm4, %v4687_v15 }
 0x426   : > { %4132 = vrot.lane.b32.xlu0 %v12928_v13, %s10887_s9  ;;  %v12956_v63 = vadd.f32 %v9193_v36, %v12771_v28 }
 0x427   : > { %4134 = vrot.lane.b32.xlu1 %v12949_v1, %s10887_s9  ;;  %v3538_v55 = vpop.f32.mrf.mxu1 }
 0x428   : > { %v12961_v26 = vadd.f32 %v12771_v28, %v3538_v55  ;;  %v4689_v37 = vpack.c.bf16 %v12956_v63, %v12964_v57 }
 0x429   : > { %v9196_v34 = vpop.f32.mrf.mxu1  ;;  %9291 = vmatmul.mubr.msk.bf16.gmra.mxu1 %vm2236_vm1, %v3180_v53 }
 0x42a   : > { %v4688_v51 = vpack.c.bf16 %v12961_v26, %v12949_v1  ;;  %4136 = vrot.lane.b32.xlu0 %v12961_v26, %s10887_s9  ;;  %9294 = vmatprep.mubr.msk.bf16.mxu1 %vm2236_vm1, %v3181_v22  ;;  %v12992_v40 = vadd.f32 %v9196_v34, %v12771_v28 }
 0x42b   : > { %4138 = vrot.lane.b32.xlu1 %v12964_v57, %s10887_s9  ;;  %v3551_v7 = vpop.f32.mrf.mxu1 }
 0x42c   : > { %v12977_v48 = vadd.f32 %v12771_v28, %v3551_v7  ;;  %9324 = vmatprep.mubr.msk.bf16.mxu0 %vm4757_vm4, %v4688_v51 }
 0x42d   : > { %v9197_v21 = vpop.f32.mrf.mxu1  ;;  %9325 = vmatmul.mubr.msk.bf16.gmra.mxu0 %vm4757_vm4, %v4689_v37 }
 0x42e   : > { %4140 = vrot.lane.b32.xlu0 %v12956_v63, %s10887_s9  ;;  %v12984_v19 = vadd.f32 %v9197_v21, %v12771_v28 }
 0x42f   : > { %4142 = vrot.lane.b32.xlu1 %v12977_v48, %s10887_s9  ;;  %v3554_v35 = vpop.f32.mrf.mxu1 }
 0x430   : > { %v12989_v42 = vadd.f32 %v12771_v28, %v3554_v35  ;;  %v4691_v39 = vpack.c.bf16 %v12984_v19, %v12992_v40 }
 0x431   : > { %v9200_v56 = vpop.f32.mrf.mxu1  ;;  %9295 = vmatmul.mubr.msk.bf16.gmra.mxu1 %vm2236_vm1, %v3182_v25 }
 0x432   : > { %v4690_v31 = vpack.c.bf16 %v12989_v42, %v12977_v48  ;;  %4144 = vrot.lane.b32.xlu0 %v12989_v42, %s10887_s9  ;;  %v13019_v38 = vadd.f32 %v9200_v56, %v12771_v28 }
 0x433   : > { %4146 = vrot.lane.b32.xlu1 %v12992_v40, %s10887_s9  ;;  %v3567_v47 = vpop.f32.mrf.mxu1 }
 0x434   : > { %v13004_v23 = vadd.f32 %v12771_v28, %v3567_v47  ;;  %9328 = vmatprep.mubr.msk.bf16.mxu0 %vm4757_vm4, %v4690_v31 }
 0x435   : > { %v9201_v16 = vpop.f32.mrf.mxu1  ;;  %9329 = vmatmul.mubr.msk.bf16.gmra.mxu0 %vm4757_vm4, %v4691_v39 }
 0x436   : > { %4148 = vrot.lane.b32.xlu0 %v12984_v19, %s10887_s9  ;;  %v13011_v8 = vadd.f32 %v9201_v16, %v12771_v28 }
 0x437   : > { %4150 = vrot.lane.b32.xlu1 %v13004_v23, %s10887_s9  ;;  %v3570_v2 = vpop.f32.mrf.mxu1 }
 0x438   : > { %v13016_v43 = vadd.f32 %v12771_v28, %v3570_v2  ;;  %v4693_v20 = vpack.c.bf16 %v13011_v8, %v13019_v38 }
 0x439   : > { %v9204_v17 = vpop.f32.mrf.mxu1 }
 0x43a   : > { %v4692_v46 = vpack.c.bf16 %v13016_v43, %v13004_v23  ;;  %4152 = vrot.lane.b32.xlu0 %v13016_v43, %s10887_s9  ;;  %v13045_v60 = vadd.f32 %v9204_v17, %v12771_v28 }
 0x43b   : > { %4154 = vrot.lane.b32.xlu1 %v13019_v38, %s10887_s9  ;;  %v3583_v12 = vpop.f32.mrf.mxu1 }
 0x43c   : > { %v13030_v62 = vadd.f32 %v12771_v28, %v3583_v12  ;;  %9332 = vmatprep.mubr.msk.bf16.mxu0 %vm4757_vm4, %v4692_v46 }
 0x43d   : > { %v9205_v41 = vpop.f32.mrf.mxu1  ;;  %9333 = vmatmul.mubr.msk.bf16.gmra.mxu0 %vm4757_vm4, %v4693_v20 }
 0x43e   : > { %4156 = vrot.lane.b32.xlu0 %v13011_v8, %s10887_s9  ;;  %v13037_v15 = vadd.f32 %v9205_v41, %v12771_v28 }
 0x43f   : > { %4158 = vrot.lane.b32.xlu1 %v13030_v62, %s10887_s9  ;;  %v3586_v24 = vpop.f32.mrf.mxu1 }
 0x440   : > { %v13042_v52 = vadd.f32 %v12771_v28, %v3586_v24  ;;  %v4695_v9 = vpack.c.bf16 %v13037_v15, %v13045_v60 }
 0x441   : > { %v9208_v36 = vpop.f32.mrf.mxu1 }
 0x442   : > { %v4694_v14 = vpack.c.bf16 %v13042_v52, %v13030_v62  ;;  %4160 = vrot.lane.b32.xlu0 %v13042_v52, %s10887_s9  ;;  %v13071_v7 = vadd.f32 %v9208_v36, %v12771_v28 }
 0x443   : > { %4162 = vrot.lane.b32.xlu1 %v13045_v60, %s10887_s9  ;;  %v3599_v55 = vpop.f32.mrf.mxu1 }
 0x444   : > { %v13056_v53 = vadd.f32 %v12771_v28, %v3599_v55  ;;  %9336 = vmatprep.mubr.msk.bf16.mxu0 %vm4757_vm4, %v4694_v14 }
 0x445   : > { %v9209_v22 = vpop.f32.mrf.mxu1  ;;  %9337 = vmatmul.mubr.msk.bf16.gmra.mxu0 %vm4757_vm4, %v4695_v9 }
 0x446   : > { %4164 = vrot.lane.b32.xlu0 %v13037_v15, %s10887_s9  ;;  %v13063_v34 = vadd.f32 %v9209_v22, %v12771_v28 }
 0x447   : > { %4166 = vrot.lane.b32.xlu1 %v13056_v53, %s10887_s9  ;;  %v3602_v51 = vpop.f32.mrf.mxu1 }
 0x448   : > { %v13068_v37 = vadd.f32 %v12771_v28, %v3602_v51  ;;  %v4697_v27 = vpack.c.bf16 %v13063_v34, %v13071_v7 }
 0x449   : > { %v9212_v29 = vpop.f32.mrf.mxu1 }
 0x44a   : > { %v4696_v21 = vpack.c.bf16 %v13068_v37, %v13056_v53  ;;  %4168 = vrot.lane.b32.xlu0 %v13068_v37, %s10887_s9  ;;  %v13097_v16 = vadd.f32 %v9212_v29, %v12771_v28 }
 0x44b   : > { %4170 = vrot.lane.b32.xlu1 %v13071_v7, %s10887_s9  ;;  %v3615_v35 = vpop.f32.mrf.mxu1 }
 0x44c   : > { %v13082_v25 = vadd.f32 %v12771_v28, %v3615_v35  ;;  %9340 = vmatprep.mubr.msk.bf16.mxu0 %vm4757_vm4, %v4696_v21  ;;  %v9829_v21 = vld [vmem:[%s15266_s2 + $0xa0] sm:$0xff]  }
 0x44d   : > { %v9213_v56 = vpop.f32.mrf.mxu1  ;;  %9341 = vmatmul.mubr.msk.bf16.gmra.mxu0 %vm4757_vm4, %v4697_v27  ;;  %9568 = vmatprep.subr.bf16.mxu0 %v9829_v21 }
 0x44e   : > { %4172 = vrot.lane.b32.xlu0 %v13063_v34, %s10887_s9  ;;  %v13089_v31 = vadd.f32 %v9213_v56, %v12771_v28  ;;  %9569 = vmatpush3.bf16.msra.mxu0 %v9829_v21 }
 0x44f   : > { %4174 = vrot.lane.b32.xlu1 %v13082_v25, %s10887_s9  ;;  %v3618_v39 = vpop.f32.mrf.mxu1 }
 0x450   : > { %v13094_v47 = vadd.f32 %v12771_v28, %v3618_v39  ;;  %v4699_v46 = vpack.c.bf16 %v13089_v31, %v13097_v16 }
 0x451   : > { %v9216_v2 = vpop.f32.mrf.mxu1 }
 0x452   : > { %v4698_v17 = vpack.c.bf16 %v13094_v47, %v13082_v25  ;;  %4176 = vrot.lane.b32.xlu0 %v13094_v47, %s10887_s9  ;;  %v13123_v9 = vadd.f32 %v9216_v2, %v12771_v28 }
 0x453   : > { %4178 = vrot.lane.b32.xlu1 %v13097_v16, %s10887_s9  ;;  %v3631_v20 = vpop.f32.mrf.mxu1 }
 0x454   : > { %v13108_v12 = vadd.f32 %v12771_v28, %v3631_v20  ;;  %9344 = vmatprep.mubr.msk.bf16.mxu0 %vm4757_vm4, %v4698_v17 }
 0x455   : > { %v9217_v41 = vpop.f32.mrf.mxu1  ;;  %9345 = vmatmul.mubr.msk.bf16.gmra.mxu0 %vm4757_vm4, %v4699_v46 }
 0x456   : > { %4180 = vrot.lane.b32.xlu0 %v13089_v31, %s10887_s9  ;;  %v13115_v24 = vadd.f32 %v9217_v41, %v12771_v28 }
 0x457   : > { %4182 = vrot.lane.b32.xlu1 %v13108_v12, %s10887_s9  ;;  %v3634_v36 = vpop.f32.mrf.mxu1 }
 0x458   : > { %v13120_v14 = vadd.f32 %v12771_v28, %v3634_v36  ;;  %v4701_v51 = vpack.c.bf16 %v13115_v24, %v13123_v9 }
 0x459   : > { %v9220_v55 = vpop.f32.mrf.mxu1 }
 0x45a   : > { %v4700_v22 = vpack.c.bf16 %v13120_v14, %v13108_v12  ;;  %4184 = vrot.lane.b32.xlu0 %v13120_v14, %s10887_s9  ;;  %v13152_v17 = vadd.f32 %v9220_v55, %v12771_v28 }
 0x45b   : > { %4186 = vrot.lane.b32.xlu1 %v13123_v9, %s10887_s9  ;;  %v3647_v29 = vpop.f32.mrf.mxu1 }
 0x45c   : > { %v13137_v27 = vadd.f32 %v12771_v28, %v3647_v29  ;;  %9348 = vmatprep.mubr.msk.bf16.mxu0 %vm4757_vm4, %v4700_v22  ;;  %15404 = vst [vmem:[#allocation45_spill] sm:$0xff] %v13152_v17 }
 0x45d   : > { %v9221_v35 = vpop.f32.mrf.mxu1  ;;  %9349 = vmatmul.mubr.msk.bf16.gmra.mxu0 %vm4757_vm4, %v4701_v51 }
 0x45e   : > { %4188 = vrot.lane.b32.xlu0 %v13115_v24, %s10887_s9  ;;  %v13144_v56 = vadd.f32 %v9221_v35, %v12771_v28 }
 0x45f   : > { %4190 = vrot.lane.b32.xlu1 %v13137_v27, %s10887_s9  ;;  %v3650_v39 = vpop.f32.mrf.mxu1 }
 0x460   : > { %15402 = vst [vmem:[#allocation3_spill] sm:$0xff] %v13144_v56  ;;  %v13149_v2 = vadd.f32 %v12771_v28, %v3650_v39  ;;  %v4703_v41 = vpack.c.bf16 %v13144_v56, %v13152_v17 }
 0x461   : > { %v9224_v46 = vpop.f32.mrf.mxu1 }
 0x462   : > { %15403 = vst [vmem:[#allocation4_spill] sm:$0xff] %v13149_v2  ;;  %v4702_v20 = vpack.c.bf16 %v13149_v2, %v13137_v27  ;;  %4192 = vrot.lane.b32.xlu0 %v13149_v2, %s10887_s9  ;;  %v13178_v35 = vadd.f32 %v9224_v46, %v12771_v28 }
 0x463   : > { %4194 = vrot.lane.b32.xlu1 %v13152_v17, %s10887_s9  ;;  %v3663_v36 = vpop.f32.mrf.mxu1 }
 0x464   : > { %v13163_v22 = vadd.f32 %v12771_v28, %v3663_v36  ;;  %9352 = vmatprep.mubr.msk.bf16.mxu0 %vm4757_vm4, %v4702_v20  ;;  %15408 = vst [vmem:[#allocation2_spill] sm:$0xff] %v13178_v35 }
 0x465   : > { %v9225_v55 = vpop.f32.mrf.mxu1  ;;  %9353 = vmatmul.mubr.msk.bf16.gmra.mxu0 %vm4757_vm4, %v4703_v41 }
 0x466   : > { %15405 = vst [vmem:[#allocation5_spill] sm:$0xff] %v13163_v22  ;;  %4196 = vrot.lane.b32.xlu0 %v13144_v56, %s10887_s9  ;;  %v13170_v51 = vadd.f32 %v9225_v55, %v12771_v28 }
 0x467   : > { %4198 = vrot.lane.b32.xlu1 %v13163_v22, %s10887_s9  ;;  %v3666_v29 = vpop.f32.mrf.mxu1 }
 0x468   : > { %15406 = vst [vmem:[#allocation6_spill] sm:$0xff] %v13170_v51  ;;  %v13175_v21 = vadd.f32 %v12771_v28, %v3666_v29  ;;  %v4705_v41 = vpack.c.bf16 %v13170_v51, %v13178_v35 }
 0x469   : > { %v9228_v39 = vpop.f32.mrf.mxu1 }
 0x46a   : > { %15407 = vst [vmem:[#allocation47_spill] sm:$0xff] %v13175_v21  ;;  %v4704_v20 = vpack.c.bf16 %v13175_v21, %v13163_v22  ;;  %4200 = vrot.lane.b32.xlu0 %v13175_v21, %s10887_s9  ;;  %v13204_v22 = vadd.f32 %v9228_v39, %v12771_v28 }
 0x46b   : > { %4202 = vrot.lane.b32.xlu1 %v13178_v35, %s10887_s9  ;;  %v3679_v36 = vpop.f32.mrf.mxu1 }
 0x46c   : > { %v13189_v55 = vadd.f32 %v12771_v28, %v3679_v36  ;;  %9356 = vmatprep.mubr.msk.bf16.mxu0 %vm4757_vm4, %v4704_v20  ;;  %15411 = vst [vmem:[#allocation9_spill] sm:$0xff] %v13204_v22 }
 0x46d   : > { %v9229_v46 = vpop.f32.mrf.mxu1  ;;  %9357 = vmatmul.mubr.msk.bf16.gmra.mxu0 %vm4757_vm4, %v4705_v41 }
 0x46e   : > { %15409 = vst [vmem:[#allocation7_spill] sm:$0xff] %v13189_v55  ;;  %4204 = vrot.lane.b32.xlu0 %v13170_v51, %s10887_s9  ;;  %v13196_v29 = vadd.f32 %v9229_v46, %v12771_v28 }
 0x46f   : > { %4206 = vrot.lane.b32.xlu1 %v13189_v55, %s10887_s9  ;;  %v3682_v21 = vpop.f32.mrf.mxu1 }
 0x470   : > { %v13201_v35 = vadd.f32 %v12771_v28, %v3682_v21  ;;  %v4095_v36 = vpop.permute.xlu1 %4094  ;;  %v4707_v46 = vpack.c.bf16 %v13196_v29, %v13204_v22 }
 0x471   : > { %v9232_v20 = vpop.f32.mrf.mxu1  ;;  %v4478_v39 = vmul.f32 %v4095_v36, %v12776_v61 }
 0x472   : > { %15410 = vst [vmem:[#allocation8_spill] sm:$0xff] %v13201_v35  ;;  %v4706_v41 = vpack.c.bf16 %v13201_v35, %v13189_v55  ;;  %4208 = vrot.lane.b32.xlu0 %v13201_v35, %s10887_s9 }
 0x473   : > { %4210 = vrot.lane.b32.xlu1 %v13204_v22, %s10887_s9  ;;  %v3695_v51 = vpop.f32.mrf.mxu1 }
 0x474   : > { %v13215_v21 = vadd.f32 %v12771_v28, %v3695_v51  ;;  %v4097_v56 = vpop.permute.xlu0 %4096  ;;  %9360 = vmatprep.mubr.msk.bf16.mxu0 %vm4757_vm4, %v4706_v41 }
 0x475   : > { %v4479_v55 = vmul.f32 %v4097_v56, %v12788_v45  ;;  %v4099_v17 = vpop.permute.xlu1 %4098  ;;  %v9233_v2 = vpop.f32.mrf.mxu1  ;;  %9361 = vmatmul.mubr.msk.bf16.gmra.mxu0 %vm4757_vm4, %v4707_v46  ;;  %v13232_v56 = vadd.f32 %v9232_v20, %v12771_v28 }
 0x476   : > { %4212 = vrot.lane.b32.xlu0 %v13196_v29, %s10887_s9  ;;  %v13224_v35 = vadd.f32 %v9233_v2, %v12771_v28  ;;  %v4480_v36 = vmul.f32 %v4099_v17, %v12791_v0 }
 0x477   : > { %v4609_v22 = vpack.c.bf16 %v4479_v55, %v4478_v39  ;;  %4214 = vrot.lane.b32.xlu1 %v13215_v21, %s10887_s9  ;;  %v3698_v51 = vpop.f32.mrf.mxu1 }
 0x478   : > { %v13229_v61 = vadd.f32 %v12771_v28, %v3698_v51  ;;  %v4101_v45 = vpop.permute.xlu0 %4100  ;;  %v4709_v39 = vpack.c.bf16 %v13224_v35, %v13232_v56 }
 0x479   : > { %v4481_v41 = vmul.f32 %v4101_v45, %v12785_v54  ;;  %v4103_v46 = vpop.permute.xlu1 %4102  ;;  %v9236_v55 = vpop.f32.mrf.mxu1  ;;  %9436 = vmatprep.mubr.msk.bf16.mxu1 %vm5508_vm5, %v4609_v22 }
 0x47a   : > { %15412 = vst [vmem:[#allocation10_spill] sm:$0xff] %v13229_v61  ;;  %v4708_v2 = vpack.c.bf16 %v13229_v61, %v13215_v21  ;;  %4216 = vrot.lane.b32.xlu0 %v13229_v61, %s10887_s9  ;;  %v4482_v22 = vmul.f32 %v4103_v46, %v12810_v4  ;;  %v13264_v46 = vadd.f32 %v9236_v55, %v12771_v28 }
 0x47b   : > { %v4610_v51 = vpack.c.bf16 %v4481_v41, %v4480_v36  ;;  %4218 = vrot.lane.b32.xlu1 %v13232_v56, %s10887_s9  ;;  %v3711_v0 = vpop.f32.mrf.mxu1 }
 0x47c   : > { %v13246_v54 = vadd.f32 %v12771_v28, %v3711_v0  ;;  %v4105_v17 = vpop.permute.xlu0 %4104  ;;  %9364 = vmatprep.mubr.msk.bf16.mxu0 %vm4757_vm4, %v4708_v2 }
 0x47d   : > { %v4483_v20 = vmul.f32 %v4105_v17, %v12826_v58  ;;  %v4107_v45 = vpop.permute.xlu1 %4106  ;;  %v9237_v61 = vpop.f32.mrf.mxu1  ;;  %9365 = vmatmul.mubr.msk.bf16.gmra.mxu0 %vm4757_vm4, %v4709_v39  ;;  %9437 = vmatmul.mubr.msk.bf16.vlgmr.msra.gmra.mxu1 %vm5508_vm5, %v4610_v51 }
 0x47e   : > { %4220 = vrot.lane.b32.xlu0 %v13224_v35, %s10887_s9  ;;  %v13256_v41 = vadd.f32 %v9237_v61, %v12771_v28  ;;  %v4484_v39 = vmul.f32 %v4107_v45, %v12829_v49 }
 0x47f   : > { %v4611_v36 = vpack.c.bf16 %v4483_v20, %v4482_v22  ;;  %4222 = vrot.lane.b32.xlu1 %v13246_v54, %s10887_s9  ;;  %v3714_v2 = vpop.f32.mrf.mxu1 }
 0x480   : > { %v13261_v4 = vadd.f32 %v12771_v28, %v3714_v2  ;;  %v4109_v58 = vpop.permute.xlu0 %4108  ;;  %v4711_v22 = vpack.c.bf16 %v13256_v41, %v13264_v46 }
 0x481   : > { %v4485_v51 = vmul.f32 %v4109_v58, %v12821_v59  ;;  %v4111_v0 = vpop.permute.xlu1 %4110  ;;  %v9240_v17 = vpop.f32.mrf.mxu1  ;;  %9440 = vmatprep.mubr.msk.bf16.mxu1 %vm5508_vm5, %v4611_v36 }
 0x482   : > { %v4710_v61 = vpack.c.bf16 %v13261_v4, %v13246_v54  ;;  %4224 = vrot.lane.b32.xlu0 %v13261_v4, %s10887_s9  ;;  %v4486_v45 = vmul.f32 %v4111_v0, %v12846_v3  ;;  %v13296_v0 = vadd.f32 %v9240_v17, %v12771_v28 }
 0x483   : > { %v4612_v20 = vpack.c.bf16 %v4485_v51, %v4484_v39  ;;  %4226 = vrot.lane.b32.xlu1 %v13264_v46, %s10887_s9  ;;  %v3727_v49 = vpop.f32.mrf.mxu1 }
 0x484   : > { %v13278_v59 = vadd.f32 %v12771_v28, %v3727_v49  ;;  %v4113_v55 = vpop.permute.xlu0 %4112  ;;  %9368 = vmatprep.mubr.msk.bf16.mxu0 %vm4757_vm4, %v4710_v61 }
 0x485   : > { %v4487_v36 = vmul.f32 %v4113_v55, %v12862_v50  ;;  %v4115_v2 = vpop.permute.xlu1 %4114  ;;  %v9241_v58 = vpop.f32.mrf.mxu1  ;;  %9369 = vmatmul.mubr.msk.bf16.gmra.mxu0 %vm4757_vm4, %v4711_v22  ;;  %9441 = vmatmul.mubr.msk.bf16.gmra.mxu1 %vm5508_vm5, %v4612_v20 }
 0x486   : > { %4228 = vrot.lane.b32.xlu0 %v13256_v41, %s10887_s9  ;;  %v13288_v51 = vadd.f32 %v9241_v58, %v12771_v28  ;;  %v4488_v22 = vmul.f32 %v4115_v2, %v12865_v11 }
 0x487   : > { %v4613_v39 = vpack.c.bf16 %v4487_v36, %v4486_v45  ;;  %4230 = vrot.lane.b32.xlu1 %v13278_v59, %s10887_s9  ;;  %v3730_v61 = vpop.f32.mrf.mxu1 }
 0x488   : > { %v13293_v3 = vadd.f32 %v12771_v28, %v3730_v61  ;;  %v4117_v50 = vpop.permute.xlu0 %4116  ;;  %v4713_v36 = vpack.c.bf16 %v13288_v51, %v13296_v0 }
 0x489   : > { %v4489_v20 = vmul.f32 %v4117_v50, %v12857_v44  ;;  %v4119_v49 = vpop.permute.xlu1 %4118  ;;  %v9244_v55 = vpop.f32.mrf.mxu1  ;;  %9444 = vmatprep.mubr.msk.bf16.mxu1 %vm5508_vm5, %v4613_v39 }
 0x48a   : > { %v4712_v45 = vpack.c.bf16 %v13293_v3, %v13278_v59  ;;  %4232 = vrot.lane.b32.xlu0 %v13293_v3, %s10887_s9  ;;  %v4490_v2 = vmul.f32 %v4119_v49, %v12882_v6  ;;  %v13328_v49 = vadd.f32 %v9244_v55, %v12771_v28 }
 0x48b   : > { %v4614_v58 = vpack.c.bf16 %v4489_v20, %v4488_v22  ;;  %4234 = vrot.lane.b32.xlu1 %v13296_v0, %s10887_s9  ;;  %v3743_v11 = vpop.f32.mrf.mxu1 }
 0x48c   : > { %v13310_v44 = vadd.f32 %v12771_v28, %v3743_v11  ;;  %v4121_v17 = vpop.permute.xlu0 %4120  ;;  %9372 = vmatprep.mubr.msk.bf16.mxu0 %vm4757_vm4, %v4712_v45 }
 0x48d   : > { %v4491_v39 = vmul.f32 %v4121_v17, %v12898_v30  ;;  %v4123_v61 = vpop.permute.xlu1 %4122  ;;  %v9245_v50 = vpop.f32.mrf.mxu1  ;;  %9373 = vmatmul.mubr.msk.bf16.gmra.mxu0 %vm4757_vm4, %v4713_v36  ;;  %9445 = vmatmul.mubr.msk.bf16.gmra.mxu1 %vm5508_vm5, %v4614_v58 }
 0x48e   : > { %4236 = vrot.lane.b32.xlu0 %v13288_v51, %s10887_s9  ;;  %v13320_v20 = vadd.f32 %v9245_v50, %v12771_v28  ;;  %v4492_v36 = vmul.f32 %v4123_v61, %v12901_v33 }
 0x48f   : > { %v4615_v22 = vpack.c.bf16 %v4491_v39, %v4490_v2  ;;  %4238 = vrot.lane.b32.xlu1 %v13310_v44, %s10887_s9  ;;  %v3746_v45 = vpop.f32.mrf.mxu1 }
 0x490   : > { %v13325_v6 = vadd.f32 %v12771_v28, %v3746_v45  ;;  %v4125_v30 = vpop.permute.xlu0 %4124  ;;  %v4715_v39 = vpack.c.bf16 %v13320_v20, %v13328_v49 }
 0x491   : > { %v4493_v58 = vmul.f32 %v4125_v30, %v12893_v5  ;;  %v4127_v11 = vpop.permute.xlu1 %4126  ;;  %v9248_v17 = vpop.f32.mrf.mxu1  ;;  %9448 = vmatprep.mubr.msk.bf16.mxu1 %vm5508_vm5, %v4615_v22 }
 0x492   : > { %v4714_v2 = vpack.c.bf16 %v13325_v6, %v13310_v44  ;;  %4240 = vrot.lane.b32.xlu0 %v13325_v6, %s10887_s9  ;;  %v4494_v61 = vmul.f32 %v4127_v11, %v12919_v10  ;;  %v13360_v11 = vadd.f32 %v9248_v17, %v12771_v28 }
 0x493   : > { %v4616_v50 = vpack.c.bf16 %v4493_v58, %v4492_v36  ;;  %4242 = vrot.lane.b32.xlu1 %v13328_v49, %s10887_s9  ;;  %v3759_v33 = vpop.f32.mrf.mxu1 }
 0x494   : > { %v13342_v5 = vadd.f32 %v12771_v28, %v3759_v33  ;;  %v4129_v55 = vpop.permute.xlu0 %4128  ;;  %9376 = vmatprep.mubr.msk.bf16.mxu0 %vm4757_vm4, %v4714_v2 }
 0x495   : > { %v4495_v22 = vmul.f32 %v4129_v55, %v12933_v18  ;;  %v4131_v45 = vpop.permute.xlu1 %4130  ;;  %v9249_v30 = vpop.f32.mrf.mxu1  ;;  %9377 = vmatmul.mubr.msk.bf16.gmra.mxu0 %vm4757_vm4, %v4715_v39  ;;  %9449 = vmatmul.mubr.msk.bf16.gmra.mxu1 %vm5508_vm5, %v4616_v50 }
 0x496   : > { %4244 = vrot.lane.b32.xlu0 %v13320_v20, %s10887_s9  ;;  %v13352_v58 = vadd.f32 %v9249_v30, %v12771_v28  ;;  %v4496_v39 = vmul.f32 %v4131_v45, %v12936_v32 }
 0x497   : > { %v4617_v36 = vpack.c.bf16 %v4495_v22, %v4494_v61  ;;  %4246 = vrot.lane.b32.xlu1 %v13342_v5, %s10887_s9  ;;  %v3762_v2 = vpop.f32.mrf.mxu1 }
 0x498   : > { %v13357_v10 = vadd.f32 %v12771_v28, %v3762_v2  ;;  %v4133_v18 = vpop.permute.xlu0 %4132  ;;  %v4717_v22 = vpack.c.bf16 %v13352_v58, %v13360_v11 }
 0x499   : > { %v4497_v50 = vmul.f32 %v4133_v18, %v12928_v13  ;;  %v4135_v33 = vpop.permute.xlu1 %4134  ;;  %v9252_v55 = vpop.f32.mrf.mxu1  ;;  %9452 = vmatprep.mubr.msk.bf16.mxu1 %vm5508_vm5, %v4617_v36  ;;  %v9830_v13 = vld [vmem:[%s15266_s2 + $0x98] sm:$0xff]  }
 0x49a   : > { %v4716_v61 = vpack.c.bf16 %v13357_v10, %v13342_v5  ;;  %4248 = vrot.lane.b32.xlu0 %v13357_v10, %s10887_s9  ;;  %v4498_v36 = vmul.f32 %v4135_v33, %v12949_v1  ;;  %9570 = vmatprep.subr.bf16.mxu0 %v9830_v13 }
 0x49b   : > { %v4618_v30 = vpack.c.bf16 %v4497_v50, %v4496_v39  ;;  %4250 = vrot.lane.b32.xlu1 %v13360_v11, %s10887_s9  ;;  %v3775_v32 = vpop.f32.mrf.mxu1  ;;  %9571 = vmatpush3.bf16.msra.mxu0 %v9830_v13 }
 0x49c   : > { %v13377_v17 = vadd.f32 %v12771_v28, %v3775_v32  ;;  %v4137_v45 = vpop.permute.xlu0 %4136  ;;  %9380 = vmatprep.mubr.msk.bf16.mxu0 %vm4757_vm4, %v4716_v61  ;;  %v13395_v61 = vadd.f32 %v9252_v55, %v12771_v28 }
 0x49d   : > { %v4499_v2 = vmul.f32 %v4137_v45, %v12961_v26  ;;  %v4139_v18 = vpop.permute.xlu1 %4138  ;;  %v9253_v39 = vpop.f32.mrf.mxu1  ;;  %9381 = vmatmul.mubr.msk.bf16.gmra.mxu0 %vm4757_vm4, %v4717_v22  ;;  %9453 = vmatmul.mubr.msk.bf16.gmra.mxu1 %vm5508_vm5, %v4618_v30 }
 0x49e   : > { %4252 = vrot.lane.b32.xlu0 %v13352_v58, %s10887_s9  ;;  %v13387_v32 = vadd.f32 %v9253_v39, %v12771_v28  ;;  %v4500_v22 = vmul.f32 %v4139_v18, %v12964_v57 }
 0x49f   : > { %v4619_v50 = vpack.c.bf16 %v4499_v2, %v4498_v36  ;;  %4254 = vrot.lane.b32.xlu1 %v13377_v17, %s10887_s9  ;;  %v3778_v1 = vpop.f32.mrf.mxu1 }
 0x4a0   : > { %v13392_v26 = vadd.f32 %v12771_v28, %v3778_v1  ;;  %v4141_v33 = vpop.permute.xlu0 %4140  ;;  %v4719_v13 = vpack.c.bf16 %v13387_v32, %v13395_v61 }
 0x4a1   : > { %v4501_v30 = vmul.f32 %v4141_v33, %v12956_v63  ;;  %v4143_v45 = vpop.permute.xlu1 %4142  ;;  %v9256_v36 = vpop.f32.mrf.mxu1  ;;  %9456 = vmatprep.mubr.msk.bf16.mxu1 %vm5508_vm5, %v4619_v50 }
 0x4a2   : > { %v4718_v2 = vpack.c.bf16 %v13392_v26, %v13377_v17  ;;  %4256 = vrot.lane.b32.xlu0 %v13392_v26, %s10887_s9  ;;  %v4502_v18 = vmul.f32 %v4143_v45, %v12977_v48 }
 0x4a3   : > { %v4620_v39 = vpack.c.bf16 %v4501_v30, %v4500_v22  ;;  %4258 = vrot.lane.b32.xlu1 %v13395_v61, %s10887_s9  ;;  %v3791_v57 = vpop.f32.mrf.mxu1 }
 0x4a4   : > { %v13409_v63 = vadd.f32 %v12771_v28, %v3791_v57  ;;  %v4145_v55 = vpop.permute.xlu0 %4144  ;;  %9384 = vmatprep.mubr.msk.bf16.mxu0 %vm4757_vm4, %v4718_v2  ;;  %v13421_v28 = vld [vmem:[%s15265_s1 + $0x4] ss:$0 sm:$0xff] }
 0x4a5   : > { %v4503_v50 = vmul.f32 %v4145_v55, %v12989_v42  ;;  %v4147_v1 = vpop.permute.xlu1 %4146  ;;  %v9257_v33 = vpop.f32.mrf.mxu1  ;;  %9385 = vmatmul.mubr.msk.bf16.gmra.mxu0 %vm4757_vm4, %v4719_v13  ;;  %9457 = vmatmul.mubr.msk.bf16.gmra.mxu1 %vm5508_vm5, %v4620_v39  ;;  %v13432_v2 = vadd.f32 %v13421_v28, %v9256_v36 }
 0x4a6   : > { %4260 = vrot.lane.b32.xlu0 %v13387_v32, %s10887_s9  ;;  %v13424_v30 = vadd.f32 %v13421_v28, %v9257_v33  ;;  %v4504_v13 = vmul.f32 %v4147_v1, %v12992_v40 }
 0x4a7   : > { %v4621_v22 = vpack.c.bf16 %v4503_v50, %v4502_v18  ;;  %4262 = vrot.lane.b32.xlu1 %v13409_v63, %s10887_s9  ;;  %v3794_v48 = vpop.f32.mrf.mxu1 }
 0x4a8   : > { %v13429_v42 = vadd.f32 %v13421_v28, %v3794_v48  ;;  %v4149_v45 = vpop.permute.xlu0 %4148  ;;  %v4721_v50 = vpack.c.bf16 %v13424_v30, %v13432_v2 }
 0x4a9   : > { %v4505_v39 = vmul.f32 %v4149_v45, %v12984_v19  ;;  %v4151_v57 = vpop.permute.xlu1 %4150  ;;  %v9260_v55 = vpop.f32.mrf.mxu1  ;;  %9460 = vmatprep.mubr.msk.bf16.mxu1 %vm5508_vm5, %v4621_v22 }
 0x4aa   : > { %v4720_v18 = vpack.c.bf16 %v13429_v42, %v13409_v63  ;;  %4264 = vrot.lane.b32.xlu0 %v13429_v42, %s10887_s9  ;;  %v4506_v1 = vmul.f32 %v4151_v57, %v13004_v23  ;;  %v13464_v57 = vadd.f32 %v13421_v28, %v9260_v55 }
 0x4ab   : > { %v4622_v33 = vpack.c.bf16 %v4505_v39, %v4504_v13  ;;  %4266 = vrot.lane.b32.xlu1 %v13432_v2, %s10887_s9  ;;  %v3807_v40 = vpop.f32.mrf.mxu1 }
 0x4ac   : > { %v13446_v19 = vadd.f32 %v13421_v28, %v3807_v40  ;;  %v4153_v36 = vpop.permute.xlu0 %4152  ;;  %9388 = vmatprep.mubr.msk.bf16.mxu0 %vm4757_vm4, %v4720_v18 }
 0x4ad   : > { %v4507_v22 = vmul.f32 %v4153_v36, %v13016_v43  ;;  %v4155_v48 = vpop.permute.xlu1 %4154  ;;  %v9261_v45 = vpop.f32.mrf.mxu1  ;;  %9389 = vmatmul.mubr.msk.bf16.gmra.mxu0 %vm4757_vm4, %v4721_v50  ;;  %9461 = vmatmul.mubr.msk.bf16.gmra.mxu1 %vm5508_vm5, %v4622_v33 }
 0x4ae   : > { %4268 = vrot.lane.b32.xlu0 %v13424_v30, %s10887_s9  ;;  %v13456_v39 = vadd.f32 %v13421_v28, %v9261_v45  ;;  %v4508_v50 = vmul.f32 %v4155_v48, %v13019_v38 }
 0x4af   : > { %v4623_v13 = vpack.c.bf16 %v4507_v22, %v4506_v1  ;;  %4270 = vrot.lane.b32.xlu1 %v13446_v19, %s10887_s9  ;;  %v3810_v18 = vpop.f32.mrf.mxu1 }
 0x4b0   : > { %v13461_v23 = vadd.f32 %v13421_v28, %v3810_v18  ;;  %v4157_v43 = vpop.permute.xlu0 %4156  ;;  %v4723_v22 = vpack.c.bf16 %v13456_v39, %v13464_v57 }
 0x4b1   : > { %v4509_v33 = vmul.f32 %v4157_v43, %v13011_v8  ;;  %v4159_v40 = vpop.permute.xlu1 %4158  ;;  %v9264_v36 = vpop.f32.mrf.mxu1  ;;  %9464 = vmatprep.mubr.msk.bf16.mxu1 %vm5508_vm5, %v4623_v13 }
 0x4b2   : > { %v4722_v1 = vpack.c.bf16 %v13461_v23, %v13446_v19  ;;  %4272 = vrot.lane.b32.xlu0 %v13461_v23, %s10887_s9  ;;  %v4510_v48 = vmul.f32 %v4159_v40, %v13030_v62  ;;  %v13496_v40 = vadd.f32 %v13421_v28, %v9264_v36 }
 0x4b3   : > { %v4624_v45 = vpack.c.bf16 %v4509_v33, %v4508_v50  ;;  %4274 = vrot.lane.b32.xlu1 %v13464_v57, %s10887_s9  ;;  %v3823_v38 = vpop.f32.mrf.mxu1 }
 0x4b4   : > { %v13478_v8 = vadd.f32 %v13421_v28, %v3823_v38  ;;  %v4161_v55 = vpop.permute.xlu0 %4160  ;;  %9392 = vmatprep.mubr.msk.bf16.mxu0 %vm4757_vm4, %v4722_v1 }
 0x4b5   : > { %v4511_v13 = vmul.f32 %v4161_v55, %v13042_v52  ;;  %v4163_v18 = vpop.permute.xlu1 %4162  ;;  %v9265_v43 = vpop.f32.mrf.mxu1  ;;  %9393 = vmatmul.mubr.msk.bf16.gmra.mxu0 %vm4757_vm4, %v4723_v22  ;;  %9465 = vmatmul.mubr.msk.bf16.gmra.mxu1 %vm5508_vm5, %v4624_v45 }
 0x4b6   : > { %4276 = vrot.lane.b32.xlu0 %v13456_v39, %s10887_s9  ;;  %v13488_v33 = vadd.f32 %v13421_v28, %v9265_v43  ;;  %v4512_v22 = vmul.f32 %v4163_v18, %v13045_v60 }
 0x4b7   : > { %v4625_v50 = vpack.c.bf16 %v4511_v13, %v4510_v48  ;;  %4278 = vrot.lane.b32.xlu1 %v13478_v8, %s10887_s9  ;;  %v3826_v1 = vpop.f32.mrf.mxu1 }
 0x4b8   : > { %v13493_v62 = vadd.f32 %v13421_v28, %v3826_v1  ;;  %v4165_v52 = vpop.permute.xlu0 %4164  ;;  %v4725_v13 = vpack.c.bf16 %v13488_v33, %v13496_v40 }
 0x4b9   : > { %v4513_v45 = vmul.f32 %v4165_v52, %v13037_v15  ;;  %v4167_v38 = vpop.permute.xlu1 %4166  ;;  %v9268_v55 = vpop.f32.mrf.mxu1  ;;  %9468 = vmatprep.mubr.msk.bf16.mxu1 %vm5508_vm5, %v4625_v50 }
 0x4ba   : > { %v4724_v48 = vpack.c.bf16 %v13493_v62, %v13478_v8  ;;  %4280 = vrot.lane.b32.xlu0 %v13493_v62, %s10887_s9  ;;  %v4514_v18 = vmul.f32 %v4167_v38, %v13056_v53  ;;  %v13528_v38 = vadd.f32 %v13421_v28, %v9268_v55 }
 0x4bb   : > { %v4626_v43 = vpack.c.bf16 %v4513_v45, %v4512_v22  ;;  %4282 = vrot.lane.b32.xlu1 %v13496_v40, %s10887_s9  ;;  %v3839_v60 = vpop.f32.mrf.mxu1 }
 0x4bc   : > { %v13510_v15 = vadd.f32 %v13421_v28, %v3839_v60  ;;  %v4169_v36 = vpop.permute.xlu0 %4168  ;;  %9396 = vmatprep.mubr.msk.bf16.mxu0 %vm4757_vm4, %v4724_v48 }
 0x4bd   : > { %v4515_v50 = vmul.f32 %v4169_v36, %v13068_v37  ;;  %v4171_v1 = vpop.permute.xlu1 %4170  ;;  %v9269_v52 = vpop.f32.mrf.mxu1  ;;  %9397 = vmatmul.mubr.msk.bf16.gmra.mxu0 %vm4757_vm4, %v4725_v13  ;;  %9469 = vmatmul.mubr.msk.bf16.gmra.mxu1 %vm5508_vm5, %v4626_v43 }
 0x4be   : > { %4284 = vrot.lane.b32.xlu0 %v13488_v33, %s10887_s9  ;;  %v13520_v45 = vadd.f32 %v13421_v28, %v9269_v52  ;;  %v4516_v13 = vmul.f32 %v4171_v1, %v13071_v7 }
 0x4bf   : > { %v4627_v22 = vpack.c.bf16 %v4515_v50, %v4514_v18  ;;  %4286 = vrot.lane.b32.xlu1 %v13510_v15, %s10887_s9  ;;  %v3842_v48 = vpop.f32.mrf.mxu1 }
 0x4c0   : > { %v13525_v53 = vadd.f32 %v13421_v28, %v3842_v48  ;;  %v4173_v37 = vpop.permute.xlu0 %4172  ;;  %v4727_v50 = vpack.c.bf16 %v13520_v45, %v13528_v38 }
 0x4c1   : > { %v4517_v43 = vmul.f32 %v4173_v37, %v13063_v34  ;;  %v4175_v60 = vpop.permute.xlu1 %4174  ;;  %v9272_v36 = vpop.f32.mrf.mxu1  ;;  %9472 = vmatprep.mubr.msk.bf16.mxu1 %vm5508_vm5, %v4627_v22 }
 0x4c2   : > { %v4726_v18 = vpack.c.bf16 %v13525_v53, %v13510_v15  ;;  %4288 = vrot.lane.b32.xlu0 %v13525_v53, %s10887_s9  ;;  %v4518_v1 = vmul.f32 %v4175_v60, %v13082_v25 }
 0x4c3   : > { %v4628_v52 = vpack.c.bf16 %v4517_v43, %v4516_v13  ;;  %4290 = vrot.lane.b32.xlu1 %v13528_v38, %s10887_s9  ;;  %v3855_v7 = vpop.f32.mrf.mxu1 }
 0x4c4   : > { %v13542_v34 = vadd.f32 %v13421_v28, %v3855_v7  ;;  %v4177_v55 = vpop.permute.xlu0 %4176  ;;  %9400 = vmatprep.mubr.msk.bf16.mxu0 %vm4757_vm4, %v4726_v18 }
 0x4c5   : > { %v4519_v22 = vmul.f32 %v4177_v55, %v13094_v47  ;;  %v4179_v48 = vpop.permute.xlu1 %4178  ;;  %v9273_v37 = vpop.f32.mrf.mxu1  ;;  %9401 = vmatmul.mubr.msk.bf16.gmra.mxu0 %vm4757_vm4, %v4727_v50  ;;  %9473 = vmatmul.mubr.msk.bf16.gmra.mxu1 %vm5508_vm5, %v4628_v52  ;;  %v13564_v50 = vadd.f32 %v13421_v28, %v9272_v36 }
 0x4c6   : > { %v13549_v13 = vpop.f32.mrf.mxu0  ;;  %4292 = vrot.lane.b32.xlu0 %v13520_v45, %s10887_s9  ;;  %v13554_v7 = vadd.f32 %v13421_v28, %v9273_v37  ;;  %v4520_v52 = vmul.f32 %v4179_v48, %v13097_v16 }
 0x4c7   : > { %15413 = vst [vmem:[#allocation49_spill] sm:$0xff] %v13549_v13  ;;  %v4629_v43 = vpack.c.bf16 %v4519_v22, %v4518_v1  ;;  %4294 = vrot.lane.b32.xlu1 %v13542_v34, %s10887_s9  ;;  %v3858_v25 = vpop.f32.mrf.mxu1 }
 0x4c8   : > { %v13559_v47 = vadd.f32 %v13421_v28, %v3858_v25  ;;  %v13561_v60 = vpop.f32.mrf.mxu0  ;;  %v4181_v18 = vpop.permute.xlu0 %4180  ;;  %v4729_v36 = vpack.c.bf16 %v13554_v7, %v13564_v50 }
 0x4c9   : > { %15415 = vst [vmem:[#allocation11_spill] sm:$0xff] %v13561_v60  ;;  %v4521_v55 = vmul.f32 %v4181_v18, %v13089_v31  ;;  %v4183_v1 = vpop.permute.xlu1 %4182  ;;  %v9276_v22 = vpop.f32.mrf.mxu1  ;;  %9476 = vmatprep.mubr.msk.bf16.mxu1 %vm5508_vm5, %v4629_v43 }
 0x4ca   : > { %15414 = vst [vmem:[#allocation51_spill] sm:$0xff] %v13559_v47  ;;  %v4728_v37 = vpack.c.bf16 %v13559_v47, %v13542_v34  ;;  %v13571_v13 = vpop.f32.mrf.mxu0  ;;  %4296 = vrot.lane.b32.xlu0 %v13559_v47, %s10887_s9  ;;  %v4522_v18 = vmul.f32 %v4183_v1, %v13108_v12 }
 0x4cb   : > { %15416 = vst [vmem:[#allocation12_spill] sm:$0xff] %v13571_v13  ;;  %v4630_v25 = vpack.c.bf16 %v4521_v55, %v4520_v52  ;;  %4298 = vrot.lane.b32.xlu1 %v13564_v50, %s10887_s9  ;;  %v3871_v31 = vpop.f32.mrf.mxu1 }
 0x4cc   : > { %v13580_v16 = vadd.f32 %v13421_v28, %v3871_v31  ;;  %v13582_v48 = vpop.f32.mrf.mxu0  ;;  %v4185_v43 = vpop.permute.xlu0 %4184  ;;  %9404 = vmatprep.mubr.msk.bf16.mxu0 %vm4757_vm4, %v4728_v37 }
 0x4cd   : > { %v4523_v13 = vmul.f32 %v4185_v43, %v13120_v14  ;;  %v4187_v60 = vpop.permute.xlu1 %4186  ;;  %v9277_v47 = vpop.f32.mrf.mxu1  ;;  %9405 = vmatmul.mubr.msk.bf16.gmra.mxu0 %vm4757_vm4, %v4729_v36  ;;  %9477 = vmatmul.mubr.msk.bf16.gmra.mxu1 %vm5508_vm5, %v4630_v25  ;;  %v13604_v36 = vadd.f32 %v13421_v28, %v9276_v22 }
 0x4ce   : > { %15417 = vst [vmem:[#allocation52_spill] sm:$0xff] %v13580_v16  ;;  %v13589_v52 = vpop.f32.mrf.mxu0  ;;  %4300 = vrot.lane.b32.xlu0 %v13554_v7, %s10887_s9  ;;  %v13594_v31 = vadd.f32 %v13421_v28, %v9277_v47  ;;  %v4524_v25 = vmul.f32 %v4187_v60, %v13123_v9 }
 0x4cf   : > { %15418 = vst [vmem:[#allocation13_spill] sm:$0xff] %v13589_v52  ;;  %v4631_v55 = vpack.c.bf16 %v4523_v13, %v4522_v18  ;;  %4302 = vrot.lane.b32.xlu1 %v13580_v16, %s10887_s9  ;;  %v3874_v12 = vpop.f32.mrf.mxu1  ;;  %15422 = vst [vmem:[#allocation17_spill] sm:$0xff] %v13604_v36 }
 0x4d0   : > { %15419 = vst [vmem:[#allocation14_spill] sm:$0xff] %v13594_v31  ;;  %v13599_v14 = vadd.f32 %v13421_v28, %v3874_v12  ;;  %v13601_v1 = vpop.f32.mrf.mxu0  ;;  %v4189_v37 = vpop.permute.xlu0 %4188  ;;  %v4731_v22 = vpack.c.bf16 %v13594_v31, %v13604_v36 }
 0x4d1   : > { %15421 = vst [vmem:[#allocation16_spill] sm:$0xff] %v13601_v1  ;;  %v4525_v13 = vmul.f32 %v4189_v37, %v13115_v24  ;;  %v4191_v43 = vpop.permute.xlu1 %4190  ;;  %v9280_v47 = vpop.f32.mrf.mxu1  ;;  %9480 = vmatprep.mubr.msk.bf16.mxu1 %vm5508_vm5, %v4631_v55 }
 0x4d2   : > { %15420 = vst [vmem:[#allocation15_spill] sm:$0xff] %v13599_v14  ;;  %v4730_v18 = vpack.c.bf16 %v13599_v14, %v13580_v16  ;;  %v13611_v52 = vpop.f32.mrf.mxu0  ;;  %4304 = vrot.lane.b32.xlu0 %v13599_v14, %s10887_s9  ;;  %v4526_v37 = vmul.f32 %v4191_v43, %v13137_v27 }
 0x4d3   : > { %15423 = vst [vmem:[#allocation18_spill] sm:$0xff] %v13611_v52  ;;  %v4632_v12 = vpack.c.bf16 %v4525_v13, %v4524_v25  ;;  %4306 = vrot.lane.b32.xlu1 %v13604_v36, %s10887_s9  ;;  %v3887_v24 = vpop.f32.mrf.mxu1  ;;  %v15426_v52 = vld [vmem:[#allocation4_spill] sm:$0xff] }
 0x4d4   : > { %v13620_v9 = vadd.f32 %v13421_v28, %v3887_v24  ;;  %v13622_v60 = vpop.f32.mrf.mxu0  ;;  %v4193_v55 = vpop.permute.xlu0 %4192  ;;  %9408 = vmatprep.mubr.msk.bf16.mxu0 %vm4757_vm4, %v4730_v18 }
 0x4d5   : > { %15425 = vst [vmem:[#allocation20_spill] sm:$0xff] %v13622_v60  ;;  %v4527_v1 = vmul.f32 %v4193_v55, %v15426_v52  ;;  %v4195_v14 = vpop.permute.xlu1 %4194  ;;  %v9281_v16 = vpop.f32.mrf.mxu1  ;;  %9409 = vmatmul.mubr.msk.bf16.gmra.mxu0 %vm4757_vm4, %v4731_v22  ;;  %9481 = vmatmul.mubr.msk.bf16.gmra.mxu1 %vm5508_vm5, %v4632_v12  ;;  %v13644_v22 = vadd.f32 %v13421_v28, %v9280_v47  ;;  %v15432_v12 = vld [vmem:[#allocation45_spill] sm:$0xff] }
 0x4d6   : > { %15424 = vst [vmem:[#allocation19_spill] sm:$0xff] %v13620_v9  ;;  %v13629_v25 = vpop.f32.mrf.mxu0  ;;  %4308 = vrot.lane.b32.xlu0 %v13594_v31, %s10887_s9  ;;  %v13634_v24 = vadd.f32 %v13421_v28, %v9281_v16  ;;  %v4528_v55 = vmul.f32 %v4195_v14, %v15432_v12  ;;  %v15437_v12 = vld [vmem:[#allocation5_spill] sm:$0xff] }
 0x4d7   : > { %15427 = vst [vmem:[#allocation21_spill] sm:$0xff] %v13629_v25  ;;  %v4633_v13 = vpack.c.bf16 %v4527_v1, %v4526_v37  ;;  %4310 = vrot.lane.b32.xlu1 %v13620_v9, %s10887_s9  ;;  %v3890_v27 = vpop.f32.mrf.mxu1  ;;  %15431 = vst [vmem:[#allocation28_spill] sm:$0xff] %v13644_v22  ;;  %v15433_v25 = vld [vmem:[#allocation3_spill] sm:$0xff] }
 0x4d8   : > { %15428 = vst [vmem:[#allocation22_spill] sm:$0xff] %v13634_v24  ;;  %v13639_v52 = vadd.f32 %v13421_v28, %v3890_v27  ;;  %v13641_v43 = vpop.f32.mrf.mxu0  ;;  %v4197_v18 = vpop.permute.xlu0 %4196  ;;  %v4733_v47 = vpack.c.bf16 %v13634_v24, %v13644_v22 }
 0x4d9   : > { %15430 = vst [vmem:[#allocation23_spill] sm:$0xff] %v13641_v43  ;;  %v4529_v1 = vmul.f32 %v4197_v18, %v15433_v25  ;;  %v4199_v37 = vpop.permute.xlu1 %4198  ;;  %v9284_v16 = vpop.f32.mrf.mxu1  ;;  %9484 = vmatprep.mubr.msk.bf16.mxu1 %vm5508_vm5, %v4633_v13  ;;  %v15438_v43 = vld [vmem:[#allocation47_spill] sm:$0xff] }
 0x4da   : > { %15429 = vst [vmem:[#allocation26_spill] sm:$0xff] %v13639_v52  ;;  %v4732_v60 = vpack.c.bf16 %v13639_v52, %v13620_v9  ;;  %v13651_v31 = vpop.f32.mrf.mxu0  ;;  %4312 = vrot.lane.b32.xlu0 %v13639_v52, %s10887_s9 }
 0x4db   : > { %15434 = vst [vmem:[#allocation25_spill] sm:$0xff] %v13651_v31  ;;  %v4634_v27 = vpack.c.bf16 %v4529_v1, %v4528_v55  ;;  %4314 = vrot.lane.b32.xlu1 %v13644_v22, %s10887_s9  ;;  %v3903_v14 = vpop.f32.mrf.mxu1  ;;  %v4530_v31 = vmul.f32 %v4199_v37, %v15437_v12 }
 0x4dc   : > { %v13660_v25 = vadd.f32 %v13421_v28, %v3903_v14  ;;  %v13662_v13 = vpop.f32.mrf.mxu0  ;;  %v4201_v18 = vpop.permute.xlu0 %4200  ;;  %9412 = vmatprep.mubr.msk.bf16.mxu0 %vm4757_vm4, %v4732_v60 }
 0x4dd   : > { %15436 = vst [vmem:[#allocation27_spill] sm:$0xff] %v13662_v13  ;;  %v4531_v52 = vmul.f32 %v4201_v18, %v15438_v43  ;;  %v4203_v9 = vpop.permute.xlu1 %4202  ;;  %v9285_v36 = vpop.f32.mrf.mxu1  ;;  %9413 = vmatmul.mubr.msk.bf16.gmra.mxu0 %vm4757_vm4, %v4733_v47  ;;  %9485 = vmatmul.mubr.msk.bf16.gmra.mxu1 %vm5508_vm5, %v4634_v27  ;;  %v13684_v27 = vadd.f32 %v13421_v28, %v9284_v16  ;;  %v15442_v18 = vld [vmem:[#allocation2_spill] sm:$0xff] }
 0x4de   : > { %15435 = vst [vmem:[#allocation31_spill] sm:$0xff] %v13660_v25  ;;  %v13669_v55 = vpop.f32.mrf.mxu0  ;;  %4316 = vrot.lane.b32.xlu0 %v13634_v24, %s10887_s9  ;;  %v13674_v14 = vadd.f32 %v13421_v28, %v9285_v36  ;;  %v4532_v12 = vmul.f32 %v4203_v9, %v15442_v18  ;;  %v15447_v18 = vld [vmem:[#allocation7_spill] sm:$0xff] }
 0x4df   : > { %15439 = vst [vmem:[#allocation32_spill] sm:$0xff] %v13669_v55  ;;  %v4635_v1 = vpack.c.bf16 %v4531_v52, %v4530_v31  ;;  %4318 = vrot.lane.b32.xlu1 %v13660_v25, %s10887_s9  ;;  %v3906_v60 = vpop.f32.mrf.mxu1  ;;  %v15443_v55 = vld [vmem:[#allocation6_spill] sm:$0xff] }
 0x4e0   : > { %v13679_v43 = vadd.f32 %v13421_v28, %v3906_v60  ;;  %v13681_v37 = vpop.f32.mrf.mxu0  ;;  %v4205_v47 = vpop.permute.xlu0 %4204  ;;  %v4735_v16 = vpack.c.bf16 %v13674_v14, %v13684_v27 }
 0x4e1   : > { %15441 = vst [vmem:[#allocation24_spill] sm:$0xff] %v13681_v37  ;;  %v4533_v31 = vmul.f32 %v4205_v47, %v15443_v55  ;;  %v4207_v52 = vpop.permute.xlu1 %4206  ;;  %v9288_v36 = vpop.f32.mrf.mxu1  ;;  %9488 = vmatprep.mubr.msk.bf16.mxu1 %vm5508_vm5, %v4635_v1  ;;  %v15448_v37 = vld [vmem:[#allocation8_spill] sm:$0xff] }
 0x4e2   : > { %15440 = vst [vmem:[#allocation29_spill] sm:$0xff] %v13679_v43  ;;  %v4734_v13 = vpack.c.bf16 %v13679_v43, %v13660_v25  ;;  %v13691_v24 = vpop.f32.mrf.mxu0  ;;  %4320 = vrot.lane.b32.xlu0 %v13679_v43, %s10887_s9 }
 0x4e3   : > { %15444 = vst [vmem:[#allocation30_spill] sm:$0xff] %v13691_v24  ;;  %v4636_v60 = vpack.c.bf16 %v4533_v31, %v4532_v12  ;;  %4322 = vrot.lane.b32.xlu1 %v13684_v27, %s10887_s9  ;;  %v3919_v9 = vpop.f32.mrf.mxu1  ;;  %v4534_v24 = vmul.f32 %v4207_v52, %v15447_v18 }
 0x4e4   : > { %v13700_v55 = vadd.f32 %v13421_v28, %v3919_v9  ;;  %v13702_v1 = vpop.f32.mrf.mxu0  ;;  %v4209_v47 = vpop.permute.xlu0 %4208  ;;  %9416 = vmatprep.mubr.msk.bf16.mxu0 %vm4757_vm4, %v4734_v13 }
 0x4e5   : > { %15446 = vst [vmem:[#allocation34_spill] sm:$0xff] %v13702_v1  ;;  %v4535_v43 = vmul.f32 %v4209_v47, %v15448_v37  ;;  %v4211_v25 = vpop.permute.xlu1 %4210  ;;  %v9289_v22 = vpop.f32.mrf.mxu1  ;;  %9417 = vmatmul.mubr.msk.bf16.gmra.mxu0 %vm4757_vm4, %v4735_v16  ;;  %9489 = vmatmul.mubr.msk.bf16.gmra.mxu1 %vm5508_vm5, %v4636_v60  ;;  %v13724_v60 = vadd.f32 %v13421_v28, %v9288_v36  ;;  %v15452_v47 = vld [vmem:[#allocation9_spill] sm:$0xff] }
 0x4e6   : > { %15445 = vst [vmem:[#allocation33_spill] sm:$0xff] %v13700_v55  ;;  %v13709_v12 = vpop.f32.mrf.mxu0  ;;  %4324 = vrot.lane.b32.xlu0 %v13674_v14, %s10887_s9  ;;  %v13714_v9 = vadd.f32 %v13421_v28, %v9289_v22  ;;  %v4536_v18 = vmul.f32 %v4211_v25, %v15452_v47 }
 0x4e7   : > { %15449 = vst [vmem:[#allocation35_spill] sm:$0xff] %v13709_v12  ;;  %v4637_v31 = vpack.c.bf16 %v4535_v43, %v4534_v24  ;;  %4326 = vrot.lane.b32.xlu1 %v13700_v55, %s10887_s9  ;;  %v3922_v13 = vpop.f32.mrf.mxu1 }
 0x4e8   : > { %v13719_v37 = vadd.f32 %v13421_v28, %v3922_v13  ;;  %v13721_v52 = vpop.f32.mrf.mxu0  ;;  %v4213_v16 = vpop.permute.xlu0 %4212  ;;  %v4737_v36 = vpack.c.bf16 %v13714_v9, %v13724_v60 }
 0x4e9   : > { %15451 = vst [vmem:[#allocation37_spill] sm:$0xff] %v13721_v52  ;;  %v4537_v24 = vmul.f32 %v4213_v16, %v13196_v29  ;;  %v4215_v43 = vpop.permute.xlu1 %4214  ;;  %v9292_v22 = vpop.f32.mrf.mxu1  ;;  %9492 = vmatprep.mubr.msk.bf16.mxu1 %vm5508_vm5, %v4637_v31 }
 0x4ea   : > { %15450 = vst [vmem:[#allocation36_spill] sm:$0xff] %v13719_v37  ;;  %v4736_v12 = vpack.c.bf16 %v13719_v37, %v13700_v55  ;;  %v13731_v1 = vpop.f32.mrf.mxu0  ;;  %4328 = vrot.lane.b32.xlu0 %v13719_v37, %s10887_s9  ;;  %v4538_v47 = vmul.f32 %v4215_v43, %v13215_v21 }
 0x4eb   : > { %15453 = vst [vmem:[#allocation38_spill] sm:$0xff] %v13731_v1  ;;  %v4638_v13 = vpack.c.bf16 %v4537_v24, %v4536_v18  ;;  %4330 = vrot.lane.b32.xlu1 %v13724_v60, %s10887_s9  ;;  %v3935_v29 = vpop.f32.mrf.mxu1  ;;  %v15454_v1 = vld [vmem:[#allocation10_spill] sm:$0xff] }
 0x4ec   : > { %v13740_v25 = vadd.f32 %v13421_v28, %v3935_v29  ;;  %v13742_v31 = vpop.f32.mrf.mxu0  ;;  %v4217_v16 = vpop.permute.xlu0 %4216  ;;  %9420 = vmatprep.mubr.msk.bf16.mxu0 %vm4757_vm4, %v4736_v12 }
 0x4ed   : > { %v4539_v52 = vmul.f32 %v4217_v16, %v15454_v1  ;;  %v4219_v37 = vpop.permute.xlu1 %4218  ;;  %v9293_v55 = vpop.f32.mrf.mxu1  ;;  %9421 = vmatmul.mubr.msk.bf16.gmra.mxu0 %vm4757_vm4, %v4737_v36  ;;  %9493 = vmatmul.mubr.msk.bf16.gmra.mxu1 %vm5508_vm5, %v4638_v13  ;;  %v13764_v36 = vadd.f32 %v13421_v28, %v9292_v22 }
 0x4ee   : > { %v13749_v18 = vpop.f32.mrf.mxu0  ;;  %4332 = vrot.lane.b32.xlu0 %v13714_v9, %s10887_s9  ;;  %v13754_v29 = vadd.f32 %v13421_v28, %v9293_v55  ;;  %v4540_v13 = vmul.f32 %v4219_v37, %v13232_v56 }
 0x4ef   : > { %15455 = vst [vmem:[#allocation39_spill] sm:$0xff] %v13749_v18  ;;  %v4639_v24 = vpack.c.bf16 %v4539_v52, %v4538_v47  ;;  %4334 = vrot.lane.b32.xlu1 %v13740_v25, %s10887_s9  ;;  %v3938_v21 = vpop.f32.mrf.mxu1 }
 0x4f0   : > { %v13759_v1 = vadd.f32 %v13421_v28, %v3938_v21  ;;  %v13761_v12 = vpop.f32.mrf.mxu0  ;;  %v4221_v43 = vpop.permute.xlu0 %4220  ;;  %v4739_v22 = vpack.c.bf16 %v13754_v29, %v13764_v36 }
 0x4f1   : > { %15457 = vst [vmem:[#allocation41_spill] sm:$0xff] %v13761_v12  ;;  %v4541_v52 = vmul.f32 %v4221_v43, %v13224_v35  ;;  %v4223_v16 = vpop.permute.xlu1 %4222  ;;  %v9296_v55 = vpop.f32.mrf.mxu1  ;;  %9496 = vmatprep.mubr.msk.bf16.mxu1 %vm5508_vm5, %v4639_v24 }
 0x4f2   : > { %15456 = vst [vmem:[#allocation40_spill] sm:$0xff] %v13759_v1  ;;  %v4738_v47 = vpack.c.bf16 %v13759_v1, %v13740_v25  ;;  %v13771_v18 = vpop.f32.mrf.mxu0  ;;  %4336 = vrot.lane.b32.xlu0 %v13759_v1, %s10887_s9  ;;  %v4542_v43 = vmul.f32 %v4223_v16, %v13246_v54 }
 0x4f3   : > { %15458 = vst [vmem:[#allocation42_spill] sm:$0xff] %v13771_v18  ;;  %v4640_v21 = vpack.c.bf16 %v4541_v52, %v4540_v13  ;;  %4338 = vrot.lane.b32.xlu1 %v13764_v36, %s10887_s9  ;;  %v3951_v35 = vpop.f32.mrf.mxu1 }
 0x4f4   : > { %v13780_v56 = vadd.f32 %v13421_v28, %v3951_v35  ;;  %v13782_v37 = vpop.f32.mrf.mxu0  ;;  %v4225_v24 = vpop.permute.xlu0 %4224  ;;  %9424 = vmatprep.mubr.msk.bf16.mxu0 %vm4757_vm4, %v4738_v47 }
 0x4f5   : > { %v4543_v18 = vmul.f32 %v4225_v24, %v13261_v4  ;;  %v4227_v12 = vpop.permute.xlu1 %4226  ;;  %v9297_v1 = vpop.f32.mrf.mxu1  ;;  %9425 = vmatmul.mubr.msk.bf16.gmra.mxu0 %vm4757_vm4, %v4739_v22  ;;  %9497 = vmatmul.mubr.msk.bf16.gmra.mxu1 %vm5508_vm5, %v4640_v21  ;;  %v13804_v22 = vadd.f32 %v13421_v28, %v9296_v55 }
 0x4f6   : > { %v13789_v13 = vpop.f32.mrf.mxu0  ;;  %4340 = vrot.lane.b32.xlu0 %v13754_v29, %s10887_s9  ;;  %v13794_v35 = vadd.f32 %v13421_v28, %v9297_v1  ;;  %v4544_v21 = vmul.f32 %v4227_v12, %v13264_v46 }
 0x4f7   : > { %v4641_v52 = vpack.c.bf16 %v4543_v18, %v4542_v43  ;;  %4342 = vrot.lane.b32.xlu1 %v13780_v56, %s10887_s9  ;;  %v3954_v54 = vpop.f32.mrf.mxu1 }
 0x4f8   : > { %v13799_v4 = vadd.f32 %v13421_v28, %v3954_v54  ;;  %v13801_v16 = vpop.f32.mrf.mxu0  ;;  %v4229_v47 = vpop.permute.xlu0 %4228  ;;  %v4741_v54 = vpack.c.bf16 %v13794_v35, %v13804_v22 }
 0x4f9   : > { %v4545_v18 = vmul.f32 %v4229_v47, %v13256_v41  ;;  %v4231_v24 = vpop.permute.xlu1 %4230  ;;  %9500 = vmatprep.mubr.msk.bf16.mxu1 %vm5508_vm5, %v4641_v52 }
 0x4fa   : > { %v4740_v1 = vpack.c.bf16 %v13799_v4, %v13780_v56  ;;  %v13811_v43 = vpop.f32.mrf.mxu0  ;;  %4344 = vrot.lane.b32.xlu0 %v13799_v4, %s10887_s9  ;;  %v4546_v12 = vmul.f32 %v4231_v24, %v13278_v59 }
 0x4fb   : > { %v4642_v28 = vpack.c.bf16 %v4545_v18, %v4544_v21  ;;  %4346 = vrot.lane.b32.xlu1 %v13804_v22, %s10887_s9 }
 0x4fc   : > { %v13819_v46 = vpop.f32.mrf.mxu0  ;;  %v4233_v41 = vpop.permute.xlu0 %4232  ;;  %9428 = vmatprep.mubr.msk.bf16.mxu0 %vm4757_vm4, %v4740_v1 }
 0x4fd   : > { %15459 = vst [vmem:[#allocation43_spill] sm:$0xff] %v13819_v46  ;;  %v4547_v55 = vmul.f32 %v4233_v41, %v13293_v3  ;;  %v4235_v52 = vpop.permute.xlu1 %4234  ;;  %9429 = vmatmul.mubr.msk.bf16.gmra.mxu0 %vm4757_vm4, %v4741_v54  ;;  %9501 = vmatmul.mubr.msk.bf16.gmra.mxu1 %vm5508_vm5, %v4642_v28 }
 0x4fe   : > { %v13826_v47 = vpop.f32.mrf.mxu0  ;;  %4348 = vrot.lane.b32.xlu0 %v13794_v35, %s10887_s9  ;;  %v4548_v1 = vmul.f32 %v4235_v52, %v13296_v0 }
 0x4ff   : > { %15460 = vst [vmem:[#allocation44_spill] sm:$0xff] %v13826_v47  ;;  %v4643_v21 = vpack.c.bf16 %v4547_v55, %v4546_v12 }
 0x500   : > { %v13830_v18 = vpop.f32.mrf.mxu0  ;;  %v4237_v46 = vpop.permute.xlu0 %4236 }
 0x501   : > { %15461 = vst [vmem:[#allocation46_spill] sm:$0xff] %v13830_v18  ;;  %v4549_v59 = vmul.f32 %v4237_v46, %v13288_v51  ;;  %v4239_v24 = vpop.permute.xlu1 %4238  ;;  %9504 = vmatprep.mubr.msk.bf16.mxu1 %vm5508_vm5, %v4643_v21 }
 0x502   : > { %v13835_v3 = vpop.f32.mrf.mxu0  ;;  %v4550_v47 = vmul.f32 %v4239_v24, %v13310_v44 }
 0x503   : > { %v4644_v54 = vpack.c.bf16 %v4549_v59, %v4548_v1 }
 0x504   : > { %v13837_v28 = vpop.f32.mrf.mxu0  ;;  %v4241_v41 = vpop.permute.xlu0 %4240 }
 0x505   : > { %v4551_v12 = vmul.f32 %v4241_v41, %v13325_v6  ;;  %v4243_v55 = vpop.permute.xlu1 %4242  ;;  %9505 = vmatmul.mubr.msk.bf16.gmra.mxu1 %vm5508_vm5, %v4644_v54 }
 0x506   : > { %v13842_v18 = vpop.f32.mrf.mxu0  ;;  %v4552_v52 = vmul.f32 %v4243_v55, %v13328_v49 }
 0x507   : > { %v4645_v0 = vpack.c.bf16 %v4551_v12, %v4550_v47 }
 0x508   : > { %v13844_v51 = vpop.f32.mrf.mxu0  ;;  %v4245_v46 = vpop.permute.xlu0 %4244 }
 0x509   : > { %v4553_v21 = vmul.f32 %v4245_v46, %v13320_v20  ;;  %v4247_v1 = vpop.permute.xlu1 %4246  ;;  %9508 = vmatprep.mubr.msk.bf16.mxu1 %vm5508_vm5, %v4645_v0 }
 0x50a   : > { %v13849_v59 = vpop.f32.mrf.mxu0  ;;  %v4554_v54 = vmul.f32 %v4247_v1, %v13342_v5 }
 0x50b   : > { %v4646_v44 = vpack.c.bf16 %v4553_v21, %v4552_v52 }
 0x50c   : > { %v13851_v6 = vpop.f32.mrf.mxu0  ;;  %v4249_v24 = vpop.permute.xlu0 %4248 }
 0x50d   : > { %v4555_v47 = vmul.f32 %v4249_v24, %v13357_v10  ;;  %v4251_v41 = vpop.permute.xlu1 %4250  ;;  %9509 = vmatmul.mubr.msk.bf16.gmra.mxu1 %vm5508_vm5, %v4646_v44 }
 0x50e   : > { %v13856_v12 = vpop.f32.mrf.mxu0  ;;  %v4556_v0 = vmul.f32 %v4251_v41, %v13360_v11 }
 0x50f   : > { %v4647_v49 = vpack.c.bf16 %v4555_v47, %v4554_v54 }
 0x510   : > { %v13858_v20 = vpop.f32.mrf.mxu0  ;;  %v4253_v55 = vpop.permute.xlu0 %4252 }
 0x511   : > { %v4557_v46 = vmul.f32 %v4253_v55, %v13352_v58  ;;  %v4255_v52 = vpop.permute.xlu1 %4254  ;;  %9512 = vmatprep.mubr.msk.bf16.mxu1 %vm5508_vm5, %v4647_v49 }
 0x512   : > { %v13863_v21 = vpop.f32.mrf.mxu0  ;;  %v4558_v44 = vmul.f32 %v4255_v52, %v13377_v17 }
 0x513   : > { %v4648_v5 = vpack.c.bf16 %v4557_v46, %v4556_v0 }
 0x514   : > { %v13865_v10 = vpop.f32.mrf.mxu0  ;;  %v4257_v1 = vpop.permute.xlu0 %4256 }
 0x515   : > { %v4559_v24 = vmul.f32 %v4257_v1, %v13392_v26  ;;  %v4259_v54 = vpop.permute.xlu1 %4258  ;;  %9513 = vmatmul.mubr.msk.bf16.gmra.mxu1 %vm5508_vm5, %v4648_v5 }
 0x516   : > { %v13870_v47 = vpop.f32.mrf.mxu0  ;;  %v4560_v49 = vmul.f32 %v4259_v54, %v13395_v61 }
 0x517   : > { %v4649_v11 = vpack.c.bf16 %v4559_v24, %v4558_v44 }
 0x518   : > { %v13872_v58 = vpop.f32.mrf.mxu0  ;;  %v4261_v41 = vpop.permute.xlu0 %4260 }
 0x519   : > { %v4561_v55 = vmul.f32 %v4261_v41, %v13387_v32  ;;  %v4263_v0 = vpop.permute.xlu1 %4262  ;;  %9516 = vmatprep.mubr.msk.bf16.mxu1 %vm5508_vm5, %v4649_v11 }
 0x51a   : > { %v13877_v46 = vpop.f32.mrf.mxu0  ;;  %v4562_v5 = vmul.f32 %v4263_v0, %v13409_v63 }
 0x51b   : > { %v4650_v17 = vpack.c.bf16 %v4561_v55, %v4560_v49 }
 0x51c   : > { %v13879_v26 = vpop.f32.mrf.mxu0  ;;  %v4265_v52 = vpop.permute.xlu0 %4264 }
 0x51d   : > { %v4563_v1 = vmul.f32 %v4265_v52, %v13429_v42  ;;  %v4267_v44 = vpop.permute.xlu1 %4266  ;;  %9517 = vmatmul.mubr.msk.bf16.gmra.mxu1 %vm5508_vm5, %v4650_v17 }
 0x51e   : > { %v13884_v24 = vpop.f32.mrf.mxu0  ;;  %v4564_v11 = vmul.f32 %v4267_v44, %v13432_v2 }
 0x51f   : > { %v4651_v61 = vpack.c.bf16 %v4563_v1, %v4562_v5 }
 0x520   : > { %v13886_v32 = vpop.f32.mrf.mxu0  ;;  %v4269_v54 = vpop.permute.xlu0 %4268 }
 0x521   : > { %v4565_v41 = vmul.f32 %v4269_v54, %v13424_v30  ;;  %v4271_v49 = vpop.permute.xlu1 %4270  ;;  %9520 = vmatprep.mubr.msk.bf16.mxu1 %vm5508_vm5, %v4651_v61 }
 0x522   : > { %v13891_v55 = vpop.f32.mrf.mxu0  ;;  %v4566_v17 = vmul.f32 %v4271_v49, %v13446_v19 }
 0x523   : > { %v4652_v63 = vpack.c.bf16 %v4565_v41, %v4564_v11 }
 0x524   : > { %v13893_v42 = vpop.f32.mrf.mxu0  ;;  %v4273_v0 = vpop.permute.xlu0 %4272 }
 0x525   : > { %v4567_v52 = vmul.f32 %v4273_v0, %v13461_v23  ;;  %v4275_v5 = vpop.permute.xlu1 %4274  ;;  %9521 = vmatmul.mubr.msk.bf16.gmra.mxu1 %vm5508_vm5, %v4652_v63 }
 0x526   : > { %v13898_v1 = vpop.f32.mrf.mxu0  ;;  %v4568_v61 = vmul.f32 %v4275_v5, %v13464_v57 }
 0x527   : > { %v4653_v2 = vpack.c.bf16 %v4567_v52, %v4566_v17 }
 0x528   : > { %v13900_v30 = vpop.f32.mrf.mxu0  ;;  %v4277_v44 = vpop.permute.xlu0 %4276 }
 0x529   : > { %v4569_v54 = vmul.f32 %v4277_v44, %v13456_v39  ;;  %v4279_v11 = vpop.permute.xlu1 %4278  ;;  %9524 = vmatprep.mubr.msk.bf16.mxu1 %vm5508_vm5, %v4653_v2 }
 0x52a   : > { %v13905_v41 = vpop.f32.mrf.mxu0  ;;  %v4570_v63 = vmul.f32 %v4279_v11, %v13478_v8 }
 0x52b   : > { %v4654_v19 = vpack.c.bf16 %v4569_v54, %v4568_v61 }
 0x52c   : > { %v13907_v23 = vpop.f32.mrf.mxu0  ;;  %v4281_v49 = vpop.permute.xlu0 %4280 }
 0x52d   : > { %v4571_v0 = vmul.f32 %v4281_v49, %v13493_v62  ;;  %v4283_v17 = vpop.permute.xlu1 %4282  ;;  %9525 = vmatmul.mubr.msk.bf16.gmra.mxu1 %vm5508_vm5, %v4654_v19 }
 0x52e   : > { %v13912_v52 = vpop.f32.mrf.mxu0  ;;  %v4572_v2 = vmul.f32 %v4283_v17, %v13496_v40 }
 0x52f   : > { %15462 = vst [vmem:[#allocation48_spill] sm:$0xff] %v13912_v52  ;;  %v4655_v57 = vpack.c.bf16 %v4571_v0, %v4570_v63 }
 0x530   : > { %v13914_v39 = vpop.f32.mrf.mxu0  ;;  %v4285_v5 = vpop.permute.xlu0 %4284 }
 0x531   : > { %v4573_v44 = vmul.f32 %v4285_v5, %v13488_v33  ;;  %v4287_v61 = vpop.permute.xlu1 %4286  ;;  %9528 = vmatprep.mubr.msk.bf16.mxu1 %vm5508_vm5, %v4655_v57 }
 0x532   : > { %v13919_v54 = vpop.f32.mrf.mxu0  ;;  %v4574_v19 = vmul.f32 %v4287_v61, %v13510_v15 }
 0x533   : > { %15463 = vst [vmem:[#allocation50_spill] sm:$0xff] %v13919_v54  ;;  %v4656_v8 = vpack.c.bf16 %v4573_v44, %v4572_v2 }
 0x534   : > { %v13921_v62 = vpop.f32.mrf.mxu0  ;;  %v4289_v11 = vpop.permute.xlu0 %4288 }
 0x535   : > { %15464 = vst [vmem:[#allocation4_spill] sm:$0xff] %v13921_v62  ;;  %v4575_v49 = vmul.f32 %v4289_v11, %v13525_v53  ;;  %v4291_v63 = vpop.permute.xlu1 %4290  ;;  %9529 = vmatmul.mubr.msk.bf16.gmra.mxu1 %vm5508_vm5, %v4656_v8  ;;  %v15469_v11 = vld [vmem:[#allocation51_spill] sm:$0xff] }
 0x536   : > { %v13926_v0 = vpop.f32.mrf.mxu0  ;;  %v4576_v57 = vmul.f32 %v4291_v63, %v13528_v38 }
 0x537   : > { %15465 = vst [vmem:[#allocation45_spill] sm:$0xff] %v13926_v0  ;;  %v4657_v40 = vpack.c.bf16 %v4575_v49, %v4574_v19 }
 0x538   : > { %v13928_v33 = vpop.f32.mrf.mxu0  ;;  %v4293_v17 = vpop.permute.xlu0 %4292 }
 0x539   : > { %15466 = vst [vmem:[#allocation3_spill] sm:$0xff] %v13928_v33  ;;  %v4577_v5 = vmul.f32 %v4293_v17, %v13520_v45  ;;  %v4295_v2 = vpop.permute.xlu1 %4294  ;;  %9532 = vmatprep.mubr.msk.bf16.mxu1 %vm5508_vm5, %v4657_v40  ;;  %v15483_v33 = vld [vmem:[#allocation14_spill] sm:$0xff] }
 0x53a   : > { %v13933_v44 = vpop.f32.mrf.mxu0  ;;  %v4578_v8 = vmul.f32 %v4295_v2, %v13542_v34 }
 0x53b   : > { %15467 = vst [vmem:[#allocation5_spill] sm:$0xff] %v13933_v44  ;;  %v4658_v15 = vpack.c.bf16 %v4577_v5, %v4576_v57  ;;  %v15472_v5 = vld [vmem:[#allocation11_spill] sm:$0xff] }
 0x53c   : > { %v13935_v53 = vpop.f32.mrf.mxu0  ;;  %v4297_v61 = vpop.permute.xlu0 %4296 }
 0x53d   : > { %15468 = vst [vmem:[#allocation47_spill] sm:$0xff] %v13935_v53  ;;  %v4579_v19 = vmul.f32 %v4297_v61, %v15469_v11  ;;  %v4299_v49 = vpop.permute.xlu1 %4298  ;;  %v9438_v0 = vpop.f32.mrf.mxu1  ;;  %9533 = vmatmul.mubr.msk.bf16.gmra.mxu1 %vm5508_vm5, %v4658_v15  ;;  %v15473_v61 = vld [vmem:[#allocation49_spill] sm:$0xff] }
 0x53e   : > { %v13940_v38 = vpop.f32.mrf.mxu0  ;;  %v4580_v57 = vmul.f32 %v4299_v49, %v13564_v50  ;;  %v5747_v11 = vadd.f32 %v9438_v0, %v15473_v61 }
 0x53f   : > { %15470 = vst [vmem:[#allocation2_spill] sm:$0xff] %v13940_v38  ;;  %v4659_v45 = vpack.c.bf16 %v4579_v19, %v4578_v8  ;;  %v5738_v63 = vpop.f32.mrf.mxu1  ;;  %v15475_v38 = vld [vmem:[#allocation12_spill] sm:$0xff]  ;;  %v13955_v19 = vld [vmem:[%s15265_s1 + $0x5] ss:$0 sm:$0xff] }
 0x540   : > { %v13942_v17 = vpop.f32.mrf.mxu0  ;;  %v4301_v40 = vpop.permute.xlu0 %4300  ;;  %v5739_v53 = vadd.f32 %v5738_v63, %v15472_v5  ;;  %v15477_v5 = vld [vmem:[#allocation52_spill] sm:$0xff] }
 0x541   : > { %15471 = vst [vmem:[#allocation6_spill] sm:$0xff] %v13942_v17  ;;  %v4581_v44 = vmul.f32 %v4301_v40, %v13554_v7  ;;  %v4303_v34 = vpop.permute.xlu1 %4302  ;;  %v9439_v2 = vpop.f32.mrf.mxu1  ;;  %9536 = vmatprep.mubr.msk.bf16.mxu1 %vm5508_vm5, %v4659_v45 }
 0x542   : > { %v13949_v15 = vpop.f32.mrf.mxu0  ;;  %v5750_v8 = vadd.f32 %v9439_v2, %v15475_v38  ;;  %v6253_v0 = vadd.f32 %v13955_v19, %v5739_v53  ;;  %v4582_v61 = vmul.f32 %v4303_v34, %v15477_v5  ;;  %v15481_v34 = vld [vmem:[#allocation17_spill] sm:$0xff] }
 0x543   : > { %15474 = vst [vmem:[#allocation7_spill] sm:$0xff] %v13949_v15  ;;  %v4660_v50 = vpack.c.bf16 %v4581_v44, %v4580_v57  ;;  %v5741_v49 = vpop.f32.mrf.mxu1  ;;  %v15478_v15 = vld [vmem:[#allocation15_spill] sm:$0xff]  ;;  %v6255_v44 = vadd.f32 %v13955_v19, %v5747_v11 }
 0x544   : > { %v6256_v63 = vadd.f32 %v13955_v19, %v5750_v8  ;;  %v13958_v7 = vpop.f32.mrf.mxu0  ;;  %v5742_v40 = vadd.f32 %v5741_v49, %v13582_v48  ;;  %v4305_v45 = vpop.permute.xlu0 %4304 }
 0x545   : > { %15476 = vst [vmem:[#allocation8_spill] sm:$0xff] %v13958_v7  ;;  %v4583_v38 = vmul.f32 %v4305_v45, %v15478_v15  ;;  %v4307_v2 = vpop.permute.xlu1 %4306  ;;  %v9442_v17 = vpop.f32.mrf.mxu1  ;;  %9537 = vmatmul.mubr.msk.bf16.gmra.mxu1 %vm5508_vm5, %v4660_v50  ;;  %v15482_v45 = vld [vmem:[#allocation16_spill] sm:$0xff] }
 0x546   : > { %v6254_v57 = vadd.f32 %v13955_v19, %v5742_v40  ;;  %v13967_v8 = vpop.f32.mrf.mxu0  ;;  %10343 = vtanh.f32 %v6256_v63  ;;  %v4584_v15 = vmul.f32 %v4307_v2, %v15481_v34  ;;  %v15484_v40 = vld [vmem:[#allocation13_spill] sm:$0xff] }
 0x547   : > { %15479 = vst [vmem:[#allocation9_spill] sm:$0xff] %v13967_v8  ;;  %v4661_v7 = vpack.c.bf16 %v4583_v38, %v4582_v61  ;;  %v5754_v48 = vpop.f32.mrf.mxu1  ;;  %v5763_v63 = vadd.f32 %v9442_v17, %v15484_v40  ;;  %v15486_v38 = vld [vmem:[#allocation18_spill] sm:$0xff] }
 0x548   : > { %10345 = vtanh.f32 %v6254_v57  ;;  %v13969_v49 = vpop.f32.mrf.mxu0  ;;  %v4309_v53 = vpop.permute.xlu0 %4308  ;;  %v5755_v5 = vadd.f32 %v5754_v48, %v15482_v45  ;;  %v15488_v48 = vld [vmem:[#allocation20_spill] sm:$0xff]  ;;  %v15489_v45 = vld [vmem:[#allocation19_spill] sm:$0xff] }
 0x549   : > { %15480 = vst [vmem:[#allocation10_spill] sm:$0xff] %v13969_v49  ;;  %10347 = vtanh.f32 %v6253_v0  ;;  %v4585_v50 = vmul.f32 %v4309_v53, %v15483_v33  ;;  %v4311_v62 = vpop.permute.xlu1 %4310  ;;  %v9443_v11 = vpop.f32.mrf.mxu1  ;;  %9540 = vmatprep.mubr.msk.bf16.mxu1 %vm5508_vm5, %v4661_v7 }
 0x54a   : > { %10349 = vtanh.f32 %v6255_v44  ;;  %v13976_v61 = vpop.f32.mrf.mxu0  ;;  %v5766_v57 = vadd.f32 %v9443_v11, %v15486_v38  ;;  %v6257_v53 = vadd.f32 %v13955_v19, %v5755_v5  ;;  %v4586_v7 = vmul.f32 %v4311_v62, %v15489_v45  ;;  %v15490_v44 = vld [vmem:[#allocation26_spill] sm:$0xff]  ;;  %v15493_v62 = vld [vmem:[#allocation28_spill] sm:$0xff] }
 0x54b   : > { %15485 = vst [vmem:[#allocation51_spill] sm:$0xff] %v13976_v61  ;;  %v4662_v8 = vpack.c.bf16 %v4585_v50, %v4584_v15  ;;  %v5757_v49 = vpop.f32.mrf.mxu1  ;;  %v6259_v15 = vadd.f32 %v13955_v19, %v5763_v63 }
 0x54c   : > { %v6260_v0 = vadd.f32 %v13955_v19, %v5766_v57  ;;  %v13980_v2 = vpop.f32.mrf.mxu0  ;;  %v5758_v34 = vadd.f32 %v5757_v49, %v15488_v48  ;;  %v4313_v33 = vpop.permute.xlu0 %4312 }
 0x54d   : > { %15487 = vst [vmem:[#allocation11_spill] sm:$0xff] %v13980_v2  ;;  %v4587_v54 = vmul.f32 %v4313_v33, %v15490_v44  ;;  %v4315_v17 = vpop.permute.xlu1 %4314  ;;  %v9446_v40 = vpop.f32.mrf.mxu1  ;;  %9541 = vmatmul.mubr.msk.bf16.gmra.mxu1 %vm5508_vm5, %v4662_v8  ;;  %v15494_v33 = vld [vmem:[#allocation23_spill] sm:$0xff]  ;;  %v15495_v44 = vld [vmem:[#allocation22_spill] sm:$0xff] }
 0x54e   : > { %v6258_v50 = vadd.f32 %v13955_v19, %v5758_v34  ;;  %v13989_v11 = vpop.f32.mrf.mxu0  ;;  %10351 = vtanh.f32 %v6260_v0  ;;  %v4588_v48 = vmul.f32 %v4315_v17, %v15493_v62  ;;  %v15496_v34 = vld [vmem:[#allocation21_spill] sm:$0xff] }
 0x54f   : > { %15491 = vst [vmem:[#allocation49_spill] sm:$0xff] %v13989_v11  ;;  %v4663_v38 = vpack.c.bf16 %v4587_v54, %v4586_v7  ;;  %v5770_v49 = vpop.f32.mrf.mxu1  ;;  %v5779_v0 = vadd.f32 %v9446_v40, %v15496_v34  ;;  %v15498_v7 = vld [vmem:[#allocation25_spill] sm:$0xff] }
 0x550   : > { %10353 = vtanh.f32 %v6258_v50  ;;  %v13991_v57 = vpop.f32.mrf.mxu0  ;;  %v4317_v5 = vpop.permute.xlu0 %4316  ;;  %v5771_v45 = vadd.f32 %v5770_v49, %v15494_v33  ;;  %v15500_v49 = vld [vmem:[#allocation27_spill] sm:$0xff]  ;;  %v15502_v40 = vld [vmem:[#allocation29_spill] sm:$0xff] }
 0x551   : > { %15492 = vst [vmem:[#allocation12_spill] sm:$0xff] %v13991_v57  ;;  %10355 = vtanh.f32 %v6257_v53  ;;  %v4589_v8 = vmul.f32 %v4317_v5, %v15495_v44  ;;  %v4319_v2 = vpop.permute.xlu1 %4318  ;;  %v9447_v63 = vpop.f32.mrf.mxu1  ;;  %9544 = vmatprep.mubr.msk.bf16.mxu1 %vm5508_vm5, %v4663_v38 }
 0x552   : > { %10357 = vtanh.f32 %v6259_v15  ;;  %v13998_v54 = vpop.f32.mrf.mxu0  ;;  %v5782_v50 = vadd.f32 %v9447_v63, %v15498_v7  ;;  %v6261_v38 = vadd.f32 %v13955_v19, %v5771_v45  ;;  %v15501_v15 = vld [vmem:[#allocation31_spill] sm:$0xff] }
 0x553   : > { %15497 = vst [vmem:[#allocation52_spill] sm:$0xff] %v13998_v54  ;;  %v4664_v11 = vpack.c.bf16 %v4589_v8, %v4588_v48  ;;  %v5773_v57 = vpop.f32.mrf.mxu1  ;;  %v10344_v53 = vpop.eup %10343  ;;  %v4590_v61 = vmul.f32 %v4319_v2, %v15501_v15  ;;  %v6263_v8 = vadd.f32 %v13955_v19, %v5779_v0 }
 0x554   : > { %v6264_v17 = vadd.f32 %v13955_v19, %v5782_v50  ;;  %v14002_v62 = vpop.f32.mrf.mxu0  ;;  %v5774_v5 = vadd.f32 %v5773_v57, %v15500_v49  ;;  %v4321_v33 = vpop.permute.xlu0 %4320 }
 0x555   : > { %15499 = vst [vmem:[#allocation15_spill] sm:$0xff] %v14002_v62  ;;  %v10346_v44 = vpop.eup %10345  ;;  %v4591_v34 = vmul.f32 %v4321_v33, %v15502_v40  ;;  %v4323_v54 = vpop.permute.xlu1 %4322  ;;  %9545 = vmatmul.mubr.msk.bf16.gmra.mxu1 %vm5508_vm5, %v4664_v11  ;;  %v15504_v40 = vld [vmem:[#allocation24_spill] sm:$0xff] }
 0x556   : > { %v9450_v52 = vpop.f32.mrf.mxu1  ;;  %v10348_v48 = vpop.eup %10347  ;;  %v6262_v63 = vadd.f32 %v13955_v19, %v5774_v5  ;;  %10359 = vtanh.f32 %v6264_v17  ;;  %v4592_v11 = vmul.f32 %v4323_v54, %v13684_v27 }
 0x557   : > { %v14011_v7 = vpop.f32.mrf.mxu0  ;;  %v10350_v57 = vpop.eup %10349  ;;  %v4665_v50 = vpack.c.bf16 %v4591_v34, %v4590_v61  ;;  %v6516_v49 = vpack.c.bf16 %v10346_v44, %v10348_v48  ;;  %v15505_v61 = vld [vmem:[#allocation32_spill] sm:$0xff]  ;;  %v15506_v44 = vld [vmem:[#allocation30_spill] sm:$0xff] }
 0x558   : > { %15503 = vst [vmem:[#allocation17_spill] sm:$0xff] %v14011_v7  ;;  %v5786_v45 = vpop.f32.mrf.mxu1  ;;  %v6517_v2 = vpack.c.bf16 %v10344_v53, %v10350_v57  ;;  %10361 = vtanh.f32 %v6262_v63  ;;  %v4325_v15 = vpop.permute.xlu0 %4324  ;;  %v5795_v53 = vadd.f32 %v9450_v52, %v15505_v61  ;;  %v15508_v63 = vld [vmem:[#allocation34_spill] sm:$0xff]  ;;  %v15509_v52 = vld [vmem:[#allocation33_spill] sm:$0xff] }
 0x559   : > { %v14013_v33 = vpop.f32.mrf.mxu0  ;;  %10363 = vtanh.f32 %v6261_v38  ;;  %v5787_v0 = vadd.f32 %v5786_v45, %v15504_v40  ;;  %v4593_v5 = vmul.f32 %v4325_v15, %v13674_v14  ;;  %v4327_v62 = vpop.permute.xlu1 %4326  ;;  %9572 = vmatprep.mubr.msk.bf16.mxu0 %vm6605_vm6, %v6516_v49  ;;  %9548 = vmatprep.mubr.msk.bf16.mxu1 %vm5508_vm5, %v4665_v50  ;;  %v15510_v15 = vld [vmem:[#allocation36_spill] sm:$0xff] }
 0x55a   : > { %v9451_v7 = vpop.f32.mrf.mxu1  ;;  %10365 = vtanh.f32 %v6263_v8  ;;  %9573 = vmatmul.mubr.msk.bf16.vlgmr.msra.gmra.mxu0 %vm6605_vm6, %v6517_v2  ;;  %v4594_v49 = vmul.f32 %v4327_v62, %v15509_v52 }
 0x55b   : > { %v14021_v17 = vpop.f32.mrf.mxu0  ;;  %v5798_v34 = vadd.f32 %v9451_v7, %v15506_v44  ;;  %v4666_v27 = vpack.c.bf16 %v4593_v5, %v4592_v11  ;;  %v10352_v38 = vpop.eup %10351  ;;  %v6265_v8 = vadd.f32 %v13955_v19, %v5787_v0  ;;  %v6267_v11 = vadd.f32 %v13955_v19, %v5795_v53 }
 0x55c   : > { %v5789_v54 = vpop.f32.mrf.mxu1  ;;  %v4329_v45 = vpop.permute.xlu0 %4328 }
 0x55d   : > { %v6268_v14 = vadd.f32 %v13955_v19, %v5798_v34  ;;  %v14026_v48 = vpop.f32.mrf.mxu0  ;;  %v5790_v57 = vadd.f32 %v5789_v54, %v15508_v63  ;;  %v10354_v50 = vpop.eup %10353  ;;  %v4595_v40 = vmul.f32 %v4329_v45, %v15510_v15  ;;  %9549 = vmatmul.mubr.msk.bf16.gmra.mxu1 %vm5508_vm5, %v4666_v27  ;;  %v15512_v45 = vld [vmem:[#allocation37_spill] sm:$0xff] }
 0x55e   : > { %15507 = vst [vmem:[#allocation16_spill] sm:$0xff] %v14026_v48  ;;  %v4331_v7 = vpop.permute.xlu1 %4330  ;;  %v9454_v61 = vpop.f32.mrf.mxu1 }
 0x55f   : > { %v10356_v2 = vpop.eup %10355  ;;  %v6266_v5 = vadd.f32 %v13955_v19, %v5790_v57  ;;  %v14035_v44 = vpop.f32.mrf.mxu0  ;;  %10367 = vtanh.f32 %v6268_v14  ;;  %v4667_v54 = vpack.c.bf16 %v4595_v40, %v4594_v49  ;;  %v4596_v27 = vmul.f32 %v4331_v7, %v13724_v60  ;;  %v15513_v14 = vld [vmem:[#allocation35_spill] sm:$0xff] }
 0x560   : > { %15511 = vst [vmem:[#allocation14_spill] sm:$0xff] %v14035_v44  ;;  %v10358_v34 = vpop.eup %10357  ;;  %v5802_v63 = vpop.f32.mrf.mxu1  ;;  %v6518_v0 = vpack.c.bf16 %v10354_v50, %v10356_v2  ;;  %v5811_v50 = vadd.f32 %v9454_v61, %v15513_v14  ;;  %v15514_v2 = vld [vmem:[#allocation38_spill] sm:$0xff] }
 0x561   : > { %10369 = vtanh.f32 %v6266_v5  ;;  %v14037_v62 = vpop.f32.mrf.mxu0  ;;  %v5803_v52 = vadd.f32 %v5802_v63, %v15512_v45  ;;  %v4333_v15 = vpop.permute.xlu0 %4332  ;;  %v6519_v48 = vpack.c.bf16 %v10352_v38, %v10358_v34  ;;  %9552 = vmatprep.mubr.msk.bf16.mxu1 %vm5508_vm5, %v4667_v54  ;;  %v15515_v63 = vld [vmem:[#allocation40_spill] sm:$0xff] }
 0x562   : > { %10371 = vtanh.f32 %v6265_v8  ;;  %v4597_v53 = vmul.f32 %v4333_v15, %v13714_v9  ;;  %v4335_v57 = vpop.permute.xlu1 %4334  ;;  %9576 = vmatprep.mubr.msk.bf16.mxu0 %vm6605_vm6, %v6518_v0  ;;  %v9455_v44 = vpop.f32.mrf.mxu1 }
 0x563   : > { %10373 = vtanh.f32 %v6267_v11  ;;  %v6269_v49 = vadd.f32 %v13955_v19, %v5803_v52  ;;  %v14046_v40 = vpop.f32.mrf.mxu0  ;;  %v5814_v38 = vadd.f32 %v9455_v44, %v15514_v2  ;;  %9577 = vmatmul.mubr.msk.bf16.gmra.mxu0 %vm6605_vm6, %v6519_v48  ;;  %v10360_v9 = vpop.eup %10359  ;;  %v4598_v61 = vmul.f32 %v4335_v57, %v13740_v25  ;;  %v15516_v57 = vld [vmem:[#allocation41_spill] sm:$0xff] }
 0x564   : > { %v4668_v60 = vpack.c.bf16 %v4597_v53, %v4596_v27  ;;  %v5805_v8 = vpop.f32.mrf.mxu1  ;;  %v6271_v44 = vadd.f32 %v13955_v19, %v5811_v50 }
 0x565   : > { %v6272_v7 = vadd.f32 %v13955_v19, %v5814_v38  ;;  %v14051_v5 = vpop.f32.mrf.mxu0  ;;  %v5806_v34 = vadd.f32 %v5805_v8, %v13742_v31  ;;  %v4337_v11 = vpop.permute.xlu0 %4336  ;;  %10375 = vtanh.f32 %v6269_v49 }
 0x566   : > { %v10362_v54 = vpop.eup %10361  ;;  %v4599_v0 = vmul.f32 %v4337_v11, %v15515_v63  ;;  %v4339_v45 = vpop.permute.xlu1 %4338  ;;  %9553 = vmatmul.mubr.msk.bf16.gmra.mxu1 %vm5508_vm5, %v4668_v60 }
 0x567   : > { %v9458_v52 = vpop.f32.mrf.mxu1  ;;  %v10364_v48 = vpop.eup %10363  ;;  %v6270_v15 = vadd.f32 %v13955_v19, %v5806_v34  ;;  %10377 = vtanh.f32 %v6272_v7  ;;  %v4600_v11 = vmul.f32 %v4339_v45, %v13764_v36  ;;  %v15517_v7 = vld [vmem:[#allocation39_spill] sm:$0xff] }
 0x568   : > { %v14059_v27 = vpop.f32.mrf.mxu0  ;;  %v10366_v53 = vpop.eup %10365  ;;  %v4669_v31 = vpack.c.bf16 %v4599_v0, %v4598_v61  ;;  %v6520_v2 = vpack.c.bf16 %v10362_v54, %v10364_v48  ;;  %v5827_v54 = vadd.f32 %v9458_v52, %v15517_v7  ;;  %v15518_v0 = vld [vmem:[#allocation42_spill] sm:$0xff] }
 0x569   : > { %v5818_v14 = vpop.f32.mrf.mxu1  ;;  %10379 = vtanh.f32 %v6270_v15  ;;  %v4341_v8 = vpop.permute.xlu0 %4340  ;;  %v6521_v60 = vpack.c.bf16 %v10360_v9, %v10366_v53 }
 0x56a   : > { %v14061_v25 = vpop.f32.mrf.mxu0  ;;  %v5819_v38 = vadd.f32 %v5818_v14, %v15516_v57  ;;  %v4601_v50 = vmul.f32 %v4341_v8, %v13754_v29  ;;  %v4343_v49 = vpop.permute.xlu1 %4342  ;;  %9580 = vmatprep.mubr.msk.bf16.mxu0 %vm6605_vm6, %v6520_v2  ;;  %9556 = vmatprep.mubr.msk.bf16.mxu1 %vm5508_vm5, %v4669_v31  ;;  %10381 = vtanh.f32 %v6271_v44 }
 0x56b   : > { %v9459_v34 = vpop.f32.mrf.mxu1  ;;  %9581 = vmatmul.mubr.msk.bf16.gmra.mxu0 %vm6605_vm6, %v6521_v60  ;;  %v4602_v52 = vmul.f32 %v4343_v49, %v13780_v56 }
 0x56c   : > { %v6273_v61 = vadd.f32 %v13955_v19, %v5819_v38  ;;  %v14070_v63 = vpop.f32.mrf.mxu0  ;;  %v5830_v48 = vadd.f32 %v9459_v34, %v15518_v0  ;;  %v4670_v36 = vpack.c.bf16 %v4601_v50, %v4600_v11  ;;  %v10368_v29 = vpop.eup %10367  ;;  %v6275_v38 = vadd.f32 %v13955_v19, %v5827_v54 }
 0x56d   : > { %v5821_v9 = vpop.f32.mrf.mxu1  ;;  %v4345_v44 = vpop.permute.xlu0 %4344 }
 0x56e   : > { %v6276_v45 = vadd.f32 %v13955_v19, %v5830_v48  ;;  %v14075_v15 = vpop.f32.mrf.mxu0  ;;  %v5822_v53 = vadd.f32 %v5821_v9, %v13782_v37  ;;  %v10370_v31 = vpop.eup %10369  ;;  %v4603_v14 = vmul.f32 %v4345_v44, %v13799_v4  ;;  %9557 = vmatmul.mubr.msk.bf16.gmra.mxu1 %vm5508_vm5, %v4670_v36  ;;  %10383 = vtanh.f32 %v6273_v61 }
 0x56f   : > { %v9462_v2 = vpop.f32.mrf.mxu1  ;;  %v10372_v57 = vpop.eup %10371 }
 0x570   : > { %v6274_v8 = vadd.f32 %v13955_v19, %v5822_v53  ;;  %v4347_v60 = vpop.permute.xlu1 %4346  ;;  %v14083_v11 = vpop.f32.mrf.mxu0  ;;  %10385 = vtanh.f32 %v6276_v45  ;;  %v4671_v37 = vpack.c.bf16 %v4603_v14, %v4602_v52  ;;  %v6522_v7 = vpack.c.bf16 %v10370_v31, %v10372_v57  ;;  %v15519_v31 = vld [vmem:[#allocation43_spill] sm:$0xff] }
 0x571   : > { %v10374_v50 = vpop.eup %10373  ;;  %v5834_v34 = vpop.f32.mrf.mxu1  ;;  %v4604_v54 = vmul.f32 %v4347_v60, %v13804_v22  ;;  %v5843_v36 = vadd.f32 %v9462_v2, %v13789_v13 }
 0x572   : > { %10387 = vtanh.f32 %v6274_v8  ;;  %v14085_v56 = vpop.f32.mrf.mxu0  ;;  %v5835_v4 = vadd.f32 %v5834_v34, %v13801_v16  ;;  %v4349_v49 = vpop.permute.xlu0 %4348  ;;  %v6523_v0 = vpack.c.bf16 %v10368_v29, %v10374_v50  ;;  %9584 = vmatprep.mubr.msk.bf16.mxu0 %vm6605_vm6, %v6522_v7  ;;  %9560 = vmatprep.mubr.msk.bf16.mxu1 %vm5508_vm5, %v4671_v37  ;;  %v15520_v50 = vld [vmem:[#allocation46_spill] sm:$0xff] }
 0x573   : > { %v4605_v61 = vmul.f32 %v4349_v49, %v13794_v35  ;;  %v9463_v48 = vpop.f32.mrf.mxu1  ;;  %10389 = vtanh.f32 %v6275_v38  ;;  %v10376_v16 = vpop.eup %10375  ;;  %v6279_v13 = vadd.f32 %v13955_v19, %v5843_v36 }
 0x574   : > { %v6277_v9 = vadd.f32 %v13955_v19, %v5835_v4  ;;  %v5846_v45 = vadd.f32 %v9463_v48, %v13811_v43  ;;  %9585 = vmatmul.mubr.msk.bf16.gmra.mxu0 %vm6605_vm6, %v6523_v0  ;;  %v10378_v22 = vpop.eup %10377  ;;  %v14096_v44 = vpop.f32.mrf.mxu0  ;;  %v15521_v4 = vld [vmem:[#allocation44_spill] sm:$0xff] }
 0x575   : > { %v4672_v29 = vpack.c.bf16 %v4605_v61, %v4604_v54  ;;  %v5837_v53 = vpop.f32.mrf.mxu1 }
 0x576   : > { %v6280_v35 = vadd.f32 %v13955_v19, %v5846_v45  ;;  %v5838_v52 = vadd.f32 %v5837_v53, %v15519_v31  ;;  %v10380_v14 = vpop.eup %10379  ;;  %10391 = vtanh.f32 %v6277_v9  ;;  %v14103_v60 = vpop.f32.mrf.mxu0 }
 0x577   : > { %v9466_v57 = vpop.f32.mrf.mxu1  ;;  %9561 = vmatmul.mubr.msk.bf16.gmra.mxu1 %vm5508_vm5, %v4672_v29  ;;  %v6524_v2 = vpack.c.bf16 %v10380_v14, %v10376_v16  ;;  %v10382_v38 = vpop.eup %10381 }
 0x578   : > { %v6278_v43 = vadd.f32 %v13955_v19, %v5838_v52  ;;  %10393 = vtanh.f32 %v6280_v35  ;;  %v6525_v34 = vpack.c.bf16 %v10378_v22, %v10382_v38  ;;  %v5859_v49 = vadd.f32 %v9466_v57, %v15521_v4  ;;  %v14111_v9 = vpop.f32.mrf.mxu0 }
 0x579   : > { %v5850_v8 = vpop.f32.mrf.mxu1  ;;  %9588 = vmatprep.mubr.msk.bf16.mxu0 %vm6605_vm6, %v6524_v2 }
 0x57a   : > { %10395 = vtanh.f32 %v6278_v43  ;;  %v5851_v37 = vadd.f32 %v5850_v8, %v15520_v50  ;;  %v6283_v22 = vadd.f32 %v13955_v19, %v5859_v49  ;;  %v14117_v14 = vpop.f32.mrf.mxu0 }
 0x57b   : > { %v9467_v7 = vpop.f32.mrf.mxu1  ;;  %10397 = vtanh.f32 %v6279_v13  ;;  %v10384_v61 = vpop.eup %10383 }
 0x57c   : > { %v6281_v0 = vadd.f32 %v13955_v19, %v5851_v37  ;;  %v5862_v54 = vadd.f32 %v9467_v7, %v13835_v3  ;;  %9589 = vmatmul.mubr.msk.bf16.gmra.mxu0 %vm6605_vm6, %v6525_v34  ;;  %v14125_v34 = vpop.f32.mrf.mxu0 }
 0x57d   : > { %v5853_v48 = vpop.f32.mrf.mxu1  ;;  %v10386_v36 = vpop.eup %10385 }
 0x57e   : > { %v6284_v45 = vadd.f32 %v13955_v19, %v5862_v54  ;;  %v5854_v16 = vadd.f32 %v5853_v48, %v13837_v28  ;;  %10399 = vtanh.f32 %v6281_v0  ;;  %v14131_v48 = vpop.f32.mrf.mxu0 }
 0x57f   : > { %v10388_v29 = vpop.eup %10387  ;;  %v9470_v53 = vpop.f32.mrf.mxu1 }
 0x580   : > { %v6282_v35 = vadd.f32 %v13955_v19, %v5854_v16  ;;  %v6526_v31 = vpack.c.bf16 %v10388_v29, %v10384_v61  ;;  %v10390_v3 = vpop.eup %10389  ;;  %10401 = vtanh.f32 %v6284_v45  ;;  %v5875_v43 = vadd.f32 %v9470_v53, %v13842_v18 }
 0x581   : > { %v5866_v52 = vpop.f32.mrf.mxu1  ;;  %v6527_v13 = vpack.c.bf16 %v10386_v36, %v10390_v3  ;;  %v14139_v3 = vpop.f32.mrf.mxu0 }
 0x582   : > { %10403 = vtanh.f32 %v6282_v35  ;;  %v5867_v57 = vadd.f32 %v5866_v52, %v13844_v51  ;;  %9592 = vmatprep.mubr.msk.bf16.mxu0 %vm6605_vm6, %v6526_v31  ;;  %v6287_v0 = vadd.f32 %v13955_v19, %v5875_v43 }
 0x583   : > { %v9471_v28 = vpop.f32.mrf.mxu1  ;;  %10405 = vtanh.f32 %v6283_v22  ;;  %v10392_v8 = vpop.eup %10391 }
 0x584   : > { %v6285_v2 = vadd.f32 %v13955_v19, %v5867_v57  ;;  %v5878_v38 = vadd.f32 %v9471_v28, %v13849_v59  ;;  %9593 = vmatmul.mubr.msk.bf16.gmra.mxu0 %vm6605_vm6, %v6527_v13 }
 0x585   : > { %v5869_v50 = vpop.f32.mrf.mxu1  ;;  %v10394_v37 = vpop.eup %10393 }
 0x586   : > { %v6288_v51 = vadd.f32 %v13955_v19, %v5878_v38  ;;  %v5870_v7 = vadd.f32 %v5869_v50, %v13851_v6  ;;  %10407 = vtanh.f32 %v6285_v2  ;;  %v14145_v38 = vpop.f32.mrf.mxu0 }
 0x587   : > { %v10396_v4 = vpop.eup %10395  ;;  %v9474_v49 = vpop.f32.mrf.mxu1 }
 0x588   : > { %v6286_v18 = vadd.f32 %v13955_v19, %v5870_v7  ;;  %v6528_v54 = vpack.c.bf16 %v10396_v4, %v10392_v8  ;;  %v10398_v59 = vpop.eup %10397  ;;  %10409 = vtanh.f32 %v6288_v51  ;;  %v5891_v16 = vadd.f32 %v9474_v49, %v13856_v12 }
 0x589   : > { %v5882_v61 = vpop.f32.mrf.mxu1  ;;  %v6529_v45 = vpack.c.bf16 %v10394_v37, %v10398_v59 }
 0x58a   : > { %10411 = vtanh.f32 %v6286_v18  ;;  %v5883_v36 = vadd.f32 %v5882_v61, %v13858_v20  ;;  %9596 = vmatprep.mubr.msk.bf16.mxu0 %vm6605_vm6, %v6528_v54  ;;  %v6291_v28 = vadd.f32 %v13955_v19, %v5891_v16  ;;  %v14153_v18 = vpop.f32.mrf.mxu0 }
 0x58b   : > { %v9475_v6 = vpop.f32.mrf.mxu1  ;;  %10413 = vtanh.f32 %v6287_v0  ;;  %v10400_v22 = vpop.eup %10399 }
 0x58c   : > { %v6289_v29 = vadd.f32 %v13955_v19, %v5883_v36  ;;  %v5894_v53 = vadd.f32 %v9475_v6, %v13863_v21  ;;  %9597 = vmatmul.mubr.msk.bf16.gmra.mxu0 %vm6605_vm6, %v6529_v45  ;;  %v14159_v16 = vpop.f32.mrf.mxu0 }
 0x58d   : > { %v5885_v35 = vpop.f32.mrf.mxu1  ;;  %v10402_v31 = vpop.eup %10401 }
 0x58e   : > { %v6292_v20 = vadd.f32 %v13955_v19, %v5894_v53  ;;  %v5886_v52 = vadd.f32 %v5885_v35, %v13865_v10  ;;  %10415 = vtanh.f32 %v6289_v29 }
 0x58f   : > { %v10404_v57 = vpop.eup %10403  ;;  %v9478_v13 = vpop.f32.mrf.mxu1 }
 0x590   : > { %v6290_v12 = vadd.f32 %v13955_v19, %v5886_v52  ;;  %v6530_v43 = vpack.c.bf16 %v10404_v57, %v10400_v22  ;;  %v10406_v21 = vpop.eup %10405  ;;  %10417 = vtanh.f32 %v6292_v20  ;;  %v5907_v37 = vadd.f32 %v9478_v13, %v13870_v47  ;;  %v14167_v13 = vpop.f32.mrf.mxu0 }
 0x591   : > { %v5898_v2 = vpop.f32.mrf.mxu1  ;;  %v6531_v50 = vpack.c.bf16 %v10402_v31, %v10406_v21 }
 0x592   : > { %10419 = vtanh.f32 %v6290_v12  ;;  %v5899_v8 = vadd.f32 %v5898_v2, %v13872_v58  ;;  %9600 = vmatprep.mubr.msk.bf16.mxu0 %vm6605_vm6, %v6530_v43  ;;  %v6295_v36 = vadd.f32 %v13955_v19, %v5907_v37 }
 0x593   : > { %v9479_v10 = vpop.f32.mrf.mxu1  ;;  %10421 = vtanh.f32 %v6291_v28  ;;  %v10408_v4 = vpop.eup %10407 }
 0x594   : > { %v6293_v51 = vadd.f32 %v13955_v19, %v5899_v8  ;;  %v5910_v7 = vadd.f32 %v9479_v10, %v13877_v46  ;;  %9601 = vmatmul.mubr.msk.bf16.gmra.mxu0 %vm6605_vm6, %v6531_v50  ;;  %v14173_v50 = vpop.f32.mrf.mxu0 }
 0x595   : > { %v5901_v49 = vpop.f32.mrf.mxu1  ;;  %v10410_v0 = vpop.eup %10409 }
 0x596   : > { %v6296_v58 = vadd.f32 %v13955_v19, %v5910_v7  ;;  %v5902_v54 = vadd.f32 %v5901_v49, %v13879_v26  ;;  %10423 = vtanh.f32 %v6293_v51 }
 0x597   : > { %v10412_v59 = vpop.eup %10411  ;;  %v9482_v61 = vpop.f32.mrf.mxu1 }
 0x598   : > { %v6294_v47 = vadd.f32 %v13955_v19, %v5902_v54  ;;  %v6532_v45 = vpack.c.bf16 %v10412_v59, %v10408_v4  ;;  %v10414_v46 = vpop.eup %10413  ;;  %10425 = vtanh.f32 %v6296_v58  ;;  %v5923_v22 = vadd.f32 %v9482_v61, %v13884_v24  ;;  %v14181_v54 = vpop.f32.mrf.mxu0 }
 0x599   : > { %v5914_v6 = vpop.f32.mrf.mxu1  ;;  %v6533_v53 = vpack.c.bf16 %v10410_v0, %v10414_v46 }
 0x59a   : > { %10427 = vtanh.f32 %v6294_v47  ;;  %v5915_v29 = vadd.f32 %v5914_v6, %v13886_v32  ;;  %9604 = vmatprep.mubr.msk.bf16.mxu0 %vm6605_vm6, %v6532_v45  ;;  %v6299_v21 = vadd.f32 %v13955_v19, %v5923_v22  ;;  %v14187_v6 = vpop.f32.mrf.mxu0 }
 0x59b   : > { %v9483_v26 = vpop.f32.mrf.mxu1  ;;  %10429 = vtanh.f32 %v6295_v36  ;;  %v10416_v20 = vpop.eup %10415 }
 0x59c   : > { %v6297_v35 = vadd.f32 %v13955_v19, %v5915_v29  ;;  %v5926_v31 = vadd.f32 %v9483_v26, %v13891_v55  ;;  %9605 = vmatmul.mubr.msk.bf16.gmra.mxu0 %vm6605_vm6, %v6533_v53  ;;  %v15522_v26 = vld [vmem:[#allocation48_spill] sm:$0xff] }
 0x59d   : > { %v5917_v52 = vpop.f32.mrf.mxu1  ;;  %v10418_v57 = vpop.eup %10417 }
 0x59e   : > { %v6300_v32 = vadd.f32 %v13955_v19, %v5926_v31  ;;  %v5918_v28 = vadd.f32 %v5917_v52, %v13893_v42  ;;  %10431 = vtanh.f32 %v6297_v35  ;;  %v15523_v31 = vld [vmem:[#allocation50_spill] sm:$0xff] }
 0x59f   : > { %v10420_v12 = vpop.eup %10419  ;;  %v9486_v43 = vpop.f32.mrf.mxu1 }
 0x5a0   : > { %v6298_v24 = vadd.f32 %v13955_v19, %v5918_v28  ;;  %v6534_v2 = vpack.c.bf16 %v10420_v12, %v10416_v20  ;;  %v10422_v55 = vpop.eup %10421  ;;  %10433 = vtanh.f32 %v6300_v32  ;;  %v5939_v51 = vadd.f32 %v9486_v43, %v13898_v1  ;;  %v14195_v28 = vpop.f32.mrf.mxu0  ;;  %v15524_v12 = vld [vmem:[#allocation4_spill] sm:$0xff] }
 0x5a1   : > { %v5930_v8 = vpop.f32.mrf.mxu1  ;;  %v6535_v37 = vpack.c.bf16 %v10418_v57, %v10422_v55 }
 0x5a2   : > { %10435 = vtanh.f32 %v6298_v24  ;;  %v5931_v10 = vadd.f32 %v5930_v8, %v13900_v30  ;;  %9608 = vmatprep.mubr.msk.bf16.mxu0 %vm6605_vm6, %v6534_v2  ;;  %v6303_v47 = vadd.f32 %v13955_v19, %v5939_v51  ;;  %v15525_v51 = vld [vmem:[#allocation3_spill] sm:$0xff] }
 0x5a3   : > { %v9487_v42 = vpop.f32.mrf.mxu1  ;;  %10437 = vtanh.f32 %v6299_v21  ;;  %v10424_v49 = vpop.eup %10423 }
 0x5a4   : > { %v6301_v7 = vadd.f32 %v13955_v19, %v5931_v10  ;;  %v5942_v4 = vadd.f32 %v9487_v42, %v13905_v41  ;;  %9609 = vmatmul.mubr.msk.bf16.gmra.mxu0 %vm6605_vm6, %v6535_v37  ;;  %v14201_v42 = vpop.f32.mrf.mxu0 }
 0x5a5   : > { %v5933_v0 = vpop.f32.mrf.mxu1  ;;  %v10426_v58 = vpop.eup %10425 }
 0x5a6   : > { %v6304_v30 = vadd.f32 %v13955_v19, %v5942_v4  ;;  %v5934_v59 = vadd.f32 %v5933_v0, %v13907_v23  ;;  %10439 = vtanh.f32 %v6301_v7  ;;  %v15526_v0 = vld [vmem:[#allocation45_spill] sm:$0xff] }
 0x5a7   : > { %v10428_v61 = vpop.eup %10427  ;;  %v9490_v36 = vpop.f32.mrf.mxu1 }
 0x5a8   : > { %v6302_v1 = vadd.f32 %v13955_v19, %v5934_v59  ;;  %v6536_v45 = vpack.c.bf16 %v10428_v61, %v10424_v49  ;;  %v10430_v41 = vpop.eup %10429  ;;  %10441 = vtanh.f32 %v6304_v30  ;;  %v5955_v22 = vadd.f32 %v9490_v36, %v15522_v26  ;;  %v15527_v59 = vld [vmem:[#allocation5_spill] sm:$0xff] }
 0x5a9   : > { %v5946_v46 = vpop.f32.mrf.mxu1  ;;  %v6537_v53 = vpack.c.bf16 %v10426_v58, %v10430_v41 }
 0x5aa   : > { %10443 = vtanh.f32 %v6302_v1  ;;  %v5947_v29 = vadd.f32 %v5946_v46, %v13914_v39  ;;  %9612 = vmatprep.mubr.msk.bf16.mxu0 %vm6605_vm6, %v6536_v45  ;;  %v6307_v2 = vadd.f32 %v13955_v19, %v5955_v22  ;;  %v14209_v45 = vpop.f32.mrf.mxu0  ;;  %v15528_v46 = vld [vmem:[#allocation47_spill] sm:$0xff] }
 0x5ab   : > { %v9491_v23 = vpop.f32.mrf.mxu1  ;;  %10445 = vtanh.f32 %v6303_v47  ;;  %v10432_v52 = vpop.eup %10431 }
 0x5ac   : > { %v6305_v35 = vadd.f32 %v13955_v19, %v5947_v29  ;;  %v5958_v20 = vadd.f32 %v9491_v23, %v15523_v31  ;;  %9613 = vmatmul.mubr.msk.bf16.gmra.mxu0 %vm6605_vm6, %v6537_v53 }
 0x5ad   : > { %v5949_v57 = vpop.f32.mrf.mxu1  ;;  %v10434_v32 = vpop.eup %10433 }
 0x5ae   : > { %v6308_v39 = vadd.f32 %v13955_v19, %v5958_v20  ;;  %v5950_v43 = vadd.f32 %v5949_v57, %v15524_v12  ;;  %10447 = vtanh.f32 %v6305_v35  ;;  %v15529_v57 = vld [vmem:[#allocation6_spill] sm:$0xff] }
 0x5af   : > { %v10436_v21 = vpop.eup %10435  ;;  %v9494_v24 = vpop.f32.mrf.mxu1 }
 0x5b0   : > { %v6306_v55 = vadd.f32 %v13955_v19, %v5950_v43  ;;  %v6538_v8 = vpack.c.bf16 %v10436_v21, %v10432_v52  ;;  %v10438_v10 = vpop.eup %10437  ;;  %10449 = vtanh.f32 %v6308_v39  ;;  %v5971_v58 = vadd.f32 %v9494_v24, %v15526_v0  ;;  %v14215_v52 = vpop.f32.mrf.mxu0  ;;  %v15530_v43 = vld [vmem:[#allocation2_spill] sm:$0xff] }
 0x5b1   : > { %v5962_v37 = vpop.f32.mrf.mxu1  ;;  %v6539_v4 = vpack.c.bf16 %v10434_v32, %v10438_v10 }
 0x5b2   : > { %10451 = vtanh.f32 %v6306_v55  ;;  %v5963_v7 = vadd.f32 %v5962_v37, %v15525_v51  ;;  %9616 = vmatprep.mubr.msk.bf16.mxu0 %vm6605_vm6, %v6538_v8  ;;  %v6311_v26 = vadd.f32 %v13955_v19, %v5971_v58  ;;  %v14223_v51 = vpop.f32.mrf.mxu0 }
 0x5b3   : > { %v9495_v49 = vpop.f32.mrf.mxu1  ;;  %10453 = vtanh.f32 %v6307_v2  ;;  %v10440_v36 = vpop.eup %10439  ;;  %v15531_v2 = vld [vmem:[#allocation7_spill] sm:$0xff] }
 0x5b4   : > { %v6309_v30 = vadd.f32 %v13955_v19, %v5963_v7  ;;  %v5974_v61 = vadd.f32 %v9495_v49, %v15527_v59  ;;  %9617 = vmatmul.mubr.msk.bf16.gmra.mxu0 %vm6605_vm6, %v6539_v4  ;;  %v15532_v4 = vld [vmem:[#allocation8_spill] sm:$0xff] }
 0x5b5   : > { %v5965_v47 = vpop.f32.mrf.mxu1  ;;  %v10442_v1 = vpop.eup %10441 }
 0x5b6   : > { %v6312_v41 = vadd.f32 %v13955_v19, %v5974_v61  ;;  %v5966_v29 = vadd.f32 %v5965_v47, %v15528_v46  ;;  %10455 = vtanh.f32 %v6309_v30 }
 0x5b7   : > { %v10444_v53 = vpop.eup %10443  ;;  %v9498_v23 = vpop.f32.mrf.mxu1 }
 0x5b8   : > { %v6310_v22 = vadd.f32 %v13955_v19, %v5966_v29  ;;  %v6540_v35 = vpack.c.bf16 %v10444_v53, %v10440_v36  ;;  %v10446_v31 = vpop.eup %10445  ;;  %10457 = vtanh.f32 %v6312_v41  ;;  %v5987_v21 = vadd.f32 %v9498_v23, %v15530_v43  ;;  %v15533_v41 = vld [vmem:[#allocation10_spill] sm:$0xff]  ;;  %v15534_v23 = vld [vmem:[#allocation9_spill] sm:$0xff]  ;;  %v15536_v43 = vld [vmem:[#allocation11_spill] sm:$0xff] }
 0x5b9   : > { %v5978_v20 = vpop.f32.mrf.mxu1  ;;  %v6541_v39 = vpack.c.bf16 %v10442_v1, %v10446_v31  ;;  %v14229_v1 = vpop.f32.mrf.mxu0 }
 0x5ba   : > { %10459 = vtanh.f32 %v6310_v22  ;;  %v5979_v32 = vadd.f32 %v5978_v20, %v15529_v57  ;;  %9620 = vmatprep.mubr.msk.bf16.mxu0 %vm6605_vm6, %v6540_v35  ;;  %v6315_v30 = vadd.f32 %v13955_v19, %v5987_v21  ;;  %v15535_v35 = vld [vmem:[#allocation51_spill] sm:$0xff] }
 0x5bb   : > { %v9499_v12 = vpop.f32.mrf.mxu1  ;;  %10461 = vtanh.f32 %v6311_v26  ;;  %v10448_v8 = vpop.eup %10447 }
 0x5bc   : > { %v6313_v24 = vadd.f32 %v13955_v19, %v5979_v32  ;;  %v5990_v55 = vadd.f32 %v9499_v12, %v15531_v2  ;;  %9621 = vmatmul.mubr.msk.bf16.gmra.mxu0 %vm6605_vm6, %v6541_v39  ;;  %v14237_v39 = vpop.f32.mrf.mxu0 }
 0x5bd   : > { %v5981_v10 = vpop.f32.mrf.mxu1  ;;  %v10450_v37 = vpop.eup %10449 }
 0x5be   : > { %v6316_v7 = vadd.f32 %v13955_v19, %v5990_v55  ;;  %v5982_v49 = vadd.f32 %v5981_v10, %v15532_v4  ;;  %10463 = vtanh.f32 %v6313_v24  ;;  %v14243_v4 = vpop.f32.mrf.mxu0 }
 0x5bf   : > { %v10452_v0 = vpop.eup %10451  ;;  %v9502_v58 = vpop.f32.mrf.mxu1 }
 0x5c0   : > { %v6314_v59 = vadd.f32 %v13955_v19, %v5982_v49  ;;  %v6542_v61 = vpack.c.bf16 %v10452_v0, %v10448_v8  ;;  %v10454_v36 = vpop.eup %10453  ;;  %10465 = vtanh.f32 %v6316_v7  ;;  %v6003_v26 = vadd.f32 %v9502_v58, %v15534_v23  ;;  %v15537_v49 = vld [vmem:[#allocation12_spill] sm:$0xff]  ;;  %v14251_v23 = vpop.f32.mrf.mxu0 }
 0x5c1   : > { %v5994_v47 = vpop.f32.mrf.mxu1  ;;  %v6543_v29 = vpack.c.bf16 %v10450_v37, %v10454_v36 }
 0x5c2   : > { %10467 = vtanh.f32 %v6314_v59  ;;  %v5995_v46 = vadd.f32 %v5994_v47, %v15533_v41  ;;  %9624 = vmatprep.mubr.msk.bf16.mxu0 %vm6605_vm6, %v6542_v61  ;;  %v6319_v55 = vadd.f32 %v13955_v19, %v6003_v26  ;;  %v15538_v59 = vld [vmem:[#allocation49_spill] sm:$0xff]  ;;  %v15539_v47 = vld [vmem:[#allocation52_spill] sm:$0xff]  ;;  %v14256_v26 = vld [vmem:[%s15265_s1 + $0x5] ss:$0 sm:$0xff] }
 0x5c3   : > { %v9503_v53 = vpop.f32.mrf.mxu1  ;;  %10469 = vtanh.f32 %v6315_v30  ;;  %v10456_v20 = vpop.eup %10455 }
 0x5c4   : > { %v6317_v22 = vadd.f32 %v13955_v19, %v5995_v46  ;;  %v6006_v31 = vadd.f32 %v9503_v53, %v15535_v35  ;;  %9625 = vmatmul.mubr.msk.bf16.gmra.mxu0 %vm6605_vm6, %v6543_v29  ;;  %v15540_v35 = vld [vmem:[#allocation15_spill] sm:$0xff] }
 0x5c5   : > { %v5997_v57 = vpop.f32.mrf.mxu1  ;;  %v10458_v32 = vpop.eup %10457 }
 0x5c6   : > { %v6320_v12 = vadd.f32 %v13955_v19, %v6006_v31  ;;  %v5998_v21 = vadd.f32 %v5997_v57, %v15536_v43  ;;  %10471 = vtanh.f32 %v6317_v22 }
 0x5c7   : > { %v10460_v24 = vpop.eup %10459  ;;  %v9506_v2 = vpop.f32.mrf.mxu1 }
 0x5c8   : > { %v6318_v8 = vadd.f32 %v13955_v19, %v5998_v21  ;;  %v6544_v10 = vpack.c.bf16 %v10460_v24, %v10456_v20  ;;  %v10462_v37 = vpop.eup %10461  ;;  %10473 = vtanh.f32 %v6320_v12  ;;  %v6019_v61 = vadd.f32 %v9506_v2, %v15538_v59  ;;  %v14262_v24 = vpop.f32.mrf.mxu0 }
 0x5c9   : > { %v6010_v7 = vpop.f32.mrf.mxu1  ;;  %v6545_v58 = vpack.c.bf16 %v10458_v32, %v10462_v37 }
 0x5ca   : > { %10475 = vtanh.f32 %v6318_v8  ;;  %v6011_v0 = vadd.f32 %v6010_v7, %v15537_v49  ;;  %9628 = vmatprep.mubr.msk.bf16.mxu0 %vm6605_vm6, %v6544_v10  ;;  %v6323_v57 = vadd.f32 %v14256_v26, %v6019_v61  ;;  %v15541_v10 = vld [vmem:[#allocation17_spill] sm:$0xff]  ;;  %v14270_v59 = vpop.f32.mrf.mxu0  ;;  %v15542_v61 = vld [vmem:[#allocation16_spill] sm:$0xff] }
 0x5cb   : > { %v9507_v30 = vpop.f32.mrf.mxu1  ;;  %10477 = vtanh.f32 %v6319_v55  ;;  %v10464_v46 = vpop.eup %10463 }
 0x5cc   : > { %v6321_v36 = vadd.f32 %v13955_v19, %v6011_v0  ;;  %v6022_v41 = vadd.f32 %v9507_v30, %v15539_v47  ;;  %9629 = vmatmul.mubr.msk.bf16.gmra.mxu0 %vm6605_vm6, %v6545_v58 }
 0x5cd   : > { %v6013_v29 = vpop.f32.mrf.mxu1  ;;  %v10466_v53 = vpop.eup %10465 }
 0x5ce   : > { %v6324_v22 = vadd.f32 %v14256_v26, %v6022_v41  ;;  %v6014_v31 = vadd.f32 %v6013_v29, %v15540_v35  ;;  %10479 = vtanh.f32 %v6321_v36  ;;  %v14276_v35 = vpop.f32.mrf.mxu0 }
 0x5cf   : > { %v10468_v20 = vpop.eup %10467  ;;  %v9510_v19 = vpop.f32.mrf.mxu1 }
 0x5d0   : > { %v6322_v32 = vadd.f32 %v14256_v26, %v6014_v31  ;;  %v6546_v12 = vpack.c.bf16 %v10468_v20, %v10464_v46  ;;  %v10470_v43 = vpop.eup %10469  ;;  %10481 = vtanh.f32 %v6324_v22  ;;  %v6035_v37 = vadd.f32 %v9510_v19, %v15541_v10 }
 0x5d1   : > { %v6026_v21 = vpop.f32.mrf.mxu1  ;;  %v6547_v55 = vpack.c.bf16 %v10466_v53, %v10470_v43 }
 0x5d2   : > { %10483 = vtanh.f32 %v6322_v32  ;;  %v6027_v2 = vadd.f32 %v6026_v21, %v14013_v33  ;;  %9632 = vmatprep.mubr.msk.bf16.mxu0 %vm6605_vm6, %v6546_v12  ;;  %v6327_v46 = vadd.f32 %v14256_v26, %v6035_v37 }
 0x5d3   : > { %v9511_v8 = vpop.f32.mrf.mxu1  ;;  %10485 = vtanh.f32 %v6323_v57  ;;  %v10472_v0 = vpop.eup %10471  ;;  %v15543_v57 = vld [vmem:[#allocation14_spill] sm:$0xff] }
 0x5d4   : > { %v6325_v7 = vadd.f32 %v14256_v26, %v6027_v2  ;;  %v6038_v49 = vadd.f32 %v9511_v8, %v14021_v17  ;;  %9633 = vmatmul.mubr.msk.bf16.gmra.mxu0 %vm6605_vm6, %v6547_v55  ;;  %v14284_v8 = vpop.f32.mrf.mxu0 }
 0x5d5   : > { %v6029_v58 = vpop.f32.mrf.mxu1  ;;  %v10474_v30 = vpop.eup %10473 }
 0x5d6   : > { %v6328_v33 = vadd.f32 %v14256_v26, %v6038_v49  ;;  %v6030_v36 = vadd.f32 %v6029_v58, %v15542_v61  ;;  %10487 = vtanh.f32 %v6325_v7 }
 0x5d7   : > { %v10476_v47 = vpop.eup %10475  ;;  %v9514_v41 = vpop.f32.mrf.mxu1 }
 0x5d8   : > { %v6326_v29 = vadd.f32 %v14256_v26, %v6030_v36  ;;  %v6548_v53 = vpack.c.bf16 %v10476_v47, %v10472_v0  ;;  %v10478_v17 = vpop.eup %10477  ;;  %10489 = vtanh.f32 %v6328_v33  ;;  %v6051_v32 = vadd.f32 %v9514_v41, %v15543_v57  ;;  %v14290_v33 = vpop.f32.mrf.mxu0 }
 0x5d9   : > { %v6042_v22 = vpop.f32.mrf.mxu1  ;;  %v6549_v20 = vpack.c.bf16 %v10474_v30, %v10478_v17 }
 0x5da   : > { %10491 = vtanh.f32 %v6326_v29  ;;  %v6043_v31 = vadd.f32 %v6042_v22, %v14037_v62  ;;  %9636 = vmatprep.mubr.msk.bf16.mxu0 %vm6605_vm6, %v6548_v53  ;;  %v6331_v49 = vadd.f32 %v14256_v26, %v6051_v32  ;;  %v14298_v22 = vpop.f32.mrf.mxu0 }
 0x5db   : > { %v9515_v19 = vpop.f32.mrf.mxu1  ;;  %10493 = vtanh.f32 %v6327_v46  ;;  %v10480_v21 = vpop.eup %10479 }
 0x5dc   : > { %v6329_v12 = vadd.f32 %v14256_v26, %v6043_v31  ;;  %v6054_v43 = vadd.f32 %v9515_v19, %v14046_v40  ;;  %9637 = vmatmul.mubr.msk.bf16.gmra.mxu0 %vm6605_vm6, %v6549_v20 }
 0x5dd   : > { %v6045_v2 = vpop.f32.mrf.mxu1  ;;  %v10482_v55 = vpop.eup %10481 }
 0x5de   : > { %v6332_v62 = vadd.f32 %v14256_v26, %v6054_v43  ;;  %v6046_v10 = vadd.f32 %v6045_v2, %v14051_v5  ;;  %10495 = vtanh.f32 %v6329_v12  ;;  %v14304_v43 = vpop.f32.mrf.mxu0 }
 0x5df   : > { %v10484_v37 = vpop.eup %10483  ;;  %v9518_v7 = vpop.f32.mrf.mxu1 }
 0x5e0   : > { %v6330_v0 = vadd.f32 %v14256_v26, %v6046_v10  ;;  %v6550_v58 = vpack.c.bf16 %v10484_v37, %v10480_v21  ;;  %v10486_v40 = vpop.eup %10485  ;;  %10497 = vtanh.f32 %v6332_v62  ;;  %v6067_v47 = vadd.f32 %v9518_v7, %v14059_v27 }
 0x5e1   : > { %v6058_v30 = vpop.f32.mrf.mxu1  ;;  %v6551_v36 = vpack.c.bf16 %v10482_v55, %v10486_v40 }
 0x5e2   : > { %10499 = vtanh.f32 %v6330_v0  ;;  %v6059_v61 = vadd.f32 %v6058_v30, %v14061_v25  ;;  %9640 = vmatprep.mubr.msk.bf16.mxu0 %vm6605_vm6, %v6550_v58  ;;  %v6335_v57 = vadd.f32 %v14256_v26, %v6067_v47  ;;  %v14312_v0 = vpop.f32.mrf.mxu0 }
 0x5e3   : > { %v9519_v5 = vpop.f32.mrf.mxu1  ;;  %10501 = vtanh.f32 %v6331_v49  ;;  %v10488_v29 = vpop.eup %10487 }
 0x5e4   : > { %v6333_v41 = vadd.f32 %v14256_v26, %v6059_v61  ;;  %v6070_v46 = vadd.f32 %v9519_v5, %v14070_v63  ;;  %9641 = vmatmul.mubr.msk.bf16.gmra.mxu0 %vm6605_vm6, %v6551_v36  ;;  %v14318_v47 = vpop.f32.mrf.mxu0 }
 0x5e5   : > { %v6061_v53 = vpop.f32.mrf.mxu1  ;;  %v10490_v17 = vpop.eup %10489 }
 0x5e6   : > { %v6336_v25 = vadd.f32 %v14256_v26, %v6070_v46  ;;  %v6062_v31 = vadd.f32 %v6061_v53, %v14075_v15  ;;  %10503 = vtanh.f32 %v6333_v41 }
 0x5e7   : > { %v10492_v20 = vpop.eup %10491  ;;  %v9522_v19 = vpop.f32.mrf.mxu1 }
 0x5e8   : > { %v6334_v27 = vadd.f32 %v14256_v26, %v6062_v31  ;;  %v6552_v32 = vpack.c.bf16 %v10492_v20, %v10488_v29  ;;  %v10494_v63 = vpop.eup %10493  ;;  %10505 = vtanh.f32 %v6336_v25  ;;  %v6083_v55 = vadd.f32 %v9522_v19, %v14083_v11  ;;  %v14326_v19 = vpop.f32.mrf.mxu0 }
 0x5e9   : > { %v6074_v12 = vpop.f32.mrf.mxu1  ;;  %v6553_v2 = vpack.c.bf16 %v10490_v17, %v10494_v63 }
 0x5ea   : > { %10507 = vtanh.f32 %v6334_v27  ;;  %v6075_v21 = vadd.f32 %v6074_v12, %v14085_v56  ;;  %9644 = vmatprep.mubr.msk.bf16.mxu0 %vm6605_vm6, %v6552_v32  ;;  %v6339_v61 = vadd.f32 %v14256_v26, %v6083_v55 }
 0x5eb   : > { %v9523_v15 = vpop.f32.mrf.mxu1  ;;  %10509 = vtanh.f32 %v6335_v57  ;;  %v10496_v37 = vpop.eup %10495 }
 0x5ec   : > { %v6337_v62 = vadd.f32 %v14256_v26, %v6075_v21  ;;  %v6086_v10 = vadd.f32 %v9523_v15, %v14096_v44  ;;  %9645 = vmatmul.mubr.msk.bf16.gmra.mxu0 %vm6605_vm6, %v6553_v2  ;;  %v14332_v2 = vpop.f32.mrf.mxu0 }
 0x5ed   : > { %v6077_v7 = vpop.f32.mrf.mxu1  ;;  %v10498_v49 = vpop.eup %10497 }
 0x5ee   : > { %v6340_v56 = vadd.f32 %v14256_v26, %v6086_v10  ;;  %v6078_v58 = vadd.f32 %v6077_v7, %v14103_v60  ;;  %10511 = vtanh.f32 %v6337_v62 }
 0x5ef   : > { %v10500_v40 = vpop.eup %10499  ;;  %v9526_v30 = vpop.f32.mrf.mxu1 }
 0x5f0   : > { %v6338_v11 = vadd.f32 %v14256_v26, %v6078_v58  ;;  %v6554_v36 = vpack.c.bf16 %v10500_v40, %v10496_v37  ;;  %v10502_v44 = vpop.eup %10501  ;;  %10513 = vtanh.f32 %v6340_v56  ;;  %v6099_v29 = vadd.f32 %v9526_v30, %v14111_v9  ;;  %v14340_v58 = vpop.f32.mrf.mxu0 }
 0x5f1   : > { %v6090_v5 = vpop.f32.mrf.mxu1  ;;  %v6555_v46 = vpack.c.bf16 %v10498_v49, %v10502_v44 }
 0x5f2   : > { %10515 = vtanh.f32 %v6338_v11  ;;  %v6091_v41 = vadd.f32 %v6090_v5, %v14117_v14  ;;  %9648 = vmatprep.mubr.msk.bf16.mxu0 %vm6605_vm6, %v6554_v36  ;;  %v6343_v63 = vadd.f32 %v14256_v26, %v6099_v29  ;;  %v14346_v5 = vpop.f32.mrf.mxu0 }
 0x5f3   : > { %v9527_v60 = vpop.f32.mrf.mxu1  ;;  %10517 = vtanh.f32 %v6339_v61  ;;  %v10504_v25 = vpop.eup %10503 }
 0x5f4   : > { %v6341_v53 = vadd.f32 %v14256_v26, %v6091_v41  ;;  %v6102_v17 = vadd.f32 %v9527_v60, %v14125_v34  ;;  %9649 = vmatmul.mubr.msk.bf16.gmra.mxu0 %vm6605_vm6, %v6555_v46 }
 0x5f5   : > { %v6093_v31 = vpop.f32.mrf.mxu1  ;;  %v10506_v20 = vpop.eup %10505 }
 0x5f6   : > { %v6344_v14 = vadd.f32 %v14256_v26, %v6102_v17  ;;  %v6094_v57 = vadd.f32 %v6093_v31, %v14131_v48  ;;  %10519 = vtanh.f32 %v6341_v53 }
 0x5f7   : > { %v10508_v27 = vpop.eup %10507  ;;  %v9530_v32 = vpop.f32.mrf.mxu1 }
 0x5f8   : > { %v6342_v9 = vadd.f32 %v14256_v26, %v6094_v57  ;;  %v6556_v12 = vpack.c.bf16 %v10508_v27, %v10504_v25  ;;  %v10510_v34 = vpop.eup %10509  ;;  %10521 = vtanh.f32 %v6344_v14  ;;  %v6115_v62 = vadd.f32 %v9530_v32, %v14139_v3 }
 0x5f9   : > { %v6106_v21 = vpop.f32.mrf.mxu1  ;;  %v6557_v55 = vpack.c.bf16 %v10506_v20, %v10510_v34  ;;  %v14354_v20 = vpop.f32.mrf.mxu0 }
 0x5fa   : > { %10523 = vtanh.f32 %v6342_v9  ;;  %v6107_v15 = vadd.f32 %v6106_v21, %v14145_v38  ;;  %9652 = vmatprep.mubr.msk.bf16.mxu0 %vm6605_vm6, %v6556_v12  ;;  %v6347_v11 = vadd.f32 %v14256_v26, %v6115_v62 }
 0x5fb   : > { %v9531_v48 = vpop.f32.mrf.mxu1  ;;  %10525 = vtanh.f32 %v6343_v63  ;;  %v10512_v7 = vpop.eup %10511 }
 0x5fc   : > { %v6345_v10 = vadd.f32 %v14256_v26, %v6107_v15  ;;  %v6118_v37 = vadd.f32 %v9531_v48, %v14153_v18  ;;  %9653 = vmatmul.mubr.msk.bf16.gmra.mxu0 %vm6605_vm6, %v6557_v55  ;;  %v14360_v12 = vpop.f32.mrf.mxu0 }
 0x5fd   : > { %v6109_v49 = vpop.f32.mrf.mxu1  ;;  %v10514_v56 = vpop.eup %10513 }
 0x5fe   : > { %v6348_v38 = vadd.f32 %v14256_v26, %v6118_v37  ;;  %v6110_v40 = vadd.f32 %v6109_v49, %v14159_v16  ;;  %10527 = vtanh.f32 %v6345_v10 }
 0x5ff   : > { %v10516_v30 = vpop.eup %10515  ;;  %v9534_v61 = vpop.f32.mrf.mxu1 }
 0x600   : > { %v6346_v3 = vadd.f32 %v14256_v26, %v6110_v40  ;;  %v6558_v36 = vpack.c.bf16 %v10516_v30, %v10512_v7  ;;  %v10518_v18 = vpop.eup %10517  ;;  %10529 = vtanh.f32 %v6348_v38  ;;  %v6131_v60 = vadd.f32 %v9534_v61, %v14167_v13  ;;  %v14368_v7 = vpop.f32.mrf.mxu0 }
 0x601   : > { %v6122_v44 = vpop.f32.mrf.mxu1  ;;  %v6559_v46 = vpack.c.bf16 %v10514_v56, %v10518_v18 }
 0x602   : > { %10531 = vtanh.f32 %v6346_v3  ;;  %v6123_v41 = vadd.f32 %v6122_v44, %v14173_v50  ;;  %9656 = vmatprep.mubr.msk.bf16.mxu0 %vm6605_vm6, %v6558_v36  ;;  %v6351_v32 = vadd.f32 %v14256_v26, %v6131_v60 }
 0x603   : > { %v9535_v16 = vpop.f32.mrf.mxu1  ;;  %10533 = vtanh.f32 %v6347_v11  ;;  %v10520_v17 = vpop.eup %10519 }
 0x604   : > { %v6349_v29 = vadd.f32 %v14256_v26, %v6123_v41  ;;  %v6134_v53 = vadd.f32 %v9535_v16, %v14181_v54  ;;  %9657 = vmatmul.mubr.msk.bf16.gmra.mxu0 %vm6605_vm6, %v6559_v46  ;;  %v14374_v11 = vpop.f32.mrf.mxu0 }
 0x605   : > { %v6125_v25 = vpop.f32.mrf.mxu1  ;;  %v10522_v31 = vpop.eup %10521 }
 0x606   : > { %v6352_v50 = vadd.f32 %v14256_v26, %v6134_v53  ;;  %v6126_v14 = vadd.f32 %v6125_v25, %v14187_v6  ;;  %10535 = vtanh.f32 %v6349_v29  ;;  %v14382_v29 = vpop.f32.mrf.mxu0 }
 0x607   : > { %v10524_v57 = vpop.eup %10523  ;;  %v9538_v27 = vpop.f32.mrf.mxu1 }
 0x608   : > { %v6350_v13 = vadd.f32 %v14256_v26, %v6126_v14  ;;  %v6560_v63 = vpack.c.bf16 %v10524_v57, %v10520_v17  ;;  %v10526_v54 = vpop.eup %10525  ;;  %10537 = vtanh.f32 %v6352_v50  ;;  %v6147_v15 = vadd.f32 %v9538_v27, %v14195_v28  ;;  %v14388_v57 = vpop.f32.mrf.mxu0 }
 0x609   : > { %v6138_v9 = vpop.f32.mrf.mxu1  ;;  %v6561_v21 = vpack.c.bf16 %v10522_v31, %v10526_v54 }
 0x60a   : > { %10539 = vtanh.f32 %v6350_v13  ;;  %v6139_v34 = vadd.f32 %v6138_v9, %v14201_v42  ;;  %9660 = vmatprep.mubr.msk.bf16.mxu0 %vm6605_vm6, %v6560_v63  ;;  %v6355_v40 = vadd.f32 %v14256_v26, %v6147_v15 }
 0x60b   : > { %v9539_v6 = vpop.f32.mrf.mxu1  ;;  %10541 = vtanh.f32 %v6351_v32  ;;  %v10528_v62 = vpop.eup %10527 }
 0x60c   : > { %v6353_v55 = vadd.f32 %v14256_v26, %v6139_v34  ;;  %v6150_v48 = vadd.f32 %v9539_v6, %v14209_v45  ;;  %9661 = vmatmul.mubr.msk.bf16.gmra.mxu0 %vm6605_vm6, %v6561_v21 }
 0x60d   : > { %v6141_v10 = vpop.f32.mrf.mxu1  ;;  %v10530_v37 = vpop.eup %10529 }
 0x60e   : > { %v6356_v42 = vadd.f32 %v14256_v26, %v6150_v48  ;;  %v6142_v49 = vadd.f32 %v6141_v10, %v14215_v52  ;;  %10543 = vtanh.f32 %v6353_v55 }
 0x60f   : > { %v10532_v56 = vpop.eup %10531  ;;  %v9542_v38 = vpop.f32.mrf.mxu1 }
 0x610   : > { %v6354_v28 = vadd.f32 %v14256_v26, %v6142_v49  ;;  %v6562_v30 = vpack.c.bf16 %v10532_v56, %v10528_v62  ;;  %v10534_v45 = vpop.eup %10533  ;;  %10545 = vtanh.f32 %v6356_v42  ;;  %v6163_v18 = vadd.f32 %v9542_v38, %v14223_v51 }
 0x611   : > { %v6154_v61 = vpop.f32.mrf.mxu1  ;;  %v6563_v36 = vpack.c.bf16 %v10530_v37, %v10534_v45 }
 0x612   : > { %10547 = vtanh.f32 %v6354_v28  ;;  %v6155_v3 = vadd.f32 %v6154_v61, %v14229_v1  ;;  %9664 = vmatprep.mubr.msk.bf16.mxu0 %vm6605_vm6, %v6562_v30  ;;  %v6359_v31 = vadd.f32 %v14256_v26, %v6163_v18 }
 0x613   : > { %v9543_v52 = vpop.f32.mrf.mxu1  ;;  %10549 = vtanh.f32 %v6355_v40  ;;  %v10536_v46 = vpop.eup %10535 }
 0x614   : > { %v6357_v44 = vadd.f32 %v14256_v26, %v6155_v3  ;;  %v6166_v41 = vadd.f32 %v9543_v52, %v14237_v39  ;;  %9665 = vmatmul.mubr.msk.bf16.gmra.mxu0 %vm6605_vm6, %v6563_v36 }
 0x615   : > { %v6157_v16 = vpop.f32.mrf.mxu1  ;;  %v10538_v60 = vpop.eup %10537 }
 0x616   : > { %v6360_v1 = vadd.f32 %v14256_v26, %v6166_v41  ;;  %v6158_v53 = vadd.f32 %v6157_v16, %v14243_v4  ;;  %10551 = vtanh.f32 %v6357_v44  ;;  %v14395_v4 = vld [vmem:[%s15265_s1 + $0x6] ss:$0 sm:$0xff] }
 0x617   : > { %v10540_v17 = vpop.eup %10539  ;;  %v9546_v25 = vpop.f32.mrf.mxu1 }
 0x618   : > { %v6358_v51 = vadd.f32 %v14256_v26, %v6158_v53  ;;  %v6564_v50 = vpack.c.bf16 %v10540_v17, %v10536_v46  ;;  %v10542_v39 = vpop.eup %10541  ;;  %10553 = vtanh.f32 %v6360_v1  ;;  %v6179_v63 = vadd.f32 %v9546_v25, %v14251_v23 }
 0x619   : > { %v6170_v14 = vpop.f32.mrf.mxu1  ;;  %v6565_v32 = vpack.c.bf16 %v10538_v60, %v10542_v39 }
 0x61a   : > { %10555 = vtanh.f32 %v6358_v51  ;;  %v6171_v27 = vadd.f32 %v6170_v14, %v14262_v24  ;;  %9668 = vmatprep.mubr.msk.bf16.mxu0 %vm6605_vm6, %v6564_v50  ;;  %v9574_v34 = vpop.f32.mrf.mxu0 }
 0x61b   : > { %v9547_v13 = vpop.f32.mrf.mxu1  ;;  %10557 = vtanh.f32 %v6359_v31  ;;  %v10544_v24 = vpop.eup %10543  ;;  %v6845_v21 = vadd.f32 %v9574_v34, %v14395_v4 }
 0x61c   : > { %v6361_v54 = vadd.f32 %v14256_v26, %v6171_v27  ;;  %v6182_v9 = vadd.f32 %v9547_v13, %v14270_v59  ;;  %9669 = vmatmul.mubr.msk.bf16.gmra.mxu0 %vm6605_vm6, %v6565_v32  ;;  %v6836_v62 = vpop.f32.mrf.mxu0  ;;  %v6363_v59 = vadd.f32 %v14256_v26, %v6179_v63  ;;  %v14427_v63 = vld [vmem:[%s15265_s1 + $0x7] ss:$0 sm:$0xff] }
 0x61d   : > { %v6173_v6 = vpop.f32.mrf.mxu1  ;;  %v10546_v15 = vpop.eup %10545  ;;  %v6837_v23 = vadd.f32 %v14395_v4, %v6836_v62 }
 0x61e   : > { %10559 = vtanh.f32 %v6361_v54  ;;  %v6364_v55 = vadd.f32 %v14256_v26, %v6182_v9  ;;  %v6174_v48 = vadd.f32 %v6173_v6, %v14276_v35  ;;  %v9575_v49 = vpop.f32.mrf.mxu0 }
 0x61f   : > { %v10548_v10 = vpop.eup %10547  ;;  %10561 = vtanh.f32 %v6845_v21  ;;  %v9550_v37 = vpop.f32.mrf.mxu1  ;;  %v6848_v40 = vadd.f32 %v9575_v49, %v14395_v4 }
 0x620   : > { %10563 = vtanh.f32 %v6364_v55  ;;  %v6362_v42 = vadd.f32 %v14256_v26, %v6174_v48  ;;  %v6566_v56 = vpack.c.bf16 %v10548_v10, %v10544_v24  ;;  %v10550_v38 = vpop.eup %10549  ;;  %v6839_v30 = vpop.f32.mrf.mxu0  ;;  %v6195_v36 = vadd.f32 %v9550_v37, %v14284_v8 }
 0x621   : > { %10565 = vtanh.f32 %v6837_v23  ;;  %v6186_v28 = vpop.f32.mrf.mxu1  ;;  %v6567_v45 = vpack.c.bf16 %v10546_v15, %v10550_v38  ;;  %v6840_v61 = vadd.f32 %v14395_v4, %v6839_v30 }
 0x622   : > { %10567 = vtanh.f32 %v6362_v42  ;;  %v6187_v35 = vadd.f32 %v6186_v28, %v14290_v33  ;;  %9672 = vmatprep.mubr.msk.bf16.mxu0 %vm6605_vm6, %v6566_v56  ;;  %v6367_v25 = vadd.f32 %v14256_v26, %v6195_v36 }
 0x623   : > { %10569 = vtanh.f32 %v6848_v40  ;;  %v9551_v3 = vpop.f32.mrf.mxu1  ;;  %v9578_v44 = vpop.f32.mrf.mxu0 }
 0x624   : > { %10571 = vtanh.f32 %v6363_v59  ;;  %v6365_v52 = vadd.f32 %v14256_v26, %v6187_v35  ;;  %v6198_v18 = vadd.f32 %v9551_v3, %v14298_v22  ;;  %9673 = vmatmul.mubr.msk.bf16.gmra.mxu0 %vm6605_vm6, %v6567_v45  ;;  %v10552_v41 = vpop.eup %10551  ;;  %v6861_v33 = vadd.f32 %v9578_v44, %v14395_v4 }
 0x625   : > { %10573 = vtanh.f32 %v6840_v61  ;;  %v6189_v46 = vpop.f32.mrf.mxu1  ;;  %v10554_v16 = vpop.eup %10553 }
 0x626   : > { %10575 = vtanh.f32 %v6365_v52  ;;  %v6368_v60 = vadd.f32 %v14256_v26, %v6198_v18  ;;  %v6190_v1 = vadd.f32 %v6189_v46, %v14304_v43  ;;  %v6852_v53 = vpop.f32.mrf.mxu0 }
 0x627   : > { %v10556_v8 = vpop.eup %10555  ;;  %10577 = vtanh.f32 %v6861_v33  ;;  %v6853_v17 = vadd.f32 %v14395_v4, %v6852_v53  ;;  %v9554_v22 = vpop.f32.mrf.mxu1 }
 0x628   : > { %10579 = vtanh.f32 %v6368_v60  ;;  %v6366_v31 = vadd.f32 %v14256_v26, %v6190_v1  ;;  %v9579_v51 = vpop.f32.mrf.mxu0  ;;  %v6568_v50 = vpack.c.bf16 %v10556_v8, %v10552_v41  ;;  %v10558_v39 = vpop.eup %10557  ;;  %v6211_v21 = vadd.f32 %v9554_v22, %v14312_v0 }
 0x629   : > { %10581 = vtanh.f32 %v6853_v17  ;;  %v6864_v14 = vadd.f32 %v9579_v51, %v14395_v4  ;;  %v6202_v27 = vpop.f32.mrf.mxu1  ;;  %v6569_v13 = vpack.c.bf16 %v10554_v16, %v10558_v39 }
 0x62a   : > { %10583 = vtanh.f32 %v6366_v31  ;;  %v6203_v43 = vadd.f32 %v6202_v27, %v14318_v47  ;;  %v6855_v32 = vpop.f32.mrf.mxu0  ;;  %9676 = vmatprep.mubr.msk.bf16.mxu0 %vm6605_vm6, %v6568_v50  ;;  %v6371_v28 = vadd.f32 %v14256_v26, %v6211_v21 }
 0x62b   : > { %v10560_v54 = vpop.eup %10559  ;;  %10585 = vtanh.f32 %v6864_v14  ;;  %v6856_v9 = vadd.f32 %v14395_v4, %v6855_v32  ;;  %v9555_v34 = vpop.f32.mrf.mxu1 }
 0x62c   : > { %v10562_v24 = vpop.eup %10561  ;;  %10587 = vtanh.f32 %v6367_v25  ;;  %v6369_v47 = vadd.f32 %v14256_v26, %v6203_v43  ;;  %v6214_v6 = vadd.f32 %v9555_v34, %v14326_v19  ;;  %v9582_v15 = vpop.f32.mrf.mxu0  ;;  %9677 = vmatmul.mubr.msk.bf16.gmra.mxu0 %vm6605_vm6, %v6569_v13 }
 0x62d   : > { %v10564_v55 = vpop.eup %10563  ;;  %10589 = vtanh.f32 %v6856_v9  ;;  %v6877_v48 = vadd.f32 %v9582_v15, %v14395_v4  ;;  %v6205_v62 = vpop.f32.mrf.mxu1  ;;  %v7481_v10 = vmul.f32 %v10562_v24, %v14427_v63 }
 0x62e   : > { %v10566_v23 = vpop.eup %10565  ;;  %10591 = vtanh.f32 %v6369_v47  ;;  %v6372_v37 = vadd.f32 %v14256_v26, %v6214_v6  ;;  %v6206_v0 = vadd.f32 %v6205_v62, %v14332_v2  ;;  %v6868_v59 = vpop.f32.mrf.mxu0 }
 0x62f   : > { %v10568_v42 = vpop.eup %10567  ;;  %10593 = vtanh.f32 %v6877_v48  ;;  %v6869_v19 = vadd.f32 %v14395_v4, %v6868_v59  ;;  %v9558_v49 = vpop.f32.mrf.mxu1  ;;  %v7613_v56 = vsel %vm6605_vm6, %v7481_v10, 0.0  ;;  %v7479_v38 = vmul.f32 %v10566_v23, %v14427_v63 }
 0x630   : > { %v10570_v40 = vpop.eup %10569  ;;  %10595 = vtanh.f32 %v6372_v37  ;;  %v6370_v35 = vadd.f32 %v14256_v26, %v6206_v0  ;;  %7614 = vadd.xlane.f32.xlu0 %v7613_v56  ;;  %v9583_v30 = vpop.f32.mrf.mxu0  ;;  %v6570_v45 = vpack.c.bf16 %v10568_v42, %v10560_v54  ;;  %v6227_v16 = vadd.f32 %v9558_v49, %v14340_v58 }
 0x631   : > { %v10572_v2 = vpop.eup %10571  ;;  %10597 = vtanh.f32 %v6869_v19  ;;  %v6880_v61 = vadd.f32 %v9583_v30, %v14395_v4  ;;  %v6218_v3 = vpop.f32.mrf.mxu1  ;;  %v7607_v36 = vsel %vm6605_vm6, %v7479_v38, 0.0  ;;  %v7482_v52 = vmul.f32 %v10570_v40, %v14427_v63 }
 0x632   : > { %v10574_v18 = vpop.eup %10573  ;;  %10599 = vtanh.f32 %v6370_v35  ;;  %v6219_v44 = vadd.f32 %v6218_v3, %v14346_v5  ;;  %v6871_v41 = vpop.f32.mrf.mxu0  ;;  %7608 = vadd.xlane.f32.xlu1 %v7607_v36  ;;  %9680 = vmatprep.mubr.msk.bf16.mxu0 %vm6605_vm6, %v6570_v45  ;;  %v6571_v33 = vpack.c.bf16 %v10564_v55, %v10572_v2  ;;  %v6375_v13 = vadd.f32 %v14256_v26, %v6227_v16 }
 0x633   : > { %v10576_v46 = vpop.eup %10575  ;;  %10601 = vtanh.f32 %v6880_v61  ;;  %v6872_v60 = vadd.f32 %v14395_v4, %v6871_v41  ;;  %v9559_v1 = vpop.f32.mrf.mxu1  ;;  %v7480_v53 = vmul.f32 %v10574_v18, %v14427_v63  ;;  %v7616_v25 = vsel %vm6605_vm6, %v7482_v52, 0.0 }
 0x634   : > { %v10578_v8 = vpop.eup %10577  ;;  %10603 = vtanh.f32 %v6371_v28  ;;  %v6373_v17 = vadd.f32 %v14256_v26, %v6219_v44  ;;  %v6230_v5 = vadd.f32 %v9559_v1, %v14354_v20  ;;  %v9586_v22 = vpop.f32.mrf.mxu0  ;;  %9681 = vmatmul.mubr.msk.bf16.gmra.mxu0 %vm6605_vm6, %v6571_v33 }
 0x635   : > { %v10580_v31 = vpop.eup %10579  ;;  %10605 = vtanh.f32 %v6872_v60  ;;  %v6893_v58 = vadd.f32 %v9586_v22, %v14395_v4  ;;  %v6221_v51 = vpop.f32.mrf.mxu1  ;;  %v7610_v50 = vsel %vm6605_vm6, %v7480_v53, 0.0  ;;  %v7485_v39 = vmul.f32 %v10578_v8, %v14427_v63 }
 0x636   : > { %v10582_v14 = vpop.eup %10581  ;;  %10607 = vtanh.f32 %v6373_v17  ;;  %v6376_v27 = vadd.f32 %v14256_v26, %v6230_v5  ;;  %v6222_v20 = vadd.f32 %v6221_v51, %v14360_v12  ;;  %v6884_v43 = vpop.f32.mrf.mxu0  ;;  %7611 = vadd.xlane.f32.xlu0 %v7610_v50  ;;  %7617 = vadd.xlane.f32.xlu1 %v7616_v25 }
 0x637   : > { %v10584_v32 = vpop.eup %10583  ;;  %10609 = vtanh.f32 %v6893_v58  ;;  %v6885_v54 = vadd.f32 %v14395_v4, %v6884_v43  ;;  %v9562_v9 = vpop.f32.mrf.mxu1  ;;  %v7625_v47 = vsel %vm6605_vm6, %v7485_v39, 0.0  ;;  %v7483_v62 = vmul.f32 %v10582_v14, %v14427_v63 }
 0x638   : > { %v10586_v34 = vpop.eup %10585  ;;  %10611 = vtanh.f32 %v6376_v27  ;;  %v6374_v24 = vadd.f32 %v14256_v26, %v6222_v20  ;;  %v9587_v21 = vpop.f32.mrf.mxu0  ;;  %v6572_v6 = vpack.c.bf16 %v10584_v32, %v10576_v46  ;;  %v6243_v23 = vadd.f32 %v9562_v9, %v14368_v7 }
 0x639   : > { %v10588_v15 = vpop.eup %10587  ;;  %10613 = vtanh.f32 %v6885_v54  ;;  %v6896_v12 = vadd.f32 %v9587_v21, %v14395_v4  ;;  %v6234_v55 = vpop.f32.mrf.mxu1  ;;  %v7486_v48 = vmul.f32 %v10586_v34, %v14427_v63  ;;  %v7619_v2 = vsel %vm6605_vm6, %v7483_v62, 0.0 }
 0x63a   : > { %v10590_v10 = vpop.eup %10589  ;;  %10615 = vtanh.f32 %v6374_v24  ;;  %v6235_v37 = vadd.f32 %v6234_v55, %v14374_v11  ;;  %v6887_v0 = vpop.f32.mrf.mxu0  ;;  %7626 = vadd.xlane.f32.xlu0 %v7625_v47  ;;  %9684 = vmatprep.mubr.msk.bf16.mxu0 %vm6605_vm6, %v6572_v6  ;;  %v6573_v59 = vpack.c.bf16 %v10580_v31, %v10588_v15  ;;  %v6379_v44 = vadd.f32 %v14256_v26, %v6243_v23 }
 0x63b   : > { %v10592_v42 = vpop.eup %10591  ;;  %10617 = vtanh.f32 %v6896_v12  ;;  %v6888_v19 = vadd.f32 %v14395_v4, %v6887_v0  ;;  %v9563_v49 = vpop.f32.mrf.mxu1  ;;  %v7628_v56 = vsel %vm6605_vm6, %v7486_v48, 0.0  ;;  %v7484_v38 = vmul.f32 %v10590_v10, %v14427_v63 }
 0x63c   : > { %v10594_v40 = vpop.eup %10593  ;;  %10619 = vtanh.f32 %v6375_v13  ;;  %v6377_v7 = vadd.f32 %v14256_v26, %v6235_v37  ;;  %v6246_v11 = vadd.f32 %v9563_v49, %v14382_v29  ;;  %v9590_v28 = vpop.f32.mrf.mxu0  ;;  %9685 = vmatmul.mubr.msk.bf16.gmra.mxu0 %vm6605_vm6, %v6573_v59  ;;  %7629 = vadd.xlane.f32.xlu1 %v7628_v56 }
 0x63d   : > { %v10596_v35 = vpop.eup %10595  ;;  %10621 = vtanh.f32 %v6888_v19  ;;  %v6909_v30 = vadd.f32 %v9590_v28, %v14395_v4  ;;  %v6237_v45 = vpop.f32.mrf.mxu1  ;;  %v7489_v61 = vmul.f32 %v10594_v40, %v14427_v63  ;;  %v7622_v33 = vsel %vm6605_vm6, %v7484_v38, 0.0 }
 0x63e   : > { %v10598_v3 = vpop.eup %10597  ;;  %10623 = vtanh.f32 %v6377_v7  ;;  %v6380_v36 = vadd.f32 %v14256_v26, %v6246_v11  ;;  %v6238_v52 = vadd.f32 %v6237_v45, %v14388_v57  ;;  %v6900_v29 = vpop.f32.mrf.mxu0  ;;  %7620 = vadd.xlane.f32.xlu0 %v7619_v2 }
 0x63f   : > { %v10600_v18 = vpop.eup %10599  ;;  %10625 = vtanh.f32 %v6909_v30  ;;  %v6901_v41 = vadd.f32 %v14395_v4, %v6900_v29  ;;  %v7637_v1 = vsel %vm6605_vm6, %v7489_v61, 0.0  ;;  %v7487_v5 = vmul.f32 %v10598_v3, %v14427_v63 }
 0x640   : > { %v10602_v46 = vpop.eup %10601  ;;  %10627 = vtanh.f32 %v6380_v36  ;;  %v6378_v16 = vadd.f32 %v14256_v26, %v6238_v52  ;;  %v9591_v60 = vpop.f32.mrf.mxu0  ;;  %7623 = vadd.xlane.f32.xlu1 %v7622_v33  ;;  %v6574_v53 = vpack.c.bf16 %v10600_v18, %v10592_v42 }
 0x641   : > { %v10604_v57 = vpop.eup %10603  ;;  %10629 = vtanh.f32 %v6901_v41  ;;  %v6912_v8 = vadd.f32 %v9591_v60, %v14395_v4  ;;  %v7490_v17 = vmul.f32 %v10602_v46, %v14427_v63  ;;  %v7631_v43 = vsel %vm6605_vm6, %v7487_v5, 0.0 }
 0x642   : > { %v10606_v22 = vpop.eup %10605  ;;  %10631 = vtanh.f32 %v6378_v16  ;;  %v6903_v25 = vpop.f32.mrf.mxu0  ;;  %7638 = vadd.xlane.f32.xlu0 %v7637_v1  ;;  %9688 = vmatprep.mubr.msk.bf16.mxu0 %vm6605_vm6, %v6574_v53  ;;  %v6575_v26 = vpack.c.bf16 %v10596_v35, %v10604_v57 }
 0x643   : > { %v10608_v31 = vpop.eup %10607  ;;  %10633 = vtanh.f32 %v6912_v8  ;;  %v6904_v58 = vadd.f32 %v14395_v4, %v6903_v25  ;;  %v7640_v51 = vsel %vm6605_vm6, %v7490_v17, 0.0  ;;  %v7488_v50 = vmul.f32 %v10606_v22, %v14427_v63 }
 0x644   : > { %v10610_v39 = vpop.eup %10609  ;;  %10635 = vtanh.f32 %v6379_v44  ;;  %v9594_v14 = vpop.f32.mrf.mxu0  ;;  %9689 = vmatmul.mubr.msk.bf16.gmra.mxu0 %vm6605_vm6, %v6575_v26  ;;  %7641 = vadd.xlane.f32.xlu1 %v7640_v51 }
 0x645   : > { %v10612_v27 = vpop.eup %10611  ;;  %10637 = vtanh.f32 %v6904_v58  ;;  %v6925_v20 = vadd.f32 %v9594_v14, %v14395_v4  ;;  %v7493_v32 = vmul.f32 %v10610_v39, %v14427_v63  ;;  %v7634_v24 = vsel %vm6605_vm6, %v7488_v50, 0.0 }
 0x646   : > { %v10614_v13 = vpop.eup %10613  ;;  %v6916_v54 = vpop.f32.mrf.mxu0  ;;  %7632 = vadd.xlane.f32.xlu0 %v7631_v43 }
 0x647   : > { %v10616_v9 = vpop.eup %10615  ;;  %10639 = vtanh.f32 %v6925_v20  ;;  %v6917_v34 = vadd.f32 %v14395_v4, %v6916_v54  ;;  %v7649_v6 = vsel %vm6605_vm6, %v7493_v32, 0.0  ;;  %v7491_v62 = vmul.f32 %v10614_v13, %v14427_v63 }
 0x648   : > { %v10618_v21 = vpop.eup %10617  ;;  %v9595_v47 = vpop.f32.mrf.mxu0  ;;  %7635 = vadd.xlane.f32.xlu1 %v7634_v24  ;;  %v6576_v15 = vpack.c.bf16 %v10616_v9, %v10608_v31 }
 0x649   : > { %v10620_v12 = vpop.eup %10619  ;;  %10641 = vtanh.f32 %v6917_v34  ;;  %v6928_v55 = vadd.f32 %v9595_v47, %v14395_v4  ;;  %v7494_v48 = vmul.f32 %v10618_v21, %v14427_v63  ;;  %v7643_v7 = vsel %vm6605_vm6, %v7491_v62, 0.0 }
 0x64a   : > { %v10622_v10 = vpop.eup %10621  ;;  %v6919_v23 = vpop.f32.mrf.mxu0  ;;  %7650 = vadd.xlane.f32.xlu0 %v7649_v6  ;;  %9692 = vmatprep.mubr.msk.bf16.mxu0 %vm6605_vm6, %v6576_v15  ;;  %v6577_v37 = vpack.c.bf16 %v10612_v27, %v10620_v12 }
 0x64b   : > { %v10624_v0 = vpop.eup %10623  ;;  %10643 = vtanh.f32 %v6928_v55  ;;  %v6920_v59 = vadd.f32 %v14395_v4, %v6919_v23  ;;  %v7652_v42 = vsel %vm6605_vm6, %v7494_v48, 0.0  ;;  %v7492_v19 = vmul.f32 %v10622_v10, %v14427_v63 }
 0x64c   : > { %v10626_v49 = vpop.eup %10625  ;;  %v9598_v56 = vpop.f32.mrf.mxu0  ;;  %9693 = vmatmul.mubr.msk.bf16.gmra.mxu0 %vm6605_vm6, %v6577_v37  ;;  %7653 = vadd.xlane.f32.xlu1 %v7652_v42 }
 0x64d   : > { %v10628_v38 = vpop.eup %10627  ;;  %10645 = vtanh.f32 %v6920_v59  ;;  %v6941_v40 = vadd.f32 %v9598_v56, %v14395_v4  ;;  %v7497_v11 = vmul.f32 %v10626_v49, %v14427_v63  ;;  %v7646_v2 = vsel %vm6605_vm6, %v7492_v19, 0.0 }
 0x64e   : > { %v10630_v28 = vpop.eup %10629  ;;  %v6932_v35 = vpop.f32.mrf.mxu0  ;;  %7644 = vadd.xlane.f32.xlu0 %v7643_v7 }
 0x64f   : > { %v10632_v30 = vpop.eup %10631  ;;  %10647 = vtanh.f32 %v6941_v40  ;;  %v6933_v45 = vadd.f32 %v14395_v4, %v6932_v35  ;;  %v7661_v36 = vsel %vm6605_vm6, %v7497_v11, 0.0  ;;  %v7495_v41 = vmul.f32 %v10630_v28, %v14427_v63 }
 0x650   : > { %v10634_v61 = vpop.eup %10633  ;;  %v9599_v3 = vpop.f32.mrf.mxu0  ;;  %7647 = vadd.xlane.f32.xlu1 %v7646_v2  ;;  %v6578_v52 = vpack.c.bf16 %v10632_v30, %v10624_v0 }
 0x651   : > { %v10636_v29 = vpop.eup %10635  ;;  %10649 = vtanh.f32 %v6933_v45  ;;  %v6944_v18 = vadd.f32 %v9599_v3, %v14395_v4  ;;  %v7498_v44 = vmul.f32 %v10634_v61, %v14427_v63  ;;  %v7655_v5 = vsel %vm6605_vm6, %v7495_v41, 0.0 }
 0x652   : > { %v10638_v33 = vpop.eup %10637  ;;  %v6935_v46 = vpop.f32.mrf.mxu0  ;;  %7662 = vadd.xlane.f32.xlu0 %v7661_v36  ;;  %9696 = vmatprep.mubr.msk.bf16.mxu0 %vm6605_vm6, %v6578_v52  ;;  %v6579_v16 = vpack.c.bf16 %v10628_v38, %v10636_v29 }
 0x653   : > { %10651 = vtanh.f32 %v6944_v18  ;;  %v6936_v60 = vadd.f32 %v14395_v4, %v6935_v46  ;;  %v7664_v1 = vsel %vm6605_vm6, %v7498_v44, 0.0  ;;  %v7496_v53 = vmul.f32 %v10638_v33, %v14427_v63 }
 0x654   : > { %v10640_v57 = vpop.eup %10639  ;;  %v9602_v8 = vpop.f32.mrf.mxu0  ;;  %7665 = vadd.xlane.f32.xlu1 %v7664_v1  ;;  %9697 = vmatmul.mubr.msk.bf16.gmra.mxu0 %vm6605_vm6, %v6579_v16 }
 0x655   : > { %10653 = vtanh.f32 %v6936_v60  ;;  %v6957_v17 = vadd.f32 %v9602_v8, %v14395_v4  ;;  %v7501_v22 = vmul.f32 %v10640_v57, %v14427_v63  ;;  %v7658_v58 = vsel %vm6605_vm6, %v7496_v53, 0.0 }
 0x656   : > { %v10642_v25 = vpop.eup %10641  ;;  %v6948_v26 = vpop.f32.mrf.mxu0  ;;  %7656 = vadd.xlane.f32.xlu0 %v7655_v5 }
 0x657   : > { %10655 = vtanh.f32 %v6957_v17  ;;  %v6949_v31 = vadd.f32 %v14395_v4, %v6948_v26  ;;  %v7673_v39 = vsel %vm6605_vm6, %v7501_v22, 0.0  ;;  %v7499_v20 = vmul.f32 %v10642_v25, %v14427_v63 }
 0x658   : > { %v10644_v51 = vpop.eup %10643  ;;  %v9603_v50 = vpop.f32.mrf.mxu0  ;;  %7659 = vadd.xlane.f32.xlu1 %v7658_v58 }
 0x659   : > { %10657 = vtanh.f32 %v6949_v31  ;;  %v6960_v14 = vadd.f32 %v9603_v50, %v14395_v4  ;;  %v7502_v27 = vmul.f32 %v10644_v51, %v14427_v63  ;;  %v7667_v47 = vsel %vm6605_vm6, %v7499_v20, 0.0 }
 0x65a   : > { %v10646_v43 = vpop.eup %10645  ;;  %v6951_v32 = vpop.f32.mrf.mxu0  ;;  %7674 = vadd.xlane.f32.xlu0 %v7673_v39 }
 0x65b   : > { %10659 = vtanh.f32 %v6960_v14  ;;  %v6952_v13 = vadd.f32 %v14395_v4, %v6951_v32  ;;  %v7676_v54 = vsel %vm6605_vm6, %v7502_v27, 0.0  ;;  %v7500_v9 = vmul.f32 %v10646_v43, %v14427_v63 }
 0x65c   : > { %v10648_v34 = vpop.eup %10647  ;;  %v9606_v24 = vpop.f32.mrf.mxu0  ;;  %7677 = vadd.xlane.f32.xlu1 %v7676_v54 }
 0x65d   : > { %10661 = vtanh.f32 %v6952_v13  ;;  %v6973_v21 = vadd.f32 %v9606_v24, %v14395_v4  ;;  %v7505_v6 = vmul.f32 %v10648_v34, %v14427_v63  ;;  %v7670_v48 = vsel %vm6605_vm6, %v7500_v9, 0.0 }
 0x65e   : > { %v10650_v15 = vpop.eup %10649  ;;  %v6964_v12 = vpop.f32.mrf.mxu0  ;;  %7668 = vadd.xlane.f32.xlu0 %v7667_v47 }
 0x65f   : > { %10663 = vtanh.f32 %v6973_v21  ;;  %v6965_v55 = vadd.f32 %v14395_v4, %v6964_v12  ;;  %v7685_v23 = vsel %vm6605_vm6, %v7505_v6, 0.0  ;;  %v7503_v59 = vmul.f32 %v10650_v15, %v14427_v63 }
 0x660   : > { %v10652_v62 = vpop.eup %10651  ;;  %v9607_v10 = vpop.f32.mrf.mxu0  ;;  %7671 = vadd.xlane.f32.xlu1 %v7670_v48 }
 0x661   : > { %10665 = vtanh.f32 %v6965_v55  ;;  %v6976_v37 = vadd.f32 %v9607_v10, %v14395_v4  ;;  %v7506_v0 = vmul.f32 %v10652_v62, %v14427_v63  ;;  %v7679_v28 = vsel %vm6605_vm6, %v7503_v59, 0.0 }
 0x662   : > { %v10654_v42 = vpop.eup %10653  ;;  %v6967_v19 = vpop.f32.mrf.mxu0  ;;  %7686 = vadd.xlane.f32.xlu0 %v7685_v23 }
 0x663   : > { %10667 = vtanh.f32 %v6976_v37  ;;  %v6968_v49 = vadd.f32 %v14395_v4, %v6967_v19  ;;  %v7688_v56 = vsel %vm6605_vm6, %v7506_v0, 0.0  ;;  %v7504_v38 = vmul.f32 %v10654_v42, %v14427_v63 }
 0x664   : > { %v10656_v40 = vpop.eup %10655  ;;  %v9610_v7 = vpop.f32.mrf.mxu0  ;;  %7689 = vadd.xlane.f32.xlu1 %v7688_v56 }
 0x665   : > { %10669 = vtanh.f32 %v6968_v49  ;;  %v6989_v11 = vadd.f32 %v9610_v7, %v14395_v4  ;;  %v7509_v35 = vmul.f32 %v10656_v40, %v14427_v63  ;;  %v7682_v61 = vsel %vm6605_vm6, %v7504_v38, 0.0 }
 0x666   : > { %v10658_v30 = vpop.eup %10657  ;;  %v6980_v45 = vpop.f32.mrf.mxu0  ;;  %7680 = vadd.xlane.f32.xlu0 %v7679_v28 }
 0x667   : > { %10671 = vtanh.f32 %v6989_v11  ;;  %v6981_v2 = vadd.f32 %v14395_v4, %v6980_v45  ;;  %v7697_v52 = vsel %vm6605_vm6, %v7509_v35, 0.0  ;;  %v7507_v44 = vmul.f32 %v10658_v30, %v14427_v63 }
 0x668   : > { %v10660_v3 = vpop.eup %10659  ;;  %v9611_v36 = vpop.f32.mrf.mxu0  ;;  %7683 = vadd.xlane.f32.xlu1 %v7682_v61 }
 0x669   : > { %10673 = vtanh.f32 %v6981_v2  ;;  %v6992_v29 = vadd.f32 %v9611_v36, %v14395_v4  ;;  %v7510_v18 = vmul.f32 %v10660_v3, %v14427_v63  ;;  %v7691_v8 = vsel %vm6605_vm6, %v7507_v44, 0.0 }
 0x66a   : > { %v10662_v41 = vpop.eup %10661  ;;  %v6983_v33 = vpop.f32.mrf.mxu0  ;;  %7698 = vadd.xlane.f32.xlu0 %v7697_v52 }
 0x66b   : > { %10675 = vtanh.f32 %v6992_v29  ;;  %v6984_v46 = vadd.f32 %v14395_v4, %v6983_v33  ;;  %v7700_v16 = vsel %vm6605_vm6, %v7510_v18, 0.0  ;;  %v7508_v60 = vmul.f32 %v10662_v41, %v14427_v63 }
 0x66c   : > { %v10664_v1 = vpop.eup %10663  ;;  %v9614_v53 = vpop.f32.mrf.mxu0  ;;  %7701 = vadd.xlane.f32.xlu1 %v7700_v16 }
 0x66d   : > { %10677 = vtanh.f32 %v6984_v46  ;;  %v7005_v57 = vadd.f32 %v9614_v53, %v14395_v4  ;;  %v7513_v17 = vmul.f32 %v10664_v1, %v14427_v63  ;;  %v7694_v26 = vsel %vm6605_vm6, %v7508_v60, 0.0 }
 0x66e   : > { %v10666_v5 = vpop.eup %10665  ;;  %v6996_v22 = vpop.f32.mrf.mxu0  ;;  %7692 = vadd.xlane.f32.xlu0 %v7691_v8 }
 0x66f   : > { %10679 = vtanh.f32 %v7005_v57  ;;  %v6997_v25 = vadd.f32 %v14395_v4, %v6996_v22  ;;  %v7709_v51 = vsel %vm6605_vm6, %v7513_v17, 0.0  ;;  %v7511_v14 = vmul.f32 %v10666_v5, %v14427_v63 }
 0x670   : > { %v10668_v31 = vpop.eup %10667  ;;  %v9615_v58 = vpop.f32.mrf.mxu0  ;;  %7695 = vadd.xlane.f32.xlu1 %v7694_v26 }
 0x671   : > { %10681 = vtanh.f32 %v6997_v25  ;;  %v7008_v50 = vadd.f32 %v9615_v58, %v14395_v4  ;;  %v7514_v39 = vmul.f32 %v10668_v31, %v14427_v63  ;;  %v7703_v24 = vsel %vm6605_vm6, %v7511_v14, 0.0 }
 0x672   : > { %v10670_v27 = vpop.eup %10669  ;;  %v6999_v20 = vpop.f32.mrf.mxu0  ;;  %7710 = vadd.xlane.f32.xlu0 %v7709_v51 }
 0x673   : > { %10683 = vtanh.f32 %v7008_v50  ;;  %v7000_v43 = vadd.f32 %v14395_v4, %v6999_v20  ;;  %v7712_v32 = vsel %vm6605_vm6, %v7514_v39, 0.0  ;;  %v7512_v13 = vmul.f32 %v10670_v27, %v14427_v63 }
 0x674   : > { %v10672_v54 = vpop.eup %10671  ;;  %v9618_v9 = vpop.f32.mrf.mxu0  ;;  %7713 = vadd.xlane.f32.xlu1 %v7712_v32 }
 0x675   : > { %10685 = vtanh.f32 %v7000_v43  ;;  %v7021_v34 = vadd.f32 %v9618_v9, %v14395_v4  ;;  %v7517_v21 = vmul.f32 %v10672_v54, %v14427_v63  ;;  %v7706_v12 = vsel %vm6605_vm6, %v7512_v13, 0.0 }
 0x676   : > { %v10674_v47 = vpop.eup %10673  ;;  %v7012_v6 = vpop.f32.mrf.mxu0  ;;  %7704 = vadd.xlane.f32.xlu0 %v7703_v24 }
 0x677   : > { %10687 = vtanh.f32 %v7021_v34  ;;  %v7013_v15 = vadd.f32 %v14395_v4, %v7012_v6  ;;  %v7721_v62 = vsel %vm6605_vm6, %v7517_v21, 0.0  ;;  %v7515_v37 = vmul.f32 %v10674_v47, %v14427_v63 }
 0x678   : > { %v10676_v55 = vpop.eup %10675  ;;  %v9619_v48 = vpop.f32.mrf.mxu0  ;;  %7707 = vadd.xlane.f32.xlu1 %v7706_v12 }
 0x679   : > { %10689 = vtanh.f32 %v7013_v15  ;;  %v7024_v10 = vadd.f32 %v9619_v48, %v14395_v4  ;;  %v7518_v23 = vmul.f32 %v10676_v55, %v14427_v63  ;;  %v7715_v7 = vsel %vm6605_vm6, %v7515_v37, 0.0 }
 0x67a   : > { %v10678_v0 = vpop.eup %10677  ;;  %v7015_v59 = vpop.f32.mrf.mxu0  ;;  %7722 = vadd.xlane.f32.xlu0 %v7721_v62 }
 0x67b   : > { %10691 = vtanh.f32 %v7024_v10  ;;  %v7016_v42 = vadd.f32 %v14395_v4, %v7015_v59  ;;  %v7724_v19 = vsel %vm6605_vm6, %v7518_v23, 0.0  ;;  %v7516_v49 = vmul.f32 %v10678_v0, %v14427_v63  ;;  %v14618_v0 = vld [vmem:[%s15265_s1 + $0x6] ss:$0 sm:$0xff] }
 0x67c   : > { %v10680_v56 = vpop.eup %10679  ;;  %v9622_v38 = vpop.f32.mrf.mxu0  ;;  %7725 = vadd.xlane.f32.xlu1 %v7724_v19 }
 0x67d   : > { %10693 = vtanh.f32 %v7016_v42  ;;  %v7037_v40 = vadd.f32 %v9622_v38, %v14395_v4  ;;  %v7521_v11 = vmul.f32 %v10680_v56, %v14427_v63  ;;  %v7718_v45 = vsel %vm6605_vm6, %v7516_v49, 0.0 }
 0x67e   : > { %v10682_v28 = vpop.eup %10681  ;;  %v7028_v35 = vpop.f32.mrf.mxu0  ;;  %7716 = vadd.xlane.f32.xlu0 %v7715_v7 }
 0x67f   : > { %10695 = vtanh.f32 %v7037_v40  ;;  %v7029_v30 = vadd.f32 %v14395_v4, %v7028_v35  ;;  %v7733_v3 = vsel %vm6605_vm6, %v7521_v11, 0.0  ;;  %v7519_v29 = vmul.f32 %v10682_v28, %v14427_v63 }
 0x680   : > { %v10684_v2 = vpop.eup %10683  ;;  %v9623_v61 = vpop.f32.mrf.mxu0  ;;  %7719 = vadd.xlane.f32.xlu1 %v7718_v45 }
 0x681   : > { %10697 = vtanh.f32 %v7029_v30  ;;  %v7040_v36 = vadd.f32 %v9623_v61, %v14395_v4  ;;  %v7522_v52 = vmul.f32 %v10684_v2, %v14427_v63  ;;  %v7727_v53 = vsel %vm6605_vm6, %v7519_v29, 0.0 }
 0x682   : > { %v10686_v18 = vpop.eup %10685  ;;  %v7031_v44 = vpop.f32.mrf.mxu0  ;;  %7734 = vadd.xlane.f32.xlu0 %v7733_v3 }
 0x683   : > { %10699 = vtanh.f32 %v7040_v36  ;;  %v7032_v41 = vadd.f32 %v14395_v4, %v7031_v44  ;;  %v7736_v33 = vsel %vm6605_vm6, %v7522_v52, 0.0  ;;  %v7520_v46 = vmul.f32 %v10686_v18, %v14427_v63 }
 0x684   : > { %v10688_v16 = vpop.eup %10687  ;;  %v9626_v60 = vpop.f32.mrf.mxu0  ;;  %7737 = vadd.xlane.f32.xlu1 %v7736_v33 }
 0x685   : > { %10701 = vtanh.f32 %v7032_v41  ;;  %v7053_v1 = vadd.f32 %v9626_v60, %v14395_v4  ;;  %v7525_v57 = vmul.f32 %v10688_v16, %v14427_v63  ;;  %v7730_v22 = vsel %vm6605_vm6, %v7520_v46, 0.0 }
 0x686   : > { %v10690_v8 = vpop.eup %10689  ;;  %v7044_v17 = vpop.f32.mrf.mxu0  ;;  %7728 = vadd.xlane.f32.xlu0 %v7727_v53 }
 0x687   : > { %10703 = vtanh.f32 %v7053_v1  ;;  %v7045_v5 = vadd.f32 %v14395_v4, %v7044_v17  ;;  %v7745_v31 = vsel %vm6605_vm6, %v7525_v57, 0.0  ;;  %v7523_v50 = vmul.f32 %v10690_v8, %v14427_v63 }
 0x688   : > { %v10692_v25 = vpop.eup %10691  ;;  %v9627_v26 = vpop.f32.mrf.mxu0  ;;  %7731 = vadd.xlane.f32.xlu1 %v7730_v22 }
 0x689   : > { %10705 = vtanh.f32 %v7045_v5  ;;  %v7056_v58 = vadd.f32 %v9627_v26, %v14395_v4  ;;  %v7526_v51 = vmul.f32 %v10692_v25, %v14427_v63  ;;  %v7739_v9 = vsel %vm6605_vm6, %v7523_v50, 0.0 }
 0x68a   : > { %v10694_v39 = vpop.eup %10693  ;;  %v7047_v14 = vpop.f32.mrf.mxu0  ;;  %7746 = vadd.xlane.f32.xlu0 %v7745_v31 }
 0x68b   : > { %10707 = vtanh.f32 %v7056_v58  ;;  %v7048_v27 = vadd.f32 %v14395_v4, %v7047_v14  ;;  %v7748_v20 = vsel %vm6605_vm6, %v7526_v51, 0.0  ;;  %v7524_v43 = vmul.f32 %v10694_v39, %v14427_v63 }
 0x68c   : > { %v10696_v32 = vpop.eup %10695  ;;  %v9630_v13 = vpop.f32.mrf.mxu0  ;;  %7749 = vadd.xlane.f32.xlu1 %v7748_v20 }
 0x68d   : > { %10709 = vtanh.f32 %v7048_v27  ;;  %v7069_v54 = vadd.f32 %v9630_v13, %v14395_v4  ;;  %v7529_v34 = vmul.f32 %v10696_v32, %v14427_v63  ;;  %v7742_v6 = vsel %vm6605_vm6, %v7524_v43, 0.0 }
 0x68e   : > { %v10698_v24 = vpop.eup %10697  ;;  %v7060_v21 = vpop.f32.mrf.mxu0  ;;  %7740 = vadd.xlane.f32.xlu0 %v7739_v9 }
 0x68f   : > { %10711 = vtanh.f32 %v7069_v54  ;;  %v7061_v47 = vadd.f32 %v14395_v4, %v7060_v21  ;;  %v7757_v55 = vsel %vm6605_vm6, %v7529_v34, 0.0  ;;  %v7527_v10 = vmul.f32 %v10698_v24, %v14427_v63 }
 0x690   : > { %v10700_v15 = vpop.eup %10699  ;;  %v9631_v12 = vpop.f32.mrf.mxu0  ;;  %7743 = vadd.xlane.f32.xlu1 %v7742_v6 }
 0x691   : > { %10713 = vtanh.f32 %v7061_v47  ;;  %v7072_v48 = vadd.f32 %v9631_v12, %v14395_v4  ;;  %v7530_v62 = vmul.f32 %v10700_v15, %v14427_v63  ;;  %v7751_v38 = vsel %vm6605_vm6, %v7527_v10, 0.0 }
 0x692   : > { %v10702_v23 = vpop.eup %10701  ;;  %v7063_v37 = vpop.f32.mrf.mxu0  ;;  %7758 = vadd.xlane.f32.xlu0 %v7757_v55 }
 0x693   : > { %10715 = vtanh.f32 %v7072_v48  ;;  %v7064_v59 = vadd.f32 %v14618_v0, %v7063_v37  ;;  %v7760_v42 = vsel %vm6605_vm6, %v7530_v62, 0.0  ;;  %v7528_v19 = vmul.f32 %v10702_v23, %v14427_v63 }
 0x694   : > { %v10704_v4 = vpop.eup %10703  ;;  %v9634_v49 = vpop.f32.mrf.mxu0  ;;  %7761 = vadd.xlane.f32.xlu1 %v7760_v42 }
 0x695   : > { %10717 = vtanh.f32 %v7064_v59  ;;  %v7085_v56 = vadd.f32 %v14618_v0, %v9634_v49  ;;  %v7533_v40 = vmul.f32 %v10704_v4, %v14427_v63  ;;  %v7754_v35 = vsel %vm6605_vm6, %v7528_v19, 0.0 }
 0x696   : > { %v10706_v7 = vpop.eup %10705  ;;  %v7076_v11 = vpop.f32.mrf.mxu0  ;;  %7752 = vadd.xlane.f32.xlu0 %v7751_v38 }
 0x697   : > { %10719 = vtanh.f32 %v7085_v56  ;;  %v7077_v28 = vadd.f32 %v14618_v0, %v7076_v11  ;;  %v7769_v2 = vsel %vm6605_vm6, %v7533_v40, 0.0  ;;  %v7531_v36 = vmul.f32 %v10706_v7, %v14427_v63 }
 0x698   : > { %v10708_v30 = vpop.eup %10707  ;;  %v9635_v45 = vpop.f32.mrf.mxu0  ;;  %7755 = vadd.xlane.f32.xlu1 %v7754_v35 }
 0x699   : > { %10721 = vtanh.f32 %v7077_v28  ;;  %v7088_v61 = vadd.f32 %v14618_v0, %v9635_v45  ;;  %v7534_v3 = vmul.f32 %v10708_v30, %v14427_v63  ;;  %v7763_v60 = vsel %vm6605_vm6, %v7531_v36, 0.0 }
 0x69a   : > { %v10710_v52 = vpop.eup %10709  ;;  %v7079_v29 = vpop.f32.mrf.mxu0  ;;  %7770 = vadd.xlane.f32.xlu0 %v7769_v2 }
 0x69b   : > { %10723 = vtanh.f32 %v7088_v61  ;;  %v7080_v18 = vadd.f32 %v14618_v0, %v7079_v29  ;;  %v7772_v44 = vsel %vm6605_vm6, %v7534_v3, 0.0  ;;  %v7532_v41 = vmul.f32 %v10710_v52, %v14427_v63 }
 0x69c   : > { %v10712_v33 = vpop.eup %10711  ;;  %v9638_v46 = vpop.f32.mrf.mxu0  ;;  %7773 = vadd.xlane.f32.xlu1 %v7772_v44 }
 0x69d   : > { %10725 = vtanh.f32 %v7080_v18  ;;  %v7101_v16 = vadd.f32 %v14618_v0, %v9638_v46  ;;  %v7537_v1 = vmul.f32 %v10712_v33, %v14427_v63  ;;  %v7766_v17 = vsel %vm6605_vm6, %v7532_v41, 0.0 }
 0x69e   : > { %v10714_v53 = vpop.eup %10713  ;;  %v7092_v57 = vpop.f32.mrf.mxu0  ;;  %7764 = vadd.xlane.f32.xlu0 %v7763_v60 }
 0x69f   : > { %10727 = vtanh.f32 %v7101_v16  ;;  %v7093_v8 = vadd.f32 %v14618_v0, %v7092_v57  ;;  %v7781_v25 = vsel %vm6605_vm6, %v7537_v1, 0.0  ;;  %v7535_v58 = vmul.f32 %v10714_v53, %v14427_v63 }
 0x6a0   : > { %v10716_v5 = vpop.eup %10715  ;;  %v9639_v22 = vpop.f32.mrf.mxu0  ;;  %7767 = vadd.xlane.f32.xlu1 %v7766_v17 }
 0x6a1   : > { %10729 = vtanh.f32 %v7093_v8  ;;  %v7104_v26 = vadd.f32 %v14618_v0, %v9639_v22  ;;  %v7538_v31 = vmul.f32 %v10716_v5, %v14427_v63  ;;  %v7775_v13 = vsel %vm6605_vm6, %v7535_v58, 0.0  ;;  %v14684_v8 = vld [vmem:[%s15265_s1 + $0x8] ss:$0 sm:$0xff] }
 0x6a2   : > { %v10718_v51 = vpop.eup %10717  ;;  %v7095_v50 = vpop.f32.mrf.mxu0  ;;  %7782 = vadd.xlane.f32.xlu0 %v7781_v25 }
 0x6a3   : > { %10731 = vtanh.f32 %v7104_v26  ;;  %v7096_v39 = vadd.f32 %v14618_v0, %v7095_v50  ;;  %v7784_v14 = vsel %vm6605_vm6, %v7538_v31, 0.0  ;;  %v7536_v27 = vmul.f32 %v10718_v51, %v14427_v63 }
 0x6a4   : > { %v10720_v20 = vpop.eup %10719  ;;  %v9642_v43 = vpop.f32.mrf.mxu0  ;;  %7785 = vadd.xlane.f32.xlu1 %v7784_v14 }
 0x6a5   : > { %10733 = vtanh.f32 %v7096_v39  ;;  %v7117_v32 = vadd.f32 %v14618_v0, %v9642_v43  ;;  %v7541_v54 = vmul.f32 %v10720_v20, %v14427_v63  ;;  %v7778_v21 = vsel %vm6605_vm6, %v7536_v27, 0.0  ;;  %v14657_v63 = vld [vmem:[%s15265_s1 + $0x7] ss:$0 sm:$0xff] }
 0x6a6   : > { %v10722_v9 = vpop.eup %10721  ;;  %v7108_v34 = vpop.f32.mrf.mxu0  ;;  %7776 = vadd.xlane.f32.xlu0 %v7775_v13 }
 0x6a7   : > { %10735 = vtanh.f32 %v7117_v32  ;;  %v7109_v24 = vadd.f32 %v14618_v0, %v7108_v34  ;;  %v7793_v15 = vsel %vm6605_vm6, %v7541_v54, 0.0  ;;  %v7539_v48 = vmul.f32 %v14657_v63, %v10722_v9 }
 0x6a8   : > { %v10724_v47 = vpop.eup %10723  ;;  %v9643_v6 = vpop.f32.mrf.mxu0  ;;  %7779 = vadd.xlane.f32.xlu1 %v7778_v21 }
 0x6a9   : > { %10737 = vtanh.f32 %v7109_v24  ;;  %v7120_v12 = vadd.f32 %v14618_v0, %v9643_v6  ;;  %v7542_v55 = vmul.f32 %v14657_v63, %v10724_v47  ;;  %v7787_v49 = vsel %vm6605_vm6, %v7539_v48, 0.0 }
 0x6aa   : > { %v10726_v62 = vpop.eup %10725  ;;  %v7111_v10 = vpop.f32.mrf.mxu0  ;;  %7794 = vadd.xlane.f32.xlu0 %v7793_v15 }
 0x6ab   : > { %10739 = vtanh.f32 %v7120_v12  ;;  %v7112_v23 = vadd.f32 %v14618_v0, %v7111_v10  ;;  %v7796_v37 = vsel %vm6605_vm6, %v7542_v55, 0.0  ;;  %v7540_v59 = vmul.f32 %v14657_v63, %v10726_v62 }
 0x6ac   : > { %v10728_v42 = vpop.eup %10727  ;;  %v9646_v19 = vpop.f32.mrf.mxu0  ;;  %7797 = vadd.xlane.f32.xlu1 %v7796_v37 }
 0x6ad   : > { %10741 = vtanh.f32 %v7112_v23  ;;  %v7133_v4 = vadd.f32 %v14618_v0, %v9646_v19  ;;  %v7545_v56 = vmul.f32 %v14657_v63, %v10728_v42  ;;  %v7790_v11 = vsel %vm6605_vm6, %v7540_v59, 0.0 }
 0x6ae   : > { %v10730_v38 = vpop.eup %10729  ;;  %v7124_v40 = vpop.f32.mrf.mxu0  ;;  %7788 = vadd.xlane.f32.xlu0 %v7787_v49 }
 0x6af   : > { %10743 = vtanh.f32 %v7133_v4  ;;  %v7125_v7 = vadd.f32 %v14618_v0, %v7124_v40  ;;  %v7805_v30 = vsel %vm6605_vm6, %v7545_v56, 0.0  ;;  %v7543_v61 = vmul.f32 %v14657_v63, %v10730_v38 }
 0x6b0   : > { %v10732_v28 = vpop.eup %10731  ;;  %v9647_v35 = vpop.f32.mrf.mxu0  ;;  %7791 = vadd.xlane.f32.xlu1 %v7790_v11 }
 0x6b1   : > { %10745 = vtanh.f32 %v7125_v7  ;;  %v7136_v45 = vadd.f32 %v14618_v0, %v9647_v35  ;;  %v7546_v2 = vmul.f32 %v14657_v63, %v10732_v28  ;;  %v7799_v46 = vsel %vm6605_vm6, %v7543_v61, 0.0 }
 0x6b2   : > { %v10734_v3 = vpop.eup %10733  ;;  %v7127_v36 = vpop.f32.mrf.mxu0  ;;  %7806 = vadd.xlane.f32.xlu0 %v7805_v30 }
 0x6b3   : > { %10747 = vtanh.f32 %v7136_v45  ;;  %v7128_v52 = vadd.f32 %v14618_v0, %v7127_v36  ;;  %v7808_v29 = vsel %vm6605_vm6, %v7546_v2, 0.0  ;;  %v7544_v18 = vmul.f32 %v14657_v63, %v10734_v3 }
 0x6b4   : > { %v10736_v44 = vpop.eup %10735  ;;  %v9650_v41 = vpop.f32.mrf.mxu0  ;;  %7809 = vadd.xlane.f32.xlu1 %v7808_v29 }
 0x6b5   : > { %10749 = vtanh.f32 %v7128_v52  ;;  %v7149_v33 = vadd.f32 %v14618_v0, %v9650_v41  ;;  %v7549_v16 = vmul.f32 %v14657_v63, %v10736_v44  ;;  %v7802_v57 = vsel %vm6605_vm6, %v7544_v18, 0.0 }
 0x6b6   : > { %v10738_v60 = vpop.eup %10737  ;;  %v7140_v1 = vpop.f32.mrf.mxu0  ;;  %7800 = vadd.xlane.f32.xlu0 %v7799_v46 }
 0x6b7   : > { %10751 = vtanh.f32 %v7149_v33  ;;  %v7141_v53 = vadd.f32 %v14618_v0, %v7140_v1  ;;  %v7817_v22 = vsel %vm6605_vm6, %v7549_v16, 0.0  ;;  %v7547_v58 = vmul.f32 %v14657_v63, %v10738_v60 }
 0x6b8   : > { %v10740_v17 = vpop.eup %10739  ;;  %v9651_v5 = vpop.f32.mrf.mxu0  ;;  %7803 = vadd.xlane.f32.xlu1 %v7802_v57 }
 0x6b9   : > { %10753 = vtanh.f32 %v7141_v53  ;;  %v7152_v25 = vadd.f32 %v14618_v0, %v9651_v5  ;;  %v7615_v26 = vpop.xlane.xlu0 %7614  ;;  %v7550_v31 = vmul.f32 %v14657_v63, %v10740_v17  ;;  %v7811_v34 = vsel %vm6605_vm6, %v7547_v58, 0.0 }
 0x6ba   : > { %v10742_v51 = vpop.eup %10741  ;;  %v7997_v50 = vadd.f32 %v14684_v8, %v7615_v26  ;;  %v7143_v39 = vpop.f32.mrf.mxu0  ;;  %7818 = vadd.xlane.f32.xlu0 %v7817_v22 }
 0x6bb   : > { %10755 = vtanh.f32 %v7152_v25  ;;  %v7144_v14 = vadd.f32 %v14618_v0, %v7143_v39  ;;  %v7609_v27 = vpop.xlane.xlu1 %7608  ;;  %v7820_v20 = vsel %vm6605_vm6, %v7550_v31, 0.0  ;;  %v7548_v43 = vmul.f32 %v14657_v63, %v10742_v51 }
 0x6bc   : > { %v10744_v32 = vpop.eup %10743  ;;  %8126 = vst.msk [vmem:[%s14692_s10 + $0x10] sm:$0xff] %vm8123_vm7, %v7997_v50  ;;  %v7995_v13 = vadd.f32 %v14684_v8, %v7609_v27  ;;  %v9654_v54 = vpop.f32.mrf.mxu0  ;;  %7821 = vadd.xlane.f32.xlu1 %v7820_v20 }
 0x6bd   : > { %10757 = vtanh.f32 %v7144_v14  ;;  %v7165_v9 = vadd.f32 %v14618_v0, %v9654_v54  ;;  %v7553_v24 = vmul.f32 %v14657_v63, %v10744_v32  ;;  %v7814_v55 = vsel %vm6605_vm6, %v7548_v43, 0.0 }
 0x6be   : > { %v10746_v21 = vpop.eup %10745  ;;  %8124 = vst.msk [vmem:[%s14692_s10] sm:$0xff] %vm8123_vm7, %v7995_v13  ;;  %v7156_v47 = vpop.f32.mrf.mxu0  ;;  %7812 = vadd.xlane.f32.xlu0 %v7811_v34 }
 0x6bf   : > { %10759 = vtanh.f32 %v7165_v9  ;;  %v7157_v6 = vadd.f32 %v14618_v0, %v7156_v47  ;;  %v7612_v15 = vpop.xlane.xlu0 %7611  ;;  %v7618_v12 = vpop.xlane.xlu1 %7617  ;;  %v7829_v37 = vsel %vm6605_vm6, %v7553_v24, 0.0  ;;  %v7551_v19 = vmul.f32 %v14657_v63, %v10746_v21 }
 0x6c0   : > { %v10748_v48 = vpop.eup %10747  ;;  %v7996_v62 = vadd.f32 %v14684_v8, %v7612_v15  ;;  %v7998_v10 = vadd.f32 %v14684_v8, %v7618_v12  ;;  %v9655_v23 = vpop.f32.mrf.mxu0  ;;  %7815 = vadd.xlane.f32.xlu1 %v7814_v55 }
 0x6c1   : > { %10761 = vtanh.f32 %v7157_v6  ;;  %v7168_v59 = vadd.f32 %v14618_v0, %v9655_v23  ;;  %v7554_v42 = vmul.f32 %v14657_v63, %v10748_v48  ;;  %v7823_v2 = vsel %vm6605_vm6, %v7551_v19, 0.0 }
 0x6c2   : > { %v10750_v4 = vpop.eup %10749  ;;  %8125 = vst.msk [vmem:[%s14692_s10 + $0x8] sm:$0xff] %vm8123_vm7, %v7996_v62  ;;  %8127 = vst.msk [vmem:[%s14692_s10 + $0x18] sm:$0xff] %vm8123_vm7, %v7998_v10  ;;  %v7159_v49 = vpop.f32.mrf.mxu0  ;;  %7830 = vadd.xlane.f32.xlu0 %v7829_v37 }
 0x6c3   : > { %10763 = vtanh.f32 %v7168_v59  ;;  %v7160_v56 = vadd.f32 %v14618_v0, %v7159_v49  ;;  %v7627_v38 = vpop.xlane.xlu0 %7626  ;;  %v7832_v40 = vsel %vm6605_vm6, %v7554_v42, 0.0  ;;  %v7552_v7 = vmul.f32 %v14657_v63, %v10750_v4 }
 0x6c4   : > { %v10752_v11 = vpop.eup %10751  ;;  %v8001_v28 = vadd.f32 %v14684_v8, %v7627_v38  ;;  %v9658_v35 = vpop.f32.mrf.mxu0  ;;  %7833 = vadd.xlane.f32.xlu1 %v7832_v40 }
 0x6c5   : > { %10765 = vtanh.f32 %v7160_v56  ;;  %v7181_v30 = vadd.f32 %v14618_v0, %v9658_v35  ;;  %v7630_v45 = vpop.xlane.xlu1 %7629  ;;  %v7557_v61 = vmul.f32 %v14657_v63, %v10752_v11  ;;  %v7826_v44 = vsel %vm6605_vm6, %v7552_v7, 0.0 }
 0x6c6   : > { %v10754_v3 = vpop.eup %10753  ;;  %8130 = vst.msk [vmem:[%s14692_s10 + $0x30] sm:$0xff] %vm8123_vm7, %v8001_v28  ;;  %v8002_v36 = vadd.f32 %v14684_v8, %v7630_v45  ;;  %v7172_v52 = vpop.f32.mrf.mxu0  ;;  %7824 = vadd.xlane.f32.xlu0 %v7823_v2 }
 0x6c7   : > { %10767 = vtanh.f32 %v7181_v30  ;;  %v7173_v29 = vadd.f32 %v14618_v0, %v7172_v52  ;;  %v7621_v18 = vpop.xlane.xlu0 %7620  ;;  %v7841_v16 = vsel %vm6605_vm6, %v7557_v61, 0.0  ;;  %v7555_v57 = vmul.f32 %v14657_v63, %v10754_v3 }
 0x6c8   : > { %v10756_v41 = vpop.eup %10755  ;;  %8131 = vst.msk [vmem:[%s14692_s10 + $0x38] sm:$0xff] %vm8123_vm7, %v8002_v36  ;;  %v7999_v33 = vadd.f32 %v14684_v8, %v7621_v18  ;;  %v9659_v46 = vpop.f32.mrf.mxu0  ;;  %7827 = vadd.xlane.f32.xlu1 %v7826_v44 }
 0x6c9   : > { %10769 = vtanh.f32 %v7173_v29  ;;  %v7184_v60 = vadd.f32 %v14618_v0, %v9659_v46  ;;  %v7624_v1 = vpop.xlane.xlu1 %7623  ;;  %v7558_v53 = vmul.f32 %v14657_v63, %v10756_v41  ;;  %v7835_v20 = vsel %vm6605_vm6, %v7555_v57, 0.0 }
 0x6ca   : > { %v10758_v17 = vpop.eup %10757  ;;  %8128 = vst.msk [vmem:[%s14692_s10 + $0x20] sm:$0xff] %vm8123_vm7, %v7999_v33  ;;  %v8000_v5 = vadd.f32 %v14684_v8, %v7624_v1  ;;  %v7175_v22 = vpop.f32.mrf.mxu0  ;;  %7842 = vadd.xlane.f32.xlu0 %v7841_v16 }
 0x6cb   : > { %10771 = vtanh.f32 %v7184_v60  ;;  %v7176_v25 = vadd.f32 %v14618_v0, %v7175_v22  ;;  %v7639_v26 = vpop.xlane.xlu0 %7638  ;;  %v7844_v31 = vsel %vm6605_vm6, %v7558_v53, 0.0  ;;  %v7556_v58 = vmul.f32 %v14657_v63, %v10758_v17 }
 0x6cc   : > { %v10760_v51 = vpop.eup %10759  ;;  %8129 = vst.msk [vmem:[%s14692_s10 + $0x28] sm:$0xff] %vm8123_vm7, %v8000_v5  ;;  %v8005_v50 = vadd.f32 %v14684_v8, %v7639_v26  ;;  %v9662_v39 = vpop.f32.mrf.mxu0  ;;  %7845 = vadd.xlane.f32.xlu1 %v7844_v31 }
 0x6cd   : > { %10773 = vtanh.f32 %v7176_v25  ;;  %v7197_v14 = vadd.f32 %v14618_v0, %v9662_v39  ;;  %v7642_v27 = vpop.xlane.xlu1 %7641  ;;  %v7561_v43 = vmul.f32 %v14657_v63, %v10760_v51  ;;  %v7838_v24 = vsel %vm6605_vm6, %v7556_v58, 0.0 }
 0x6ce   : > { %v10762_v32 = vpop.eup %10761  ;;  %8134 = vst.msk [vmem:[%s14692_s10 + $0x50] sm:$0xff] %vm8123_vm7, %v8005_v50  ;;  %v8006_v13 = vadd.f32 %v14684_v8, %v7642_v27  ;;  %v7188_v54 = vpop.f32.mrf.mxu0  ;;  %7836 = vadd.xlane.f32.xlu0 %v7835_v20 }
 0x6cf   : > { %10775 = vtanh.f32 %v7197_v14  ;;  %v7189_v9 = vadd.f32 %v14618_v0, %v7188_v54  ;;  %v7633_v34 = vpop.xlane.xlu0 %7632  ;;  %v7853_v15 = vsel %vm6605_vm6, %v7561_v43, 0.0  ;;  %v7559_v62 = vmul.f32 %v14657_v63, %v10762_v32 }
 0x6d0   : > { %v10764_v21 = vpop.eup %10763  ;;  %8135 = vst.msk [vmem:[%s14692_s10 + $0x58] sm:$0xff] %vm8123_vm7, %v8006_v13  ;;  %v8003_v47 = vadd.f32 %v14684_v8, %v7633_v34  ;;  %v9663_v6 = vpop.f32.mrf.mxu0  ;;  %7839 = vadd.xlane.f32.xlu1 %v7838_v24 }
 0x6d1   : > { %10777 = vtanh.f32 %v7189_v9  ;;  %v7200_v12 = vadd.f32 %v14618_v0, %v9663_v6  ;;  %v7636_v55 = vpop.xlane.xlu1 %7635  ;;  %v7562_v48 = vmul.f32 %v14657_v63, %v10764_v21  ;;  %v7847_v11 = vsel %vm6605_vm6, %v7559_v62, 0.0 }
 0x6d2   : > { %v10766_v10 = vpop.eup %10765  ;;  %8132 = vst.msk [vmem:[%s14692_s10 + $0x40] sm:$0xff] %vm8123_vm7, %v8003_v47  ;;  %v8004_v23 = vadd.f32 %v14684_v8, %v7636_v55  ;;  %v7191_v37 = vpop.f32.mrf.mxu0  ;;  %7854 = vadd.xlane.f32.xlu0 %v7853_v15 }
 0x6d3   : > { %10779 = vtanh.f32 %v7200_v12  ;;  %v7192_v59 = vadd.f32 %v14618_v0, %v7191_v37  ;;  %v7651_v42 = vpop.xlane.xlu0 %7650  ;;  %v7856_v19 = vsel %vm6605_vm6, %v7562_v48, 0.0  ;;  %v7560_v4 = vmul.f32 %v14657_v63, %v10766_v10 }
 0x6d4   : > { %v10768_v49 = vpop.eup %10767  ;;  %8133 = vst.msk [vmem:[%s14692_s10 + $0x48] sm:$0xff] %vm8123_vm7, %v8004_v23  ;;  %v8009_v56 = vadd.f32 %v14684_v8, %v7651_v42  ;;  %v9666_v38 = vpop.f32.mrf.mxu0  ;;  %7857 = vadd.xlane.f32.xlu1 %v7856_v19 }
 0x6d5   : > { %10781 = vtanh.f32 %v7192_v59  ;;  %v7213_v40 = vadd.f32 %v14618_v0, %v9666_v38  ;;  %v7654_v7 = vpop.xlane.xlu1 %7653  ;;  %v7565_v28 = vmul.f32 %v14657_v63, %v10768_v49  ;;  %v7850_v3 = vsel %vm6605_vm6, %v7560_v4, 0.0 }
 0x6d6   : > { %v10770_v35 = vpop.eup %10769  ;;  %8138 = vst.msk [vmem:[%s14692_s10 + $0x70] sm:$0xff] %vm8123_vm7, %v8009_v56  ;;  %v8010_v30 = vadd.f32 %v14684_v8, %v7654_v7  ;;  %v7204_v45 = vpop.f32.mrf.mxu0  ;;  %7848 = vadd.xlane.f32.xlu0 %v7847_v11 }
 0x6d7   : > { %10783 = vtanh.f32 %v7213_v40  ;;  %v7205_v2 = vadd.f32 %v14618_v0, %v7204_v45  ;;  %v7645_v61 = vpop.xlane.xlu0 %7644  ;;  %v7865_v18 = vsel %vm6605_vm6, %v7565_v28, 0.0  ;;  %v7563_v46 = vmul.f32 %v14657_v63, %v10770_v35 }
 0x6d8   : > { %v10772_v36 = vpop.eup %10771  ;;  %8139 = vst.msk [vmem:[%s14692_s10 + $0x78] sm:$0xff] %vm8123_vm7, %v8010_v30  ;;  %v8007_v52 = vadd.f32 %v14684_v8, %v7645_v61  ;;  %v9667_v29 = vpop.f32.mrf.mxu0  ;;  %7851 = vadd.xlane.f32.xlu1 %v7850_v3 }
 0x6d9   : > { %10785 = vtanh.f32 %v7205_v2  ;;  %v7216_v44 = vadd.f32 %v14618_v0, %v9667_v29  ;;  %v7648_v41 = vpop.xlane.xlu1 %7647  ;;  %v7566_v33 = vmul.f32 %v14657_v63, %v10772_v36  ;;  %v7859_v51 = vsel %vm6605_vm6, %v7563_v46, 0.0 }
 0x6da   : > { %v10774_v16 = vpop.eup %10773  ;;  %8136 = vst.msk [vmem:[%s14692_s10 + $0x60] sm:$0xff] %vm8123_vm7, %v8007_v52  ;;  %v8008_v60 = vadd.f32 %v14684_v8, %v7648_v41  ;;  %v7207_v1 = vpop.f32.mrf.mxu0  ;;  %7866 = vadd.xlane.f32.xlu0 %v7865_v18 }
 0x6db   : > { %10787 = vtanh.f32 %v7216_v44  ;;  %v7208_v53 = vadd.f32 %v14618_v0, %v7207_v1  ;;  %v7663_v57 = vpop.xlane.xlu0 %7662  ;;  %v7868_v17 = vsel %vm6605_vm6, %v7566_v33, 0.0  ;;  %v7564_v5 = vmul.f32 %v14657_v63, %v10774_v16 }
 0x6dc   : > { %v10776_v22 = vpop.eup %10775  ;;  %8137 = vst.msk [vmem:[%s14692_s10 + $0x68] sm:$0xff] %vm8123_vm7, %v8008_v60  ;;  %v8013_v25 = vadd.f32 %v14684_v8, %v7663_v57  ;;  %v9670_v26 = vpop.f32.mrf.mxu0  ;;  %7869 = vadd.xlane.f32.xlu1 %v7868_v17 }
 0x6dd   : > { %10789 = vtanh.f32 %v7208_v53  ;;  %v7229_v31 = vadd.f32 %v14618_v0, %v9670_v26  ;;  %v7666_v58 = vpop.xlane.xlu1 %7665  ;;  %v7569_v50 = vmul.f32 %v14657_v63, %v10776_v22  ;;  %v7862_v32 = vsel %vm6605_vm6, %v7564_v5, 0.0 }
 0x6de   : > { %v10778_v39 = vpop.eup %10777  ;;  %8142 = vst.msk [vmem:[%s14692_s10 + $0x90] sm:$0xff] %vm8123_vm7, %v8013_v25  ;;  %v8014_v14 = vadd.f32 %v14684_v8, %v7666_v58  ;;  %v7220_v27 = vpop.f32.mrf.mxu0  ;;  %7860 = vadd.xlane.f32.xlu0 %v7859_v51 }
 0x6df   : > { %10791 = vtanh.f32 %v7229_v31  ;;  %v7221_v20 = vadd.f32 %v14618_v0, %v7220_v27  ;;  %v7657_v43 = vpop.xlane.xlu0 %7656  ;;  %v7877_v34 = vsel %vm6605_vm6, %v7569_v50, 0.0  ;;  %v7567_v6 = vmul.f32 %v14657_v63, %v10778_v39 }
 0x6e0   : > { %v10780_v13 = vpop.eup %10779  ;;  %8143 = vst.msk [vmem:[%s14692_s10 + $0x98] sm:$0xff] %vm8123_vm7, %v8014_v14  ;;  %v8011_v54 = vadd.f32 %v14684_v8, %v7657_v43  ;;  %v9671_v9 = vpop.f32.mrf.mxu0  ;;  %7863 = vadd.xlane.f32.xlu1 %v7862_v32 }
 0x6e1   : > { %10793 = vtanh.f32 %v7221_v20  ;;  %v7232_v24 = vadd.f32 %v14618_v0, %v9671_v9  ;;  %v7660_v21 = vpop.xlane.xlu1 %7659  ;;  %v7570_v47 = vmul.f32 %v14657_v63, %v10780_v13  ;;  %v7871_v49 = vsel %vm6605_vm6, %v7567_v6, 0.0 }
 0x6e2   : > { %v10782_v15 = vpop.eup %10781  ;;  %8140 = vst.msk [vmem:[%s14692_s10 + $0x80] sm:$0xff] %vm8123_vm7, %v8011_v54  ;;  %v8012_v12 = vadd.f32 %v14684_v8, %v7660_v21  ;;  %v7223_v55 = vpop.f32.mrf.mxu0  ;;  %7878 = vadd.xlane.f32.xlu0 %v7877_v34 }
 0x6e3   : > { %10795 = vtanh.f32 %v7232_v24  ;;  %v7224_v48 = vadd.f32 %v14618_v0, %v7223_v55  ;;  %v7675_v62 = vpop.xlane.xlu0 %7674  ;;  %v7880_v10 = vsel %vm6605_vm6, %v7570_v47, 0.0  ;;  %v7568_v23 = vmul.f32 %v14657_v63, %v10782_v15 }
 0x6e4   : > { %v10784_v37 = vpop.eup %10783  ;;  %8141 = vst.msk [vmem:[%s14692_s10 + $0x88] sm:$0xff] %vm8123_vm7, %v8012_v12  ;;  %v8017_v59 = vadd.f32 %v14684_v8, %v7675_v62  ;;  %v9674_v42 = vpop.f32.mrf.mxu0  ;;  %7881 = vadd.xlane.f32.xlu1 %v7880_v10 }
 0x6e5   : > { %10797 = vtanh.f32 %v7224_v48  ;;  %v7245_v19 = vadd.f32 %v14618_v0, %v9674_v42  ;;  %v7678_v4 = vpop.xlane.xlu1 %7677  ;;  %v7573_v56 = vmul.f32 %v14657_v63, %v10784_v37  ;;  %v7874_v35 = vsel %vm6605_vm6, %v7568_v23, 0.0 }
 0x6e6   : > { %v10786_v38 = vpop.eup %10785  ;;  %8146 = vst.msk [vmem:[%s14692_s10 + $0xb0] sm:$0xff] %vm8123_vm7, %v8017_v59  ;;  %v8018_v40 = vadd.f32 %v14684_v8, %v7678_v4  ;;  %v7236_v7 = vpop.f32.mrf.mxu0  ;;  %7872 = vadd.xlane.f32.xlu0 %v7871_v49 }
 0x6e7   : > { %10799 = vtanh.f32 %v7245_v19  ;;  %v7237_v11 = vadd.f32 %v14618_v0, %v7236_v7  ;;  %v7669_v28 = vpop.xlane.xlu0 %7668  ;;  %v7889_v61 = vsel %vm6605_vm6, %v7573_v56, 0.0  ;;  %v7571_v29 = vmul.f32 %v14657_v63, %v10786_v38 }
 0x6e8   : > { %v10788_v30 = vpop.eup %10787  ;;  %8147 = vst.msk [vmem:[%s14692_s10 + $0xb8] sm:$0xff] %vm8123_vm7, %v8018_v40  ;;  %v8015_v45 = vadd.f32 %v14684_v8, %v7669_v28  ;;  %v9675_v2 = vpop.f32.mrf.mxu0  ;;  %7875 = vadd.xlane.f32.xlu1 %v7874_v35 }
 0x6e9   : > { %10801 = vtanh.f32 %v7237_v11  ;;  %v7248_v3 = vadd.f32 %v14618_v0, %v9675_v2  ;;  %v7672_v36 = vpop.xlane.xlu1 %7671  ;;  %v7574_v52 = vmul.f32 %v14657_v63, %v10788_v30  ;;  %v7883_v22 = vsel %vm6605_vm6, %v7571_v29, 0.0 }
 0x6ea   : > { %v10790_v18 = vpop.eup %10789  ;;  %8144 = vst.msk [vmem:[%s14692_s10 + $0xa0] sm:$0xff] %vm8123_vm7, %v8015_v45  ;;  %v8016_v44 = vadd.f32 %v14684_v8, %v7672_v36  ;;  %v7239_v41 = vpop.f32.mrf.mxu0  ;;  %7890 = vadd.xlane.f32.xlu0 %v7889_v61 }
 0x6eb   : > { %10803 = vtanh.f32 %v7248_v3  ;;  %v7240_v33 = vadd.f32 %v14618_v0, %v7239_v41  ;;  %v7687_v46 = vpop.xlane.xlu0 %7686  ;;  %v7892_v16 = vsel %vm6605_vm6, %v7574_v52, 0.0  ;;  %v7572_v60 = vmul.f32 %v14657_v63, %v10790_v18 }
 0x6ec   : > { %v10792_v1 = vpop.eup %10791  ;;  %8145 = vst.msk [vmem:[%s14692_s10 + $0xa8] sm:$0xff] %vm8123_vm7, %v8016_v44  ;;  %v8021_v53 = vadd.f32 %v14684_v8, %v7687_v46  ;;  %v9678_v57 = vpop.f32.mrf.mxu0  ;;  %7893 = vadd.xlane.f32.xlu1 %v7892_v16 }
 0x6ed   : > { %10805 = vtanh.f32 %v7240_v33  ;;  %v7261_v17 = vadd.f32 %v14618_v0, %v9678_v57  ;;  %v7690_v5 = vpop.xlane.xlu1 %7689  ;;  %v7577_v25 = vmul.f32 %v14657_v63, %v10792_v1  ;;  %v7886_v39 = vsel %vm6605_vm6, %v7572_v60, 0.0 }
 0x6ee   : > { %v10794_v26 = vpop.eup %10793  ;;  %8150 = vst.msk [vmem:[%s14692_s10 + $0xd0] sm:$0xff] %vm8123_vm7, %v8021_v53  ;;  %v8022_v31 = vadd.f32 %v14684_v8, %v7690_v5  ;;  %v7252_v58 = vpop.f32.mrf.mxu0  ;;  %7884 = vadd.xlane.f32.xlu0 %v7883_v22 }
 0x6ef   : > { %10807 = vtanh.f32 %v7261_v17  ;;  %v7253_v51 = vadd.f32 %v14618_v0, %v7252_v58  ;;  %v7681_v50 = vpop.xlane.xlu0 %7680  ;;  %v7901_v43 = vsel %vm6605_vm6, %v7577_v25, 0.0  ;;  %v7575_v9 = vmul.f32 %v14657_v63, %v10794_v26 }
 0x6f0   : > { %v10796_v14 = vpop.eup %10795  ;;  %8151 = vst.msk [vmem:[%s14692_s10 + $0xd8] sm:$0xff] %vm8123_vm7, %v8022_v31  ;;  %v8019_v27 = vadd.f32 %v14684_v8, %v7681_v50  ;;  %v9679_v20 = vpop.f32.mrf.mxu0  ;;  %7887 = vadd.xlane.f32.xlu1 %v7886_v39 }
 0x6f1   : > { %10809 = vtanh.f32 %v7253_v51  ;;  %v7264_v32 = vadd.f32 %v14618_v0, %v9679_v20  ;;  %v7684_v13 = vpop.xlane.xlu1 %7683  ;;  %v7578_v54 = vmul.f32 %v14657_v63, %v10796_v14  ;;  %v7895_v37 = vsel %vm6605_vm6, %v7575_v9, 0.0 }
 0x6f2   : > { %v10798_v34 = vpop.eup %10797  ;;  %8148 = vst.msk [vmem:[%s14692_s10 + $0xc0] sm:$0xff] %vm8123_vm7, %v8019_v27  ;;  %v8020_v24 = vadd.f32 %v14684_v8, %v7684_v13  ;;  %v7255_v21 = vpop.f32.mrf.mxu0  ;;  %7902 = vadd.xlane.f32.xlu0 %v7901_v43 }
 0x6f3   : > { %10811 = vtanh.f32 %v7264_v32  ;;  %v7256_v47 = vadd.f32 %v14618_v0, %v7255_v21  ;;  %v7699_v6 = vpop.xlane.xlu0 %7698  ;;  %v7904_v15 = vsel %vm6605_vm6, %v7578_v54, 0.0  ;;  %v7576_v12 = vmul.f32 %v14657_v63, %v10798_v34 }
 0x6f4   : > { %v10800_v55 = vpop.eup %10799  ;;  %8149 = vst.msk [vmem:[%s14692_s10 + $0xc8] sm:$0xff] %vm8123_vm7, %v8020_v24  ;;  %v8025_v48 = vadd.f32 %v14684_v8, %v7699_v6  ;;  %v9682_v62 = vpop.f32.mrf.mxu0  ;;  %7905 = vadd.xlane.f32.xlu1 %v7904_v15  ;;  %v14920_v15 = vld [vmem:[%s15265_s1 + $0x6] ss:$0 sm:$0xff] }
 0x6f5   : > { %10813 = vtanh.f32 %v7256_v47  ;;  %v7277_v10 = vadd.f32 %v14618_v0, %v9682_v62  ;;  %v7702_v23 = vpop.xlane.xlu1 %7701  ;;  %v7581_v59 = vmul.f32 %v14657_v63, %v10800_v55  ;;  %v7898_v38 = vsel %vm6605_vm6, %v7576_v12, 0.0 }
 0x6f6   : > { %v10802_v42 = vpop.eup %10801  ;;  %8154 = vst.msk [vmem:[%s14692_s10 + $0xf0] sm:$0xff] %vm8123_vm7, %v8025_v48  ;;  %v8026_v19 = vadd.f32 %v14684_v8, %v7702_v23  ;;  %v7268_v4 = vpop.f32.mrf.mxu0  ;;  %7896 = vadd.xlane.f32.xlu0 %v7895_v37 }
 0x6f7   : > { %10815 = vtanh.f32 %v7277_v10  ;;  %v7269_v49 = vadd.f32 %v14618_v0, %v7268_v4  ;;  %v7693_v56 = vpop.xlane.xlu0 %7692  ;;  %v7913_v28 = vsel %vm6605_vm6, %v7581_v59, 0.0  ;;  %v7579_v2 = vmul.f32 %v14657_v63, %v10802_v42 }
 0x6f8   : > { %v10804_v40 = vpop.eup %10803  ;;  %8155 = vst.msk [vmem:[%s14692_s10 + $0xf8] sm:$0xff] %vm8123_vm7, %v8026_v19  ;;  %v8023_v7 = vadd.f32 %v14684_v8, %v7693_v56  ;;  %v9683_v11 = vpop.f32.mrf.mxu0  ;;  %7899 = vadd.xlane.f32.xlu1 %v7898_v38 }
 0x6f9   : > { %10817 = vtanh.f32 %v7269_v49  ;;  %v7280_v35 = vadd.f32 %v14618_v0, %v9683_v11  ;;  %v7696_v30 = vpop.xlane.xlu1 %7695  ;;  %v7582_v45 = vmul.f32 %v14657_v63, %v10804_v40  ;;  %v7907_v1 = vsel %vm6605_vm6, %v7579_v2, 0.0 }
 0x6fa   : > { %v10806_v61 = vpop.eup %10805  ;;  %8152 = vst.msk [vmem:[%s14692_s10 + $0xe0] sm:$0xff] %vm8123_vm7, %v8023_v7  ;;  %v8024_v3 = vadd.f32 %v14684_v8, %v7696_v30  ;;  %v7271_v36 = vpop.f32.mrf.mxu0  ;;  %7914 = vadd.xlane.f32.xlu0 %v7913_v28 }
 0x6fb   : > { %10819 = vtanh.f32 %v7280_v35  ;;  %v7272_v52 = vadd.f32 %v14618_v0, %v7271_v36  ;;  %v7711_v29 = vpop.xlane.xlu0 %7710  ;;  %v7916_v18 = vsel %vm6605_vm6, %v7582_v45, 0.0  ;;  %v7580_v44 = vmul.f32 %v14657_v63, %v10806_v61 }
 0x6fc   : > { %v10808_v41 = vpop.eup %10807  ;;  %8153 = vst.msk [vmem:[%s14692_s10 + $0xe8] sm:$0xff] %vm8123_vm7, %v8024_v3  ;;  %v8029_v33 = vadd.f32 %v14684_v8, %v7711_v29  ;;  %v9686_v46 = vpop.f32.mrf.mxu0  ;;  %7917 = vadd.xlane.f32.xlu1 %v7916_v18 }
 0x6fd   : > { %10821 = vtanh.f32 %v7272_v52  ;;  %v7293_v16 = vadd.f32 %v14618_v0, %v9686_v46  ;;  %v7714_v60 = vpop.xlane.xlu1 %7713  ;;  %v7585_v53 = vmul.f32 %v14657_v63, %v10808_v41  ;;  %v7910_v26 = vsel %vm6605_vm6, %v7580_v44, 0.0 }
 0x6fe   : > { %v10810_v57 = vpop.eup %10809  ;;  %8158 = vst.msk [vmem:[%s14692_s10 + $0x110] sm:$0xff] %vm8123_vm7, %v8029_v33  ;;  %v8030_v17 = vadd.f32 %v14684_v8, %v7714_v60  ;;  %v7284_v5 = vpop.f32.mrf.mxu0  ;;  %7908 = vadd.xlane.f32.xlu0 %v7907_v1 }
 0x6ff   : > { %10823 = vtanh.f32 %v7293_v16  ;;  %v7285_v22 = vadd.f32 %v14618_v0, %v7284_v5  ;;  %v7705_v25 = vpop.xlane.xlu0 %7704  ;;  %v7925_v50 = vsel %vm6605_vm6, %v7585_v53, 0.0  ;;  %v7583_v20 = vmul.f32 %v14657_v63, %v10810_v57 }
 0x700   : > { %v10812_v31 = vpop.eup %10811  ;;  %8159 = vst.msk [vmem:[%s14692_s10 + $0x118] sm:$0xff] %vm8123_vm7, %v8030_v17  ;;  %v8027_v58 = vadd.f32 %v14684_v8, %v7705_v25  ;;  %v9687_v51 = vpop.f32.mrf.mxu0  ;;  %7911 = vadd.xlane.f32.xlu1 %v7910_v26 }
 0x701   : > { %10825 = vtanh.f32 %v7285_v22  ;;  %v7296_v39 = vadd.f32 %v14618_v0, %v9687_v51  ;;  %v7708_v14 = vpop.xlane.xlu1 %7707  ;;  %v7586_v27 = vmul.f32 %v14657_v63, %v10812_v31  ;;  %v7919_v55 = vsel %vm6605_vm6, %v7583_v20, 0.0 }
 0x702   : > { %v10814_v43 = vpop.eup %10813  ;;  %8156 = vst.msk [vmem:[%s14692_s10 + $0x100] sm:$0xff] %vm8123_vm7, %v8027_v58  ;;  %v8028_v32 = vadd.f32 %v14684_v8, %v7708_v14  ;;  %v7287_v13 = vpop.f32.mrf.mxu0  ;;  %7926 = vadd.xlane.f32.xlu0 %v7925_v50 }
 0x703   : > { %10827 = vtanh.f32 %v7296_v39  ;;  %v7288_v54 = vadd.f32 %v14618_v0, %v7287_v13  ;;  %v7723_v9 = vpop.xlane.xlu0 %7722  ;;  %v7928_v34 = vsel %vm6605_vm6, %v7586_v27, 0.0  ;;  %v7584_v24 = vmul.f32 %v14657_v63, %v10814_v43 }
 0x704   : > { %v10816_v21 = vpop.eup %10815  ;;  %8157 = vst.msk [vmem:[%s14692_s10 + $0x108] sm:$0xff] %vm8123_vm7, %v8028_v32  ;;  %v8033_v47 = vadd.f32 %v14684_v8, %v7723_v9  ;;  %v9690_v6 = vpop.f32.mrf.mxu0  ;;  %7929 = vadd.xlane.f32.xlu1 %v7928_v34 }
 0x705   : > { %10829 = vtanh.f32 %v7288_v54  ;;  %v7309_v0 = vadd.f32 %v14920_v15, %v9690_v6  ;;  %v7726_v12 = vpop.xlane.xlu1 %7725  ;;  %v7589_v48 = vmul.f32 %v14657_v63, %v10816_v21  ;;  %v7922_v42 = vsel %vm6605_vm6, %v7584_v24, 0.0 }
 0x706   : > { %v10818_v62 = vpop.eup %10817  ;;  %8162 = vst.msk [vmem:[%s14692_s10 + $0x130] sm:$0xff] %vm8123_vm7, %v8033_v47  ;;  %v8034_v10 = vadd.f32 %v14684_v8, %v7726_v12  ;;  %v7300_v23 = vpop.f32.mrf.mxu0  ;;  %7920 = vadd.xlane.f32.xlu0 %v7919_v55  ;;  %v14975_v47 = vld [vmem:[%s15265_s1 + $0x7] ss:$0 sm:$0xff] }
 0x707   : > { %10831 = vtanh.f32 %v7309_v0  ;;  %v7301_v37 = vadd.f32 %v14920_v15, %v7300_v23  ;;  %v7717_v59 = vpop.xlane.xlu0 %7716  ;;  %v7937_v56 = vsel %vm6605_vm6, %v7589_v48, 0.0  ;;  %v7587_v11 = vmul.f32 %v14657_v63, %v10818_v62 }
 0x708   : > { %v10820_v19 = vpop.eup %10819  ;;  %8163 = vst.msk [vmem:[%s14692_s10 + $0x138] sm:$0xff] %vm8123_vm7, %v8034_v10  ;;  %v8031_v4 = vadd.f32 %v14684_v8, %v7717_v59  ;;  %v9691_v49 = vpop.f32.mrf.mxu0  ;;  %7923 = vadd.xlane.f32.xlu1 %v7922_v42 }
 0x709   : > { %10833 = vtanh.f32 %v7301_v37  ;;  %v7312_v38 = vadd.f32 %v14920_v15, %v9691_v49  ;;  %v7720_v40 = vpop.xlane.xlu1 %7719  ;;  %v7590_v7 = vmul.f32 %v14657_v63, %v10820_v19  ;;  %v7931_v41 = vsel %vm6605_vm6, %v7587_v11, 0.0 }
 0x70a   : > { %v10822_v28 = vpop.eup %10821  ;;  %8160 = vst.msk [vmem:[%s14692_s10 + $0x120] sm:$0xff] %vm8123_vm7, %v8031_v4  ;;  %v8032_v35 = vadd.f32 %v14684_v8, %v7720_v40  ;;  %v7303_v30 = vpop.f32.mrf.mxu0  ;;  %7938 = vadd.xlane.f32.xlu0 %v7937_v56 }
 0x70b   : > { %10835 = vtanh.f32 %v7312_v38  ;;  %v7304_v45 = vadd.f32 %v14920_v15, %v7303_v30  ;;  %v7735_v2 = vpop.xlane.xlu0 %7734  ;;  %v7940_v61 = vsel %vm6605_vm6, %v7590_v7, 0.0  ;;  %v7588_v3 = vmul.f32 %v14657_v63, %v10822_v28 }
 0x70c   : > { %v10824_v36 = vpop.eup %10823  ;;  %8161 = vst.msk [vmem:[%s14692_s10 + $0x128] sm:$0xff] %vm8123_vm7, %v8032_v35  ;;  %v8037_v52 = vadd.f32 %v14684_v8, %v7735_v2  ;;  %v9694_v29 = vpop.f32.mrf.mxu0  ;;  %7941 = vadd.xlane.f32.xlu1 %v7940_v61 }
 0x70d   : > { %10837 = vtanh.f32 %v7304_v45  ;;  %v7325_v18 = vadd.f32 %v14920_v15, %v9694_v29  ;;  %v7738_v44 = vpop.xlane.xlu1 %7737  ;;  %v7593_v33 = vmul.f32 %v14657_v63, %v10824_v36  ;;  %v7934_v57 = vsel %vm6605_vm6, %v7588_v3, 0.0 }
 0x70e   : > { %v10826_v46 = vpop.eup %10825  ;;  %8166 = vst.msk [vmem:[%s14692_s10 + $0x150] sm:$0xff] %vm8123_vm7, %v8037_v52  ;;  %v8038_v16 = vadd.f32 %v14684_v8, %v7738_v44  ;;  %v7316_v60 = vpop.f32.mrf.mxu0  ;;  %7932 = vadd.xlane.f32.xlu0 %v7931_v41  ;;  %v15010_v44 = vld [vmem:[%s15265_s1 + $0x8] ss:$0 sm:$0xff] }
 0x70f   : > { %10839 = vtanh.f32 %v7325_v18  ;;  %v7317_v1 = vadd.f32 %v14920_v15, %v7316_v60  ;;  %v7729_v53 = vpop.xlane.xlu0 %7728  ;;  %v7949_v25 = vsel %vm6605_vm6, %v7593_v33, 0.0  ;;  %v7591_v51 = vmul.f32 %v14657_v63, %v10826_v46 }
 0x710   : > { %v10828_v17 = vpop.eup %10827  ;;  %8167 = vst.msk [vmem:[%s14692_s10 + $0x158] sm:$0xff] %vm8123_vm7, %v8038_v16  ;;  %v8035_v5 = vadd.f32 %v14684_v8, %v7729_v53  ;;  %v9695_v22 = vpop.f32.mrf.mxu0  ;;  %7935 = vadd.xlane.f32.xlu1 %v7934_v57 }
 0x711   : > { %10841 = vtanh.f32 %v7317_v1  ;;  %v7328_v26 = vadd.f32 %v14920_v15, %v9695_v22  ;;  %v7732_v31 = vpop.xlane.xlu1 %7731  ;;  %v7594_v58 = vmul.f32 %v14657_v63, %v10828_v17  ;;  %v7943_v21 = vsel %vm6605_vm6, %v7591_v51, 0.0 }
 0x712   : > { %v10830_v50 = vpop.eup %10829  ;;  %8164 = vst.msk [vmem:[%s14692_s10 + $0x140] sm:$0xff] %vm8123_vm7, %v8035_v5  ;;  %v8036_v39 = vadd.f32 %v14684_v8, %v7732_v31  ;;  %v7319_v14 = vpop.f32.mrf.mxu0  ;;  %7950 = vadd.xlane.f32.xlu0 %v7949_v25 }
 0x713   : > { %10843 = vtanh.f32 %v7328_v26  ;;  %v7320_v27 = vadd.f32 %v14920_v15, %v7319_v14  ;;  %v7747_v20 = vpop.xlane.xlu0 %7746  ;;  %v7952_v43 = vsel %vm6605_vm6, %v7594_v58, 0.0  ;;  %v7592_v32 = vmul.f32 %v14657_v63, %v10830_v50 }
 0x714   : > { %v10832_v13 = vpop.eup %10831  ;;  %8165 = vst.msk [vmem:[%s14692_s10 + $0x148] sm:$0xff] %vm8123_vm7, %v8036_v39  ;;  %v8041_v54 = vadd.f32 %v14684_v8, %v7747_v20  ;;  %7953 = vadd.xlane.f32.xlu1 %v7952_v43  ;;  %v9698_v9 = vpop.f32.mrf.mxu0 }
 0x715   : > { %10845 = vtanh.f32 %v7320_v27  ;;  %v7341_v34 = vadd.f32 %v14920_v15, %v9698_v9  ;;  %v7750_v24 = vpop.xlane.xlu1 %7749  ;;  %v7597_v63 = vmul.f32 %v14975_v47, %v10832_v13  ;;  %v7946_v62 = vsel %vm6605_vm6, %v7592_v32, 0.0 }
 0x716   : > { %v10834_v6 = vpop.eup %10833  ;;  %8170 = vst.msk [vmem:[%s14692_s10 + $0x170] sm:$0xff] %vm8123_vm7, %v8041_v54  ;;  %v8042_v0 = vadd.f32 %v14684_v8, %v7750_v24  ;;  %7944 = vadd.xlane.f32.xlu0 %v7943_v21  ;;  %v7332_v12 = vpop.f32.mrf.mxu0 }
 0x717   : > { %v7333_v55 = vadd.f32 %v14920_v15, %v7332_v12  ;;  %v7741_v48 = vpop.xlane.xlu0 %7740  ;;  %10847 = vtanh.f32 %v7341_v34  ;;  %v7961_v59 = vsel %vm6605_vm6, %v7597_v63, 0.0  ;;  %v7595_v49 = vmul.f32 %v14975_v47, %v10834_v6 }
 0x718   : > { %v10836_v10 = vpop.eup %10835  ;;  %8171 = vst.msk [vmem:[%s14692_s10 + $0x178] sm:$0xff] %vm8123_vm7, %v8042_v0  ;;  %v8039_v23 = vadd.f32 %v14684_v8, %v7741_v48  ;;  %7947 = vadd.xlane.f32.xlu1 %v7946_v62  ;;  %v9699_v37 = vpop.f32.mrf.mxu0 }
 0x719   : > { %10849 = vtanh.f32 %v7333_v55  ;;  %v7344_v42 = vadd.f32 %v14920_v15, %v9699_v37  ;;  %v7744_v19 = vpop.xlane.xlu1 %7743  ;;  %v7598_v4 = vmul.f32 %v14975_v47, %v10836_v10  ;;  %v7955_v61 = vsel %vm6605_vm6, %v7595_v49, 0.0 }
 0x71a   : > { %v10838_v56 = vpop.eup %10837  ;;  %8168 = vst.msk [vmem:[%s14692_s10 + $0x160] sm:$0xff] %vm8123_vm7, %v8039_v23  ;;  %v8040_v38 = vadd.f32 %v14684_v8, %v7744_v19  ;;  %7962 = vadd.xlane.f32.xlu0 %v7961_v59  ;;  %v7335_v40 = vpop.f32.mrf.mxu0 }
 0x71b   : > { %v7336_v7 = vadd.f32 %v14920_v15, %v7335_v40  ;;  %v7759_v11 = vpop.xlane.xlu0 %7758  ;;  %v7964_v28 = vsel %vm6605_vm6, %v7598_v4, 0.0  ;;  %v7596_v35 = vmul.f32 %v14975_v47, %v10838_v56  ;;  %10851 = vtanh.f32 %v7344_v42 }
 0x71c   : > { %v10840_v30 = vpop.eup %10839  ;;  %8169 = vst.msk [vmem:[%s14692_s10 + $0x168] sm:$0xff] %vm8123_vm7, %v8040_v38  ;;  %v8045_v45 = vadd.f32 %v14684_v8, %v7759_v11  ;;  %7965 = vadd.xlane.f32.xlu1 %v7964_v28 }
 0x71d   : > { %10853 = vtanh.f32 %v7336_v7  ;;  %v7762_v2 = vpop.xlane.xlu1 %7761  ;;  %v7601_v3 = vmul.f32 %v14975_v47, %v10840_v30  ;;  %v7958_v29 = vsel %vm6605_vm6, %v7596_v35, 0.0 }
 0x71e   : > { %v10842_v15 = vpop.eup %10841  ;;  %8174 = vst.msk [vmem:[%s14692_s10 + $0x190] sm:$0xff] %vm8123_vm7, %v8045_v45  ;;  %v8046_v36 = vadd.f32 %v14684_v8, %v7762_v2  ;;  %7956 = vadd.xlane.f32.xlu0 %v7955_v61 }
 0x71f   : > { %v7753_v52 = vpop.xlane.xlu0 %7752  ;;  %v7973_v46 = vsel %vm6605_vm6, %v7601_v3, 0.0  ;;  %v7599_v16 = vmul.f32 %v14975_v47, %v10842_v15 }
 0x720   : > { %v10844_v18 = vpop.eup %10843  ;;  %8175 = vst.msk [vmem:[%s14692_s10 + $0x198] sm:$0xff] %vm8123_vm7, %v8046_v36  ;;  %v8043_v41 = vadd.f32 %v15010_v44, %v7753_v52  ;;  %7959 = vadd.xlane.f32.xlu1 %v7958_v29 }
 0x721   : > { %v7756_v33 = vpop.xlane.xlu1 %7755  ;;  %v7602_v8 = vmul.f32 %v14975_v47, %v10844_v18  ;;  %v7967_v26 = vsel %vm6605_vm6, %v7599_v16, 0.0 }
 0x722   : > { %v10846_v60 = vpop.eup %10845  ;;  %8172 = vst.msk [vmem:[%s14692_s10 + $0x180] sm:$0xff] %vm8123_vm7, %v8043_v41  ;;  %v8044_v1 = vadd.f32 %v15010_v44, %v7756_v33  ;;  %7974 = vadd.xlane.f32.xlu0 %v7973_v46 }
 0x723   : > { %v7771_v53 = vpop.xlane.xlu0 %7770  ;;  %v7976_v57 = vsel %vm6605_vm6, %v7602_v8, 0.0  ;;  %v7600_v17 = vmul.f32 %v14975_v47, %v10846_v60 }
 0x724   : > { %8173 = vst.msk [vmem:[%s14692_s10 + $0x188] sm:$0xff] %vm8123_vm7, %v8044_v1  ;;  %v8049_v5 = vadd.f32 %v15010_v44, %v7771_v53  ;;  %7977 = vadd.xlane.f32.xlu1 %v7976_v57  ;;  %v10848_v22 = vpop.eup %10847 }
 0x725   : > { %v7774_v25 = vpop.xlane.xlu1 %7773  ;;  %v7970_v50 = vsel %vm6605_vm6, %v7600_v17, 0.0  ;;  %v7605_v32 = vmul.f32 %v14975_v47, %v10848_v22 }
 0x726   : > { %v10850_v31 = vpop.eup %10849  ;;  %8178 = vst.msk [vmem:[%s14692_s10 + $0x1b0] sm:$0xff] %vm8123_vm7, %v8049_v5  ;;  %v8050_v58 = vadd.f32 %v15010_v44, %v7774_v25  ;;  %7968 = vadd.xlane.f32.xlu0 %v7967_v26 }
 0x727   : > { %v7765_v51 = vpop.xlane.xlu0 %7764  ;;  %v7603_v39 = vmul.f32 %v14975_v47, %v10850_v31  ;;  %v7985_v6 = vsel %vm6605_vm6, %v7605_v32, 0.0 }
 0x728   : > { %8179 = vst.msk [vmem:[%s14692_s10 + $0x1b8] sm:$0xff] %vm8123_vm7, %v8050_v58  ;;  %v8047_v14 = vadd.f32 %v15010_v44, %v7765_v51  ;;  %7971 = vadd.xlane.f32.xlu1 %v7970_v50  ;;  %v10852_v27 = vpop.eup %10851 }
 0x729   : > { %v7768_v20 = vpop.xlane.xlu1 %7767  ;;  %v7979_v43 = vsel %vm6605_vm6, %v7603_v39, 0.0  ;;  %v7606_v0 = vmul.f32 %v14975_v47, %v10852_v27 }
 0x72a   : > { %v10854_v13 = vpop.eup %10853  ;;  %8176 = vst.msk [vmem:[%s14692_s10 + $0x1a0] sm:$0xff] %vm8123_vm7, %v8047_v14  ;;  %v8048_v54 = vadd.f32 %v15010_v44, %v7768_v20  ;;  %7980 = vadd.xlane.f32.xlu0 %v7979_v43 }
 0x72b   : > { %v7783_v9 = vpop.xlane.xlu0 %7782  ;;  %v7604_v34 = vmul.f32 %v14975_v47, %v10854_v13  ;;  %v7988_v10 = vsel %vm6605_vm6, %v7606_v0, 0.0 }
 0x72c   : > { %8177 = vst.msk [vmem:[%s14692_s10 + $0x1a8] sm:$0xff] %vm8123_vm7, %v8048_v54  ;;  %v8053_v24 = vadd.f32 %v15010_v44, %v7783_v9 }
 0x72d   : > { %v7786_v21 = vpop.xlane.xlu1 %7785  ;;  %v7982_v63 = vsel %vm6605_vm6, %v7604_v34, 0.0 }
 0x72e   : > { %8182 = vst.msk [vmem:[%s14692_s10 + $0x1d0] sm:$0xff] %vm8123_vm7, %v8053_v24  ;;  %v8054_v12 = vadd.f32 %v15010_v44, %v7786_v21  ;;  %7983 = vadd.xlane.f32.xlu1 %v7982_v63  ;;  %7986 = vadd.xlane.f32.xlu0 %v7985_v6 }
 0x72f   : > { %v7777_v55 = vpop.xlane.xlu0 %7776 }
 0x730   : > { %8183 = vst.msk [vmem:[%s14692_s10 + $0x1d8] sm:$0xff] %vm8123_vm7, %v8054_v12  ;;  %v8051_v48 = vadd.f32 %v15010_v44, %v7777_v55 }
 0x731   : > { %v7780_v62 = vpop.xlane.xlu1 %7779 }
 0x732   : > { %8180 = vst.msk [vmem:[%s14692_s10 + $0x1c0] sm:$0xff] %vm8123_vm7, %v8051_v48  ;;  %v8052_v47 = vadd.f32 %v15010_v44, %v7780_v62  ;;  %7989 = vadd.xlane.f32.xlu1 %v7988_v10 }
 0x733   : > { %v7795_v23 = vpop.xlane.xlu0 %7794 }
 0x734   : > { %8181 = vst.msk [vmem:[%s14692_s10 + $0x1c8] sm:$0xff] %vm8123_vm7, %v8052_v47  ;;  %v8057_v37 = vadd.f32 %v15010_v44, %v7795_v23 }
 0x735   : > { %v7798_v59 = vpop.xlane.xlu1 %7797 }
 0x736   : > { %8186 = vst.msk [vmem:[%s14692_s10 + $0x1f0] sm:$0xff] %vm8123_vm7, %v8057_v37  ;;  %v8058_v42 = vadd.f32 %v15010_v44, %v7798_v59 }
 0x737   : > { %v7789_v19 = vpop.xlane.xlu0 %7788 }
 0x738   : > { %8187 = vst.msk [vmem:[%s14692_s10 + $0x1f8] sm:$0xff] %vm8123_vm7, %v8058_v42  ;;  %v8055_v4 = vadd.f32 %v15010_v44, %v7789_v19 }
 0x739   : > { %v7792_v49 = vpop.xlane.xlu1 %7791 }
 0x73a   : > { %8184 = vst.msk [vmem:[%s14692_s10 + $0x1e0] sm:$0xff] %vm8123_vm7, %v8055_v4  ;;  %v8056_v56 = vadd.f32 %v15010_v44, %v7792_v49 }
 0x73b   : > { %v7807_v38 = vpop.xlane.xlu0 %7806 }
 0x73c   : > { %8185 = vst.msk [vmem:[%s14692_s10 + $0x1e8] sm:$0xff] %vm8123_vm7, %v8056_v56  ;;  %v8061_v40 = vadd.f32 %v15010_v44, %v7807_v38 }
 0x73d   : > { %v7810_v7 = vpop.xlane.xlu1 %7809 }
 0x73e   : > { %8190 = vst.msk [vmem:[%s14692_s10 + $0x210] sm:$0xff] %vm8123_vm7, %v8061_v40  ;;  %v8062_v11 = vadd.f32 %v15010_v44, %v7810_v7 }
 0x73f   : > { %v7801_v28 = vpop.xlane.xlu0 %7800 }
 0x740   : > { %8191 = vst.msk [vmem:[%s14692_s10 + $0x218] sm:$0xff] %vm8123_vm7, %v8062_v11  ;;  %v8059_v35 = vadd.f32 %v15010_v44, %v7801_v28 }
 0x741   : > { %v7804_v30 = vpop.xlane.xlu1 %7803 }
 0x742   : > { %8188 = vst.msk [vmem:[%s14692_s10 + $0x200] sm:$0xff] %vm8123_vm7, %v8059_v35  ;;  %v8060_v45 = vadd.f32 %v15010_v44, %v7804_v30 }
 0x743   : > { %v7819_v2 = vpop.xlane.xlu0 %7818 }
 0x744   : > { %8189 = vst.msk [vmem:[%s14692_s10 + $0x208] sm:$0xff] %vm8123_vm7, %v8060_v45  ;;  %v8065_v61 = vadd.f32 %v15010_v44, %v7819_v2 }
 0x745   : > { %v7822_v3 = vpop.xlane.xlu1 %7821 }
 0x746   : > { %8194 = vst.msk [vmem:[%s14692_s10 + $0x230] sm:$0xff] %vm8123_vm7, %v8065_v61  ;;  %v8066_v15 = vadd.f32 %v15010_v44, %v7822_v3 }
 0x747   : > { %v7813_v36 = vpop.xlane.xlu0 %7812 }
 0x748   : > { %8195 = vst.msk [vmem:[%s14692_s10 + $0x238] sm:$0xff] %vm8123_vm7, %v8066_v15  ;;  %v8063_v52 = vadd.f32 %v15010_v44, %v7813_v36 }
 0x749   : > { %v7816_v29 = vpop.xlane.xlu1 %7815 }
 0x74a   : > { %8192 = vst.msk [vmem:[%s14692_s10 + $0x220] sm:$0xff] %vm8123_vm7, %v8063_v52  ;;  %v8064_v18 = vadd.f32 %v15010_v44, %v7816_v29 }
 0x74b   : > { %v7831_v41 = vpop.xlane.xlu0 %7830 }
 0x74c   : > { %8193 = vst.msk [vmem:[%s14692_s10 + $0x228] sm:$0xff] %vm8123_vm7, %v8064_v18  ;;  %v8069_v33 = vadd.f32 %v15010_v44, %v7831_v41 }
 0x74d   : > { %v7834_v46 = vpop.xlane.xlu1 %7833 }
 0x74e   : > { %8198 = vst.msk [vmem:[%s14692_s10 + $0x250] sm:$0xff] %vm8123_vm7, %v8069_v33  ;;  %v8070_v8 = vadd.f32 %v15010_v44, %v7834_v46 }
 0x74f   : > { %v7825_v16 = vpop.xlane.xlu0 %7824 }
 0x750   : > { %8199 = vst.msk [vmem:[%s14692_s10 + $0x258] sm:$0xff] %vm8123_vm7, %v8070_v8  ;;  %v8067_v60 = vadd.f32 %v15010_v44, %v7825_v16 }
 0x751   : > { %v7828_v1 = vpop.xlane.xlu1 %7827 }
 0x752   : > { %8196 = vst.msk [vmem:[%s14692_s10 + $0x240] sm:$0xff] %vm8123_vm7, %v8067_v60  ;;  %v8068_v53 = vadd.f32 %v15010_v44, %v7828_v1 }
 0x753   : > { %v7843_v57 = vpop.xlane.xlu0 %7842 }
 0x754   : > { %8197 = vst.msk [vmem:[%s14692_s10 + $0x248] sm:$0xff] %vm8123_vm7, %v8068_v53  ;;  %v8073_v17 = vadd.f32 %v15010_v44, %v7843_v57 }
 0x755   : > { %v7846_v5 = vpop.xlane.xlu1 %7845 }
 0x756   : > { %8202 = vst.msk [vmem:[%s14692_s10 + $0x270] sm:$0xff] %vm8123_vm7, %v8073_v17  ;;  %v8074_v22 = vadd.f32 %v15010_v44, %v7846_v5 }
 0x757   : > { %v7837_v25 = vpop.xlane.xlu0 %7836 }
 0x758   : > { %8203 = vst.msk [vmem:[%s14692_s10 + $0x278] sm:$0xff] %vm8123_vm7, %v8074_v22  ;;  %v8071_v26 = vadd.f32 %v15010_v44, %v7837_v25 }
 0x759   : > { %v7840_v31 = vpop.xlane.xlu1 %7839 }
 0x75a   : > { %8200 = vst.msk [vmem:[%s14692_s10 + $0x260] sm:$0xff] %vm8123_vm7, %v8071_v26  ;;  %v8072_v58 = vadd.f32 %v15010_v44, %v7840_v31 }
 0x75b   : > { %v7855_v51 = vpop.xlane.xlu0 %7854 }
 0x75c   : > { %8201 = vst.msk [vmem:[%s14692_s10 + $0x268] sm:$0xff] %vm8123_vm7, %v8072_v58  ;;  %v8077_v50 = vadd.f32 %v15010_v44, %v7855_v51 }
 0x75d   : > { %v7858_v39 = vpop.xlane.xlu1 %7857 }
 0x75e   : > { %8206 = vst.msk [vmem:[%s14692_s10 + $0x290] sm:$0xff] %vm8123_vm7, %v8077_v50  ;;  %v8078_v14 = vadd.f32 %v15010_v44, %v7858_v39 }
 0x75f   : > { %v7849_v27 = vpop.xlane.xlu0 %7848 }
 0x760   : > { %8207 = vst.msk [vmem:[%s14692_s10 + $0x298] sm:$0xff] %vm8123_vm7, %v8078_v14  ;;  %v8075_v20 = vadd.f32 %v15010_v44, %v7849_v27 }
 0x761   : > { %v7852_v43 = vpop.xlane.xlu1 %7851 }
 0x762   : > { %8204 = vst.msk [vmem:[%s14692_s10 + $0x280] sm:$0xff] %vm8123_vm7, %v8075_v20  ;;  %v8076_v32 = vadd.f32 %v15010_v44, %v7852_v43 }
 0x763   : > { %v7867_v13 = vpop.xlane.xlu0 %7866 }
 0x764   : > { %8205 = vst.msk [vmem:[%s14692_s10 + $0x288] sm:$0xff] %vm8123_vm7, %v8076_v32  ;;  %v8081_v54 = vadd.f32 %v15010_v44, %v7867_v13 }
 0x765   : > { %v7870_v9 = vpop.xlane.xlu1 %7869 }
 0x766   : > { %8210 = vst.msk [vmem:[%s14692_s10 + $0x2b0] sm:$0xff] %vm8123_vm7, %v8081_v54  ;;  %v8082_v34 = vadd.f32 %v15010_v44, %v7870_v9 }
 0x767   : > { %v7861_v24 = vpop.xlane.xlu0 %7860 }
 0x768   : > { %8211 = vst.msk [vmem:[%s14692_s10 + $0x2b8] sm:$0xff] %vm8123_vm7, %v8082_v34  ;;  %v8079_v21 = vadd.f32 %v15010_v44, %v7861_v24 }
 0x769   : > { %v7864_v63 = vpop.xlane.xlu1 %7863 }
 0x76a   : > { %8208 = vst.msk [vmem:[%s14692_s10 + $0x2a0] sm:$0xff] %vm8123_vm7, %v8079_v21  ;;  %v8080_v6 = vadd.f32 %v15010_v44, %v7864_v63 }
 0x76b   : > { %v7879_v0 = vpop.xlane.xlu0 %7878 }
 0x76c   : > { %8209 = vst.msk [vmem:[%s14692_s10 + $0x2a8] sm:$0xff] %vm8123_vm7, %v8080_v6  ;;  %v8085_v12 = vadd.f32 %v15010_v44, %v7879_v0 }
 0x76d   : > { %v7882_v55 = vpop.xlane.xlu1 %7881 }
 0x76e   : > { %8214 = vst.msk [vmem:[%s14692_s10 + $0x2d0] sm:$0xff] %vm8123_vm7, %v8085_v12  ;;  %v8086_v48 = vadd.f32 %v15010_v44, %v7882_v55 }
 0x76f   : > { %v7873_v62 = vpop.xlane.xlu0 %7872 }
 0x770   : > { %8215 = vst.msk [vmem:[%s14692_s10 + $0x2d8] sm:$0xff] %vm8123_vm7, %v8086_v48  ;;  %v8083_v10 = vadd.f32 %v15010_v44, %v7873_v62 }
 0x771   : > { %v7876_v47 = vpop.xlane.xlu1 %7875 }
 0x772   : > { %8212 = vst.msk [vmem:[%s14692_s10 + $0x2c0] sm:$0xff] %vm8123_vm7, %v8083_v10  ;;  %v8084_v23 = vadd.f32 %v15010_v44, %v7876_v47 }
 0x773   : > { %v7891_v37 = vpop.xlane.xlu0 %7890 }
 0x774   : > { %8213 = vst.msk [vmem:[%s14692_s10 + $0x2c8] sm:$0xff] %vm8123_vm7, %v8084_v23  ;;  %v8089_v59 = vadd.f32 %v15010_v44, %v7891_v37 }
 0x775   : > { %v7894_v42 = vpop.xlane.xlu1 %7893 }
 0x776   : > { %8218 = vst.msk [vmem:[%s14692_s10 + $0x2f0] sm:$0xff] %vm8123_vm7, %v8089_v59  ;;  %v8090_v19 = vadd.f32 %v15010_v44, %v7894_v42 }
 0x777   : > { %v7885_v4 = vpop.xlane.xlu0 %7884 }
 0x778   : > { %8219 = vst.msk [vmem:[%s14692_s10 + $0x2f8] sm:$0xff] %vm8123_vm7, %v8090_v19  ;;  %v8087_v49 = vadd.f32 %v15010_v44, %v7885_v4 }
 0x779   : > { %v7888_v56 = vpop.xlane.xlu1 %7887 }
 0x77a   : > { %8216 = vst.msk [vmem:[%s14692_s10 + $0x2e0] sm:$0xff] %vm8123_vm7, %v8087_v49  ;;  %v8088_v38 = vadd.f32 %v15010_v44, %v7888_v56 }
 0x77b   : > { %v7903_v40 = vpop.xlane.xlu0 %7902 }
 0x77c   : > { %8217 = vst.msk [vmem:[%s14692_s10 + $0x2e8] sm:$0xff] %vm8123_vm7, %v8088_v38  ;;  %v8093_v7 = vadd.f32 %v15010_v44, %v7903_v40 }
 0x77d   : > { %v7906_v11 = vpop.xlane.xlu1 %7905 }
 0x77e   : > { %8222 = vst.msk [vmem:[%s14692_s10 + $0x310] sm:$0xff] %vm8123_vm7, %v8093_v7  ;;  %v8094_v28 = vadd.f32 %v15010_v44, %v7906_v11 }
 0x77f   : > { %v7897_v35 = vpop.xlane.xlu0 %7896 }
 0x780   : > { %8223 = vst.msk [vmem:[%s14692_s10 + $0x318] sm:$0xff] %vm8123_vm7, %v8094_v28  ;;  %v8091_v30 = vadd.f32 %v15010_v44, %v7897_v35 }
 0x781   : > { %v7900_v45 = vpop.xlane.xlu1 %7899 }
 0x782   : > { %8220 = vst.msk [vmem:[%s14692_s10 + $0x300] sm:$0xff] %vm8123_vm7, %v8091_v30  ;;  %v8092_v2 = vadd.f32 %v15010_v44, %v7900_v45 }
 0x783   : > { %v7915_v61 = vpop.xlane.xlu0 %7914 }
 0x784   : > { %8221 = vst.msk [vmem:[%s14692_s10 + $0x308] sm:$0xff] %vm8123_vm7, %v8092_v2  ;;  %v8097_v3 = vadd.f32 %v15010_v44, %v7915_v61 }
 0x785   : > { %v7918_v15 = vpop.xlane.xlu1 %7917 }
 0x786   : > { %8226 = vst.msk [vmem:[%s14692_s10 + $0x330] sm:$0xff] %vm8123_vm7, %v8097_v3  ;;  %v8098_v36 = vadd.f32 %v15010_v44, %v7918_v15 }
 0x787   : > { %v7909_v52 = vpop.xlane.xlu0 %7908 }
 0x788   : > { %8227 = vst.msk [vmem:[%s14692_s10 + $0x338] sm:$0xff] %vm8123_vm7, %v8098_v36  ;;  %v8095_v29 = vadd.f32 %v15010_v44, %v7909_v52 }
 0x789   : > { %v7912_v18 = vpop.xlane.xlu1 %7911 }
 0x78a   : > { %8224 = vst.msk [vmem:[%s14692_s10 + $0x320] sm:$0xff] %vm8123_vm7, %v8095_v29  ;;  %v8096_v41 = vadd.f32 %v15010_v44, %v7912_v18 }
 0x78b   : > { %v7927_v33 = vpop.xlane.xlu0 %7926 }
 0x78c   : > { %8225 = vst.msk [vmem:[%s14692_s10 + $0x328] sm:$0xff] %vm8123_vm7, %v8096_v41  ;;  %v8101_v46 = vadd.f32 %v15010_v44, %v7927_v33 }
 0x78d   : > { %v7930_v8 = vpop.xlane.xlu1 %7929 }
 0x78e   : > { %8230 = vst.msk [vmem:[%s14692_s10 + $0x350] sm:$0xff] %vm8123_vm7, %v8101_v46  ;;  %v8102_v16 = vadd.f32 %v15010_v44, %v7930_v8 }
 0x78f   : > { %v7921_v60 = vpop.xlane.xlu0 %7920 }
 0x790   : > { %8231 = vst.msk [vmem:[%s14692_s10 + $0x358] sm:$0xff] %vm8123_vm7, %v8102_v16  ;;  %v8099_v1 = vadd.f32 %v15010_v44, %v7921_v60 }
 0x791   : > { %v7924_v53 = vpop.xlane.xlu1 %7923 }
 0x792   : > { %8228 = vst.msk [vmem:[%s14692_s10 + $0x340] sm:$0xff] %vm8123_vm7, %v8099_v1  ;;  %v8100_v57 = vadd.f32 %v15010_v44, %v7924_v53 }
 0x793   : > { %v7939_v17 = vpop.xlane.xlu0 %7938 }
 0x794   : > { %8229 = vst.msk [vmem:[%s14692_s10 + $0x348] sm:$0xff] %vm8123_vm7, %v8100_v57  ;;  %v8105_v5 = vadd.f32 %v15010_v44, %v7939_v17 }
 0x795   : > { %v7942_v22 = vpop.xlane.xlu1 %7941 }
 0x796   : > { %8234 = vst.msk [vmem:[%s14692_s10 + $0x370] sm:$0xff] %vm8123_vm7, %v8105_v5  ;;  %v8106_v25 = vadd.f32 %v15010_v44, %v7942_v22 }
 0x797   : > { %v7933_v26 = vpop.xlane.xlu0 %7932 }
 0x798   : > { %8235 = vst.msk [vmem:[%s14692_s10 + $0x378] sm:$0xff] %vm8123_vm7, %v8106_v25  ;;  %v8103_v31 = vadd.f32 %v15010_v44, %v7933_v26 }
 0x799   : > { %v7936_v58 = vpop.xlane.xlu1 %7935 }
 0x79a   : > { %8232 = vst.msk [vmem:[%s14692_s10 + $0x360] sm:$0xff] %vm8123_vm7, %v8103_v31  ;;  %v8104_v51 = vadd.f32 %v15010_v44, %v7936_v58 }
 0x79b   : > { %v7951_v50 = vpop.xlane.xlu0 %7950 }
 0x79c   : > { %8233 = vst.msk [vmem:[%s14692_s10 + $0x368] sm:$0xff] %vm8123_vm7, %v8104_v51  ;;  %v8109_v39 = vadd.f32 %v15010_v44, %v7951_v50 }
 0x79d   : > { %v7954_v14 = vpop.xlane.xlu1 %7953 }
 0x79e   : > { %8238 = vst.msk [vmem:[%s14692_s10 + $0x390] sm:$0xff] %vm8123_vm7, %v8109_v39  ;;  %v8110_v27 = vadd.f32 %v15010_v44, %v7954_v14 }
 0x79f   : > { %v7945_v20 = vpop.xlane.xlu0 %7944 }
 0x7a0   : > { %8239 = vst.msk [vmem:[%s14692_s10 + $0x398] sm:$0xff] %vm8123_vm7, %v8110_v27  ;;  %v8107_v43 = vadd.f32 %v15010_v44, %v7945_v20 }
 0x7a1   : > { %v7948_v32 = vpop.xlane.xlu1 %7947 }
 0x7a2   : > { %8236 = vst.msk [vmem:[%s14692_s10 + $0x380] sm:$0xff] %vm8123_vm7, %v8107_v43  ;;  %v8108_v13 = vadd.f32 %v15010_v44, %v7948_v32 }
 0x7a3   : > { %v7963_v54 = vpop.xlane.xlu0 %7962 }
 0x7a4   : > { %8237 = vst.msk [vmem:[%s14692_s10 + $0x388] sm:$0xff] %vm8123_vm7, %v8108_v13  ;;  %v8113_v9 = vadd.f32 %v15010_v44, %v7963_v54 }
 0x7a5   : > { %v7966_v34 = vpop.xlane.xlu1 %7965 }
 0x7a6   : > { %8242 = vst.msk [vmem:[%s14692_s10 + $0x3b0] sm:$0xff] %vm8123_vm7, %v8113_v9  ;;  %v8114_v24 = vadd.f32 %v15010_v44, %v7966_v34 }
 0x7a7   : > { %v7957_v21 = vpop.xlane.xlu0 %7956 }
 0x7a8   : > { %8243 = vst.msk [vmem:[%s14692_s10 + $0x3b8] sm:$0xff] %vm8123_vm7, %v8114_v24  ;;  %v8111_v63 = vadd.f32 %v15010_v44, %v7957_v21 }
 0x7a9   : > { %v7960_v6 = vpop.xlane.xlu1 %7959 }
 0x7aa   : > { %8240 = vst.msk [vmem:[%s14692_s10 + $0x3a0] sm:$0xff] %vm8123_vm7, %v8111_v63  ;;  %v8112_v0 = vadd.f32 %v15010_v44, %v7960_v6 }
 0x7ab   : > { %v7975_v12 = vpop.xlane.xlu0 %7974 }
 0x7ac   : > { %8241 = vst.msk [vmem:[%s14692_s10 + $0x3a8] sm:$0xff] %vm8123_vm7, %v8112_v0  ;;  %v8117_v55 = vadd.f32 %v15010_v44, %v7975_v12 }
 0x7ad   : > { %v7978_v48 = vpop.xlane.xlu1 %7977 }
 0x7ae   : > { %8246 = vst.msk [vmem:[%s14692_s10 + $0x3d0] sm:$0xff] %vm8123_vm7, %v8117_v55  ;;  %v8118_v62 = vadd.f32 %v15010_v44, %v7978_v48 }
 0x7af   : > { %v7969_v10 = vpop.xlane.xlu0 %7968 }
 0x7b0   : > { %8247 = vst.msk [vmem:[%s14692_s10 + $0x3d8] sm:$0xff] %vm8123_vm7, %v8118_v62  ;;  %v8115_v47 = vadd.f32 %v15010_v44, %v7969_v10 }
 0x7b1   : > { %v7972_v23 = vpop.xlane.xlu1 %7971 }
 0x7b2   : > { %8244 = vst.msk [vmem:[%s14692_s10 + $0x3c0] sm:$0xff] %vm8123_vm7, %v8115_v47  ;;  %v8116_v37 = vadd.f32 %v15010_v44, %v7972_v23 }
 0x7b3   : > { %v7981_v59 = vpop.xlane.xlu0 %7980 }
 0x7b4   : > { %8245 = vst.msk [vmem:[%s14692_s10 + $0x3c8] sm:$0xff] %vm8123_vm7, %v8116_v37  ;;  %v8119_v42 = vadd.f32 %v15010_v44, %v7981_v59 }
 0x7b6   : > { %8248 = vst.msk [vmem:[%s14692_s10 + $0x3e0] sm:$0xff] %vm8123_vm7, %v8119_v42 }
 0x7b7   : > { %v7984_v19 = vpop.xlane.xlu1 %7983  ;;  %v7987_v4 = vpop.xlane.xlu0 %7986 }
 0x7b8   : > { %v8120_v49 = vadd.f32 %v15010_v44, %v7984_v19  ;;  %v8121_v56 = vadd.f32 %v15010_v44, %v7987_v4 }
 0x7ba   : > { %8249 = vst.msk [vmem:[%s14692_s10 + $0x3e8] sm:$0xff] %vm8123_vm7, %v8120_v49  ;;  %8250 = vst.msk [vmem:[%s14692_s10 + $0x3f0] sm:$0xff] %vm8123_vm7, %v8121_v56 }
 0x7bb   : > { %v7990_v38 = vpop.xlane.xlu1 %7989 }
 0x7bc   : > { %v8122_v40 = vadd.f32 %v15010_v44, %v7990_v38 }
 0x7be   : > { %8251 = vst.msk [vmem:[%s14692_s10 + $0x3f8] sm:$0xff] %vm8123_vm7, %v8122_v40 }
 0x7bf PF: > { %s13_s12 = sadd.s32 1, %s10883_s12  }
 0x7c0   : > { %p10_p4 = scmp.ge.s32.totalorder %s13_s12, 4  }
 0x7c2   :  { %12 = sbr.rel (!%p10_p4) target bundleno = 1 (0x1), region = 62 }

</bundles_post_ra>
